<compile_context>
chip_gen: v6e
topology: v6e:2x2x1
jax: 0.10.0
libtpu: 0.0.40
codegen_flags: <defaults>
</compile_context>

<pallas_src>
import jax
import jax.numpy as jnp
from jax.experimental import pallas as pl
from jax.experimental.pallas import tpu as pltpu

EPS = 1e-5


def _resnet_block_kernel(x_ref, w1_ref, w2_ref, o_ref, shift_ref, acc_ref):
    # x_ref:     (1, H, W, C) bf16   one batch element (NHWC)
    # w*_ref:    (3, 3, C, C) bf16   conv weights, HWIO
    # o_ref:     (1, H, W, C) bf16
    # shift_ref: VMEM (3, H+2, W, C) bf16  reflect-padded slabs, dx = 0/1/2
    # acc_ref:   VMEM (H*W, C) f32         partial conv accumulator (dy = 0, 1)
    _, H, W, C = x_ref.shape
    HW = H * W
    inv_n = 1.0 / float(HW)

    def reflect_pad(a_bf16):
        # a_bf16: (H, W, C) bf16.  Build the three column-shifted, reflect-
        # padded slabs.  Slab dx=1 holds the row-padded original columns; the
        # dx=0 / dx=2 slabs are column-shifted copies of it (the only two
        # sublane-unaligned copies per conv).
        shift_ref[1, 1:H + 1] = a_bf16
        shift_ref[1, 0:1] = shift_ref[1, 2:3]              # reflect top row
        shift_ref[1, H + 1:H + 2] = shift_ref[1, H - 1:H]  # reflect bottom row
        # dx = 0: columns shifted right by one; left edge = reflect of col 1.
        shift_ref[0, :, 1:W, :] = shift_ref[1, :, 0:W - 1, :]
        shift_ref[0, :, 0:1, :] = shift_ref[1, :, 1:2, :]
        # dx = 2: columns shifted left by one; right edge = reflect of col W-2.
        shift_ref[2, :, 0:W - 1, :] = shift_ref[1, :, 1:W, :]
        shift_ref[2, :, W - 1:W, :] = shift_ref[1, :, W - 2:W - 1, :]

    def conv3x3_in(w_ref):
        # 'same' 3x3 conv over the pre-shifted bf16 slabs as 9 MXU matmuls with
        # f32 accumulation.  Every tap slices only the leading (non-tiled) dy
        # axis.  Rows dy=0,1 accumulate into acc_ref (keeps vreg pressure low);
        # the dy=2 row is kept as a value and folded straight into the
        # InstanceNorm statistics (no extra store+reload of the conv result).
        def tap_row(dy):
            row = None
            for dx in range(3):
                patch = shift_ref[dx, dy:dy + H].reshape(HW, C)
                d = jnp.dot(patch, w_ref[dy, dx],
                            preferred_element_type=jnp.float32)
                row = d if row is None else row + d
            return row

        acc_ref[...] = tap_row(0)
        acc_ref[...] += tap_row(1)
        conv = acc_ref[...] + tap_row(2)                   # (H*W, C) f32

        # InstanceNorm (affine=False): per-channel stats over H*W pixels.
        # Single-read E[x^2] - E[x]^2 with a clamp; fine under the bf16-level
        # tolerance contract (conv means are small relative to the variance).
        mean = jnp.sum(conv, axis=0, keepdims=True) * inv_n
        mean_sq = jnp.sum(conv * conv, axis=0, keepdims=True) * inv_n
        var = jnp.maximum(mean_sq - mean * mean, 0.0)
        return (conv - mean) * jax.lax.rsqrt(var + EPS)    # (H*W, C) f32

    # Conv -> InstanceNorm -> ReLU  (conv bias dropped: cancelled by IN mean).
    reflect_pad(x_ref[0])
    h = jnp.maximum(conv3x3_in(w1_ref), 0.0)

    # Conv -> InstanceNorm (no activation); the ReLU output is cast to bf16
    # exactly once as it is written into the pad scratch.
    reflect_pad(h.reshape(H, W, C).astype(jnp.bfloat16))
    h = conv3x3_in(w2_ref)

    # Residual add in f32; x is re-read from its ref at the point of use to
    # keep its live range short across the two convs.
    o_ref[0] = (h.reshape(H, W, C) + x_ref[0].astype(jnp.float32)
                ).astype(o_ref.dtype)


def resnet_block_pallas(x_nchw, w1_oihw, b1, w2_oihw, b2):
    """x_nchw: (N, C, H, W); weights OIHW (PyTorch layout); biases (C,).

    The biases are accepted for interface parity with nn.Conv2d but are not
    used: a per-channel bias immediately before a non-affine InstanceNorm is
    mathematically a no-op.
    """
    del b1, b2  # cancelled exactly by the InstanceNorm mean subtraction
    # TODO(synk): Dropout2d path (use_dropout=True) not implemented; the module
    # default (use_dropout=False) has no dropout in the forward pass.
    N, C, H, W = x_nchw.shape
    assert H >= 2 and W >= 2, "reflect padding requires H >= 2 and W >= 2"

    # bf16 activations/weights at the kernel boundary (f32 accumulation inside).
    x_nhwc = jnp.transpose(x_nchw, (0, 2, 3, 1)).astype(jnp.bfloat16)
    w1 = jnp.transpose(w1_oihw, (2, 3, 1, 0)).astype(jnp.bfloat16)   # OIHW->HWIO
    w2 = jnp.transpose(w2_oihw, (2, 3, 1, 0)).astype(jnp.bfloat16)

    grid_spec = pltpu.PrefetchScalarGridSpec(
        num_scalar_prefetch=0,
        grid=(N,),
        in_specs=[
            pl.BlockSpec((1, H, W, C), lambda n: (n, 0, 0, 0)),
            pl.BlockSpec((3, 3, C, C), lambda n: (0, 0, 0, 0)),
            pl.BlockSpec((3, 3, C, C), lambda n: (0, 0, 0, 0)),
        ],
        out_specs=pl.BlockSpec((1, H, W, C), lambda n: (n, 0, 0, 0)),
        scratch_shapes=[
            pltpu.VMEM((3, H + 2, W, C), jnp.bfloat16),   # shifted pad slabs
            pltpu.VMEM((H * W, C), jnp.float32),          # conv accumulator
        ],
    )

    out_nhwc = pl.pallas_call(
        _resnet_block_kernel,
        out_shape=jax.ShapeDtypeStruct((N, H, W, C), jnp.bfloat16),
        grid_spec=grid_spec,
        compiler_params=pltpu.CompilerParams(
            dimension_semantics=("parallel",),
            vmem_limit_bytes=48 * 1024 * 1024,   # stays below v7x's 64 MiB VMEM
        ),
    )(x_nhwc, w1, w2)

    # Back to NCHW / caller dtype (a real CycleGAN stack would stay NHWC bf16).
    return jnp.transpose(out_nhwc, (0, 3, 1, 2)).astype(x_nchw.dtype)


def _reference_forward(x_nchw, w1, b1, w2, b2):
    """Pure-JAX f32 reference matching PyTorch semantics (NCHW), biases kept."""
    def conv(x, w, b):
        xp = jnp.pad(x, ((0, 0), (0, 0), (1, 1), (1, 1)), mode="reflect")
        y = jax.lax.conv_general_dilated(
            xp, w, window_strides=(1, 1), padding="VALID",
            dimension_numbers=("NCHW", "OIHW", "NCHW"))
        return y + b[None, :, None, None]

    def inorm(a):
        m = jnp.mean(a, axis=(2, 3), keepdims=True)
        v = jnp.mean(jnp.square(a - m), axis=(2, 3), keepdims=True)
        return (a - m) / jnp.sqrt(v + EPS)

    h = jnp.maximum(inorm(conv(x_nchw, w1, b1)), 0.0)
    h = inorm(conv(h, w2, b2))
    return h + x_nchw


if __name__ == "__main__":
    key = jax.random.PRNGKey(0)
    N, C, H, W = 2, 4, 16, 16

    k_x, k_w1, k_b1, k_w2, k_b2 = jax.random.split(key, 5)
    x = jax.random.normal(k_x, (N, C, H, W), dtype=jnp.float32)
    # Deterministic PyTorch-shaped parameters (Conv2d weight: OIHW, bias: (C,))
    w1 = jax.random.normal(k_w1, (C, C, 3, 3), dtype=jnp.float32) * 0.1
    b1 = jax.random.normal(k_b1, (C,), dtype=jnp.float32) * 0.1
    w2 = jax.random.normal(k_w2, (C, C, 3, 3), dtype=jnp.float32) * 0.1
    b2 = jax.random.normal(k_b2, (C,), dtype=jnp.float32) * 0.1

    out = jax.block_until_ready(resnet_block_pallas(x, w1, b1, w2, b2))

    ref = _reference_forward(x, w1, b1, w2, b2)
    assert out.shape == (N, C, H, W)
    # Tolerance contract: kernel runs with bf16 activations/weights on the MXU
    # (f32 accumulation, IN stats and residual), so agreement with the f32
    # PyTorch-equivalent reference is at the bf16 level.
    max_diff = float(jnp.max(jnp.abs(out - ref)))
    assert jnp.allclose(out, ref, atol=4e-2, rtol=4e-2), (
        f"mismatch vs reference (max|diff|={max_diff})")

    print("KERNEL_OK")
</pallas_src>

<mosaic_0001>
module attributes {stable_mosaic.version = 11 : i64} {
  func.func @_resnet_block_kernel(%arg0: i32, %arg1: memref<1x16x16x4xbf16, #tpu.memory_space<vmem>>, %arg2: memref<3x3x4x4xbf16, #tpu.memory_space<vmem>>, %arg3: memref<3x3x4x4xbf16, #tpu.memory_space<vmem>>, %arg4: memref<1x16x16x4xbf16, #tpu.memory_space<vmem>>, %arg5: memref<3x18x16x4xbf16, #tpu.memory_space<vmem>>, %arg6: memref<256x4xf32, #tpu.memory_space<vmem>>) attributes {dimension_semantics = [#tpu.dimension_semantics<parallel>], iteration_bounds = array<i64: 2>, scalar_prefetch = 0 : i64, scratch_operands = 2 : i64, tpu.core_type = #tpu.core_type<tc>, window_params = [{transform_indices = @transform_0, window_bounds = array<i64: 1, 16, 16, 4>}, {pipeline_mode = #tpu.pipeline_mode<synchronous>, transform_indices = @transform_1, window_bounds = array<i64: 3, 3, 4, 4>}, {pipeline_mode = #tpu.pipeline_mode<synchronous>, transform_indices = @transform_2, window_bounds = array<i64: 3, 3, 4, 4>}, {transform_indices = @transform_3, window_bounds = array<i64: 1, 16, 16, 4>}]} {
    %c0 = arith.constant 0 : index
    %c0_0 = arith.constant 0 : index
    %c0_1 = arith.constant 0 : index
    %c0_2 = arith.constant 0 : index
    %0 = vector.load %arg1[%c0, %c0_0, %c0_1, %c0_2] : memref<1x16x16x4xbf16, #tpu.memory_space<vmem>>, vector<1x16x16x4xbf16>
    %1 = vector.shape_cast %0 : vector<1x16x16x4xbf16> to vector<16x16x4xbf16>
    %c1 = arith.constant 1 : index
    %c1_3 = arith.constant 1 : index
    %c0_4 = arith.constant 0 : index
    %c0_5 = arith.constant 0 : index
    %2 = vector.load %arg5[%c1, %c1_3, %c0_4, %c0_5] : memref<3x18x16x4xbf16, #tpu.memory_space<vmem>>, vector<1x16x16x4xbf16>
    %3 = vector.shape_cast %2 : vector<1x16x16x4xbf16> to vector<16x16x4xbf16>
    %4 = vector.shape_cast %1 : vector<16x16x4xbf16> to vector<1x16x16x4xbf16>
    tpu.vector_store %arg5[%c1, %c1_3, %c0_4, %c0_5], %4 {strides = array<i32>} : memref<3x18x16x4xbf16, #tpu.memory_space<vmem>>, vector<1x16x16x4xbf16>,
    %c1_6 = arith.constant 1 : index
    %c2 = arith.constant 2 : index
    %c0_7 = arith.constant 0 : index
    %c0_8 = arith.constant 0 : index
    %5 = vector.load %arg5[%c1_6, %c2, %c0_7, %c0_8] : memref<3x18x16x4xbf16, #tpu.memory_space<vmem>>, vector<1x1x16x4xbf16>
    %6 = vector.shape_cast %5 : vector<1x1x16x4xbf16> to vector<1x16x4xbf16>
    %c1_9 = arith.constant 1 : index
    %c0_10 = arith.constant 0 : index
    %c0_11 = arith.constant 0 : index
    %c0_12 = arith.constant 0 : index
    %7 = vector.load %arg5[%c1_9, %c0_10, %c0_11, %c0_12] : memref<3x18x16x4xbf16, #tpu.memory_space<vmem>>, vector<1x1x16x4xbf16>
    %8 = vector.shape_cast %7 : vector<1x1x16x4xbf16> to vector<1x16x4xbf16>
    %9 = vector.shape_cast %6 : vector<1x16x4xbf16> to vector<1x1x16x4xbf16>
    tpu.vector_store %arg5[%c1_9, %c0_10, %c0_11, %c0_12], %9 {strides = array<i32>} : memref<3x18x16x4xbf16, #tpu.memory_space<vmem>>, vector<1x1x16x4xbf16>,
    %c1_13 = arith.constant 1 : index
    %c15 = arith.constant 15 : index
    %c0_14 = arith.constant 0 : index
    %c0_15 = arith.constant 0 : index
    %10 = vector.load %arg5[%c1_13, %c15, %c0_14, %c0_15] : memref<3x18x16x4xbf16, #tpu.memory_space<vmem>>, vector<1x1x16x4xbf16>
    %11 = vector.shape_cast %10 : vector<1x1x16x4xbf16> to vector<1x16x4xbf16>
    %c1_16 = arith.constant 1 : index
    %c17 = arith.constant 17 : index
    %c0_17 = arith.constant 0 : index
    %c0_18 = arith.constant 0 : index
    %12 = vector.load %arg5[%c1_16, %c17, %c0_17, %c0_18] : memref<3x18x16x4xbf16, #tpu.memory_space<vmem>>, vector<1x1x16x4xbf16>
    %13 = vector.shape_cast %12 : vector<1x1x16x4xbf16> to vector<1x16x4xbf16>
    %14 = vector.shape_cast %11 : vector<1x16x4xbf16> to vector<1x1x16x4xbf16>
    tpu.vector_store %arg5[%c1_16, %c17, %c0_17, %c0_18], %14 {strides = array<i32>} : memref<3x18x16x4xbf16, #tpu.memory_space<vmem>>, vector<1x1x16x4xbf16>,
    %c1_19 = arith.constant 1 : index
    %c0_20 = arith.constant 0 : index
    %c0_21 = arith.constant 0 : index
    %c0_22 = arith.constant 0 : index
    %15 = vector.load %arg5[%c1_19, %c0_20, %c0_21, %c0_22] : memref<3x18x16x4xbf16, #tpu.memory_space<vmem>>, vector<1x18x15x4xbf16>
    %16 = vector.shape_cast %15 : vector<1x18x15x4xbf16> to vector<18x15x4xbf16>
    %c0_23 = arith.constant 0 : index
    %c0_24 = arith.constant 0 : index
    %c1_25 = arith.constant 1 : index
    %c0_26 = arith.constant 0 : index
    %17 = vector.load %arg5[%c0_23, %c0_24, %c1_25, %c0_26] : memref<3x18x16x4xbf16, #tpu.memory_space<vmem>>, vector<1x18x15x4xbf16>
    %18 = vector.shape_cast %17 : vector<1x18x15x4xbf16> to vector<18x15x4xbf16>
    %19 = vector.shape_cast %16 : vector<18x15x4xbf16> to vector<1x18x15x4xbf16>
    tpu.vector_store %arg5[%c0_23, %c0_24, %c1_25, %c0_26], %19 {strides = array<i32>} : memref<3x18x16x4xbf16, #tpu.memory_space<vmem>>, vector<1x18x15x4xbf16>,
    %c1_27 = arith.constant 1 : index
    %c0_28 = arith.constant 0 : index
    %c1_29 = arith.constant 1 : index
    %c0_30 = arith.constant 0 : index
    %20 = vector.load %arg5[%c1_27, %c0_28, %c1_29, %c0_30] : memref<3x18x16x4xbf16, #tpu.memory_space<vmem>>, vector<1x18x1x4xbf16>
    %21 = vector.shape_cast %20 : vector<1x18x1x4xbf16> to vector<18x1x4xbf16>
    %c0_31 = arith.constant 0 : index
    %c0_32 = arith.constant 0 : index
    %c0_33 = arith.constant 0 : index
    %c0_34 = arith.constant 0 : index
    %22 = vector.load %arg5[%c0_31, %c0_32, %c0_33, %c0_34] : memref<3x18x16x4xbf16, #tpu.memory_space<vmem>>, vector<1x18x1x4xbf16>
    %23 = vector.shape_cast %22 : vector<1x18x1x4xbf16> to vector<18x1x4xbf16>
    %24 = vector.shape_cast %21 : vector<18x1x4xbf16> to vector<1x18x1x4xbf16>
    tpu.vector_store %arg5[%c0_31, %c0_32, %c0_33, %c0_34], %24 {strides = array<i32>} : memref<3x18x16x4xbf16, #tpu.memory_space<vmem>>, vector<1x18x1x4xbf16>,
    %c1_35 = arith.constant 1 : index
    %c0_36 = arith.constant 0 : index
    %c1_37 = arith.constant 1 : index
    %c0_38 = arith.constant 0 : index
    %25 = vector.load %arg5[%c1_35, %c0_36, %c1_37, %c0_38] : memref<3x18x16x4xbf16, #tpu.memory_space<vmem>>, vector<1x18x15x4xbf16>
    %26 = vector.shape_cast %25 : vector<1x18x15x4xbf16> to vector<18x15x4xbf16>
    %c2_39 = arith.constant 2 : index
    %c0_40 = arith.constant 0 : index
    %c0_41 = arith.constant 0 : index
    %c0_42 = arith.constant 0 : index
    %27 = vector.load %arg5[%c2_39, %c0_40, %c0_41, %c0_42] : memref<3x18x16x4xbf16, #tpu.memory_space<vmem>>, vector<1x18x15x4xbf16>
    %28 = vector.shape_cast %27 : vector<1x18x15x4xbf16> to vector<18x15x4xbf16>
    %29 = vector.shape_cast %26 : vector<18x15x4xbf16> to vector<1x18x15x4xbf16>
    tpu.vector_store %arg5[%c2_39, %c0_40, %c0_41, %c0_42], %29 {strides = array<i32>} : memref<3x18x16x4xbf16, #tpu.memory_space<vmem>>, vector<1x18x15x4xbf16>,
    %c1_43 = arith.constant 1 : index
    %c0_44 = arith.constant 0 : index
    %c14 = arith.constant 14 : index
    %c0_45 = arith.constant 0 : index
    %30 = vector.load %arg5[%c1_43, %c0_44, %c14, %c0_45] : memref<3x18x16x4xbf16, #tpu.memory_space<vmem>>, vector<1x18x1x4xbf16>
    %31 = vector.shape_cast %30 : vector<1x18x1x4xbf16> to vector<18x1x4xbf16>
    %c2_46 = arith.constant 2 : index
    %c0_47 = arith.constant 0 : index
    %c15_48 = arith.constant 15 : index
    %c0_49 = arith.constant 0 : index
    %32 = vector.load %arg5[%c2_46, %c0_47, %c15_48, %c0_49] : memref<3x18x16x4xbf16, #tpu.memory_space<vmem>>, vector<1x18x1x4xbf16>
    %33 = vector.shape_cast %32 : vector<1x18x1x4xbf16> to vector<18x1x4xbf16>
    %34 = vector.shape_cast %31 : vector<18x1x4xbf16> to vector<1x18x1x4xbf16>
    tpu.vector_store %arg5[%c2_46, %c0_47, %c15_48, %c0_49], %34 {strides = array<i32>} : memref<3x18x16x4xbf16, #tpu.memory_space<vmem>>, vector<1x18x1x4xbf16>,
    %c0_50 = arith.constant 0 : index
    %c0_51 = arith.constant 0 : index
    %c0_52 = arith.constant 0 : index
    %c0_53 = arith.constant 0 : index
    %35 = vector.load %arg5[%c0_50, %c0_51, %c0_52, %c0_53] : memref<3x18x16x4xbf16, #tpu.memory_space<vmem>>, vector<1x16x16x4xbf16>
    %36 = vector.shape_cast %35 : vector<1x16x16x4xbf16> to vector<16x16x4xbf16>
    %37 = vector.shape_cast %36 : vector<16x16x4xbf16> to vector<256x4xbf16>
    %c0_54 = arith.constant 0 : index
    %c0_55 = arith.constant 0 : index
    %c0_56 = arith.constant 0 : index
    %c0_57 = arith.constant 0 : index
    %38 = vector.load %arg2[%c0_54, %c0_55, %c0_56, %c0_57] : memref<3x3x4x4xbf16, #tpu.memory_space<vmem>>, vector<1x1x4x4xbf16>
    %39 = vector.shape_cast %38 : vector<1x1x4x4xbf16> to vector<4x4xbf16>
    %cst = arith.constant dense<0.000000e+00> : vector<256x4xf32>
    %40 = tpu.matmul %37, %39, %cst {dimension_numbers = #tpu.dot_dimension_numbers<[1], [0], [0], [1], [0, 0, 1, 1], [], []>} : vector<256x4xbf16>, vector<4x4xbf16>, vector<256x4xf32> -> vector<256x4xf32>
    %c1_58 = arith.constant 1 : index
    %c0_59 = arith.constant 0 : index
    %c0_60 = arith.constant 0 : index
    %c0_61 = arith.constant 0 : index
    %41 = vector.load %arg5[%c1_58, %c0_59, %c0_60, %c0_61] : memref<3x18x16x4xbf16, #tpu.memory_space<vmem>>, vector<1x16x16x4xbf16>
    %42 = vector.shape_cast %41 : vector<1x16x16x4xbf16> to vector<16x16x4xbf16>
    %43 = vector.shape_cast %42 : vector<16x16x4xbf16> to vector<256x4xbf16>
    %c0_62 = arith.constant 0 : index
    %c1_63 = arith.constant 1 : index
    %c0_64 = arith.constant 0 : index
    %c0_65 = arith.constant 0 : index
    %44 = vector.load %arg2[%c0_62, %c1_63, %c0_64, %c0_65] : memref<3x3x4x4xbf16, #tpu.memory_space<vmem>>, vector<1x1x4x4xbf16>
    %45 = vector.shape_cast %44 : vector<1x1x4x4xbf16> to vector<4x4xbf16>
    %cst_66 = arith.constant dense<0.000000e+00> : vector<256x4xf32>
    %46 = tpu.matmul %43, %45, %cst_66 {dimension_numbers = #tpu.dot_dimension_numbers<[1], [0], [0], [1], [0, 0, 1, 1], [], []>} : vector<256x4xbf16>, vector<4x4xbf16>, vector<256x4xf32> -> vector<256x4xf32>
    %47 = arith.addf %40, %46 : vector<256x4xf32>
    %c2_67 = arith.constant 2 : index
    %c0_68 = arith.constant 0 : index
    %c0_69 = arith.constant 0 : index
    %c0_70 = arith.constant 0 : index
    %48 = vector.load %arg5[%c2_67, %c0_68, %c0_69, %c0_70] : memref<3x18x16x4xbf16, #tpu.memory_space<vmem>>, vector<1x16x16x4xbf16>
    %49 = vector.shape_cast %48 : vector<1x16x16x4xbf16> to vector<16x16x4xbf16>
    %50 = vector.shape_cast %49 : vector<16x16x4xbf16> to vector<256x4xbf16>
    %c0_71 = arith.constant 0 : index
    %c2_72 = arith.constant 2 : index
    %c0_73 = arith.constant 0 : index
    %c0_74 = arith.constant 0 : index
    %51 = vector.load %arg2[%c0_71, %c2_72, %c0_73, %c0_74] : memref<3x3x4x4xbf16, #tpu.memory_space<vmem>>, vector<1x1x4x4xbf16>
    %52 = vector.shape_cast %51 : vector<1x1x4x4xbf16> to vector<4x4xbf16>
    %cst_75 = arith.constant dense<0.000000e+00> : vector<256x4xf32>
    %53 = tpu.matmul %50, %52, %cst_75 {dimension_numbers = #tpu.dot_dimension_numbers<[1], [0], [0], [1], [0, 0, 1, 1], [], []>} : vector<256x4xbf16>, vector<4x4xbf16>, vector<256x4xf32> -> vector<256x4xf32>
    %54 = arith.addf %47, %53 : vector<256x4xf32>
    %c0_76 = arith.constant 0 : index
    %c0_77 = arith.constant 0 : index
    %55 = vector.load %arg6[%c0_76, %c0_77] : memref<256x4xf32, #tpu.memory_space<vmem>>, vector<256x4xf32>
    tpu.vector_store %arg6[%c0_76, %c0_77], %54 {strides = array<i32>} : memref<256x4xf32, #tpu.memory_space<vmem>>, vector<256x4xf32>,
    %c0_78 = arith.constant 0 : index
    %c0_79 = arith.constant 0 : index
    %56 = vector.load %arg6[%c0_78, %c0_79] : memref<256x4xf32, #tpu.memory_space<vmem>>, vector<256x4xf32>
    %c0_80 = arith.constant 0 : index
    %c1_81 = arith.constant 1 : index
    %c0_82 = arith.constant 0 : index
    %c0_83 = arith.constant 0 : index
    %57 = vector.load %arg5[%c0_80, %c1_81, %c0_82, %c0_83] : memref<3x18x16x4xbf16, #tpu.memory_space<vmem>>, vector<1x16x16x4xbf16>
    %58 = vector.shape_cast %57 : vector<1x16x16x4xbf16> to vector<16x16x4xbf16>
    %59 = vector.shape_cast %58 : vector<16x16x4xbf16> to vector<256x4xbf16>
    %c1_84 = arith.constant 1 : index
    %c0_85 = arith.constant 0 : index
    %c0_86 = arith.constant 0 : index
    %c0_87 = arith.constant 0 : index
    %60 = vector.load %arg2[%c1_84, %c0_85, %c0_86, %c0_87] : memref<3x3x4x4xbf16, #tpu.memory_space<vmem>>, vector<1x1x4x4xbf16>
    %61 = vector.shape_cast %60 : vector<1x1x4x4xbf16> to vector<4x4xbf16>
    %cst_88 = arith.constant dense<0.000000e+00> : vector<256x4xf32>
    %62 = tpu.matmul %59, %61, %cst_88 {dimension_numbers = #tpu.dot_dimension_numbers<[1], [0], [0], [1], [0, 0, 1, 1], [], []>} : vector<256x4xbf16>, vector<4x4xbf16>, vector<256x4xf32> -> vector<256x4xf32>
    %c1_89 = arith.constant 1 : index
    %c1_90 = arith.constant 1 : index
    %c0_91 = arith.constant 0 : index
    %c0_92 = arith.constant 0 : index
    %63 = vector.load %arg5[%c1_89, %c1_90, %c0_91, %c0_92] : memref<3x18x16x4xbf16, #tpu.memory_space<vmem>>, vector<1x16x16x4xbf16>
    %64 = vector.shape_cast %63 : vector<1x16x16x4xbf16> to vector<16x16x4xbf16>
    %65 = vector.shape_cast %64 : vector<16x16x4xbf16> to vector<256x4xbf16>
    %c1_93 = arith.constant 1 : index
    %c1_94 = arith.constant 1 : index
    %c0_95 = arith.constant 0 : index
    %c0_96 = arith.constant 0 : index
    %66 = vector.load %arg2[%c1_93, %c1_94, %c0_95, %c0_96] : memref<3x3x4x4xbf16, #tpu.memory_space<vmem>>, vector<1x1x4x4xbf16>
    %67 = vector.shape_cast %66 : vector<1x1x4x4xbf16> to vector<4x4xbf16>
    %cst_97 = arith.constant dense<0.000000e+00> : vector<256x4xf32>
    %68 = tpu.matmul %65, %67, %cst_97 {dimension_numbers = #tpu.dot_dimension_numbers<[1], [0], [0], [1], [0, 0, 1, 1], [], []>} : vector<256x4xbf16>, vector<4x4xbf16>, vector<256x4xf32> -> vector<256x4xf32>
    %69 = arith.addf %62, %68 : vector<256x4xf32>
    %c2_98 = arith.constant 2 : index
    %c1_99 = arith.constant 1 : index
    %c0_100 = arith.constant 0 : index
    %c0_101 = arith.constant 0 : index
    %70 = vector.load %arg5[%c2_98, %c1_99, %c0_100, %c0_101] : memref<3x18x16x4xbf16, #tpu.memory_space<vmem>>, vector<1x16x16x4xbf16>
    %71 = vector.shape_cast %70 : vector<1x16x16x4xbf16> to vector<16x16x4xbf16>
    %72 = vector.shape_cast %71 : vector<16x16x4xbf16> to vector<256x4xbf16>
    %c1_102 = arith.constant 1 : index
    %c2_103 = arith.constant 2 : index
    %c0_104 = arith.constant 0 : index
    %c0_105 = arith.constant 0 : index
    %73 = vector.load %arg2[%c1_102, %c2_103, %c0_104, %c0_105] : memref<3x3x4x4xbf16, #tpu.memory_space<vmem>>, vector<1x1x4x4xbf16>
    %74 = vector.shape_cast %73 : vector<1x1x4x4xbf16> to vector<4x4xbf16>
    %cst_106 = arith.constant dense<0.000000e+00> : vector<256x4xf32>
    %75 = tpu.matmul %72, %74, %cst_106 {dimension_numbers = #tpu.dot_dimension_numbers<[1], [0], [0], [1], [0, 0, 1, 1], [], []>} : vector<256x4xbf16>, vector<4x4xbf16>, vector<256x4xf32> -> vector<256x4xf32>
    %76 = arith.addf %69, %75 : vector<256x4xf32>
    %77 = arith.addf %56, %76 : vector<256x4xf32>
    %c0_107 = arith.constant 0 : index
    %c0_108 = arith.constant 0 : index
    %78 = vector.load %arg6[%c0_107, %c0_108] : memref<256x4xf32, #tpu.memory_space<vmem>>, vector<256x4xf32>
    tpu.vector_store %arg6[%c0_107, %c0_108], %77 {strides = array<i32>} : memref<256x4xf32, #tpu.memory_space<vmem>>, vector<256x4xf32>,
    %c0_109 = arith.constant 0 : index
    %c0_110 = arith.constant 0 : index
    %79 = vector.load %arg6[%c0_109, %c0_110] : memref<256x4xf32, #tpu.memory_space<vmem>>, vector<256x4xf32>
    %c0_111 = arith.constant 0 : index
    %c2_112 = arith.constant 2 : index
    %c0_113 = arith.constant 0 : index
    %c0_114 = arith.constant 0 : index
    %80 = vector.load %arg5[%c0_111, %c2_112, %c0_113, %c0_114] : memref<3x18x16x4xbf16, #tpu.memory_space<vmem>>, vector<1x16x16x4xbf16>
    %81 = vector.shape_cast %80 : vector<1x16x16x4xbf16> to vector<16x16x4xbf16>
    %82 = vector.shape_cast %81 : vector<16x16x4xbf16> to vector<256x4xbf16>
    %c2_115 = arith.constant 2 : index
    %c0_116 = arith.constant 0 : index
    %c0_117 = arith.constant 0 : index
    %c0_118 = arith.constant 0 : index
    %83 = vector.load %arg2[%c2_115, %c0_116, %c0_117, %c0_118] : memref<3x3x4x4xbf16, #tpu.memory_space<vmem>>, vector<1x1x4x4xbf16>
    %84 = vector.shape_cast %83 : vector<1x1x4x4xbf16> to vector<4x4xbf16>
    %cst_119 = arith.constant dense<0.000000e+00> : vector<256x4xf32>
    %85 = tpu.matmul %82, %84, %cst_119 {dimension_numbers = #tpu.dot_dimension_numbers<[1], [0], [0], [1], [0, 0, 1, 1], [], []>} : vector<256x4xbf16>, vector<4x4xbf16>, vector<256x4xf32> -> vector<256x4xf32>
    %c1_120 = arith.constant 1 : index
    %c2_121 = arith.constant 2 : index
    %c0_122 = arith.constant 0 : index
    %c0_123 = arith.constant 0 : index
    %86 = vector.load %arg5[%c1_120, %c2_121, %c0_122, %c0_123] : memref<3x18x16x4xbf16, #tpu.memory_space<vmem>>, vector<1x16x16x4xbf16>
    %87 = vector.shape_cast %86 : vector<1x16x16x4xbf16> to vector<16x16x4xbf16>
    %88 = vector.shape_cast %87 : vector<16x16x4xbf16> to vector<256x4xbf16>
    %c2_124 = arith.constant 2 : index
    %c1_125 = arith.constant 1 : index
    %c0_126 = arith.constant 0 : index
    %c0_127 = arith.constant 0 : index
    %89 = vector.load %arg2[%c2_124, %c1_125, %c0_126, %c0_127] : memref<3x3x4x4xbf16, #tpu.memory_space<vmem>>, vector<1x1x4x4xbf16>
    %90 = vector.shape_cast %89 : vector<1x1x4x4xbf16> to vector<4x4xbf16>
    %cst_128 = arith.constant dense<0.000000e+00> : vector<256x4xf32>
    %91 = tpu.matmul %88, %90, %cst_128 {dimension_numbers = #tpu.dot_dimension_numbers<[1], [0], [0], [1], [0, 0, 1, 1], [], []>} : vector<256x4xbf16>, vector<4x4xbf16>, vector<256x4xf32> -> vector<256x4xf32>
    %92 = arith.addf %85, %91 : vector<256x4xf32>
    %c2_129 = arith.constant 2 : index
    %c2_130 = arith.constant 2 : index
    %c0_131 = arith.constant 0 : index
    %c0_132 = arith.constant 0 : index
    %93 = vector.load %arg5[%c2_129, %c2_130, %c0_131, %c0_132] : memref<3x18x16x4xbf16, #tpu.memory_space<vmem>>, vector<1x16x16x4xbf16>
    %94 = vector.shape_cast %93 : vector<1x16x16x4xbf16> to vector<16x16x4xbf16>
    %95 = vector.shape_cast %94 : vector<16x16x4xbf16> to vector<256x4xbf16>
    %c2_133 = arith.constant 2 : index
    %c2_134 = arith.constant 2 : index
    %c0_135 = arith.constant 0 : index
    %c0_136 = arith.constant 0 : index
    %96 = vector.load %arg2[%c2_133, %c2_134, %c0_135, %c0_136] : memref<3x3x4x4xbf16, #tpu.memory_space<vmem>>, vector<1x1x4x4xbf16>
    %97 = vector.shape_cast %96 : vector<1x1x4x4xbf16> to vector<4x4xbf16>
    %cst_137 = arith.constant dense<0.000000e+00> : vector<256x4xf32>
    %98 = tpu.matmul %95, %97, %cst_137 {dimension_numbers = #tpu.dot_dimension_numbers<[1], [0], [0], [1], [0, 0, 1, 1], [], []>} : vector<256x4xbf16>, vector<4x4xbf16>, vector<256x4xf32> -> vector<256x4xf32>
    %99 = arith.addf %92, %98 : vector<256x4xf32>
    %100 = arith.addf %79, %99 : vector<256x4xf32>
    %cst_138 = arith.constant dense<0.000000e+00> : vector<4xf32>
    %101 = vector.multi_reduction <add>, %100, %cst_138 [0] : vector<256x4xf32> to vector<4xf32>
    %102 = vector.shape_cast %101 : vector<4xf32> to vector<1x4xf32>
    %cst_139 = arith.constant 3.906250e-03 : f32
    %103 = vector.broadcast %cst_139 : f32 to vector<1x4xf32>
    %104 = arith.mulf %102, %103 : vector<1x4xf32>
    %105 = arith.mulf %100, %100 : vector<256x4xf32>
    %cst_140 = arith.constant dense<0.000000e+00> : vector<4xf32>
    %106 = vector.multi_reduction <add>, %105, %cst_140 [0] : vector<256x4xf32> to vector<4xf32>
    %107 = vector.shape_cast %106 : vector<4xf32> to vector<1x4xf32>
    %cst_141 = arith.constant 3.906250e-03 : f32
    %108 = vector.broadcast %cst_141 : f32 to vector<1x4xf32>
    %109 = arith.mulf %107, %108 : vector<1x4xf32>
    %110 = arith.mulf %104, %104 : vector<1x4xf32>
    %111 = arith.subf %109, %110 : vector<1x4xf32>
    %cst_142 = arith.constant 0.000000e+00 : f32
    %112 = vector.broadcast %cst_142 : f32 to vector<1x4xf32>
    %113 = arith.maximumf %111, %112 : vector<1x4xf32>
    %114 = vector.broadcast %104 : vector<1x4xf32> to vector<256x4xf32>
    %115 = arith.subf %100, %114 : vector<256x4xf32>
    %cst_143 = arith.constant 9.99999974E-6 : f32
    %116 = vector.broadcast %cst_143 : f32 to vector<1x4xf32>
    %117 = arith.addf %113, %116 : vector<1x4xf32>
    %118 = math.rsqrt %117 : vector<1x4xf32>
    %119 = vector.broadcast %118 : vector<1x4xf32> to vector<256x4xf32>
    %120 = arith.mulf %115, %119 : vector<256x4xf32>
    %cst_144 = arith.constant 0.000000e+00 : f32
    %121 = vector.broadcast %cst_144 : f32 to vector<256x4xf32>
    %122 = arith.maximumf %120, %121 : vector<256x4xf32>
    %123 = vector.shape_cast %122 : vector<256x4xf32> to vector<16x16x4xf32>
    %124 = arith.truncf %123 : vector<16x16x4xf32> to vector<16x16x4xbf16>
    %c1_145 = arith.constant 1 : index
    %c1_146 = arith.constant 1 : index
    %c0_147 = arith.constant 0 : index
    %c0_148 = arith.constant 0 : index
    %125 = vector.load %arg5[%c1_145, %c1_146, %c0_147, %c0_148] : memref<3x18x16x4xbf16, #tpu.memory_space<vmem>>, vector<1x16x16x4xbf16>
    %126 = vector.shape_cast %125 : vector<1x16x16x4xbf16> to vector<16x16x4xbf16>
    %127 = vector.shape_cast %124 : vector<16x16x4xbf16> to vector<1x16x16x4xbf16>
    tpu.vector_store %arg5[%c1_145, %c1_146, %c0_147, %c0_148], %127 {strides = array<i32>} : memref<3x18x16x4xbf16, #tpu.memory_space<vmem>>, vector<1x16x16x4xbf16>,
    %c1_149 = arith.constant 1 : index
    %c2_150 = arith.constant 2 : index
    %c0_151 = arith.constant 0 : index
    %c0_152 = arith.constant 0 : index
    %128 = vector.load %arg5[%c1_149, %c2_150, %c0_151, %c0_152] : memref<3x18x16x4xbf16, #tpu.memory_space<vmem>>, vector<1x1x16x4xbf16>
    %129 = vector.shape_cast %128 : vector<1x1x16x4xbf16> to vector<1x16x4xbf16>
    %c1_153 = arith.constant 1 : index
    %c0_154 = arith.constant 0 : index
    %c0_155 = arith.constant 0 : index
    %c0_156 = arith.constant 0 : index
    %130 = vector.load %arg5[%c1_153, %c0_154, %c0_155, %c0_156] : memref<3x18x16x4xbf16, #tpu.memory_space<vmem>>, vector<1x1x16x4xbf16>
    %131 = vector.shape_cast %130 : vector<1x1x16x4xbf16> to vector<1x16x4xbf16>
    %132 = vector.shape_cast %129 : vector<1x16x4xbf16> to vector<1x1x16x4xbf16>
    tpu.vector_store %arg5[%c1_153, %c0_154, %c0_155, %c0_156], %132 {strides = array<i32>} : memref<3x18x16x4xbf16, #tpu.memory_space<vmem>>, vector<1x1x16x4xbf16>,
    %c1_157 = arith.constant 1 : index
    %c15_158 = arith.constant 15 : index
    %c0_159 = arith.constant 0 : index
    %c0_160 = arith.constant 0 : index
    %133 = vector.load %arg5[%c1_157, %c15_158, %c0_159, %c0_160] : memref<3x18x16x4xbf16, #tpu.memory_space<vmem>>, vector<1x1x16x4xbf16>
    %134 = vector.shape_cast %133 : vector<1x1x16x4xbf16> to vector<1x16x4xbf16>
    %c1_161 = arith.constant 1 : index
    %c17_162 = arith.constant 17 : index
    %c0_163 = arith.constant 0 : index
    %c0_164 = arith.constant 0 : index
    %135 = vector.load %arg5[%c1_161, %c17_162, %c0_163, %c0_164] : memref<3x18x16x4xbf16, #tpu.memory_space<vmem>>, vector<1x1x16x4xbf16>
    %136 = vector.shape_cast %135 : vector<1x1x16x4xbf16> to vector<1x16x4xbf16>
    %137 = vector.shape_cast %134 : vector<1x16x4xbf16> to vector<1x1x16x4xbf16>
    tpu.vector_store %arg5[%c1_161, %c17_162, %c0_163, %c0_164], %137 {strides = array<i32>} : memref<3x18x16x4xbf16, #tpu.memory_space<vmem>>, vector<1x1x16x4xbf16>,
    %c1_165 = arith.constant 1 : index
    %c0_166 = arith.constant 0 : index
    %c0_167 = arith.constant 0 : index
    %c0_168 = arith.constant 0 : index
    %138 = vector.load %arg5[%c1_165, %c0_166, %c0_167, %c0_168] : memref<3x18x16x4xbf16, #tpu.memory_space<vmem>>, vector<1x18x15x4xbf16>
    %139 = vector.shape_cast %138 : vector<1x18x15x4xbf16> to vector<18x15x4xbf16>
    %c0_169 = arith.constant 0 : index
    %c0_170 = arith.constant 0 : index
    %c1_171 = arith.constant 1 : index
    %c0_172 = arith.constant 0 : index
    %140 = vector.load %arg5[%c0_169, %c0_170, %c1_171, %c0_172] : memref<3x18x16x4xbf16, #tpu.memory_space<vmem>>, vector<1x18x15x4xbf16>
    %141 = vector.shape_cast %140 : vector<1x18x15x4xbf16> to vector<18x15x4xbf16>
    %142 = vector.shape_cast %139 : vector<18x15x4xbf16> to vector<1x18x15x4xbf16>
    tpu.vector_store %arg5[%c0_169, %c0_170, %c1_171, %c0_172], %142 {strides = array<i32>} : memref<3x18x16x4xbf16, #tpu.memory_space<vmem>>, vector<1x18x15x4xbf16>,
    %c1_173 = arith.constant 1 : index
    %c0_174 = arith.constant 0 : index
    %c1_175 = arith.constant 1 : index
    %c0_176 = arith.constant 0 : index
    %143 = vector.load %arg5[%c1_173, %c0_174, %c1_175, %c0_176] : memref<3x18x16x4xbf16, #tpu.memory_space<vmem>>, vector<1x18x1x4xbf16>
    %144 = vector.shape_cast %143 : vector<1x18x1x4xbf16> to vector<18x1x4xbf16>
    %c0_177 = arith.constant 0 : index
    %c0_178 = arith.constant 0 : index
    %c0_179 = arith.constant 0 : index
    %c0_180 = arith.constant 0 : index
    %145 = vector.load %arg5[%c0_177, %c0_178, %c0_179, %c0_180] : memref<3x18x16x4xbf16, #tpu.memory_space<vmem>>, vector<1x18x1x4xbf16>
    %146 = vector.shape_cast %145 : vector<1x18x1x4xbf16> to vector<18x1x4xbf16>
    %147 = vector.shape_cast %144 : vector<18x1x4xbf16> to vector<1x18x1x4xbf16>
    tpu.vector_store %arg5[%c0_177, %c0_178, %c0_179, %c0_180], %147 {strides = array<i32>} : memref<3x18x16x4xbf16, #tpu.memory_space<vmem>>, vector<1x18x1x4xbf16>,
    %c1_181 = arith.constant 1 : index
    %c0_182 = arith.constant 0 : index
    %c1_183 = arith.constant 1 : index
    %c0_184 = arith.constant 0 : index
    %148 = vector.load %arg5[%c1_181, %c0_182, %c1_183, %c0_184] : memref<3x18x16x4xbf16, #tpu.memory_space<vmem>>, vector<1x18x15x4xbf16>
    %149 = vector.shape_cast %148 : vector<1x18x15x4xbf16> to vector<18x15x4xbf16>
    %c2_185 = arith.constant 2 : index
    %c0_186 = arith.constant 0 : index
    %c0_187 = arith.constant 0 : index
    %c0_188 = arith.constant 0 : index
    %150 = vector.load %arg5[%c2_185, %c0_186, %c0_187, %c0_188] : memref<3x18x16x4xbf16, #tpu.memory_space<vmem>>, vector<1x18x15x4xbf16>
    %151 = vector.shape_cast %150 : vector<1x18x15x4xbf16> to vector<18x15x4xbf16>
    %152 = vector.shape_cast %149 : vector<18x15x4xbf16> to vector<1x18x15x4xbf16>
    tpu.vector_store %arg5[%c2_185, %c0_186, %c0_187, %c0_188], %152 {strides = array<i32>} : memref<3x18x16x4xbf16, #tpu.memory_space<vmem>>, vector<1x18x15x4xbf16>,
    %c1_189 = arith.constant 1 : index
    %c0_190 = arith.constant 0 : index
    %c14_191 = arith.constant 14 : index
    %c0_192 = arith.constant 0 : index
    %153 = vector.load %arg5[%c1_189, %c0_190, %c14_191, %c0_192] : memref<3x18x16x4xbf16, #tpu.memory_space<vmem>>, vector<1x18x1x4xbf16>
    %154 = vector.shape_cast %153 : vector<1x18x1x4xbf16> to vector<18x1x4xbf16>
    %c2_193 = arith.constant 2 : index
    %c0_194 = arith.constant 0 : index
    %c15_195 = arith.constant 15 : index
    %c0_196 = arith.constant 0 : index
    %155 = vector.load %arg5[%c2_193, %c0_194, %c15_195, %c0_196] : memref<3x18x16x4xbf16, #tpu.memory_space<vmem>>, vector<1x18x1x4xbf16>
    %156 = vector.shape_cast %155 : vector<1x18x1x4xbf16> to vector<18x1x4xbf16>
    %157 = vector.shape_cast %154 : vector<18x1x4xbf16> to vector<1x18x1x4xbf16>
    tpu.vector_store %arg5[%c2_193, %c0_194, %c15_195, %c0_196], %157 {strides = array<i32>} : memref<3x18x16x4xbf16, #tpu.memory_space<vmem>>, vector<1x18x1x4xbf16>,
    %c0_197 = arith.constant 0 : index
    %c0_198 = arith.constant 0 : index
    %c0_199 = arith.constant 0 : index
    %c0_200 = arith.constant 0 : index
    %158 = vector.load %arg5[%c0_197, %c0_198, %c0_199, %c0_200] : memref<3x18x16x4xbf16, #tpu.memory_space<vmem>>, vector<1x16x16x4xbf16>
    %159 = vector.shape_cast %158 : vector<1x16x16x4xbf16> to vector<16x16x4xbf16>
    %160 = vector.shape_cast %159 : vector<16x16x4xbf16> to vector<256x4xbf16>
    %c0_201 = arith.constant 0 : index
    %c0_202 = arith.constant 0 : index
    %c0_203 = arith.constant 0 : index
    %c0_204 = arith.constant 0 : index
    %161 = vector.load %arg3[%c0_201, %c0_202, %c0_203, %c0_204] : memref<3x3x4x4xbf16, #tpu.memory_space<vmem>>, vector<1x1x4x4xbf16>
    %162 = vector.shape_cast %161 : vector<1x1x4x4xbf16> to vector<4x4xbf16>
    %cst_205 = arith.constant dense<0.000000e+00> : vector<256x4xf32>
    %163 = tpu.matmul %160, %162, %cst_205 {dimension_numbers = #tpu.dot_dimension_numbers<[1], [0], [0], [1], [0, 0, 1, 1], [], []>} : vector<256x4xbf16>, vector<4x4xbf16>, vector<256x4xf32> -> vector<256x4xf32>
    %c1_206 = arith.constant 1 : index
    %c0_207 = arith.constant 0 : index
    %c0_208 = arith.constant 0 : index
    %c0_209 = arith.constant 0 : index
    %164 = vector.load %arg5[%c1_206, %c0_207, %c0_208, %c0_209] : memref<3x18x16x4xbf16, #tpu.memory_space<vmem>>, vector<1x16x16x4xbf16>
    %165 = vector.shape_cast %164 : vector<1x16x16x4xbf16> to vector<16x16x4xbf16>
    %166 = vector.shape_cast %165 : vector<16x16x4xbf16> to vector<256x4xbf16>
    %c0_210 = arith.constant 0 : index
    %c1_211 = arith.constant 1 : index
    %c0_212 = arith.constant 0 : index
    %c0_213 = arith.constant 0 : index
    %167 = vector.load %arg3[%c0_210, %c1_211, %c0_212, %c0_213] : memref<3x3x4x4xbf16, #tpu.memory_space<vmem>>, vector<1x1x4x4xbf16>
    %168 = vector.shape_cast %167 : vector<1x1x4x4xbf16> to vector<4x4xbf16>
    %cst_214 = arith.constant dense<0.000000e+00> : vector<256x4xf32>
    %169 = tpu.matmul %166, %168, %cst_214 {dimension_numbers = #tpu.dot_dimension_numbers<[1], [0], [0], [1], [0, 0, 1, 1], [], []>} : vector<256x4xbf16>, vector<4x4xbf16>, vector<256x4xf32> -> vector<256x4xf32>
    %170 = arith.addf %163, %169 : vector<256x4xf32>
    %c2_215 = arith.constant 2 : index
    %c0_216 = arith.constant 0 : index
    %c0_217 = arith.constant 0 : index
    %c0_218 = arith.constant 0 : index
    %171 = vector.load %arg5[%c2_215, %c0_216, %c0_217, %c0_218] : memref<3x18x16x4xbf16, #tpu.memory_space<vmem>>, vector<1x16x16x4xbf16>
    %172 = vector.shape_cast %171 : vector<1x16x16x4xbf16> to vector<16x16x4xbf16>
    %173 = vector.shape_cast %172 : vector<16x16x4xbf16> to vector<256x4xbf16>
    %c0_219 = arith.constant 0 : index
    %c2_220 = arith.constant 2 : index
    %c0_221 = arith.constant 0 : index
    %c0_222 = arith.constant 0 : index
    %174 = vector.load %arg3[%c0_219, %c2_220, %c0_221, %c0_222] : memref<3x3x4x4xbf16, #tpu.memory_space<vmem>>, vector<1x1x4x4xbf16>
    %175 = vector.shape_cast %174 : vector<1x1x4x4xbf16> to vector<4x4xbf16>
    %cst_223 = arith.constant dense<0.000000e+00> : vector<256x4xf32>
    %176 = tpu.matmul %173, %175, %cst_223 {dimension_numbers = #tpu.dot_dimension_numbers<[1], [0], [0], [1], [0, 0, 1, 1], [], []>} : vector<256x4xbf16>, vector<4x4xbf16>, vector<256x4xf32> -> vector<256x4xf32>
    %177 = arith.addf %170, %176 : vector<256x4xf32>
    %c0_224 = arith.constant 0 : index
    %c0_225 = arith.constant 0 : index
    %178 = vector.load %arg6[%c0_224, %c0_225] : memref<256x4xf32, #tpu.memory_space<vmem>>, vector<256x4xf32>
    tpu.vector_store %arg6[%c0_224, %c0_225], %177 {strides = array<i32>} : memref<256x4xf32, #tpu.memory_space<vmem>>, vector<256x4xf32>,
    %c0_226 = arith.constant 0 : index
    %c0_227 = arith.constant 0 : index
    %179 = vector.load %arg6[%c0_226, %c0_227] : memref<256x4xf32, #tpu.memory_space<vmem>>, vector<256x4xf32>
    %c0_228 = arith.constant 0 : index
    %c1_229 = arith.constant 1 : index
    %c0_230 = arith.constant 0 : index
    %c0_231 = arith.constant 0 : index
    %180 = vector.load %arg5[%c0_228, %c1_229, %c0_230, %c0_231] : memref<3x18x16x4xbf16, #tpu.memory_space<vmem>>, vector<1x16x16x4xbf16>
    %181 = vector.shape_cast %180 : vector<1x16x16x4xbf16> to vector<16x16x4xbf16>
    %182 = vector.shape_cast %181 : vector<16x16x4xbf16> to vector<256x4xbf16>
    %c1_232 = arith.constant 1 : index
    %c0_233 = arith.constant 0 : index
    %c0_234 = arith.constant 0 : index
    %c0_235 = arith.constant 0 : index
    %183 = vector.load %arg3[%c1_232, %c0_233, %c0_234, %c0_235] : memref<3x3x4x4xbf16, #tpu.memory_space<vmem>>, vector<1x1x4x4xbf16>
    %184 = vector.shape_cast %183 : vector<1x1x4x4xbf16> to vector<4x4xbf16>
    %cst_236 = arith.constant dense<0.000000e+00> : vector<256x4xf32>
    %185 = tpu.matmul %182, %184, %cst_236 {dimension_numbers = #tpu.dot_dimension_numbers<[1], [0], [0], [1], [0, 0, 1, 1], [], []>} : vector<256x4xbf16>, vector<4x4xbf16>, vector<256x4xf32> -> vector<256x4xf32>
    %c1_237 = arith.constant 1 : index
    %c1_238 = arith.constant 1 : index
    %c0_239 = arith.constant 0 : index
    %c0_240 = arith.constant 0 : index
    %186 = vector.load %arg5[%c1_237, %c1_238, %c0_239, %c0_240] : memref<3x18x16x4xbf16, #tpu.memory_space<vmem>>, vector<1x16x16x4xbf16>
    %187 = vector.shape_cast %186 : vector<1x16x16x4xbf16> to vector<16x16x4xbf16>
    %188 = vector.shape_cast %187 : vector<16x16x4xbf16> to vector<256x4xbf16>
    %c1_241 = arith.constant 1 : index
    %c1_242 = arith.constant 1 : index
    %c0_243 = arith.constant 0 : index
    %c0_244 = arith.constant 0 : index
    %189 = vector.load %arg3[%c1_241, %c1_242, %c0_243, %c0_244] : memref<3x3x4x4xbf16, #tpu.memory_space<vmem>>, vector<1x1x4x4xbf16>
    %190 = vector.shape_cast %189 : vector<1x1x4x4xbf16> to vector<4x4xbf16>
    %cst_245 = arith.constant dense<0.000000e+00> : vector<256x4xf32>
    %191 = tpu.matmul %188, %190, %cst_245 {dimension_numbers = #tpu.dot_dimension_numbers<[1], [0], [0], [1], [0, 0, 1, 1], [], []>} : vector<256x4xbf16>, vector<4x4xbf16>, vector<256x4xf32> -> vector<256x4xf32>
    %192 = arith.addf %185, %191 : vector<256x4xf32>
    %c2_246 = arith.constant 2 : index
    %c1_247 = arith.constant 1 : index
    %c0_248 = arith.constant 0 : index
    %c0_249 = arith.constant 0 : index
    %193 = vector.load %arg5[%c2_246, %c1_247, %c0_248, %c0_249] : memref<3x18x16x4xbf16, #tpu.memory_space<vmem>>, vector<1x16x16x4xbf16>
    %194 = vector.shape_cast %193 : vector<1x16x16x4xbf16> to vector<16x16x4xbf16>
    %195 = vector.shape_cast %194 : vector<16x16x4xbf16> to vector<256x4xbf16>
    %c1_250 = arith.constant 1 : index
    %c2_251 = arith.constant 2 : index
    %c0_252 = arith.constant 0 : index
    %c0_253 = arith.constant 0 : index
    %196 = vector.load %arg3[%c1_250, %c2_251, %c0_252, %c0_253] : memref<3x3x4x4xbf16, #tpu.memory_space<vmem>>, vector<1x1x4x4xbf16>
    %197 = vector.shape_cast %196 : vector<1x1x4x4xbf16> to vector<4x4xbf16>
    %cst_254 = arith.constant dense<0.000000e+00> : vector<256x4xf32>
    %198 = tpu.matmul %195, %197, %cst_254 {dimension_numbers = #tpu.dot_dimension_numbers<[1], [0], [0], [1], [0, 0, 1, 1], [], []>} : vector<256x4xbf16>, vector<4x4xbf16>, vector<256x4xf32> -> vector<256x4xf32>
    %199 = arith.addf %192, %198 : vector<256x4xf32>
    %200 = arith.addf %179, %199 : vector<256x4xf32>
    %c0_255 = arith.constant 0 : index
    %c0_256 = arith.constant 0 : index
    %201 = vector.load %arg6[%c0_255, %c0_256] : memref<256x4xf32, #tpu.memory_space<vmem>>, vector<256x4xf32>
    tpu.vector_store %arg6[%c0_255, %c0_256], %200 {strides = array<i32>} : memref<256x4xf32, #tpu.memory_space<vmem>>, vector<256x4xf32>,
    %c0_257 = arith.constant 0 : index
    %c0_258 = arith.constant 0 : index
    %202 = vector.load %arg6[%c0_257, %c0_258] : memref<256x4xf32, #tpu.memory_space<vmem>>, vector<256x4xf32>
    %c0_259 = arith.constant 0 : index
    %c2_260 = arith.constant 2 : index
    %c0_261 = arith.constant 0 : index
    %c0_262 = arith.constant 0 : index
    %203 = vector.load %arg5[%c0_259, %c2_260, %c0_261, %c0_262] : memref<3x18x16x4xbf16, #tpu.memory_space<vmem>>, vector<1x16x16x4xbf16>
    %204 = vector.shape_cast %203 : vector<1x16x16x4xbf16> to vector<16x16x4xbf16>
    %205 = vector.shape_cast %204 : vector<16x16x4xbf16> to vector<256x4xbf16>
    %c2_263 = arith.constant 2 : index
    %c0_264 = arith.constant 0 : index
    %c0_265 = arith.constant 0 : index
    %c0_266 = arith.constant 0 : index
    %206 = vector.load %arg3[%c2_263, %c0_264, %c0_265, %c0_266] : memref<3x3x4x4xbf16, #tpu.memory_space<vmem>>, vector<1x1x4x4xbf16>
    %207 = vector.shape_cast %206 : vector<1x1x4x4xbf16> to vector<4x4xbf16>
    %cst_267 = arith.constant dense<0.000000e+00> : vector<256x4xf32>
    %208 = tpu.matmul %205, %207, %cst_267 {dimension_numbers = #tpu.dot_dimension_numbers<[1], [0], [0], [1], [0, 0, 1, 1], [], []>} : vector<256x4xbf16>, vector<4x4xbf16>, vector<256x4xf32> -> vector<256x4xf32>
    %c1_268 = arith.constant 1 : index
    %c2_269 = arith.constant 2 : index
    %c0_270 = arith.constant 0 : index
    %c0_271 = arith.constant 0 : index
    %209 = vector.load %arg5[%c1_268, %c2_269, %c0_270, %c0_271] : memref<3x18x16x4xbf16, #tpu.memory_space<vmem>>, vector<1x16x16x4xbf16>
    %210 = vector.shape_cast %209 : vector<1x16x16x4xbf16> to vector<16x16x4xbf16>
    %211 = vector.shape_cast %210 : vector<16x16x4xbf16> to vector<256x4xbf16>
    %c2_272 = arith.constant 2 : index
    %c1_273 = arith.constant 1 : index
    %c0_274 = arith.constant 0 : index
    %c0_275 = arith.constant 0 : index
    %212 = vector.load %arg3[%c2_272, %c1_273, %c0_274, %c0_275] : memref<3x3x4x4xbf16, #tpu.memory_space<vmem>>, vector<1x1x4x4xbf16>
    %213 = vector.shape_cast %212 : vector<1x1x4x4xbf16> to vector<4x4xbf16>
    %cst_276 = arith.constant dense<0.000000e+00> : vector<256x4xf32>
    %214 = tpu.matmul %211, %213, %cst_276 {dimension_numbers = #tpu.dot_dimension_numbers<[1], [0], [0], [1], [0, 0, 1, 1], [], []>} : vector<256x4xbf16>, vector<4x4xbf16>, vector<256x4xf32> -> vector<256x4xf32>
    %215 = arith.addf %208, %214 : vector<256x4xf32>
    %c2_277 = arith.constant 2 : index
    %c2_278 = arith.constant 2 : index
    %c0_279 = arith.constant 0 : index
    %c0_280 = arith.constant 0 : index
    %216 = vector.load %arg5[%c2_277, %c2_278, %c0_279, %c0_280] : memref<3x18x16x4xbf16, #tpu.memory_space<vmem>>, vector<1x16x16x4xbf16>
    %217 = vector.shape_cast %216 : vector<1x16x16x4xbf16> to vector<16x16x4xbf16>
    %218 = vector.shape_cast %217 : vector<16x16x4xbf16> to vector<256x4xbf16>
    %c2_281 = arith.constant 2 : index
    %c2_282 = arith.constant 2 : index
    %c0_283 = arith.constant 0 : index
    %c0_284 = arith.constant 0 : index
    %219 = vector.load %arg3[%c2_281, %c2_282, %c0_283, %c0_284] : memref<3x3x4x4xbf16, #tpu.memory_space<vmem>>, vector<1x1x4x4xbf16>
    %220 = vector.shape_cast %219 : vector<1x1x4x4xbf16> to vector<4x4xbf16>
    %cst_285 = arith.constant dense<0.000000e+00> : vector<256x4xf32>
    %221 = tpu.matmul %218, %220, %cst_285 {dimension_numbers = #tpu.dot_dimension_numbers<[1], [0], [0], [1], [0, 0, 1, 1], [], []>} : vector<256x4xbf16>, vector<4x4xbf16>, vector<256x4xf32> -> vector<256x4xf32>
    %222 = arith.addf %215, %221 : vector<256x4xf32>
    %223 = arith.addf %202, %222 : vector<256x4xf32>
    %cst_286 = arith.constant dense<0.000000e+00> : vector<4xf32>
    %224 = vector.multi_reduction <add>, %223, %cst_286 [0] : vector<256x4xf32> to vector<4xf32>
    %225 = vector.shape_cast %224 : vector<4xf32> to vector<1x4xf32>
    %cst_287 = arith.constant 3.906250e-03 : f32
    %226 = vector.broadcast %cst_287 : f32 to vector<1x4xf32>
    %227 = arith.mulf %225, %226 : vector<1x4xf32>
    %228 = arith.mulf %223, %223 : vector<256x4xf32>
    %cst_288 = arith.constant dense<0.000000e+00> : vector<4xf32>
    %229 = vector.multi_reduction <add>, %228, %cst_288 [0] : vector<256x4xf32> to vector<4xf32>
    %230 = vector.shape_cast %229 : vector<4xf32> to vector<1x4xf32>
    %cst_289 = arith.constant 3.906250e-03 : f32
    %231 = vector.broadcast %cst_289 : f32 to vector<1x4xf32>
    %232 = arith.mulf %230, %231 : vector<1x4xf32>
    %233 = arith.mulf %227, %227 : vector<1x4xf32>
    %234 = arith.subf %232, %233 : vector<1x4xf32>
    %cst_290 = arith.constant 0.000000e+00 : f32
    %235 = vector.broadcast %cst_290 : f32 to vector<1x4xf32>
    %236 = arith.maximumf %234, %235 : vector<1x4xf32>
    %237 = vector.broadcast %227 : vector<1x4xf32> to vector<256x4xf32>
    %238 = arith.subf %223, %237 : vector<256x4xf32>
    %cst_291 = arith.constant 9.99999974E-6 : f32
    %239 = vector.broadcast %cst_291 : f32 to vector<1x4xf32>
    %240 = arith.addf %236, %239 : vector<1x4xf32>
    %241 = math.rsqrt %240 : vector<1x4xf32>
    %242 = vector.broadcast %241 : vector<1x4xf32> to vector<256x4xf32>
    %243 = arith.mulf %238, %242 : vector<256x4xf32>
    %244 = vector.shape_cast %243 : vector<256x4xf32> to vector<16x16x4xf32>
    %c0_292 = arith.constant 0 : index
    %c0_293 = arith.constant 0 : index
    %c0_294 = arith.constant 0 : index
    %c0_295 = arith.constant 0 : index
    %245 = vector.load %arg1[%c0_292, %c0_293, %c0_294, %c0_295] : memref<1x16x16x4xbf16, #tpu.memory_space<vmem>>, vector<1x16x16x4xbf16>
    %246 = vector.shape_cast %245 : vector<1x16x16x4xbf16> to vector<16x16x4xbf16>
    %247 = arith.extf %246 : vector<16x16x4xbf16> to vector<16x16x4xf32>
    %248 = arith.addf %244, %247 : vector<16x16x4xf32>
    %249 = arith.truncf %248 : vector<16x16x4xf32> to vector<16x16x4xbf16>
    %c0_296 = arith.constant 0 : index
    %c0_297 = arith.constant 0 : index
    %c0_298 = arith.constant 0 : index
    %c0_299 = arith.constant 0 : index
    %250 = vector.load %arg4[%c0_296, %c0_297, %c0_298, %c0_299] : memref<1x16x16x4xbf16, #tpu.memory_space<vmem>>, vector<1x16x16x4xbf16>
    %251 = vector.shape_cast %250 : vector<1x16x16x4xbf16> to vector<16x16x4xbf16>
    %252 = vector.shape_cast %249 : vector<16x16x4xbf16> to vector<1x16x16x4xbf16>
    tpu.vector_store %arg4[%c0_296, %c0_297, %c0_298, %c0_299], %252 {strides = array<i32>} : memref<1x16x16x4xbf16, #tpu.memory_space<vmem>>, vector<1x16x16x4xbf16>,
    return
  }
  func.func @transform_0(%arg0: i32) -> (i32, i32, i32, i32) {
    %c0_i32 = arith.constant 0 : i32
    %c0_i32_0 = arith.constant 0 : i32
    %c0_i32_1 = arith.constant 0 : i32
    %c0_i32_2 = arith.constant 0 : i32
    return %arg0, %c0_i32, %c0_i32_0, %c0_i32_1 : i32, i32, i32, i32
  }
  func.func @transform_1(%arg0: i32) -> (i32, i32, i32, i32) {
    %c0_i32 = arith.constant 0 : i32
    %c0_i32_0 = arith.constant 0 : i32
    %c0_i32_1 = arith.constant 0 : i32
    %c0_i32_2 = arith.constant 0 : i32
    %c0_i32_3 = arith.constant 0 : i32
    return %c0_i32, %c0_i32_0, %c0_i32_1, %c0_i32_2 : i32, i32, i32, i32
  }
  func.func @transform_2(%arg0: i32) -> (i32, i32, i32, i32) {
    %c0_i32 = arith.constant 0 : i32
    %c0_i32_0 = arith.constant 0 : i32
    %c0_i32_1 = arith.constant 0 : i32
    %c0_i32_2 = arith.constant 0 : i32
    %c0_i32_3 = arith.constant 0 : i32
    return %c0_i32, %c0_i32_0, %c0_i32_1, %c0_i32_2 : i32, i32, i32, i32
  }
  func.func @transform_3(%arg0: i32) -> (i32, i32, i32, i32) {
    %c0_i32 = arith.constant 0 : i32
    %c0_i32_0 = arith.constant 0 : i32
    %c0_i32_1 = arith.constant 0 : i32
    %c0_i32_2 = arith.constant 0 : i32
    return %arg0, %c0_i32, %c0_i32_0, %c0_i32_1 : i32, i32, i32, i32
  }
}

</mosaic_0001>

<bundles_post_ra>
// kernel: tpu_custom_call.1
= control target key start
LH: loop header
LB: loop body
LE: loop exit
PB: predicated region body
PF: predicated region fallthrough
CT: control target
= control target key end

     0   :  { %s12303_s12 = smov 0   ;;  %s15427_s0 = inlined_call_operand.vmem [shape: bf16[2,16,16,4], index: 0, kind: input, shape index: {}]   ;;  %s15428_s1 = inlined_call_operand.vmem [shape: bf16[3,3,4,4], index: 1, kind: input, shape index: {}]   ;;  %s15429_s2 = inlined_call_operand.vmem [shape: bf16[3,3,4,4], index: 2, kind: input, shape index: {}]   ;;  %s15430_s3 = inlined_call_operand.vmem [shape: bf16[2,16,16,4], index: 3, kind: output, shape index: {}]  }
   0x1 LB: > { %s10191_s13 = sadd.s32 4294967295, %s12281_s12   ;;  %p10195_p0 = scmp.ge.s32.totalorder %s12281_s12, 1  ;;  %s12281_s12 = sphi %s12303_s12, %s13_s12  }
   0x2   : > { %p137_p1 = scmp.lt.s32.totalorder %s12281_s12, 3 }
   0x4   : > { %p138_p2 = pnand %p10195_p0, %p137_p1 }
   0x6   : > { %141 = sbr.rel (%p138_p2) target bundleno = 1328 (0x530), region = 32 }
   0xb   : > { %v10218_v0 = vld [vmem:[%s15428_s1 + $0x2] sm:$0x3]  ;;  %vm1704_vm0 = vcmask 1041408   ;;  %p161_p3 = scmp.lt.s32.totalorder %s10191_s13, 1  ;;  %v12319_v2 = vld [vmem:[%s15428_s1 + $0x4] sm:$0x3] }
   0xc   : > { %11957 = vmatprep.subr.msk.bf16.mxu0 %vm1704_vm0, %v10218_v0  ;;  %v1706_v1 = vsel %vm1704_vm0, %v10218_v0, 0  ;;  %v1540_v3 = vld [vmem:[%s15428_s1] sm:$0x3]  ;;  %vm205_vm1 = vcmask 27648   ;;  %vm286_vm2 = vsmask.f32 256 }
   0xd   : > { %11346 = vmatpush3.bf16.msra.mxu0 %v1706_v1  ;;  %s15541_s13 = smov (!%p161_p3, %s10191_s13), 1  ;;  %11958 = vmatprep.subr.msk.bf16.mxu1 %vm1704_vm0, %v1540_v3  ;;  %v1998_v4 = vsel %vm1704_vm0, %v1540_v3, 0  ;;  %vm287_vm3 = vsmask.f32 4368  ;;  %vm1655_vm4 = vcmask 31744   ;;  %v2324_v31 = vsel %vm1704_vm0, %v12319_v2, 0 }
   0xe   : > { %11959 = vmatprep.subr.msk.bf16.mxu0 %vm1704_vm0, %v12319_v2  ;;  %11380 = vmatpush3.bf16.msra.mxu1 %v1998_v4  ;;  %s10894_s20 = sshll.u32 %s15541_s13, 7  ;;  %vm614_vm5 = vsmask.f32 7938  ;;  %v616_v43 = vld [vmem:[#allocation2] sm:$0xf]  ;;  %v15447_v50 = vmov 0  ;;  %vm12399_vm7 = vmor %vm286_vm2, %vm287_vm3 }
   0xf   : > { %s12336_s23 = scalar_lea.vmem %s15427_s0, %s10894_s20  ;;  %v620_v47 = vld [vmem:[#allocation2 + $0x8] sm:$0xf]  ;;  %vm12393_vm6 = vmand %vm205_vm1, %vm614_vm5  ;;  %v15450_v53 = vmov 0  ;;  %vm814_vm8 = vcmask 24576   ;;  %vm906_vm10 = vsmask.f32 3328  ;;  %s15318_s5 = scalar_lea.vmem %s15430_s3, %s10894_s20 }
  0x10   : > { %v174_v5 = vld [vmem:[%s12336_s23 + $0x8] sm:$0xf]  ;;  %v175_v6 = vld [vmem:[%s12336_s23 + $0xc] sm:$0xf]  ;;  %v172_v7 = vld [vmem:[%s12336_s23] sm:$0xf] }
  0x11   : > { %208 = vst.msk [vmem:[#allocation2 + $0xa0] sm:$0xf] %vm205_vm1, %v174_v5  ;;  %209 = vst.msk [vmem:[#allocation2 + $0xa4] sm:$0xf] %vm205_vm1, %v175_v6  ;;  %v173_v8 = vld [vmem:[%s12336_s23 + $0x4] sm:$0xf] }
  0x12   : > { %206 = vst.msk [vmem:[#allocation2 + $0x98] sm:$0xf] %vm205_vm1, %v172_v7  ;;  %v176_v9 = vld [vmem:[%s12336_s23 + $0x10] sm:$0xf]  ;;  %v177_v10 = vld [vmem:[%s12336_s23 + $0x14] sm:$0xf]  ;;  %vm12420_vm9 = vmand %vm814_vm8, %vm286_vm2 }
  0x13   : > { %207 = vst.msk [vmem:[#allocation2 + $0x9c] sm:$0xf] %vm205_vm1, %v173_v8  ;;  %210 = vst.msk [vmem:[#allocation2 + $0xa8] sm:$0xf] %vm205_vm1, %v176_v9  ;;  %v178_v11 = vld [vmem:[%s12336_s23 + $0x18] sm:$0xf] }
  0x14   : > { %211 = vst.msk [vmem:[#allocation2 + $0xac] sm:$0xf] %vm205_vm1, %v177_v10  ;;  %v179_v12 = vld [vmem:[%s12336_s23 + $0x1c] sm:$0xf]  ;;  %v180_v13 = vld [vmem:[%s12336_s23 + $0x20] sm:$0xf]  ;;  %vm12546_vm15 = vmand %vm205_vm1, %vm906_vm10 }
  0x15   : > { %212 = vst.msk [vmem:[#allocation2 + $0xb0] sm:$0xf] %vm205_vm1, %v178_v11  ;;  %213 = vst.msk [vmem:[#allocation2 + $0xb4] sm:$0xf] %vm205_vm1, %v179_v12  ;;  %v181_v14 = vld [vmem:[%s12336_s23 + $0x24] sm:$0xf] }
  0x16   : > { %214 = vst.msk [vmem:[#allocation2 + $0xb8] sm:$0xf] %vm205_vm1, %v180_v13  ;;  %v182_v15 = vld [vmem:[%s12336_s23 + $0x28] sm:$0xf]  ;;  %v183_v16 = vld [vmem:[%s12336_s23 + $0x2c] sm:$0xf] }
  0x17   : > { %215 = vst.msk [vmem:[#allocation2 + $0xbc] sm:$0xf] %vm205_vm1, %v181_v14  ;;  %216 = vst.msk [vmem:[#allocation2 + $0xc0] sm:$0xf] %vm205_vm1, %v182_v15  ;;  %v184_v17 = vld [vmem:[%s12336_s23 + $0x30] sm:$0xf] }
  0x18   : > { %217 = vst.msk [vmem:[#allocation2 + $0xc4] sm:$0xf] %vm205_vm1, %v183_v16  ;;  %v185_v18 = vld [vmem:[%s12336_s23 + $0x34] sm:$0xf]  ;;  %v186_v19 = vld [vmem:[%s12336_s23 + $0x38] sm:$0xf] }
  0x19   : > { %218 = vst.msk [vmem:[#allocation2 + $0xc8] sm:$0xf] %vm205_vm1, %v184_v17  ;;  %219 = vst.msk [vmem:[#allocation2 + $0xcc] sm:$0xf] %vm205_vm1, %v185_v18  ;;  %v187_v20 = vld [vmem:[%s12336_s23 + $0x3c] sm:$0xf] }
  0x1a   : > { %220 = vst.msk [vmem:[#allocation2 + $0xd0] sm:$0xf] %vm205_vm1, %v186_v19  ;;  %v188_v21 = vld [vmem:[%s12336_s23 + $0x40] sm:$0xf]  ;;  %v189_v22 = vld [vmem:[%s12336_s23 + $0x44] sm:$0xf] }
  0x1b   : > { %221 = vst.msk [vmem:[#allocation2 + $0xd4] sm:$0xf] %vm205_vm1, %v187_v20  ;;  %222 = vst.msk [vmem:[#allocation2 + $0xd8] sm:$0xf] %vm205_vm1, %v188_v21  ;;  %v190_v23 = vld [vmem:[%s12336_s23 + $0x48] sm:$0xf] }
  0x1c   : > { %223 = vst.msk [vmem:[#allocation2 + $0xdc] sm:$0xf] %vm205_vm1, %v189_v22  ;;  %v191_v24 = vld [vmem:[%s12336_s23 + $0x4c] sm:$0xf]  ;;  %v192_v25 = vld [vmem:[%s12336_s23 + $0x50] sm:$0xf] }
  0x1d   : > { %224 = vst.msk [vmem:[#allocation2 + $0xe0] sm:$0xf] %vm205_vm1, %v190_v23  ;;  %225 = vst.msk [vmem:[#allocation2 + $0xe4] sm:$0xf] %vm205_vm1, %v191_v24  ;;  %v193_v26 = vld [vmem:[%s12336_s23 + $0x54] sm:$0xf] }
  0x1e   : > { %226 = vst.msk [vmem:[#allocation2 + $0xe8] sm:$0xf] %vm205_vm1, %v192_v25  ;;  %v194_v27 = vld [vmem:[%s12336_s23 + $0x58] sm:$0xf]  ;;  %v239_v28 = vld [vmem:[#allocation2 + $0xa0] sm:$0xf] }
  0x1f   : > { %v240_v29 = vld [vmem:[#allocation2 + $0xa4] sm:$0xf]  ;;  %227 = vst.msk [vmem:[#allocation2 + $0xec] sm:$0xf] %vm205_vm1, %v193_v26  ;;  %228 = vst.msk [vmem:[#allocation2 + $0xf0] sm:$0xf] %vm205_vm1, %v194_v27 }
  0x20   : > { %242 = vst.msk [vmem:[#allocation2 + $0x90] sm:$0xf] %vm205_vm1, %v239_v28  ;;  %243 = vst.msk [vmem:[#allocation2 + $0x94] sm:$0xf] %vm205_vm1, %v240_v29  ;;  %v11984_v30 = vld [vmem:[#allocation2 + $0x98] sm:$0xff]   ;;  %v11985_v32 = vld [vmem:[#allocation2 + $0xa0] sm:$0xff]  }
  0x21   : > { %v252_v33 = vld [vmem:[#allocation2 + $0x98] sm:$0xf]  ;;  %v253_v42 = vld [vmem:[#allocation2 + $0x9c] sm:$0xf]  ;;  %v15448_v50 = vsel %vm12393_vm6, 4294967295, %v15447_v50  ;;  %v11986_v52 = vld [vmem:[#allocation2 + $0xa8] sm:$0xff]  }
  0x22   : > { %v306_v35 = vshrl.u32 %v252_v33, 16  ;;  %v309_v45 = vshll.u32 %v252_v33, 16  ;;  %v314_v46 = vshrl.u32 %v253_v42, 16  ;;  %15449 = vst [vmem:[#allocation4_spill] sm:$0xff] %v15448_v50  ;;  %v317_v51 = vshll.u32 %v253_v42, 16  ;;  %v11987_v57 = vld [vmem:[#allocation2 + $0xb0] sm:$0xff]  }
  0x23   : > { %v15451_v53 = vsel %vm12399_vm7, 4294967295, %v15450_v53  ;;  %v254_v61 = vld [vmem:[#allocation2 + $0xa0] sm:$0xf]  ;;  %v255_v62 = vld [vmem:[#allocation2 + $0xa4] sm:$0xf]  ;;  %v11988_v28 = vld [vmem:[#allocation2 + $0xb8] sm:$0xff]  }
  0x24   : > { %v308_v44 = vrot.slane %v306_v35, 7  ;;  %15452 = vst [vmem:[#allocation5_spill] sm:$0xff] %v15451_v53  ;;  %v316_v56 = vrot.slane %v314_v46, 7  ;;  %v322_v2 = vshrl.u32 %v254_v61, 16  ;;  %v325_v3 = vshll.u32 %v254_v61, 16  ;;  %v11989_v46 = vld [vmem:[#allocation2 + $0xc0] sm:$0xff]  }
  0x25   : > { %v330_v6 = vshrl.u32 %v255_v62, 16  ;;  %v333_v7 = vshll.u32 %v255_v62, 16  ;;  %v624_v8 = vld [vmem:[#allocation2 + $0x10] sm:$0xf]  ;;  %v256_v9 = vld [vmem:[#allocation2 + $0xa8] sm:$0xf] }
  0x26   : > { %v311_v54 = vor.u32 %v309_v45, %v308_v44  ;;  %v312_v55 = vrot.slane %v308_v44, 4  ;;  %v319_v0 = vor.u32 %v317_v51, %v316_v56  ;;  %v689_v11 = vld [vmem:[#allocation2 + $0x98] sm:$0x1]  ;;  %v324_v12 = vrot.slane %v322_v2, 7  ;;  %v257_v13 = vld [vmem:[#allocation2 + $0xac] sm:$0xf] }
  0x27   : > { %v11983_v34 = vld [vmem:[#allocation2 + $0x90] sm:$0xff]   ;;  %v338_v14 = vshrl.u32 %v256_v9, 16  ;;  %v332_v15 = vrot.slane %v330_v6, 7  ;;  %v341_v16 = vshll.u32 %v256_v9, 16  ;;  %v346_v17 = vshrl.u32 %v257_v13, 16 }
  0x28   : > { %v250_v36 = vld [vmem:[#allocation2 + $0x90] sm:$0xf]  ;;  %v251_v37 = vld [vmem:[#allocation2 + $0x94] sm:$0xf]  ;;  %11347 = vmatprep.mubr.msk.bf16.mxu0 %vm1655_vm4, %v11983_v34  ;;  %v621_v1 = vsel %vm12393_vm6, %v311_v54, %v620_v47  ;;  %v320_v10 = vsel %vm12399_vm7, %v312_v55, %v319_v0  ;;  %v349_v18 = vshll.u32 %v257_v13, 16  ;;  %v327_v21 = vor.u32 %v325_v3, %v324_v12 }
  0x29   : > { %v290_v38 = vshrl.u32 %v250_v36, 16  ;;  %v293_v39 = vshll.u32 %v250_v36, 16  ;;  %v298_v40 = vshrl.u32 %v251_v37, 16  ;;  %v301_v41 = vshll.u32 %v251_v37, 16  ;;  %11348 = vmatmul.mubr.msk.bf16.vlgmr.msra.gmra.mxu0 %vm1655_vm4, %v11984_v30  ;;  %v12403_v63 = vld [vmem:[#allocation2 + $0x90] sm:$0x1] }
  0x2a   : > { %11414 = vmatpush3.bf16.msra.mxu0 %v2324_v31  ;;  %11351 = vmatprep.mubr.msk.bf16.mxu0 %vm1655_vm4, %v11985_v32  ;;  %622 = vst [vmem:[#allocation2 + $0x8] sm:$0xf] %v621_v1  ;;  %623 = vst.msk [vmem:[#allocation2 + $0xc] sm:$0xf] %vm205_vm1, %v320_v10  ;;  %v628_v19 = vld [vmem:[#allocation2 + $0x18] sm:$0xf]  ;;  %v335_v25 = vor.u32 %v333_v7, %v332_v15  ;;  %v625_v30 = vsel %vm12393_vm6, %v327_v21, %v624_v8 }
  0x2b   : > { %v292_v48 = vrot.slane %v290_v38, 7  ;;  %v300_v49 = vrot.slane %v298_v40, 7  ;;  %v707_v20 = vshrl.u32 %v12403_v63, 16  ;;  %v328_v22 = vrot.slane %v324_v12, 4  ;;  %v258_v27 = vld [vmem:[#allocation2 + $0xb0] sm:$0xf] }
  0x2c   : > { %v340_v23 = vrot.slane %v338_v14, 7  ;;  %v712_v24 = vshrl.u32 %v689_v11, 16  ;;  %v348_v26 = vrot.slane %v346_v17, 7  ;;  %v15453_v29 = vmov 0  ;;  %v690_v31 = vld [vmem:[#allocation2 + $0xa0] sm:$0x1] }
  0x2d   : > { %v295_v58 = vor.u32 %v293_v39, %v292_v48  ;;  %v296_v59 = vrot.slane %v292_v48, 4  ;;  %v303_v60 = vor.u32 %v301_v41, %v300_v49  ;;  %v15454_v29 = vsel %vm12420_vm9, 4294967295, %v15453_v29  ;;  %v259_v34 = vld [vmem:[#allocation2 + $0xb4] sm:$0xf]  ;;  %626 = vst [vmem:[#allocation2 + $0x10] sm:$0xf] %v625_v30 }
  0x2e   : > { %15455 = vst [vmem:[#allocation6_spill] sm:$0xff] %v15454_v29  ;;  %v343_v32 = vor.u32 %v341_v16, %v340_v23  ;;  %v344_v33 = vrot.slane %v340_v23, 4  ;;  %v354_v35 = vshrl.u32 %v258_v27, 16  ;;  %v336_v36 = vsel %vm12399_vm7, %v328_v22, %v335_v25  ;;  %v632_v40 = vld [vmem:[#allocation2 + $0x20] sm:$0xf]  ;;  %v11991_v8 = vld [vmem:[#allocation2 + $0xc8] sm:$0xff]  }
  0x2f   : > { %v304_v4 = vsel %vm12399_vm7, %v296_v59, %v303_v60  ;;  %v617_v5 = vsel %vm12393_vm6, %v295_v58, %v616_v43  ;;  %v351_v37 = vor.u32 %v349_v18, %v348_v26  ;;  %v357_v38 = vshll.u32 %v258_v27, 16  ;;  %627 = vst.msk [vmem:[#allocation2 + $0x14] sm:$0xf] %vm205_vm1, %v336_v36  ;;  %v691_v43 = vld [vmem:[#allocation2 + $0xa8] sm:$0x1] }
  0x30   : > { %618 = vst [vmem:[#allocation2] sm:$0xf] %v617_v5  ;;  %619 = vst.msk [vmem:[#allocation2 + $0x4] sm:$0xf] %vm205_vm1, %v304_v4  ;;  %v362_v39 = vshrl.u32 %v259_v34, 16  ;;  %v629_v42 = vsel %vm12393_vm6, %v343_v32, %v628_v19  ;;  %v356_v44 = vrot.slane %v354_v35, 7 }
  0x31   : > { %11352 = vmatmul.mubr.msk.bf16.gmra.mxu0 %vm1655_vm4, %v11986_v52  ;;  %v819_v41 = vld [vmem:[#allocation2 + $0x8] sm:$0x1]  ;;  %v365_v45 = vshll.u32 %v259_v34, 16  ;;  %v352_v49 = vsel %vm12399_vm7, %v344_v33, %v351_v37  ;;  %630 = vst [vmem:[#allocation2 + $0x18] sm:$0xf] %v629_v42  ;;  %v722_v4 = vshrl.u32 %v691_v43, 16 }
  0x32   : > { %11355 = vmatprep.mubr.msk.bf16.mxu0 %vm1655_vm4, %v11987_v57  ;;  %v820_v48 = vsel %vm12420_vm9, %v712_v24, %v819_v41  ;;  %v364_v51 = vrot.slane %v362_v39, 7  ;;  %631 = vst.msk [vmem:[#allocation2 + $0x1c] sm:$0xf] %vm205_vm1, %v352_v49  ;;  %v359_v54 = vor.u32 %v357_v38, %v356_v44  ;;  %v360_v55 = vrot.slane %v356_v44, 4  ;;  %v260_v56 = vld [vmem:[#allocation2 + $0xb8] sm:$0xf] }
  0x33   : > { %821 = vst [vmem:[#allocation2 + $0x8] sm:$0x1] %v820_v48  ;;  %v717_v57 = vshrl.u32 %v690_v31, 16  ;;  %v261_v59 = vld [vmem:[#allocation2 + $0xbc] sm:$0xf]  ;;  %v370_v60 = vshrl.u32 %v260_v56, 16 }
  0x34   : > { %v367_v58 = vor.u32 %v365_v45, %v364_v51  ;;  %v373_v61 = vshll.u32 %v260_v56, 16  ;;  %v633_v62 = vsel %vm12393_vm6, %v359_v54, %v632_v40  ;;  %v692_v63 = vld [vmem:[#allocation2 + $0xb0] sm:$0x1]  ;;  %v378_v0 = vshrl.u32 %v261_v59, 16  ;;  %v636_v2 = vld [vmem:[#allocation2 + $0x28] sm:$0xf] }
  0x35   : > { %v381_v1 = vshll.u32 %v261_v59, 16  ;;  %v195_v3 = vld [vmem:[%s12336_s23 + $0x5c] sm:$0xf]  ;;  %634 = vst [vmem:[#allocation2 + $0x20] sm:$0xf] %v633_v62  ;;  %v372_v6 = vrot.slane %v370_v60, 7 }
  0x36   : > { %v368_v5 = vsel %vm12399_vm7, %v360_v55, %v367_v58  ;;  %229 = vst.msk [vmem:[#allocation2 + $0xf4] sm:$0xf] %vm205_vm1, %v195_v3  ;;  %v262_v7 = vld [vmem:[#allocation2 + $0xc0] sm:$0xf]  ;;  %v822_v9 = vld [vmem:[#allocation2 + $0x10] sm:$0x1] }
  0x37   : > { %v816_v47 = vld [vmem:[#allocation2] sm:$0x1]  ;;  %635 = vst.msk [vmem:[#allocation2 + $0x24] sm:$0xf] %vm205_vm1, %v368_v5  ;;  %v380_v10 = vrot.slane %v378_v0, 7  ;;  %v386_v12 = vshrl.u32 %v262_v7, 16  ;;  %v823_v13 = vsel %vm12420_vm9, %v717_v57, %v822_v9  ;;  %v375_v14 = vor.u32 %v373_v61, %v372_v6 }
  0x38   : > { %v817_v52 = vsel %vm12420_vm9, %v707_v20, %v816_v47  ;;  %v263_v11 = vld [vmem:[#allocation2 + $0xc4] sm:$0xf]  ;;  %v376_v15 = vrot.slane %v372_v6, 4  ;;  %v693_v16 = vld [vmem:[#allocation2 + $0xb8] sm:$0x1]  ;;  %v389_v17 = vshll.u32 %v262_v7, 16 }
  0x39   : > { %818 = vst [vmem:[#allocation2] sm:$0x1] %v817_v52  ;;  %11356 = vmatmul.mubr.msk.bf16.gmra.mxu0 %vm1655_vm4, %v11988_v28  ;;  %v640_v18 = vld [vmem:[#allocation2 + $0x30] sm:$0xf]  ;;  %824 = vst [vmem:[#allocation2 + $0x10] sm:$0x1] %v823_v13  ;;  %v383_v21 = vor.u32 %v381_v1, %v380_v10  ;;  %v637_v28 = vsel %vm12393_vm6, %v375_v14, %v636_v2 }
  0x3a   : > { %11359 = vmatprep.mubr.msk.bf16.mxu0 %vm1655_vm4, %v11989_v46  ;;  %v11993_v19 = vld [vmem:[#allocation2 + $0xd0] sm:$0xff]   ;;  %v825_v20 = vld [vmem:[#allocation2 + $0x18] sm:$0x1]  ;;  %v388_v22 = vrot.slane %v386_v12, 7  ;;  %v394_v23 = vshrl.u32 %v263_v11, 16  ;;  %v397_v24 = vshll.u32 %v263_v11, 16 }
  0x3b   : > { %v11992_v25 = vld [vmem:[#allocation2 + $0x8] sm:$0xff]   ;;  %v826_v26 = vsel %vm12420_vm9, %v722_v4, %v825_v20  ;;  %v727_v27 = vshrl.u32 %v692_v63, 16  ;;  %v384_v31 = vsel %vm12399_vm7, %v376_v15, %v383_v21  ;;  %638 = vst [vmem:[#allocation2 + $0x28] sm:$0xf] %v637_v28  ;;  %v196_v35 = vld [vmem:[%s12336_s23 + $0x60] sm:$0xf] }
  0x3c   : > { %827 = vst [vmem:[#allocation2 + $0x18] sm:$0x1] %v826_v26  ;;  %v391_v32 = vor.u32 %v389_v17, %v388_v22  ;;  %v392_v33 = vrot.slane %v388_v22, 4  ;;  %v396_v34 = vrot.slane %v394_v23, 7  ;;  %639 = vst.msk [vmem:[#allocation2 + $0x2c] sm:$0xf] %vm205_vm1, %v384_v31 }
  0x3d   : > { %v197_v36 = vld [vmem:[%s12336_s23 + $0x64] sm:$0xf]  ;;  %v828_v37 = vld [vmem:[#allocation2 + $0x20] sm:$0x1]  ;;  %v732_v38 = vshrl.u32 %v693_v16, 16  ;;  %v11995_v44 = vld [vmem:[#allocation2 + $0xd8] sm:$0xff]  }
  0x3e   : > { %v399_v39 = vor.u32 %v397_v24, %v396_v34  ;;  %v641_v40 = vsel %vm12393_vm6, %v391_v32, %v640_v18  ;;  %230 = vst.msk [vmem:[#allocation2 + $0xf8] sm:$0xf] %vm205_vm1, %v196_v35  ;;  %231 = vst.msk [vmem:[#allocation2 + $0xfc] sm:$0xf] %vm205_vm1, %v197_v36  ;;  %v829_v41 = vsel %vm12420_vm9, %v727_v27, %v828_v37  ;;  %v264_v42 = vld [vmem:[#allocation2 + $0xc8] sm:$0xf] }
  0x3f   : > { %642 = vst [vmem:[#allocation2 + $0x30] sm:$0xf] %v641_v40  ;;  %v265_v43 = vld [vmem:[#allocation2 + $0xcc] sm:$0xf]  ;;  %830 = vst [vmem:[#allocation2 + $0x20] sm:$0x1] %v829_v41 }
  0x40   : > { %v11990_v30 = vld [vmem:[#allocation2] sm:$0xff]   ;;  %v400_v45 = vsel %vm12399_vm7, %v392_v33, %v399_v39  ;;  %v402_v47 = vshrl.u32 %v264_v42, 16  ;;  %v405_v48 = vshll.u32 %v264_v42, 16  ;;  %v410_v49 = vshrl.u32 %v265_v43, 16  ;;  %v11994_v51 = vld [vmem:[#allocation2 + $0x10] sm:$0xff]   ;;  %v11999_v15 = vld [vmem:[#allocation2 + $0xe8] sm:$0xff]  }
  0x41   : > { %11381 = vmatprep.mubr.msk.bf16.mxu1 %vm1655_vm4, %v11990_v30  ;;  %11360 = vmatmul.mubr.msk.bf16.gmra.mxu0 %vm1655_vm4, %v11991_v8  ;;  %v694_v46 = vld [vmem:[#allocation2 + $0xc0] sm:$0x1]  ;;  %643 = vst.msk [vmem:[#allocation2 + $0x34] sm:$0xf] %vm205_vm1, %v400_v45  ;;  %v413_v54 = vshll.u32 %v265_v43, 16  ;;  %v12001_v16 = vld [vmem:[#allocation2 + $0xf0] sm:$0xff]  }
  0x42   : > { %11382 = vmatmul.mubr.msk.bf16.vlgmr.msra.gmra.mxu1 %vm1655_vm4, %v11992_v25  ;;  %11363 = vmatprep.mubr.msk.bf16.mxu0 %vm1655_vm4, %v11993_v19  ;;  %v11997_v52 = vld [vmem:[#allocation2 + $0xe0] sm:$0xff]   ;;  %v404_v55 = vrot.slane %v402_v47, 7  ;;  %v412_v56 = vrot.slane %v410_v49, 7  ;;  %v644_v57 = vld [vmem:[#allocation2 + $0x38] sm:$0xf]  ;;  %v737_v61 = vshrl.u32 %v694_v46, 16 }
  0x43   : > { %v198_v58 = vld [vmem:[%s12336_s23 + $0x68] sm:$0xf]  ;;  %11385 = vmatprep.mubr.msk.bf16.mxu1 %vm1655_vm4, %v11994_v51  ;;  %v11996_v59 = vld [vmem:[#allocation2 + $0x18] sm:$0xff]   ;;  %v199_v2 = vld [vmem:[%s12336_s23 + $0x6c] sm:$0xf]  ;;  %vm1451_vm12 = vcmask 27651  }
  0x44   : > { %v831_v60 = vld [vmem:[#allocation2 + $0x28] sm:$0x1]  ;;  %232 = vst.msk [vmem:[#allocation2 + $0x100] sm:$0xf] %vm205_vm1, %v198_v58  ;;  %v407_v63 = vor.u32 %v405_v48, %v404_v55  ;;  %v408_v0 = vrot.slane %v404_v55, 4  ;;  %v415_v1 = vor.u32 %v413_v54, %v412_v56 }
  0x45   : > { %v832_v62 = vsel %vm12420_vm9, %v732_v38, %v831_v60  ;;  %233 = vst.msk [vmem:[#allocation2 + $0x104] sm:$0xf] %vm205_vm1, %v199_v2  ;;  %v266_v6 = vld [vmem:[#allocation2 + $0xd0] sm:$0xf]  ;;  %v267_v7 = vld [vmem:[#allocation2 + $0xd4] sm:$0xf] }
  0x46   : > { %833 = vst [vmem:[#allocation2 + $0x28] sm:$0x1] %v832_v62  ;;  %v834_v3 = vld [vmem:[#allocation2 + $0x30] sm:$0x1]  ;;  %v416_v4 = vsel %vm12399_vm7, %v408_v0, %v415_v1  ;;  %v645_v5 = vsel %vm12393_vm6, %v407_v63, %v644_v57  ;;  %v11998_v8 = vld [vmem:[#allocation2 + $0x20] sm:$0xff]   ;;  %v418_v10 = vshrl.u32 %v266_v6, 16 }
  0x47   : > { %v835_v9 = vsel %vm12420_vm9, %v737_v61, %v834_v3  ;;  %646 = vst [vmem:[#allocation2 + $0x38] sm:$0xf] %v645_v5  ;;  %647 = vst.msk [vmem:[#allocation2 + $0x3c] sm:$0xf] %vm205_vm1, %v416_v4  ;;  %v421_v11 = vshll.u32 %v266_v6, 16  ;;  %v426_v12 = vshrl.u32 %v267_v7, 16 }
  0x48   : > { %836 = vst [vmem:[#allocation2 + $0x30] sm:$0x1] %v835_v9  ;;  %v695_v13 = vld [vmem:[#allocation2 + $0xc8] sm:$0x1]  ;;  %v429_v14 = vshll.u32 %v267_v7, 16  ;;  %v420_v17 = vrot.slane %v418_v10, 7 }
  0x49   : > { %11364 = vmatmul.mubr.msk.bf16.gmra.mxu0 %vm1655_vm4, %v11995_v44  ;;  %v428_v18 = vrot.slane %v426_v12, 7  ;;  %v200_v19 = vld [vmem:[%s12336_s23 + $0x70] sm:$0xf]  ;;  %v648_v20 = vld [vmem:[#allocation2 + $0x40] sm:$0xf]  ;;  %v742_v22 = vshrl.u32 %v695_v13, 16 }
  0x4a   : > { %11386 = vmatmul.mubr.msk.bf16.gmra.mxu1 %vm1655_vm4, %v11996_v59  ;;  %11367 = vmatprep.mubr.msk.bf16.mxu0 %vm1655_vm4, %v11997_v52  ;;  %v201_v21 = vld [vmem:[%s12336_s23 + $0x74] sm:$0xf]  ;;  %234 = vst.msk [vmem:[#allocation2 + $0x108] sm:$0xf] %vm205_vm1, %v200_v19  ;;  %v423_v23 = vor.u32 %v421_v11, %v420_v17  ;;  %v424_v24 = vrot.slane %v420_v17, 4  ;;  %v12003_v55 = vld [vmem:[#allocation2 + $0xf8] sm:$0xff]  }
  0x4b   : > { %11389 = vmatprep.mubr.msk.bf16.mxu1 %vm1655_vm4, %v11998_v8  ;;  %v431_v25 = vor.u32 %v429_v14, %v428_v18  ;;  %235 = vst.msk [vmem:[#allocation2 + $0x10c] sm:$0xf] %vm205_vm1, %v201_v21  ;;  %v268_v26 = vld [vmem:[#allocation2 + $0xd8] sm:$0xf]  ;;  %v269_v27 = vld [vmem:[#allocation2 + $0xdc] sm:$0xf] }
  0x4c   : > { %v434_v30 = vshrl.u32 %v268_v26, 16  ;;  %v649_v32 = vsel %vm12393_vm6, %v423_v23, %v648_v20  ;;  %v696_v33 = vld [vmem:[#allocation2 + $0xd0] sm:$0x1]  ;;  %v437_v34 = vshll.u32 %v268_v26, 16  ;;  %v442_v35 = vshrl.u32 %v269_v27, 16  ;;  %v12005_v60 = vld [vmem:[#allocation2 + $0x100] sm:$0xff]  }
  0x4d   : > { %v12000_v28 = vld [vmem:[#allocation2 + $0x28] sm:$0xff]   ;;  %v432_v31 = vsel %vm12399_vm7, %v424_v24, %v431_v25  ;;  %650 = vst [vmem:[#allocation2 + $0x40] sm:$0xf] %v649_v32  ;;  %v445_v38 = vshll.u32 %v269_v27, 16  ;;  %v747_v43 = vshrl.u32 %v696_v33, 16 }
  0x4e   : > { %v837_v36 = vld [vmem:[#allocation2 + $0x38] sm:$0x1]  ;;  %651 = vst.msk [vmem:[#allocation2 + $0x44] sm:$0xf] %vm205_vm1, %v432_v31  ;;  %v436_v37 = vrot.slane %v434_v30, 7  ;;  %v444_v41 = vrot.slane %v442_v35, 7 }
  0x4f   : > { %v12002_v39 = vld [vmem:[#allocation2 + $0x30] sm:$0xff]   ;;  %v838_v40 = vsel %vm12420_vm9, %v742_v22, %v837_v36  ;;  %v652_v42 = vld [vmem:[#allocation2 + $0x48] sm:$0xf]  ;;  %v270_v47 = vld [vmem:[#allocation2 + $0xe0] sm:$0xf]  ;;  %v15456_v31 = vmov 0 }
  0x50   : > { %839 = vst [vmem:[#allocation2 + $0x38] sm:$0x1] %v838_v40  ;;  %v439_v44 = vor.u32 %v437_v34, %v436_v37  ;;  %v440_v45 = vrot.slane %v436_v37, 4  ;;  %v10317_v46 = vld [vmem:[%s15428_s1 + $0x8] sm:$0x3]  ;;  %v447_v48 = vor.u32 %v445_v38, %v444_v41  ;;  %v450_v54 = vshrl.u32 %v270_v47, 16 }
  0x51   : > { %11368 = vmatmul.mubr.msk.bf16.gmra.mxu0 %vm1655_vm4, %v11999_v15  ;;  %v697_v49 = vld [vmem:[#allocation2 + $0xd8] sm:$0x1]  ;;  %11960 = vmatprep.subr.msk.bf16.mxu1 %vm1704_vm0, %v10317_v46  ;;  %v2781_v51 = vsel %vm1704_vm0, %v10317_v46, 0  ;;  %v271_v52 = vld [vmem:[#allocation2 + $0xe4] sm:$0xf]  ;;  %v453_v57 = vshll.u32 %v270_v47, 16 }
  0x52   : > { %11390 = vmatmul.mubr.msk.bf16.gmra.mxu1 %vm1655_vm4, %v12000_v28  ;;  %11371 = vmatprep.mubr.msk.bf16.mxu0 %vm1655_vm4, %v12001_v16  ;;  %v653_v56 = vsel %vm12393_vm6, %v439_v44, %v652_v42  ;;  %v458_v58 = vshrl.u32 %v271_v52, 16  ;;  %v461_v59 = vshll.u32 %v271_v52, 16  ;;  %v448_v61 = vsel %vm12399_vm7, %v440_v45, %v447_v48  ;;  %v656_v63 = vld [vmem:[#allocation2 + $0x50] sm:$0xf]  ;;  %v12513_v0 = vld [vmem:[#allocation2 + $0xe0] sm:$0x1] }
  0x53   : > { %11393 = vmatprep.mubr.msk.bf16.mxu1 %vm1655_vm4, %v12002_v39  ;;  %11448 = vmatpush3.bf16.msra.mxu1 %v2781_v51  ;;  %654 = vst [vmem:[#allocation2 + $0x48] sm:$0xf] %v653_v56  ;;  %v452_v62 = vrot.slane %v450_v54, 7  ;;  %655 = vst.msk [vmem:[#allocation2 + $0x4c] sm:$0xf] %vm205_vm1, %v448_v61  ;;  %v752_v9 = vshrl.u32 %v697_v49, 16 }
  0x54   : > { %v460_v1 = vrot.slane %v458_v58, 7  ;;  %v870_v2 = vld [vmem:[#allocation2 + $0x90] sm:$0xf]  ;;  %v871_v3 = vld [vmem:[#allocation2 + $0x94] sm:$0xf]  ;;  %v12007_v17 = vld [vmem:[#allocation2 + $0x108] sm:$0xff]  }
  0x55   : > { %v840_v4 = vld [vmem:[#allocation2 + $0x40] sm:$0x1]  ;;  %v455_v5 = vor.u32 %v453_v57, %v452_v62  ;;  %v456_v6 = vrot.slane %v452_v62, 4  ;;  %v910_v7 = vshrl.u32 %v870_v2, 16  ;;  %v913_v11 = vshll.u32 %v870_v2, 16 }
  0x56   : > { %v841_v8 = vsel %vm12420_vm9, %v747_v43, %v840_v4  ;;  %v463_v10 = vor.u32 %v461_v59, %v460_v1  ;;  %v919_v15 = vshll.u32 %v871_v3, 16  ;;  %v923_v16 = vshrl.u32 %v871_v3, 16  ;;  %v12527_v23 = vld [vmem:[#allocation2 + $0x94] sm:$0x8]  ;;  %v12532_v24 = vld [vmem:[%s15428_s1 + $0x6] sm:$0x3] }
  0x57   : > { %v12004_v12 = vld [vmem:[#allocation2 + $0x38] sm:$0xff]   ;;  %842 = vst [vmem:[#allocation2 + $0x40] sm:$0x1] %v841_v8  ;;  %v657_v13 = vsel %vm12393_vm6, %v455_v5, %v656_v63  ;;  %v912_v14 = vrot.slane %v910_v7, 4  ;;  %v757_v19 = vshrl.u32 %v12513_v0, 16  ;;  %v915_v20 = vrot.slane %v913_v11, 5  ;;  %11961 = vmatprep.subr.msk.bf16.mxu0 %vm1704_vm0, %v12532_v24 }
  0x58   : > { %v464_v18 = vsel %vm12399_vm7, %v456_v6, %v463_v10  ;;  %658 = vst [vmem:[#allocation2 + $0x50] sm:$0xf] %v657_v13  ;;  %vm907_vm11 = vsmask.f32 7440  ;;  %v921_v21 = vrot.slane %v919_v15, 5  ;;  %v925_v22 = vrot.slane %v923_v16, 4 }
  0x59   : > { %11372 = vmatmul.mubr.msk.bf16.gmra.mxu0 %vm1655_vm4, %v12003_v55  ;;  %659 = vst.msk [vmem:[#allocation2 + $0x54] sm:$0xf] %vm205_vm1, %v464_v18  ;;  %v916_v26 = vor.u32 %v915_v20, %v912_v14  ;;  %vm1452_vm13 = vsmask.f32 7950  ;;  %v272_v27 = vld [vmem:[#allocation2 + $0xe8] sm:$0xf]  ;;  %vm12540_vm14 = vmor %vm906_vm10, %vm907_vm11 }
  0x5a   : > { %11375 = vmatprep.mubr.msk.bf16.mxu0 %vm1655_vm4, %v12005_v60  ;;  %11394 = vmatmul.mubr.msk.bf16.gmra.mxu1 %vm1655_vm4, %v12004_v12  ;;  %v843_v25 = vld [vmem:[#allocation2 + $0x48] sm:$0x1]  ;;  %v273_v28 = vld [vmem:[#allocation2 + $0xec] sm:$0xf]  ;;  %v15457_v31 = vsel %vm12540_vm14, 4294967295, %v15456_v31  ;;  %v926_v32 = vor.u32 %v925_v22, %v921_v21  ;;  %v466_v33 = vshrl.u32 %v272_v27, 16  ;;  %vm12568_vm2 = vmand %vm1451_vm12, %vm1452_vm13 }
  0x5b   : > { %v844_v30 = vsel %vm12420_vm9, %v752_v9, %v843_v25  ;;  %15458 = vst [vmem:[#allocation7_spill] sm:$0xff] %v15457_v31  ;;  %v469_v34 = vshll.u32 %v272_v27, 16  ;;  %v917_v35 = vrot.slane %v916_v26, 4  ;;  %v15459_v36 = vmov 0  ;;  %v1290_v37 = vld [vmem:[#allocation2 + $0x124] sm:$0xf] }
  0x5c   : > { %845 = vst [vmem:[#allocation2 + $0x48] sm:$0x1] %v844_v30  ;;  %v15460_v36 = vsel %vm12546_vm15, 4294967295, %v15459_v36  ;;  %v1380_v38 = vshll.u32 %v12527_v23, 16  ;;  %v474_v39 = vshrl.u32 %v273_v28, 16  ;;  %v477_v40 = vshll.u32 %v273_v28, 16 }
  0x5d   : > { %15461 = vst [vmem:[#allocation8_spill] sm:$0xff] %v15460_v36  ;;  %v927_v41 = vrot.slane %v926_v32, 4  ;;  %v468_v42 = vrot.slane %v466_v33, 7  ;;  %v660_v43 = vld [vmem:[#allocation2 + $0x58] sm:$0xf]  ;;  %v922_v46 = vsel %vm12540_vm14, %v917_v35, %v921_v21  ;;  %v15462_v15 = vmov 0 }
  0x5e   : > { %v872_v44 = vld [vmem:[#allocation2 + $0x98] sm:$0xf]  ;;  %v12006_v45 = vld [vmem:[#allocation2 + $0x40] sm:$0xff]   ;;  %v476_v47 = vrot.slane %v474_v39, 7  ;;  %v873_v48 = vld [vmem:[#allocation2 + $0x9c] sm:$0xf] }
  0x5f   : > { %v846_v49 = vld [vmem:[#allocation2 + $0x50] sm:$0x1]  ;;  %1288 = vst.msk [vmem:[#allocation2 + $0x120] sm:$0xf] %vm205_vm1, %v922_v46  ;;  %v1291_v51 = vsel %vm12546_vm15, %v927_v41, %v1290_v37  ;;  %v471_v52 = vor.u32 %v469_v34, %v468_v42  ;;  %v472_v54 = vrot.slane %v468_v42, 4  ;;  %v929_v55 = vshrl.u32 %v872_v44, 16  ;;  %11397 = vmatprep.mubr.msk.bf16.mxu1 %vm1655_vm4, %v12006_v45 }
  0x60   : > { %v847_v56 = vsel %vm12420_vm9, %v757_v19, %v846_v49  ;;  %1292 = vst [vmem:[#allocation2 + $0x124] sm:$0xf] %v1291_v51  ;;  %v479_v57 = vor.u32 %v477_v40, %v476_v47  ;;  %v932_v58 = vshll.u32 %v872_v44, 16  ;;  %v938_v59 = vshll.u32 %v873_v48, 16  ;;  %v699_v61 = vld [vmem:[#allocation2 + $0xe8] sm:$0x1] }
  0x61   : > { %11376 = vmatmul.mubr.msk.bf16.gmra.mxu0 %vm1655_vm4, %v12007_v17  ;;  %848 = vst [vmem:[#allocation2 + $0x50] sm:$0x1] %v847_v56  ;;  %v661_v60 = vsel %vm12393_vm6, %v471_v52, %v660_v43  ;;  %v931_v62 = vrot.slane %v929_v55, 4  ;;  %v942_v63 = vshrl.u32 %v873_v48, 16  ;;  %v274_v0 = vld [vmem:[#allocation2 + $0xf0] sm:$0xf] }
  0x62   : > { %v480_v1 = vsel %vm12399_vm7, %v472_v54, %v479_v57  ;;  %662 = vst [vmem:[#allocation2 + $0x58] sm:$0xf] %v661_v60  ;;  %v934_v2 = vrot.slane %v932_v58, 5  ;;  %v940_v3 = vrot.slane %v938_v59, 5  ;;  %v275_v4 = vld [vmem:[#allocation2 + $0xf4] sm:$0xf] }
  0x63   : > { %v482_v5 = vshrl.u32 %v274_v0, 16  ;;  %v12008_v6 = vld [vmem:[#allocation2 + $0x48] sm:$0xff]   ;;  %663 = vst.msk [vmem:[#allocation2 + $0x5c] sm:$0xf] %vm205_vm1, %v480_v1  ;;  %v944_v7 = vrot.slane %v942_v63, 4  ;;  %v485_v8 = vshll.u32 %v274_v0, 16 }
  0x64   : > { %v490_v9 = vshrl.u32 %v275_v4, 16  ;;  %v935_v10 = vor.u32 %v934_v2, %v931_v62  ;;  %v1294_v11 = vld [vmem:[#allocation2 + $0x12c] sm:$0xf]  ;;  %v493_v13 = vshll.u32 %v275_v4, 16  ;;  %v664_v14 = vld [vmem:[#allocation2 + $0x60] sm:$0xf]  ;;  %11398 = vmatmul.mubr.msk.bf16.gmra.mxu1 %vm1655_vm4, %v12008_v6 }
  0x65   : > { %v484_v12 = vrot.slane %v482_v5, 7  ;;  %v15463_v15 = vsel %vm12568_vm2, 4294967295, %v15462_v15  ;;  %v762_v16 = vshrl.u32 %v699_v61, 16  ;;  %v945_v17 = vor.u32 %v944_v7, %v940_v3  ;;  %v874_v19 = vld [vmem:[#allocation2 + $0xa0] sm:$0xf] }
  0x66   : > { %15464 = vst [vmem:[#allocation9_spill] sm:$0xff] %v15463_v15  ;;  %v492_v18 = vrot.slane %v490_v9, 7  ;;  %v875_v20 = vld [vmem:[#allocation2 + $0xa4] sm:$0xf]  ;;  %v936_v21 = vrot.slane %v935_v10, 4  ;;  %v948_v26 = vshrl.u32 %v874_v19, 16 }
  0x67   : > { %v487_v22 = vor.u32 %v485_v8, %v484_v12  ;;  %v488_v25 = vrot.slane %v484_v12, 4  ;;  %v1454_v27 = vld [vmem:[#allocation2 + $0x124] sm:$0x8]  ;;  %v946_v28 = vrot.slane %v945_v17, 4  ;;  %v951_v32 = vshll.u32 %v874_v19, 16 }
  0x68   : > { %v495_v30 = vor.u32 %v493_v13, %v492_v18  ;;  %v957_v33 = vshll.u32 %v875_v20, 16  ;;  %v12009_v34 = vld [vmem:[#allocation2 + $0x50] sm:$0xff]   ;;  %v1455_v35 = vsel %vm12568_vm2, %v1380_v38, %v1454_v27  ;;  %v941_v37 = vsel %vm12540_vm14, %v936_v21, %v940_v3  ;;  %v1362_v39 = vld [vmem:[#allocation2 + $0x9c] sm:$0x8]  ;;  %v276_v49 = vld [vmem:[#allocation2 + $0xf8] sm:$0xf] }
  0x69   : > { %v665_v40 = vsel %vm12393_vm6, %v487_v22, %v664_v14  ;;  %v950_v41 = vrot.slane %v948_v26, 4  ;;  %1456 = vst [vmem:[#allocation2 + $0x124] sm:$0x8] %v1455_v35  ;;  %v849_v42 = vld [vmem:[#allocation2 + $0x58] sm:$0x1]  ;;  %v1295_v43 = vsel %vm12546_vm15, %v946_v28, %v1294_v11  ;;  %v12585_v23 = vsel %vm1704_vm0, %v12532_v24, 0  ;;  %11401 = vmatprep.mubr.msk.bf16.mxu1 %vm1655_vm4, %v12009_v34 }
  0x6a   : > { %1293 = vst.msk [vmem:[#allocation2 + $0x128] sm:$0xf] %vm205_vm1, %v941_v37  ;;  %v496_v38 = vsel %vm12399_vm7, %v488_v25, %v495_v30  ;;  %666 = vst [vmem:[#allocation2 + $0x60] sm:$0xf] %v665_v40  ;;  %v700_v44 = vld [vmem:[#allocation2 + $0xf0] sm:$0x1]  ;;  %v850_v46 = vsel %vm12420_vm9, %v762_v16, %v849_v42 }
  0x6b   : > { %v953_v45 = vrot.slane %v951_v32, 5  ;;  %1296 = vst [vmem:[#allocation2 + $0x12c] sm:$0xf] %v1295_v43  ;;  %667 = vst.msk [vmem:[#allocation2 + $0x64] sm:$0xf] %vm205_vm1, %v496_v38  ;;  %v959_v47 = vrot.slane %v957_v33, 5 }
  0x6c   : > { %v961_v48 = vshrl.u32 %v875_v20, 16  ;;  %851 = vst [vmem:[#allocation2 + $0x58] sm:$0x1] %v850_v46  ;;  %v1383_v24 = vshll.u32 %v1362_v39, 16  ;;  %v277_v52 = vld [vmem:[#allocation2 + $0xfc] sm:$0xf] }
  0x6d   : > { %v954_v51 = vor.u32 %v953_v45, %v950_v41  ;;  %v498_v54 = vshrl.u32 %v276_v49, 16  ;;  %v501_v55 = vshll.u32 %v276_v49, 16  ;;  %v767_v56 = vshrl.u32 %v700_v44, 16  ;;  %v668_v62 = vld [vmem:[#allocation2 + $0x68] sm:$0xf] }
  0x6e   : > { %v963_v57 = vrot.slane %v961_v48, 4  ;;  %v506_v58 = vshrl.u32 %v277_v52, 16  ;;  %v509_v59 = vshll.u32 %v277_v52, 16  ;;  %v876_v63 = vld [vmem:[#allocation2 + $0xa8] sm:$0xf] }
  0x6f   : > { %v955_v60 = vrot.slane %v954_v51, 4  ;;  %v500_v61 = vrot.slane %v498_v54, 7  ;;  %v877_v2 = vld [vmem:[#allocation2 + $0xac] sm:$0xf]  ;;  %v967_v3 = vshrl.u32 %v876_v63, 16  ;;  %v970_v4 = vshll.u32 %v876_v63, 16 }
  0x70   : > { %v964_v0 = vor.u32 %v963_v57, %v959_v47  ;;  %v508_v1 = vrot.slane %v506_v58, 7  ;;  %v1298_v6 = vld [vmem:[#allocation2 + $0x134] sm:$0xf]  ;;  %v12595_v7 = vld [vmem:[#allocation2 + $0xa4] sm:$0x8]  ;;  %v976_v10 = vshll.u32 %v877_v2, 16 }
  0x71   : > { %v960_v5 = vsel %vm12540_vm14, %v955_v60, %v959_v47  ;;  %v503_v8 = vor.u32 %v501_v55, %v500_v61  ;;  %v504_v9 = vrot.slane %v500_v61, 4  ;;  %v12010_v11 = vld [vmem:[#allocation2 + $0x120] sm:$0xff]   ;;  %v701_v18 = vld [vmem:[#allocation2 + $0xf8] sm:$0x1]  ;;  %v969_v27 = vrot.slane %v967_v3, 4 }
  0x72   : > { %v965_v12 = vrot.slane %v964_v0, 4  ;;  %1297 = vst.msk [vmem:[#allocation2 + $0x130] sm:$0xf] %vm205_vm1, %v960_v5  ;;  %v511_v13 = vor.u32 %v509_v59, %v508_v1  ;;  %v1457_v14 = vld [vmem:[#allocation2 + $0x12c] sm:$0x8]  ;;  %11415 = vmatprep.mubr.msk.bf16.mxu0 %vm1655_vm4, %v12010_v11  ;;  %v972_v28 = vrot.slane %v970_v4, 5 }
  0x73   : > { %v852_v16 = vld [vmem:[#allocation2 + $0x60] sm:$0x1]  ;;  %v669_v17 = vsel %vm12393_vm6, %v503_v8, %v668_v62  ;;  %v12011_v19 = vld [vmem:[#allocation2 + $0x58] sm:$0xff]   ;;  %v1458_v20 = vsel %vm12568_vm2, %v1383_v24, %v1457_v14  ;;  %v978_v30 = vrot.slane %v976_v10, 5  ;;  %v980_v32 = vshrl.u32 %v877_v2, 16 }
  0x74   : > { %v853_v21 = vsel %vm12420_vm9, %v767_v56, %v852_v16  ;;  %v1299_v22 = vsel %vm12546_vm15, %v965_v12, %v1298_v6  ;;  %v512_v25 = vsel %vm12399_vm7, %v504_v9, %v511_v13  ;;  %670 = vst [vmem:[#allocation2 + $0x68] sm:$0xf] %v669_v17  ;;  %v278_v26 = vld [vmem:[#allocation2 + $0x100] sm:$0xf]  ;;  %1459 = vst [vmem:[#allocation2 + $0x12c] sm:$0x8] %v1458_v20  ;;  %11402 = vmatmul.mubr.msk.bf16.gmra.mxu1 %vm1655_vm4, %v12011_v19 }
  0x75   : > { %854 = vst [vmem:[#allocation2 + $0x60] sm:$0x1] %v853_v21  ;;  %1300 = vst [vmem:[#allocation2 + $0x134] sm:$0xf] %v1299_v22  ;;  %v279_v33 = vld [vmem:[#allocation2 + $0x104] sm:$0xf]  ;;  %v973_v40 = vor.u32 %v972_v28, %v969_v27 }
  0x76   : > { %671 = vst.msk [vmem:[#allocation2 + $0x6c] sm:$0xf] %vm205_vm1, %v512_v25  ;;  %v1386_v34 = vshll.u32 %v12595_v7, 16  ;;  %v514_v35 = vshrl.u32 %v278_v26, 16  ;;  %v517_v37 = vshll.u32 %v278_v26, 16  ;;  %v522_v39 = vshrl.u32 %v279_v33, 16 }
  0x77   : > { %v982_v41 = vrot.slane %v980_v32, 4  ;;  %v525_v42 = vshll.u32 %v279_v33, 16  ;;  %v672_v43 = vld [vmem:[#allocation2 + $0x70] sm:$0xf]  ;;  %v772_v44 = vshrl.u32 %v701_v18, 16  ;;  %v974_v49 = vrot.slane %v973_v40, 4 }
  0x78   : > { %v878_v38 = vld [vmem:[#allocation2 + $0xb0] sm:$0xf]  ;;  %v516_v45 = vrot.slane %v514_v35, 7  ;;  %v524_v46 = vrot.slane %v522_v39, 7  ;;  %v879_v47 = vld [vmem:[#allocation2 + $0xb4] sm:$0xf] }
  0x79   : > { %v986_v48 = vshrl.u32 %v878_v38, 16  ;;  %v983_v24 = vor.u32 %v982_v41, %v978_v30  ;;  %v989_v51 = vshll.u32 %v878_v38, 16  ;;  %v995_v52 = vshll.u32 %v879_v47, 16  ;;  %v1302_v54 = vld [vmem:[#allocation2 + $0x13c] sm:$0xf] }
  0x7a   : > { %v519_v55 = vor.u32 %v517_v37, %v516_v45  ;;  %v520_v56 = vrot.slane %v516_v45, 4  ;;  %v527_v57 = vor.u32 %v525_v42, %v524_v46  ;;  %v979_v60 = vsel %vm12540_vm14, %v974_v49, %v978_v30  ;;  %v12614_v62 = vld [vmem:[#allocation2 + $0xac] sm:$0x8]  ;;  %v702_v63 = vld [vmem:[#allocation2 + $0x100] sm:$0x1]  ;;  %v12104_v29 = vld [vmem:[#allocation2 + $0x58] sm:$0xff]  }
  0x7b   : > { %v988_v58 = vrot.slane %v986_v48, 4  ;;  %v855_v59 = vld [vmem:[#allocation2 + $0x68] sm:$0x1]  ;;  %v984_v61 = vrot.slane %v983_v24, 4  ;;  %v991_v0 = vrot.slane %v989_v51, 5  ;;  %v997_v1 = vrot.slane %v995_v52, 5 }
  0x7c   : > { %v12012_v2 = vld [vmem:[#allocation2 + $0x128] sm:$0xff]   ;;  %v856_v3 = vsel %vm12420_vm9, %v772_v44, %v855_v59  ;;  %1301 = vst.msk [vmem:[#allocation2 + $0x138] sm:$0xf] %vm205_vm1, %v979_v60  ;;  %v528_v4 = vsel %vm12399_vm7, %v520_v56, %v527_v57  ;;  %v673_v5 = vsel %vm12393_vm6, %v519_v55, %v672_v43  ;;  %v999_v6 = vshrl.u32 %v879_v47, 16  ;;  %v12013_v7 = vld [vmem:[#allocation2 + $0x60] sm:$0xff]  }
  0x7d   : > { %v1460_v8 = vld [vmem:[#allocation2 + $0x134] sm:$0x8]  ;;  %857 = vst [vmem:[#allocation2 + $0x68] sm:$0x1] %v856_v3  ;;  %v1303_v9 = vsel %vm12546_vm15, %v984_v61, %v1302_v54  ;;  %674 = vst [vmem:[#allocation2 + $0x70] sm:$0xf] %v673_v5  ;;  %v992_v10 = vor.u32 %v991_v0, %v988_v58  ;;  %11416 = vmatmul.mubr.msk.bf16.vlgmr.msra.gmra.mxu0 %vm1655_vm4, %v12012_v2  ;;  %11405 = vmatprep.mubr.msk.bf16.mxu1 %vm1655_vm4, %v12013_v7 }
  0x7e   : > { %675 = vst.msk [vmem:[#allocation2 + $0x74] sm:$0xf] %vm205_vm1, %v528_v4  ;;  %v1461_v11 = vsel %vm12568_vm2, %v1386_v34, %v1460_v8  ;;  %1304 = vst [vmem:[#allocation2 + $0x13c] sm:$0xf] %v1303_v9  ;;  %v1001_v12 = vrot.slane %v999_v6, 4  ;;  %11482 = vmatpush3.bf16.msra.mxu0 %v12585_v23  ;;  %v1389_v20 = vshll.u32 %v12614_v62, 16 }
  0x7f   : > { %v280_v13 = vld [vmem:[#allocation2 + $0x108] sm:$0xf]  ;;  %v281_v14 = vld [vmem:[#allocation2 + $0x10c] sm:$0xf]  ;;  %1462 = vst [vmem:[#allocation2 + $0x134] sm:$0x8] %v1461_v11 }
  0x80   : > { %v993_v16 = vrot.slane %v992_v10, 4  ;;  %v530_v17 = vshrl.u32 %v280_v13, 16  ;;  %v533_v18 = vshll.u32 %v280_v13, 16  ;;  %v538_v19 = vshrl.u32 %v281_v14, 16  ;;  %v880_v26 = vld [vmem:[#allocation2 + $0xb8] sm:$0xf] }
  0x81   : > { %v777_v21 = vshrl.u32 %v702_v63, 16  ;;  %v1002_v22 = vor.u32 %v1001_v12, %v997_v1  ;;  %v541_v25 = vshll.u32 %v281_v14, 16  ;;  %v1306_v28 = vld [vmem:[#allocation2 + $0x144] sm:$0xf]  ;;  %v881_v23 = vld [vmem:[#allocation2 + $0xbc] sm:$0xf] }
  0x82   : > { %v998_v27 = vsel %vm12540_vm14, %v993_v16, %v997_v1  ;;  %v532_v30 = vrot.slane %v530_v17, 7  ;;  %v540_v32 = vrot.slane %v538_v19, 7  ;;  %v1365_v34 = vld [vmem:[#allocation2 + $0xb4] sm:$0x8]  ;;  %v676_v35 = vld [vmem:[#allocation2 + $0x78] sm:$0xf] }
  0x83   : > { %v1003_v33 = vrot.slane %v1002_v22, 4  ;;  %1305 = vst.msk [vmem:[#allocation2 + $0x140] sm:$0xf] %vm205_vm1, %v998_v27  ;;  %v1005_v37 = vshrl.u32 %v880_v26, 16  ;;  %v1008_v39 = vshll.u32 %v880_v26, 16  ;;  %v1014_v40 = vshll.u32 %v881_v23, 16 }
  0x84   : > { %v535_v41 = vor.u32 %v533_v18, %v532_v30  ;;  %v536_v42 = vrot.slane %v532_v30, 4  ;;  %v543_v43 = vor.u32 %v541_v25, %v540_v32  ;;  %v703_v38 = vld [vmem:[#allocation2 + $0x108] sm:$0x1]  ;;  %v1018_v44 = vshrl.u32 %v881_v23, 16  ;;  %v858_v46 = vld [vmem:[#allocation2 + $0x70] sm:$0x1] }
  0x85   : > { %v12015_v45 = vld [vmem:[#allocation2 + $0x68] sm:$0xff]   ;;  %v1307_v47 = vsel %vm12546_vm15, %v1003_v33, %v1306_v28  ;;  %v1007_v48 = vrot.slane %v1005_v37, 4  ;;  %v1463_v49 = vld [vmem:[#allocation2 + $0x13c] sm:$0x8]  ;;  %v859_v24 = vsel %vm12420_vm9, %v777_v21, %v858_v46  ;;  %v1010_v54 = vrot.slane %v1008_v39, 5  ;;  %v12105_v53 = vld [vmem:[#allocation2 + $0x60] sm:$0xff]  }
  0x86   : > { %1308 = vst [vmem:[#allocation2 + $0x144] sm:$0xf] %v1307_v47  ;;  %v544_v51 = vsel %vm12399_vm7, %v536_v42, %v543_v43  ;;  %v677_v52 = vsel %vm12393_vm6, %v535_v41, %v676_v35  ;;  %v12014_v55 = vld [vmem:[#allocation2 + $0x130] sm:$0xff]   ;;  %11406 = vmatmul.mubr.msk.bf16.gmra.mxu1 %vm1655_vm4, %v12015_v45  ;;  %v1464_v56 = vsel %vm12568_vm2, %v1389_v20, %v1463_v49  ;;  %860 = vst [vmem:[#allocation2 + $0x70] sm:$0x1] %v859_v24 }
  0x87   : > { %678 = vst [vmem:[#allocation2 + $0x78] sm:$0xf] %v677_v52  ;;  %679 = vst.msk [vmem:[#allocation2 + $0x7c] sm:$0xf] %vm205_vm1, %v544_v51  ;;  %v1016_v57 = vrot.slane %v1014_v40, 5  ;;  %v1020_v58 = vrot.slane %v1018_v44, 4  ;;  %v1011_v61 = vor.u32 %v1010_v54, %v1007_v48  ;;  %11419 = vmatprep.mubr.msk.bf16.mxu0 %vm1655_vm4, %v12014_v55 }
  0x88   : > { %1465 = vst [vmem:[#allocation2 + $0x13c] sm:$0x8] %v1464_v56  ;;  %v1392_v59 = vshll.u32 %v1365_v34, 16  ;;  %v782_v60 = vshrl.u32 %v703_v38, 16  ;;  %v882_v62 = vld [vmem:[#allocation2 + $0xc0] sm:$0xf] }
  0x89   : > { %v883_v63 = vld [vmem:[#allocation2 + $0xc4] sm:$0xf]  ;;  %v1021_v0 = vor.u32 %v1020_v58, %v1016_v57  ;;  %v1024_v1 = vshrl.u32 %v882_v62, 16  ;;  %v1027_v2 = vshll.u32 %v882_v62, 16  ;;  %v1012_v4 = vrot.slane %v1011_v61, 4  ;;  %v12022_v62 = vld [vmem:[#allocation2 + $0x98] sm:$0xff]  }
  0x8a   : > { %v1033_v3 = vshll.u32 %v883_v63, 16  ;;  %v1310_v5 = vld [vmem:[#allocation2 + $0x14c] sm:$0xf]  ;;  %v1037_v6 = vshrl.u32 %v883_v63, 16  ;;  %v1366_v12 = vld [vmem:[#allocation2 + $0xbc] sm:$0x8] }
  0x8b   : > { %v1022_v7 = vrot.slane %v1021_v0, 4  ;;  %v1026_v8 = vrot.slane %v1024_v1, 4  ;;  %v1029_v9 = vrot.slane %v1027_v2, 5  ;;  %v1017_v11 = vsel %vm12540_vm14, %v1012_v4, %v1016_v57  ;;  %v884_v14 = vld [vmem:[#allocation2 + $0xc8] sm:$0xf] }
  0x8c   : > { %v1035_v10 = vrot.slane %v1033_v3, 5  ;;  %v1039_v13 = vrot.slane %v1037_v6, 4  ;;  %1309 = vst.msk [vmem:[#allocation2 + $0x148] sm:$0xf] %vm205_vm1, %v1017_v11  ;;  %v1314_v19 = vld [vmem:[#allocation2 + $0x154] sm:$0xf] }
  0x8d   : > { %v1466_v16 = vld [vmem:[#allocation2 + $0x144] sm:$0x8]  ;;  %v1311_v17 = vsel %vm12546_vm15, %v1022_v7, %v1310_v5  ;;  %v1030_v18 = vor.u32 %v1029_v9, %v1026_v8  ;;  %v885_v20 = vld [vmem:[#allocation2 + $0xcc] sm:$0xf]  ;;  %v1043_v21 = vshrl.u32 %v884_v14, 16  ;;  %v1046_v22 = vshll.u32 %v884_v14, 16 }
  0x8e   : > { %v12017_v25 = vld [vmem:[#allocation2 + $0x70] sm:$0xff]   ;;  %v1467_v26 = vsel %vm12568_vm2, %v1392_v59, %v1466_v16  ;;  %v861_v27 = vld [vmem:[#allocation2 + $0x78] sm:$0x1]  ;;  %1312 = vst [vmem:[#allocation2 + $0x14c] sm:$0xf] %v1311_v17  ;;  %v1040_v28 = vor.u32 %v1039_v13, %v1035_v10  ;;  %v1052_v30 = vshll.u32 %v885_v20, 16 }
  0x8f   : > { %v12016_v32 = vld [vmem:[#allocation2 + $0x138] sm:$0xff]   ;;  %1468 = vst [vmem:[#allocation2 + $0x144] sm:$0x8] %v1467_v26  ;;  %v862_v23 = vsel %vm12420_vm9, %v782_v60, %v861_v27  ;;  %v1031_v33 = vrot.slane %v1030_v18, 4  ;;  %11409 = vmatprep.mubr.msk.bf16.mxu1 %vm1655_vm4, %v12017_v25  ;;  %v1045_v35 = vrot.slane %v1043_v21, 4  ;;  %v1048_v37 = vrot.slane %v1046_v22, 5 }
  0x90   : > { %863 = vst [vmem:[#allocation2 + $0x78] sm:$0x1] %v862_v23  ;;  %v1041_v34 = vrot.slane %v1040_v28, 4  ;;  %11420 = vmatmul.mubr.msk.bf16.gmra.mxu0 %vm1655_vm4, %v12016_v32  ;;  %v1395_v39 = vshll.u32 %v1366_v12, 16  ;;  %v1054_v41 = vrot.slane %v1052_v30, 5  ;;  %v1056_v42 = vshrl.u32 %v885_v20, 16 }
  0x91   : > { %v1036_v40 = vsel %vm12540_vm14, %v1031_v33, %v1035_v10  ;;  %v1367_v38 = vld [vmem:[#allocation2 + $0xc4] sm:$0x8]  ;;  %v1049_v44 = vor.u32 %v1048_v37, %v1045_v35  ;;  %v886_v45 = vld [vmem:[#allocation2 + $0xd0] sm:$0xf]  ;;  %v887_v47 = vld [vmem:[#allocation2 + $0xd4] sm:$0xf] }
  0x92   : > { %1313 = vst.msk [vmem:[#allocation2 + $0x150] sm:$0xf] %vm205_vm1, %v1036_v40  ;;  %v1315_v43 = vsel %vm12546_vm15, %v1041_v34, %v1314_v19  ;;  %v1058_v46 = vrot.slane %v1056_v42, 4  ;;  %v1062_v48 = vshrl.u32 %v886_v45, 16  ;;  %v1065_v49 = vshll.u32 %v886_v45, 16  ;;  %v12024_v18 = vld [vmem:[#allocation2 + $0xa0] sm:$0xff]  }
  0x93   : > { %1316 = vst [vmem:[#allocation2 + $0x154] sm:$0xf] %v1315_v43  ;;  %v1050_v24 = vrot.slane %v1049_v44, 4  ;;  %v1318_v51 = vld [vmem:[#allocation2 + $0x15c] sm:$0xf]  ;;  %v1071_v52 = vshll.u32 %v887_v47, 16 }
  0x94   : > { %v1075_v54 = vshrl.u32 %v887_v47, 16  ;;  %v1059_v56 = vor.u32 %v1058_v46, %v1054_v41  ;;  %v12664_v57 = vld [vmem:[#allocation2 + $0xcc] sm:$0x8]  ;;  %v1064_v58 = vrot.slane %v1062_v48, 4  ;;  %v1067_v59 = vrot.slane %v1065_v49, 5 }
  0x95   : > { %v1469_v55 = vld [vmem:[#allocation2 + $0x14c] sm:$0x8]  ;;  %v1055_v63 = vsel %vm12540_vm14, %v1050_v24, %v1054_v41  ;;  %v1073_v0 = vrot.slane %v1071_v52, 5  ;;  %v1398_v3 = vshll.u32 %v1367_v38, 16  ;;  %v1322_v7 = vld [vmem:[#allocation2 + $0x164] sm:$0xf] }
  0x96   : > { %v12018_v60 = vld [vmem:[#allocation2 + $0x140] sm:$0xff]   ;;  %v1470_v61 = vsel %vm12568_vm2, %v1395_v39, %v1469_v55  ;;  %v1077_v1 = vrot.slane %v1075_v54, 4  ;;  %v1060_v4 = vrot.slane %v1059_v56, 4  ;;  %1317 = vst.msk [vmem:[#allocation2 + $0x158] sm:$0xf] %vm205_vm1, %v1055_v63  ;;  %v1068_v5 = vor.u32 %v1067_v59, %v1064_v58  ;;  %v12026_v26 = vld [vmem:[#allocation2 + $0xa8] sm:$0xff]  }
  0x97   : > { %v12019_v2 = vld [vmem:[#allocation2 + $0x78] sm:$0xff]   ;;  %1471 = vst [vmem:[#allocation2 + $0x14c] sm:$0x8] %v1470_v61  ;;  %11423 = vmatprep.mubr.msk.bf16.mxu0 %vm1655_vm4, %v12018_v60  ;;  %v1401_v9 = vshll.u32 %v12664_v57, 16  ;;  %v1369_v25 = vld [vmem:[#allocation2 + $0xd4] sm:$0x8] }
  0x98   : > { %v1078_v6 = vor.u32 %v1077_v1, %v1073_v0  ;;  %11410 = vmatmul.mubr.msk.bf16.gmra.mxu1 %vm1655_vm4, %v12019_v2  ;;  %v1319_v8 = vsel %vm12546_vm15, %v1060_v4, %v1318_v51  ;;  %v1069_v10 = vrot.slane %v1068_v5, 4  ;;  %v888_v11 = vld [vmem:[#allocation2 + $0xd8] sm:$0xf]  ;;  %v889_v14 = vld [vmem:[#allocation2 + $0xdc] sm:$0xf]  ;;  %v1404_v45 = vshll.u32 %v1369_v25, 16 }
  0x99   : > { %11449 = vmatprep.mubr.msk.bf16.mxu1 %vm1655_vm4, %v12022_v62  ;;  %1320 = vst [vmem:[#allocation2 + $0x15c] sm:$0xf] %v1319_v8  ;;  %v1081_v16 = vshrl.u32 %v888_v11, 16  ;;  %v1084_v20 = vshll.u32 %v888_v11, 16  ;;  %v1090_v21 = vshll.u32 %v889_v14, 16  ;;  %v1094_v28 = vshrl.u32 %v889_v14, 16 }
  0x9a   : > { %v1472_v12 = vld [vmem:[#allocation2 + $0x154] sm:$0x8]  ;;  %v1079_v13 = vrot.slane %v1078_v6, 4  ;;  %v1074_v19 = vsel %vm12540_vm14, %v1069_v10, %v1073_v0  ;;  %v890_v23 = vld [vmem:[#allocation2 + $0xe0] sm:$0xf]  ;;  %v12030_v6 = vld [vmem:[#allocation2 + $0xb8] sm:$0xff]  }
  0x9b   : > { %v1473_v17 = vsel %vm12568_vm2, %v1398_v3, %v1472_v12  ;;  %1321 = vst.msk [vmem:[#allocation2 + $0x160] sm:$0xf] %vm205_vm1, %v1074_v19  ;;  %v1083_v27 = vrot.slane %v1081_v16, 4  ;;  %v1086_v30 = vrot.slane %v1084_v20, 5  ;;  %v1092_v32 = vrot.slane %v1090_v21, 5  ;;  %v12028_v0 = vld [vmem:[#allocation2 + $0xb0] sm:$0xff]  }
  0x9c   : > { %1474 = vst [vmem:[#allocation2 + $0x154] sm:$0x8] %v1473_v17  ;;  %v1323_v22 = vsel %vm12546_vm15, %v1079_v13, %v1322_v7  ;;  %v1096_v34 = vrot.slane %v1094_v28, 4  ;;  %v891_v37 = vld [vmem:[#allocation2 + $0xe4] sm:$0xf]  ;;  %v1100_v39 = vshrl.u32 %v890_v23, 16 }
  0x9d   : > { %1324 = vst [vmem:[#allocation2 + $0x164] sm:$0xf] %v1323_v22  ;;  %v1087_v35 = vor.u32 %v1086_v30, %v1083_v27  ;;  %v1103_v40 = vshll.u32 %v890_v23, 16  ;;  %v1326_v42 = vld [vmem:[#allocation2 + $0x16c] sm:$0xf]  ;;  %v1109_v43 = vshll.u32 %v891_v37, 16 }
  0x9e   : > { %v12020_v33 = vld [vmem:[#allocation2 + $0x148] sm:$0xff]   ;;  %v1097_v41 = vor.u32 %v1096_v34, %v1092_v32  ;;  %v1113_v38 = vshrl.u32 %v891_v37, 16  ;;  %v1102_v47 = vrot.slane %v1100_v39, 4  ;;  %v1370_v51 = vld [vmem:[#allocation2 + $0xdc] sm:$0x8]  ;;  %v12032_v23 = vld [vmem:[#allocation2 + $0xc0] sm:$0xff]  }
  0x9f   : > { %11424 = vmatmul.mubr.msk.bf16.gmra.mxu0 %vm1655_vm4, %v12020_v33  ;;  %v1088_v46 = vrot.slane %v1087_v35, 4  ;;  %v1105_v48 = vrot.slane %v1103_v40, 5  ;;  %v1111_v52 = vrot.slane %v1109_v43, 5  ;;  %v892_v61 = vld [vmem:[#allocation2 + $0xe8] sm:$0xf] }
  0xa0   : > { %v1475_v44 = vld [vmem:[#allocation2 + $0x15c] sm:$0x8]  ;;  %11450 = vmatmul.mubr.msk.bf16.vlgmr.msra.gmra.mxu1 %vm1655_vm4, %v12024_v18  ;;  %v1098_v24 = vrot.slane %v1097_v41, 4  ;;  %v1115_v54 = vrot.slane %v1113_v38, 4  ;;  %v893_v62 = vld [vmem:[#allocation2 + $0xec] sm:$0xf] }
  0xa1   : > { %v1476_v49 = vsel %vm12568_vm2, %v1401_v9, %v1475_v44  ;;  %11453 = vmatprep.mubr.msk.bf16.mxu1 %vm1655_vm4, %v12026_v26  ;;  %v1093_v56 = vsel %vm12540_vm14, %v1088_v46, %v1092_v32  ;;  %v1106_v57 = vor.u32 %v1105_v48, %v1102_v47  ;;  %v1330_v2 = vld [vmem:[#allocation2 + $0x174] sm:$0xf]  ;;  %v1119_v3 = vshrl.u32 %v892_v61, 16  ;;  %v1371_v14 = vld [vmem:[#allocation2 + $0xe4] sm:$0x8]  ;;  %v12034_v41 = vld [vmem:[#allocation2 + $0xc8] sm:$0xff]  }
  0xa2   : > { %1477 = vst [vmem:[#allocation2 + $0x15c] sm:$0x8] %v1476_v49  ;;  %1325 = vst.msk [vmem:[#allocation2 + $0x168] sm:$0xf] %vm205_vm1, %v1093_v56  ;;  %v1327_v59 = vsel %vm12546_vm15, %v1098_v24, %v1326_v42  ;;  %v1116_v60 = vor.u32 %v1115_v54, %v1111_v52  ;;  %v1122_v4 = vshll.u32 %v892_v61, 16  ;;  %v1128_v7 = vshll.u32 %v893_v62, 16 }
  0xa3   : > { %v12021_v55 = vld [vmem:[#allocation2 + $0x150] sm:$0xff]   ;;  %1328 = vst [vmem:[#allocation2 + $0x16c] sm:$0xf] %v1327_v59  ;;  %v1107_v1 = vrot.slane %v1106_v57, 4  ;;  %v1132_v8 = vshrl.u32 %v893_v62, 16  ;;  %v1407_v9 = vshll.u32 %v1370_v51, 16 }
  0xa4   : > { %v1478_v58 = vld [vmem:[#allocation2 + $0x164] sm:$0x8]  ;;  %11427 = vmatprep.mubr.msk.bf16.mxu0 %vm1655_vm4, %v12021_v55  ;;  %v1117_v5 = vrot.slane %v1116_v60, 4  ;;  %v1121_v11 = vrot.slane %v1119_v3, 4  ;;  %v1124_v12 = vrot.slane %v1122_v4, 5  ;;  %v1130_v16 = vrot.slane %v1128_v7, 5 }
  0xa5   : > { %v1479_v63 = vsel %vm12568_vm2, %v1404_v45, %v1478_v58  ;;  %v1112_v10 = vsel %vm12540_vm14, %v1107_v1, %v1111_v52  ;;  %v1134_v17 = vrot.slane %v1132_v8, 4  ;;  %v894_v18 = vld [vmem:[#allocation2 + $0xf0] sm:$0xf]  ;;  %v1334_v20 = vld [vmem:[#allocation2 + $0x17c] sm:$0xf]  ;;  %v1410_v38 = vshll.u32 %v1371_v14, 16 }
  0xa6   : > { %1480 = vst [vmem:[#allocation2 + $0x164] sm:$0x8] %v1479_v63  ;;  %1329 = vst.msk [vmem:[#allocation2 + $0x170] sm:$0xf] %vm205_vm1, %v1112_v10  ;;  %v1331_v13 = vsel %vm12546_vm15, %v1117_v5, %v1330_v2  ;;  %v1125_v19 = vor.u32 %v1124_v12, %v1121_v11  ;;  %v895_v21 = vld [vmem:[#allocation2 + $0xf4] sm:$0xf] }
  0xa7   : > { %1332 = vst [vmem:[#allocation2 + $0x174] sm:$0xf] %v1331_v13  ;;  %v1138_v22 = vshrl.u32 %v894_v18, 16  ;;  %v1141_v25 = vshll.u32 %v894_v18, 16  ;;  %v1135_v27 = vor.u32 %v1134_v17, %v1130_v16  ;;  %v1147_v28 = vshll.u32 %v895_v21, 16  ;;  %v12036_v4 = vld [vmem:[#allocation2 + $0xd0] sm:$0xff]  }
  0xa8   : > { %11454 = vmatmul.mubr.msk.bf16.gmra.mxu1 %vm1655_vm4, %v12028_v0  ;;  %v1151_v30 = vshrl.u32 %v895_v21, 16  ;;  %v1126_v32 = vrot.slane %v1125_v19, 4  ;;  %v1372_v45 = vld [vmem:[#allocation2 + $0xec] sm:$0x8]  ;;  %v1338_v49 = vld [vmem:[#allocation2 + $0x184] sm:$0xf] }
  0xa9   : > { %v12023_v26 = vld [vmem:[#allocation2 + $0x158] sm:$0xff]   ;;  %11457 = vmatprep.mubr.msk.bf16.mxu1 %vm1655_vm4, %v12030_v6  ;;  %v1140_v33 = vrot.slane %v1138_v22, 4  ;;  %v1143_v34 = vrot.slane %v1141_v25, 5  ;;  %v1136_v37 = vrot.slane %v1135_v27, 4  ;;  %v1149_v39 = vrot.slane %v1147_v28, 5 }
  0xaa   : > { %11428 = vmatmul.mubr.msk.bf16.gmra.mxu0 %vm1655_vm4, %v12023_v26  ;;  %v1481_v35 = vld [vmem:[#allocation2 + $0x16c] sm:$0x8]  ;;  %v1153_v40 = vrot.slane %v1151_v30, 4  ;;  %v1131_v44 = vsel %vm12540_vm14, %v1126_v32, %v1130_v16  ;;  %v896_v51 = vld [vmem:[#allocation2 + $0xf8] sm:$0xf]  ;;  %v1413_v62 = vshll.u32 %v1372_v45, 16 }
  0xab   : > { %v1482_v43 = vsel %vm12568_vm2, %v1407_v9, %v1481_v35  ;;  %v1144_v46 = vor.u32 %v1143_v34, %v1140_v33  ;;  %1333 = vst.msk [vmem:[#allocation2 + $0x178] sm:$0xf] %vm205_vm1, %v1131_v44  ;;  %v1335_v47 = vsel %vm12546_vm15, %v1136_v37, %v1334_v20  ;;  %v897_v55 = vld [vmem:[#allocation2 + $0xfc] sm:$0xf]  ;;  %v1157_v56 = vshrl.u32 %v896_v51, 16 }
  0xac   : > { %1483 = vst [vmem:[#allocation2 + $0x16c] sm:$0x8] %v1482_v43  ;;  %v1154_v48 = vor.u32 %v1153_v40, %v1149_v39  ;;  %1336 = vst [vmem:[#allocation2 + $0x17c] sm:$0xf] %v1335_v47  ;;  %v1373_v59 = vld [vmem:[#allocation2 + $0xf4] sm:$0x8] }
  0xad   : > { %v12025_v42 = vld [vmem:[#allocation2 + $0x160] sm:$0xff]   ;;  %v1145_v24 = vrot.slane %v1144_v46, 4  ;;  %v1160_v60 = vshll.u32 %v896_v51, 16  ;;  %v1166_v61 = vshll.u32 %v897_v55, 16  ;;  %v1159_v0 = vrot.slane %v1157_v56, 4  ;;  %v12038_v20 = vld [vmem:[#allocation2 + $0xd8] sm:$0xff]  }
  0xae   : > { %11431 = vmatprep.mubr.msk.bf16.mxu0 %vm1655_vm4, %v12025_v42  ;;  %v1484_v52 = vld [vmem:[#allocation2 + $0x174] sm:$0x8]  ;;  %v1155_v54 = vrot.slane %v1154_v48, 4  ;;  %v1170_v1 = vshrl.u32 %v897_v55, 16  ;;  %v898_v5 = vld [vmem:[#allocation2 + $0x100] sm:$0xf] }
  0xaf   : > { %v1485_v57 = vsel %vm12568_vm2, %v1410_v38, %v1484_v52  ;;  %v1150_v58 = vsel %vm12540_vm14, %v1145_v24, %v1149_v39  ;;  %v1162_v2 = vrot.slane %v1160_v60, 5  ;;  %v1168_v3 = vrot.slane %v1166_v61, 5  ;;  %v899_v8 = vld [vmem:[#allocation2 + $0x104] sm:$0xf]  ;;  %v1342_v25 = vld [vmem:[#allocation2 + $0x18c] sm:$0xf] }
  0xb0   : > { %11458 = vmatmul.mubr.msk.bf16.gmra.mxu1 %vm1655_vm4, %v12032_v23  ;;  %1486 = vst [vmem:[#allocation2 + $0x174] sm:$0x8] %v1485_v57  ;;  %1337 = vst.msk [vmem:[#allocation2 + $0x180] sm:$0xf] %vm205_vm1, %v1150_v58  ;;  %v1339_v63 = vsel %vm12546_vm15, %v1155_v54, %v1338_v49  ;;  %v1416_v6 = vshll.u32 %v1373_v59, 16  ;;  %v1172_v7 = vrot.slane %v1170_v1, 4 }
  0xb1   : > { %11461 = vmatprep.mubr.msk.bf16.mxu1 %vm1655_vm4, %v12034_v41  ;;  %1340 = vst [vmem:[#allocation2 + $0x184] sm:$0xf] %v1339_v63  ;;  %v1176_v9 = vshrl.u32 %v898_v5, 16  ;;  %v1179_v10 = vshll.u32 %v898_v5, 16  ;;  %v1163_v12 = vor.u32 %v1162_v2, %v1159_v0  ;;  %v1185_v13 = vshll.u32 %v899_v8, 16  ;;  %v12040_v24 = vld [vmem:[#allocation2 + $0xe0] sm:$0xff]  }
  0xb2   : > { %v1173_v16 = vor.u32 %v1172_v7, %v1168_v3  ;;  %v1189_v19 = vshrl.u32 %v899_v8, 16  ;;  %v1374_v26 = vld [vmem:[#allocation2 + $0xfc] sm:$0x8]  ;;  %v12725_v23 = vld [vmem:[#allocation2 + $0x104] sm:$0x8]  ;;  %v12041_v51 = vld [vmem:[#allocation2 + $0xe8] sm:$0xff]  }
  0xb3   : > { %v12027_v11 = vld [vmem:[#allocation2 + $0x168] sm:$0xff]   ;;  %v1487_v14 = vld [vmem:[#allocation2 + $0x17c] sm:$0x8]  ;;  %v1178_v17 = vrot.slane %v1176_v9, 4  ;;  %v1181_v18 = vrot.slane %v1179_v10, 5  ;;  %v1164_v22 = vrot.slane %v1163_v12, 4 }
  0xb4   : > { %11432 = vmatmul.mubr.msk.bf16.gmra.mxu0 %vm1655_vm4, %v12027_v11  ;;  %v1488_v21 = vsel %vm12568_vm2, %v1413_v62, %v1487_v14  ;;  %v1187_v27 = vrot.slane %v1185_v13, 5  ;;  %v1174_v28 = vrot.slane %v1173_v16, 4  ;;  %v1191_v32 = vrot.slane %v1189_v19, 4  ;;  %v1346_v35 = vld [vmem:[#allocation2 + $0x194] sm:$0xf]  ;;  %v12045_v12 = vld [vmem:[#allocation2 + $0xf8] sm:$0xff]  }
  0xb5   : > { %1489 = vst [vmem:[#allocation2 + $0x17c] sm:$0x8] %v1488_v21  ;;  %v1182_v30 = vor.u32 %v1181_v18, %v1178_v17  ;;  %v1169_v34 = vsel %vm12540_vm14, %v1164_v22, %v1168_v3  ;;  %v1419_v43 = vshll.u32 %v1374_v26, 16  ;;  %v1422_v38 = vshll.u32 %v12725_v23, 16  ;;  %v900_v44 = vld [vmem:[#allocation2 + $0x108] sm:$0xf] }
  0xb6   : > { %1341 = vst.msk [vmem:[#allocation2 + $0x188] sm:$0xf] %vm205_vm1, %v1169_v34  ;;  %v1343_v39 = vsel %vm12546_vm15, %v1174_v28, %v1342_v25  ;;  %v1192_v41 = vor.u32 %v1191_v32, %v1187_v27  ;;  %v901_v45 = vld [vmem:[#allocation2 + $0x10c] sm:$0xf]  ;;  %v1195_v48 = vshrl.u32 %v900_v44, 16  ;;  %v1198_v49 = vshll.u32 %v900_v44, 16 }
  0xb7   : > { %v12029_v33 = vld [vmem:[#allocation2 + $0x170] sm:$0xff]   ;;  %v1183_v40 = vrot.slane %v1182_v30, 4  ;;  %1344 = vst [vmem:[#allocation2 + $0x18c] sm:$0xf] %v1343_v39  ;;  %v1204_v52 = vshll.u32 %v901_v45, 16  ;;  %v1208_v54 = vshrl.u32 %v901_v45, 16 }
  0xb8   : > { %11462 = vmatmul.mubr.msk.bf16.gmra.mxu1 %vm1655_vm4, %v12036_v4  ;;  %v1490_v37 = vld [vmem:[#allocation2 + $0x184] sm:$0x8]  ;;  %11435 = vmatprep.mubr.msk.bf16.mxu0 %vm1655_vm4, %v12029_v33  ;;  %v1193_v47 = vrot.slane %v1192_v41, 4  ;;  %v1376_v55 = vld [vmem:[#allocation2 + $0x10c] sm:$0x8]  ;;  %v1197_v57 = vrot.slane %v1195_v48, 4 }
  0xb9   : > { %11465 = vmatprep.mubr.msk.bf16.mxu1 %vm1655_vm4, %v12038_v20  ;;  %v1491_v42 = vsel %vm12568_vm2, %v1416_v6, %v1490_v37  ;;  %v1188_v46 = vsel %vm12540_vm14, %v1183_v40, %v1187_v27  ;;  %v1200_v58 = vrot.slane %v1198_v49, 5  ;;  %v10382_v59 = vld [vmem:[%s15428_s1 + $0xa] sm:$0x3]  ;;  %v1206_v61 = vrot.slane %v1204_v52, 5  ;;  %v1350_v1 = vld [vmem:[#allocation2 + $0x19c] sm:$0xf] }
  0xba   : > { %1492 = vst [vmem:[#allocation2 + $0x184] sm:$0x8] %v1491_v42  ;;  %1345 = vst.msk [vmem:[#allocation2 + $0x190] sm:$0xf] %vm205_vm1, %v1188_v46  ;;  %v1347_v56 = vsel %vm12546_vm15, %v1193_v47, %v1346_v35  ;;  %v1210_v62 = vrot.slane %v1208_v54, 4  ;;  %11962 = vmatprep.subr.msk.bf16.mxu1 %vm1704_vm0, %v10382_v59  ;;  %v3400_v63 = vsel %vm1704_vm0, %v10382_v59, 0 }
  0xbb   : > { %1348 = vst [vmem:[#allocation2 + $0x194] sm:$0xf] %v1347_v56  ;;  %v1201_v0 = vor.u32 %v1200_v58, %v1197_v57  ;;  %11516 = vmatpush3.bf16.msra.mxu1 %v3400_v63  ;;  %v10416_v3 = vld [vmem:[%s15428_s1 + $0xe] sm:$0x3]  ;;  %v1425_v6 = vshll.u32 %v1376_v55, 16  ;;  %v12043_v10 = vld [vmem:[#allocation2 + $0xf0] sm:$0xff]  }
  0xbc   : > { %v12031_v60 = vld [vmem:[#allocation2 + $0x178] sm:$0xff]   ;;  %v1211_v2 = vor.u32 %v1210_v62, %v1206_v61  ;;  %11963 = vmatprep.subr.msk.bf16.mxu0 %vm1704_vm0, %v10416_v3  ;;  %v12047_v20 = vld [vmem:[#allocation2 + $0x100] sm:$0xff]   ;;  %v12049_v21 = vld [vmem:[#allocation2 + $0x108] sm:$0xff]  }
  0xbd   : > { %11436 = vmatmul.mubr.msk.bf16.gmra.mxu0 %vm1655_vm4, %v12031_v60  ;;  %v1202_v5 = vrot.slane %v1201_v0, 4  ;;  %v202_v17 = vld [vmem:[%s12336_s23 + $0x78] sm:$0xf]  ;;  %v203_v18 = vld [vmem:[%s12336_s23 + $0x7c] sm:$0xf]  ;;  %v12042_v27 = vld [vmem:[#allocation2 + $0x8] sm:$0xff]  }
  0xbe   : > { %v1493_v4 = vld [vmem:[#allocation2 + $0x18c] sm:$0x8]  ;;  %v1212_v9 = vrot.slane %v1211_v2, 4  ;;  %236 = vst.msk [vmem:[#allocation2 + $0x110] sm:$0xf] %vm205_vm1, %v202_v17  ;;  %v12044_v34 = vld [vmem:[#allocation2 + $0x10] sm:$0xff]  }
  0xbf   : > { %v1494_v8 = vsel %vm12568_vm2, %v1419_v43, %v1493_v4  ;;  %v1207_v11 = vsel %vm12540_vm14, %v1202_v5, %v1206_v61  ;;  %237 = vst.msk [vmem:[#allocation2 + $0x114] sm:$0xf] %vm205_vm1, %v203_v18  ;;  %v12054_v30 = vld [vmem:[#allocation2 + $0x128] sm:$0xff]   ;;  %v12046_v35 = vld [vmem:[#allocation2 + $0x18] sm:$0xff]   ;;  %v12056_v42 = vld [vmem:[#allocation2 + $0x130] sm:$0xff]   ;;  %v3889_v43 = vsel %vm1704_vm0, %v10416_v3, 0 }
  0xc0   : > { %11466 = vmatmul.mubr.msk.bf16.gmra.mxu1 %vm1655_vm4, %v12040_v24  ;;  %1495 = vst [vmem:[#allocation2 + $0x18c] sm:$0x8] %v1494_v8  ;;  %1349 = vst.msk [vmem:[#allocation2 + $0x198] sm:$0xf] %vm205_vm1, %v1207_v11  ;;  %v1351_v13 = vsel %vm12546_vm15, %v1212_v9, %v1350_v1  ;;  %v10415_v46 = vld [vmem:[%s15428_s1 + $0xc] sm:$0x3] }
  0xc1   : > { %11469 = vmatprep.mubr.msk.bf16.mxu1 %vm1655_vm4, %v12041_v51  ;;  %v12033_v7 = vld [vmem:[#allocation2 + $0x180] sm:$0xff]   ;;  %1352 = vst [vmem:[#allocation2 + $0x19c] sm:$0xf] %v1351_v13  ;;  %11964 = vmatprep.subr.msk.bf16.mxu1 %vm1704_vm0, %v10415_v46  ;;  %v4181_v51 = vsel %vm1704_vm0, %v10415_v46, 0  ;;  %v12791_v52 = vld [vmem:[%s15428_s1 + $0x10] sm:$0x3] }
  0xc2   : > { %11439 = vmatprep.mubr.msk.bf16.mxu0 %vm1655_vm4, %v12033_v7  ;;  %v1496_v14 = vld [vmem:[#allocation2 + $0x194] sm:$0x8]  ;;  %v680_v47 = vld [vmem:[#allocation2 + $0x80] sm:$0xf]  ;;  %v12050_v58 = vld [vmem:[#allocation2 + $0x28] sm:$0xff]  }
  0xc3   : > { %v1497_v16 = vsel %vm12568_vm2, %v1422_v38, %v1496_v14  ;;  %v12058_v38 = vld [vmem:[#allocation2 + $0x138] sm:$0xff]   ;;  %v12048_v57 = vld [vmem:[#allocation2 + $0x20] sm:$0xff]   ;;  %v12062_v63 = vld [vmem:[#allocation2 + $0x148] sm:$0xff]  }
  0xc4   : > { %1498 = vst [vmem:[#allocation2 + $0x194] sm:$0x8] %v1497_v16  ;;  %v12060_v59 = vld [vmem:[#allocation2 + $0x140] sm:$0xff]   ;;  %v12052_v8 = vld [vmem:[#allocation2 + $0x30] sm:$0xff]   ;;  %v246_v46 = vld [vmem:[#allocation2 + $0x10c] sm:$0xf] }
  0xc5   : > { %v282_v23 = vld [vmem:[#allocation2 + $0x110] sm:$0xf]  ;;  %v1354_v16 = vld [vmem:[#allocation2 + $0x1a4] sm:$0xf]  ;;  %249 = vst.msk [vmem:[#allocation2 + $0x11c] sm:$0xf] %vm205_vm1, %v246_v46 }
  0xc6   : > { %v12051_v28 = vld [vmem:[#allocation2 + $0x110] sm:$0xff]   ;;  %v546_v37 = vshrl.u32 %v282_v23, 16  ;;  %v549_v39 = vshll.u32 %v282_v23, 16  ;;  %v12055_v23 = vld [vmem:[#allocation2 + $0x40] sm:$0xff]  }
  0xc7   : > { %v12035_v19 = vld [vmem:[#allocation2 + $0x188] sm:$0xff]   ;;  %v283_v33 = vld [vmem:[#allocation2 + $0x114] sm:$0xf]  ;;  %v704_v56 = vld [vmem:[#allocation2 + $0x110] sm:$0x1] }
  0xc8   : > { %11470 = vmatmul.mubr.msk.bf16.gmra.mxu1 %vm1655_vm4, %v12043_v10  ;;  %11440 = vmatmul.mubr.msk.bf16.gmra.mxu0 %vm1655_vm4, %v12035_v19  ;;  %v1499_v22 = vld [vmem:[#allocation2 + $0x19c] sm:$0x8]  ;;  %v554_v40 = vshrl.u32 %v283_v33, 16  ;;  %v557_v41 = vshll.u32 %v283_v33, 16  ;;  %v548_v44 = vrot.slane %v546_v37, 7  ;;  %v787_v60 = vshrl.u32 %v704_v56, 16 }
  0xc9   : > { %11473 = vmatprep.mubr.msk.bf16.mxu1 %vm1655_vm4, %v12045_v12  ;;  %v1500_v25 = vsel %vm12568_vm2, %v1425_v6, %v1499_v22  ;;  %v902_v61 = vld [vmem:[#allocation2 + $0x110] sm:$0xf]  ;;  %v903_v62 = vld [vmem:[#allocation2 + $0x114] sm:$0xf]  ;;  %v12053_v12 = vld [vmem:[#allocation2 + $0x38] sm:$0xff]  }
  0xca   : > { %1501 = vst [vmem:[#allocation2 + $0x19c] sm:$0x8] %v1500_v25  ;;  %v556_v45 = vrot.slane %v554_v40, 7  ;;  %v551_v48 = vor.u32 %v549_v39, %v548_v44  ;;  %v552_v49 = vrot.slane %v548_v44, 4  ;;  %v1214_v0 = vshrl.u32 %v902_v61, 16  ;;  %v12064_v18 = vld [vmem:[#allocation2 + $0x150] sm:$0xff]  }
  0xcb   : > { %v12037_v26 = vld [vmem:[#allocation2 + $0x190] sm:$0xff]   ;;  %v1217_v1 = vshll.u32 %v902_v61, 16  ;;  %v1223_v2 = vshll.u32 %v903_v62, 16  ;;  %v1227_v3 = vshrl.u32 %v903_v62, 16  ;;  %v12057_v33 = vld [vmem:[#allocation2 + $0x48] sm:$0xff]   ;;  %v12068_v37 = vld [vmem:[#allocation2 + $0x160] sm:$0xff]  }
  0xcc   : > { %11443 = vmatprep.mubr.msk.bf16.mxu0 %vm1655_vm4, %v12037_v26  ;;  %v559_v24 = vor.u32 %v557_v41, %v556_v45  ;;  %v681_v55 = vsel %vm12393_vm6, %v551_v48, %v680_v47  ;;  %v1216_v6 = vrot.slane %v1214_v0, 4  ;;  %v12070_v39 = vld [vmem:[#allocation2 + $0x168] sm:$0xff]   ;;  %v12061_v47 = vld [vmem:[#allocation2 + $0x58] sm:$0xff]   ;;  %v12075_v61 = vld [vmem:[#allocation2 + $0x180] sm:$0xff]  }
  0xcd   : > { %682 = vst [vmem:[#allocation2 + $0x80] sm:$0xf] %v681_v55  ;;  %v1219_v7 = vrot.slane %v1217_v1, 5  ;;  %v1225_v10 = vrot.slane %v1223_v2, 5  ;;  %v1229_v11 = vrot.slane %v1227_v3, 4 }
  0xce   : > { %v560_v54 = vsel %vm12399_vm7, %v552_v49, %v559_v24  ;;  %v245_v45 = vld [vmem:[#allocation2 + $0x108] sm:$0xf]  ;;  %v12072_v49 = vld [vmem:[#allocation2 + $0x170] sm:$0xff]   ;;  %v12073_v24 = vld [vmem:[#allocation2 + $0x178] sm:$0xff]  }
  0xcf   : > { %683 = vst.msk [vmem:[#allocation2 + $0x84] sm:$0xf] %vm205_vm1, %v560_v54  ;;  %v1220_v14 = vor.u32 %v1219_v7, %v1216_v6  ;;  %v1230_v17 = vor.u32 %v1229_v11, %v1225_v10  ;;  %248 = vst.msk [vmem:[#allocation2 + $0x118] sm:$0xf] %vm205_vm1, %v245_v45 }
  0xd0   : > { %11474 = vmatmul.mubr.msk.bf16.gmra.mxu1 %vm1655_vm4, %v12047_v20 }
  0xd1   : > { %11477 = vmatprep.mubr.msk.bf16.mxu1 %vm1655_vm4, %v12049_v21  ;;  %v12039_v32 = vld [vmem:[#allocation2 + $0x198] sm:$0xff]   ;;  %v1221_v20 = vrot.slane %v1220_v14, 4  ;;  %v1231_v22 = vrot.slane %v1230_v17, 4 }
  0xd2   : > { %11444 = vmatmul.mubr.msk.bf16.gmra.mxu0 %vm1655_vm4, %v12039_v32  ;;  %v12066_v21 = vld [vmem:[#allocation2 + $0x158] sm:$0xff]  }
  0xd3   : > { %11483 = vmatprep.mubr.msk.bf16.mxu0 %vm1655_vm4, %v12042_v27  ;;  %v1226_v26 = vsel %vm12540_vm14, %v1221_v20, %v1225_v10  ;;  %v1355_v27 = vsel %vm12546_vm15, %v1231_v22, %v1354_v16  ;;  %v12069_v14 = vld [vmem:[#allocation2 + $0x78] sm:$0xff]   ;;  %v12079_v22 = vld [vmem:[#allocation2 + $0x190] sm:$0xff]  }
  0xd4   : > { %v864_v4 = vld [vmem:[#allocation2 + $0x80] sm:$0x1]  ;;  %1353 = vst.msk [vmem:[#allocation2 + $0x1a0] sm:$0xf] %vm205_vm1, %v1226_v26  ;;  %1356 = vst [vmem:[#allocation2 + $0x1a4] sm:$0xf] %v1355_v27 }
  0xd5   : > { %v865_v9 = vsel %vm12420_vm9, %v787_v60, %v864_v4  ;;  %v285_v4 = vld [vmem:[#allocation2 + $0x11c] sm:$0xf] }
  0xd6   : > { %866 = vst [vmem:[#allocation2 + $0x80] sm:$0x1] %v865_v9  ;;  %v284_v3 = vld [vmem:[#allocation2 + $0x118] sm:$0xf]  ;;  %v570_v9 = vshrl.u32 %v285_v4, 16  ;;  %v573_v10 = vshll.u32 %v285_v4, 16 }
  0xd7   : > { %v562_v7 = vshrl.u32 %v284_v3, 16  ;;  %v705_v45 = vld [vmem:[#allocation2 + $0x118] sm:$0x1] }
  0xd8   : > { %11478 = vmatmul.mubr.msk.bf16.gmra.mxu1 %vm1655_vm4, %v12051_v28 }
  0xd9   : > { %11517 = vmatprep.mubr.msk.bf16.mxu1 %vm1655_vm4, %v12054_v30  ;;  %v1377_v30 = vld [vmem:[#allocation2 + $0x114] sm:$0x8]  ;;  %v564_v17 = vrot.slane %v562_v7, 7 }
  0xda   : > { %11484 = vmatmul.mubr.msk.bf16.vlgmr.msra.gmra.mxu0 %vm1655_vm4, %v12044_v34 }
  0xdb   : > { %11550 = vmatpush3.bf16.msra.mxu0 %v3889_v43  ;;  %11487 = vmatprep.mubr.msk.bf16.mxu0 %vm1655_vm4, %v12046_v35  ;;  %v1428_v35 = vshll.u32 %v1377_v30, 16  ;;  %v1502_v41 = vld [vmem:[#allocation2 + $0x1a4] sm:$0x8]  ;;  %v568_v30 = vrot.slane %v564_v17, 4 }
  0xdc   : > { %11965 = vmatprep.subr.msk.bf16.mxu0 %vm1704_vm0, %v12791_v52 }
  0xdd   : > { %v1503_v43 = vsel %vm12568_vm2, %v1428_v35, %v1502_v41 }
  0xde   : > { %1504 = vst [vmem:[#allocation2 + $0x1a4] sm:$0x8] %v1503_v43 }
  0xe0   : > { %11518 = vmatmul.mubr.msk.bf16.vlgmr.msra.gmra.mxu1 %vm1655_vm4, %v12056_v42 }
  0xe1   : > { %11521 = vmatprep.mubr.msk.bf16.mxu1 %vm1655_vm4, %v12058_v38  ;;  %11584 = vmatpush3.bf16.msra.mxu1 %v4181_v51  ;;  %v12059_v38 = vld [vmem:[#allocation2 + $0x50] sm:$0xff]  }
  0xe2   : > { %11488 = vmatmul.mubr.msk.bf16.gmra.mxu0 %vm1655_vm4, %v12048_v57  ;;  %v12063_v57 = vld [vmem:[#allocation2 + $0x60] sm:$0xff]  }
  0xe3   : > { %11491 = vmatprep.mubr.msk.bf16.mxu0 %vm1655_vm4, %v12050_v58 }
  0xe8   : > { %11522 = vmatmul.mubr.msk.bf16.gmra.mxu1 %vm1655_vm4, %v12060_v59  ;;  %v12065_v59 = vld [vmem:[#allocation2 + $0x68] sm:$0xff]  }
  0xe9   : > { %v12805_v5 = vpop.f32.mrf.mxu0  ;;  %11525 = vmatprep.mubr.msk.bf16.mxu1 %vm1655_vm4, %v12062_v63  ;;  %v12077_v63 = vld [vmem:[#allocation2 + $0x188] sm:$0xff]  }
  0xea   : > { %11492 = vmatmul.mubr.msk.bf16.gmra.mxu0 %vm1655_vm4, %v12052_v8  ;;  %v565_v8 = vshll.u32 %v284_v3, 16  ;;  %v905_v3 = vld [vmem:[#allocation2 + $0x11c] sm:$0xf] }
  0xeb   : > { %v12811_v13 = vpop.f32.mrf.mxu0  ;;  %11495 = vmatprep.mubr.msk.bf16.mxu0 %vm1655_vm4, %v12053_v12  ;;  %v12067_v12 = vld [vmem:[#allocation2 + $0x70] sm:$0xff]  }
  0xec   : > { %v567_v27 = vor.u32 %v565_v8, %v564_v17  ;;  %v12086_v8 = vld [vmem:[#allocation2 + $0x10] sm:$0xff]  }
  0xed   : > { %v12813_v19 = vpop.f32.mrf.mxu0 }
  0xef   : > { %v12815_v25 = vpop.f32.mrf.mxu0 }
  0xf0   : > { %11526 = vmatmul.mubr.msk.bf16.gmra.mxu1 %vm1655_vm4, %v12064_v18  ;;  %v572_v18 = vrot.slane %v570_v9, 7 }
  0xf1   : > { %v12824_v28 = vpop.f32.mrf.mxu0  ;;  %11529 = vmatprep.mubr.msk.bf16.mxu1 %vm1655_vm4, %v12066_v21  ;;  %v684_v21 = vld [vmem:[#allocation2 + $0x88] sm:$0xf] }
  0xf2   : > { %11496 = vmatmul.mubr.msk.bf16.gmra.mxu0 %vm1655_vm4, %v12055_v23  ;;  %v575_v23 = vor.u32 %v573_v10, %v572_v18  ;;  %v685_v41 = vsel %vm12393_vm6, %v567_v27, %v684_v21  ;;  %v1242_v10 = vshll.u32 %v905_v3, 16 }
  0xf3   : > { %v12828_v32 = vpop.f32.mrf.mxu0  ;;  %11499 = vmatprep.mubr.msk.bf16.mxu0 %vm1655_vm4, %v12057_v33  ;;  %v12081_v33 = vld [vmem:[#allocation2 + $0x198] sm:$0xff]   ;;  %686 = vst [vmem:[#allocation2 + $0x88] sm:$0xf] %v685_v41  ;;  %v12076_v41 = vld [vmem:[#allocation2 + $0xa8] sm:$0xff]  }
  0xf4   : > { %v1244_v27 = vrot.slane %v1242_v10, 5 }
  0xf5   : > { %v12830_v34 = vpop.f32.mrf.mxu0 }
  0xf7   : > { %v12832_v40 = vpop.f32.mrf.mxu0 }
  0xf8   : > { %11530 = vmatmul.mubr.msk.bf16.gmra.mxu1 %vm1655_vm4, %v12068_v37 }
  0xf9   : > { %v12836_v42 = vpop.f32.mrf.mxu0  ;;  %11533 = vmatprep.mubr.msk.bf16.mxu1 %vm1655_vm4, %v12070_v39  ;;  %v576_v39 = vsel %vm12399_vm7, %v568_v30, %v575_v23 }
  0xfa   : > { %11500 = vmatmul.mubr.msk.bf16.gmra.mxu0 %vm1655_vm4, %v12059_v38  ;;  %687 = vst.msk [vmem:[#allocation2 + $0x8c] sm:$0xf] %vm205_vm1, %v576_v39  ;;  %v867_v17 = vld [vmem:[#allocation2 + $0x88] sm:$0x1] }
  0xfb   : > { %v12842_v44 = vpop.f32.mrf.mxu0  ;;  %11503 = vmatprep.mubr.msk.bf16.mxu0 %vm1655_vm4, %v12061_v47  ;;  %v12071_v47 = vld [vmem:[#allocation2 + $0x80] sm:$0xff]  }
  0xfd   : > { %v12844_v48 = vpop.f32.mrf.mxu0 }
  0xff   : > { %v12848_v51 = vpop.f32.mrf.mxu0 }
 0x100   : > { %11534 = vmatmul.mubr.msk.bf16.gmra.mxu1 %vm1655_vm4, %v12072_v49 }
 0x101   : > { %v12852_v54 = vpop.f32.mrf.mxu0  ;;  %11537 = vmatprep.mubr.msk.bf16.mxu1 %vm1655_vm4, %v12073_v24  ;;  %v12074_v24 = vld [vmem:[#allocation2 + $0xa0] sm:$0xff]  }
 0x102   : > { %v12855_v55 = vpop.f32.mrf.mxu1  ;;  %11504 = vmatmul.mubr.msk.bf16.gmra.mxu0 %vm1655_vm4, %v12063_v57  ;;  %v792_v57 = vshrl.u32 %v705_v45, 16 }
 0x103   : > { %v12858_v56 = vpop.f32.mrf.mxu0  ;;  %11507 = vmatprep.mubr.msk.bf16.mxu0 %vm1655_vm4, %v12065_v59  ;;  %v904_v59 = vld [vmem:[#allocation2 + $0x118] sm:$0xf]  ;;  %v2043_v31 = vadd.f32 %v12855_v55, %v12805_v5 }
 0x104   : > { %v12860_v58 = vpop.f32.mrf.mxu1  ;;  %v1233_v4 = vshrl.u32 %v904_v59, 16  ;;  %v1236_v7 = vshll.u32 %v904_v59, 16  ;;  %v1358_v59 = vld [vmem:[#allocation2 + $0x1ac] sm:$0xf] }
 0x105   : > { %v12862_v60 = vpop.f32.mrf.mxu0 }
 0x106   : > { %v12864_v62 = vpop.f32.mrf.mxu1  ;;  %v1235_v18 = vrot.slane %v1233_v4, 4  ;;  %v1238_v21 = vrot.slane %v1236_v7, 5  ;;  %v12088_v4 = vld [vmem:[#allocation2 + $0x18] sm:$0xff]  }
 0x107   : > { %v12866_v0 = vpop.f32.mrf.mxu0 }
 0x108   : > { %v12869_v1 = vpop.f32.mrf.mxu1  ;;  %11538 = vmatmul.mubr.msk.bf16.gmra.mxu1 %vm1655_vm4, %v12075_v61  ;;  %v12083_v61 = vld [vmem:[#allocation2 + $0x1a0] sm:$0xff]   ;;  %v1239_v23 = vor.u32 %v1238_v21, %v1235_v18  ;;  %v12080_v21 = vld [vmem:[#allocation2 + $0xb8] sm:$0xff]  }
 0x109   : > { %v12872_v2 = vpop.f32.mrf.mxu0  ;;  %11541 = vmatprep.mubr.msk.bf16.mxu1 %vm1655_vm4, %v12077_v63 }
 0x10a   : > { %v12875_v6 = vpop.f32.mrf.mxu1  ;;  %11508 = vmatmul.mubr.msk.bf16.gmra.mxu0 %vm1655_vm4, %v12067_v12  ;;  %v1246_v12 = vshrl.u32 %v905_v3, 16 }
 0x10b   : > { %v12878_v11 = vpop.f32.mrf.mxu0  ;;  %11511 = vmatprep.mubr.msk.bf16.mxu0 %vm1655_vm4, %v12069_v14 }
 0x10c   : > { %v12880_v16 = vpop.f32.mrf.mxu1  ;;  %v1248_v30 = vrot.slane %v1246_v12, 4 }
 0x10d   : > { %v12882_v20 = vpop.f32.mrf.mxu0 }
 0x10e   : > { %v12884_v26 = vpop.f32.mrf.mxu1  ;;  %v1249_v39 = vor.u32 %v1248_v30, %v1244_v27 }
 0x10f   : > { %v12886_v35 = vpop.f32.mrf.mxu0 }
 0x110   : > { %v12889_v37 = vpop.f32.mrf.mxu1  ;;  %11542 = vmatmul.mubr.msk.bf16.gmra.mxu1 %vm1655_vm4, %v12079_v22  ;;  %v868_v22 = vsel %vm12420_vm9, %v792_v57, %v867_v17  ;;  %v1250_v3 = vrot.slane %v1249_v39, 4  ;;  %v4508_v57 = vsel %vm1704_vm0, %v12791_v52, 0  ;;  %v1378_v17 = vld [vmem:[#allocation2 + $0x11c] sm:$0x8]  ;;  %v12094_v39 = vld [vmem:[#allocation2 + $0x30] sm:$0xff]  }
 0x111   : > { %v12896_v43 = vpop.f32.mrf.mxu0  ;;  %11545 = vmatprep.mubr.msk.bf16.mxu1 %vm1655_vm4, %v12081_v33  ;;  %869 = vst [vmem:[#allocation2 + $0x88] sm:$0x1] %v868_v22  ;;  %v1431_v22 = vshll.u32 %v1378_v17, 16 }
 0x112   : > { %v12900_v38 = vpop.f32.mrf.mxu1  ;;  %11512 = vmatmul.mubr.msk.bf16.gmra.mxu0 %vm1655_vm4, %v12071_v47  ;;  %v1240_v47 = vrot.slane %v1239_v23, 4  ;;  %v1359_v12 = vsel %vm12546_vm15, %v1250_v3, %v1358_v59  ;;  %v12092_v23 = vld [vmem:[#allocation2 + $0x28] sm:$0xff]  }
 0x113   : > { %v12903_v46 = vpop.f32.mrf.mxu0  ;;  %11551 = vmatprep.mubr.msk.bf16.mxu0 %vm1655_vm4, %v12074_v24  ;;  %v12078_v24 = vld [vmem:[#allocation2 + $0xb0] sm:$0xff]   ;;  %1360 = vst [vmem:[#allocation2 + $0x1ac] sm:$0xf] %v1359_v12  ;;  %v12098_v12 = vld [vmem:[#allocation2 + $0x40] sm:$0xff]  }
 0x114   : > { %v12905_v49 = vpop.f32.mrf.mxu1 }
 0x115   : > { %v12909_v9 = vpop.f32.mrf.mxu0 }
 0x116   : > { %v12907_v63 = vpop.f32.mrf.mxu1 }
 0x117   : > { %v12919_v33 = vpop.f32.mrf.mxu0 }
 0x118   : > { %v12912_v14 = vpop.f32.mrf.mxu1  ;;  %11546 = vmatmul.mubr.msk.bf16.gmra.mxu1 %vm1655_vm4, %v12083_v61  ;;  %v1245_v61 = vsel %vm12540_vm14, %v1240_v47, %v1244_v27  ;;  %v12082_v27 = vld [vmem:[#allocation2 + $0xc0] sm:$0xff]  }
 0x119   : > { %11585 = vmatprep.mubr.msk.bf16.mxu1 %vm1655_vm4, %v12086_v8  ;;  %v12090_v8 = vld [vmem:[#allocation2 + $0x20] sm:$0xff]   ;;  %v12929_v10 = vpop.f32.mrf.mxu0  ;;  %1357 = vst.msk [vmem:[#allocation2 + $0x1a8] sm:$0xf] %vm205_vm1, %v1245_v61 }
 0x11a   : > { %v12921_v45 = vpop.f32.mrf.mxu1  ;;  %11552 = vmatmul.mubr.msk.bf16.vlgmr.msra.gmra.mxu0 %vm1655_vm4, %v12076_v41  ;;  %v1505_v47 = vld [vmem:[#allocation2 + $0x1ac] sm:$0x8] }
 0x11b   : > { %11618 = vmatpush3.bf16.msra.mxu0 %v4508_v57  ;;  %11555 = vmatprep.mubr.msk.bf16.mxu0 %vm1655_vm4, %v12078_v24  ;;  %v12940_v18 = vpop.f32.mrf.mxu0  ;;  %v1506_v59 = vsel %vm12568_vm2, %v1431_v22, %v1505_v47  ;;  %v12084_v57 = vld [vmem:[#allocation2 + $0xc8] sm:$0xff]  }
 0x11c   : > { %v12925_v7 = vpop.f32.mrf.mxu1  ;;  %1507 = vst [vmem:[#allocation2 + $0x1ac] sm:$0x8] %v1506_v59  ;;  %v12100_v47 = vld [vmem:[#allocation2 + $0x48] sm:$0xff]   ;;  %v12102_v59 = vld [vmem:[#allocation2 + $0x50] sm:$0xff]  }
 0x11d   : > { %v12944_v41 = vpop.f32.mrf.mxu0 }
 0x11e   : > { %v12936_v52 = vpop.f32.mrf.mxu1 }
 0x11f   : > { %v12954_v3 = vpop.f32.mrf.mxu0 }
 0x120   : > { %11586 = vmatmul.mubr.msk.bf16.vlgmr.msra.gmra.mxu1 %vm1655_vm4, %v12088_v4  ;;  %v12942_v30 = vpop.f32.mrf.mxu1  ;;  %v12085_v4 = vld [vmem:[#allocation2 + $0xd0] sm:$0xff]  }
 0x121   : > { %11589 = vmatprep.mubr.msk.bf16.mxu1 %vm1655_vm4, %v12090_v8  ;;  %v12096_v8 = vld [vmem:[#allocation2 + $0x38] sm:$0xff]   ;;  %v12958_v17 = vpop.f32.mrf.mxu0 }
 0x122   : > { %11556 = vmatmul.mubr.msk.bf16.gmra.mxu0 %vm1655_vm4, %v12080_v21 }
 0x123   : > { %11559 = vmatprep.mubr.msk.bf16.mxu0 %vm1655_vm4, %v12082_v27  ;;  %v12966_v22 = vpop.f32.mrf.mxu0  ;;  %v12087_v27 = vld [vmem:[#allocation2 + $0xd8] sm:$0xff]  }
 0x124   : > { %v12950_v24 = vpop.f32.mrf.mxu1 }
 0x125   : > { %v12970_v15 = vpop.f32.mrf.mxu0 }
 0x126   : > { %v12956_v61 = vpop.f32.mrf.mxu1 }
 0x128   : > { %11590 = vmatmul.mubr.msk.bf16.gmra.mxu1 %vm1655_vm4, %v12092_v23  ;;  %v12962_v21 = vpop.f32.mrf.mxu1  ;;  %v12089_v23 = vld [vmem:[#allocation2 + $0xe0] sm:$0xff]  }
 0x129   : > { %11593 = vmatprep.mubr.msk.bf16.mxu1 %vm1655_vm4, %v12094_v39 }
 0x12a   : > { %11560 = vmatmul.mubr.msk.bf16.gmra.mxu0 %vm1655_vm4, %v12084_v57  ;;  %v12968_v39 = vpop.f32.mrf.mxu1 }
 0x12b   : > { %11563 = vmatprep.mubr.msk.bf16.mxu0 %vm1655_vm4, %v12085_v4  ;;  %v12978_v4 = vpop.f32.mrf.mxu0 }
 0x12c   : > { %15465 = vst [vmem:[#allocation10_spill] sm:$0xff] %v12978_v4  ;;  %v2046_v4 = vadd.f32 %v12864_v62, %v12813_v19  ;;  %v12107_v19 = vld [vmem:[#allocation2 + $0x68] sm:$0xff]   ;;  %v12109_v62 = vld [vmem:[#allocation2 + $0x70] sm:$0xff]  }
 0x130   : > { %11594 = vmatmul.mubr.msk.bf16.gmra.mxu1 %vm1655_vm4, %v12096_v8  ;;  %v12091_v8 = vld [vmem:[#allocation2 + $0xe8] sm:$0xff]  }
 0x131   : > { %11597 = vmatprep.mubr.msk.bf16.mxu1 %vm1655_vm4, %v12098_v12  ;;  %v12093_v12 = vld [vmem:[#allocation2 + $0xf0] sm:$0xff]  }
 0x132   : > { %11564 = vmatmul.mubr.msk.bf16.gmra.mxu0 %vm1655_vm4, %v12087_v27 }
 0x133   : > { %11567 = vmatprep.mubr.msk.bf16.mxu0 %vm1655_vm4, %v12089_v23  ;;  %v2035_v23 = vadd.f32 %v12860_v58, %v12811_v13  ;;  %v2038_v13 = vadd.f32 %v12869_v1, %v12815_v25  ;;  %v12099_v25 = vld [vmem:[#allocation2 + $0x108] sm:$0xff]   ;;  %v12101_v1 = vld [vmem:[#allocation2 + $0x110] sm:$0xff]  }
 0x134   : > { %v12974_v57 = vpop.f32.mrf.mxu1 }
 0x136   : > { %v12980_v36 = vpop.f32.mrf.mxu1 }
 0x138   : > { %11598 = vmatmul.mubr.msk.bf16.gmra.mxu1 %vm1655_vm4, %v12100_v47  ;;  %v12988_v50 = vpop.f32.mrf.mxu1 }
 0x139   : > { %11601 = vmatprep.mubr.msk.bf16.mxu1 %vm1655_vm4, %v12102_v59 }
 0x13a   : > { %11568 = vmatmul.mubr.msk.bf16.gmra.mxu0 %vm1655_vm4, %v12091_v8  ;;  %v12097_v8 = vld [vmem:[#allocation2 + $0x100] sm:$0xff]  }
 0x13b   : > { %11571 = vmatprep.mubr.msk.bf16.mxu0 %vm1655_vm4, %v12093_v12  ;;  %v12998_v12 = vpop.f32.mrf.mxu1 }
 0x13d   : > { %v11417_v27 = vpop.f32.mrf.mxu0 }
 0x13e   : > { %v2489_v47 = vadd.f32 %v11417_v27, %v2043_v31  ;;  %v12095_v31 = vld [vmem:[#allocation2 + $0xf8] sm:$0xff]  }
 0x13f   : > { %v2360_v59 = vpop.f32.mrf.mxu0 }
 0x140   : > { %11602 = vmatmul.mubr.msk.bf16.gmra.mxu1 %vm1655_vm4, %v12104_v29  ;;  %2521 = vst.msk [vmem:[#allocation3 + $0x10] sm:$0xff] %vm1655_vm4, %v2489_v47  ;;  %v2487_v5 = vadd.f32 %v2360_v59, %v2035_v23  ;;  %v12111_v23 = vld [vmem:[#allocation2 + $0x78] sm:$0xff]   ;;  %v12113_v47 = vld [vmem:[#allocation2 + $0x80] sm:$0xff]   ;;  %v2059_v59 = vadd.f32 %v12875_v6, %v12824_v28 }
 0x141   : > { %11605 = vmatprep.mubr.msk.bf16.mxu1 %vm1655_vm4, %v12105_v53  ;;  %v11418_v55 = vpop.f32.mrf.mxu0  ;;  %v12103_v28 = vld [vmem:[#allocation2 + $0x118] sm:$0xff]  }
 0x142   : > { %2519 = vst.msk [vmem:[#allocation3] sm:$0xff] %vm1655_vm4, %v2487_v5  ;;  %v2490_v58 = vadd.f32 %v11418_v55, %v2046_v4  ;;  %11572 = vmatmul.mubr.msk.bf16.gmra.mxu0 %vm1655_vm4, %v12095_v31 }
 0x143   : > { %v2363_v27 = vpop.f32.mrf.mxu0  ;;  %11575 = vmatprep.mubr.msk.bf16.mxu0 %vm1655_vm4, %v12097_v8  ;;  %v2062_v8 = vadd.f32 %v12884_v26, %v12830_v34 }
 0x144   : > { %2522 = vst.msk [vmem:[#allocation3 + $0x18] sm:$0xff] %vm1655_vm4, %v2490_v58  ;;  %v2488_v29 = vadd.f32 %v2363_v27, %v2038_v13  ;;  %v2051_v13 = vadd.f32 %v12880_v16, %v12828_v32  ;;  %v12106_v27 = vld [vmem:[#allocation2 + $0x130] sm:$0xff]   ;;  %v2054_v32 = vadd.f32 %v12889_v37, %v12832_v40  ;;  %v12108_v40 = vld [vmem:[#allocation2 + $0x138] sm:$0xff]   ;;  %v12110_v37 = vld [vmem:[#allocation2 + $0x140] sm:$0xff]  }
 0x146   : > { %2520 = vst.msk [vmem:[#allocation3 + $0x8] sm:$0xff] %vm1655_vm4, %v2488_v29  ;;  %v13004_v53 = vpop.f32.mrf.mxu1 }
 0x148   : > { %11606 = vmatmul.mubr.msk.bf16.gmra.mxu1 %vm1655_vm4, %v12107_v19  ;;  %v13008_v4 = vpop.f32.mrf.mxu1 }
 0x149   : > { %11609 = vmatprep.mubr.msk.bf16.mxu1 %vm1655_vm4, %v12109_v62  ;;  %v12115_v62 = vld [vmem:[#allocation2 + $0x88] sm:$0xff]  }
 0x14a   : > { %11576 = vmatmul.mubr.msk.bf16.gmra.mxu0 %vm1655_vm4, %v12099_v25  ;;  %v13014_v55 = vpop.f32.mrf.mxu1 }
 0x14b   : > { %11579 = vmatprep.mubr.msk.bf16.mxu0 %vm1655_vm4, %v12101_v1 }
 0x14c   : > { %v13023_v29 = vpop.f32.mrf.mxu1 }
 0x150   : > { %v11421_v5 = vpop.f32.mrf.mxu0  ;;  %11610 = vmatmul.mubr.msk.bf16.gmra.mxu1 %vm1655_vm4, %v12111_v23 }
 0x151   : > { %v2493_v31 = vadd.f32 %v11421_v5, %v2059_v59  ;;  %11613 = vmatprep.mubr.msk.bf16.mxu1 %vm1655_vm4, %v12113_v47  ;;  %v2075_v47 = vadd.f32 %v12900_v38, %v12836_v42 }
 0x152   : > { %v2376_v58 = vpop.f32.mrf.mxu0  ;;  %11580 = vmatmul.mubr.msk.bf16.gmra.mxu0 %vm1655_vm4, %v12103_v28  ;;  %v2078_v28 = vadd.f32 %v12907_v63, %v12844_v48 }
 0x153   : > { %2525 = vst.msk [vmem:[#allocation3 + $0x30] sm:$0xff] %vm1655_vm4, %v2493_v31  ;;  %v2491_v6 = vadd.f32 %v2376_v58, %v2051_v13  ;;  %11619 = vmatprep.mubr.msk.bf16.mxu0 %vm1655_vm4, %v12106_v27  ;;  %v2067_v13 = vadd.f32 %v12905_v49, %v12842_v44  ;;  %v12114_v44 = vld [vmem:[#allocation2 + $0x150] sm:$0xff]  }
 0x154   : > { %v11422_v19 = vpop.f32.mrf.mxu0 }
 0x155   : > { %2523 = vst.msk [vmem:[#allocation3 + $0x20] sm:$0xff] %vm1655_vm4, %v2491_v6  ;;  %v2494_v16 = vadd.f32 %v11422_v19, %v2062_v8  ;;  %v12112_v6 = vld [vmem:[#allocation2 + $0x148] sm:$0xff]   ;;  %v2070_v19 = vadd.f32 %v12912_v14, %v12848_v51  ;;  %v2091_v51 = vadd.f32 %v12921_v45, %v12852_v54  ;;  %v2086_v45 = vadd.f32 %v12942_v30, %v12866_v0 }
 0x156   : > { %v2379_v25 = vpop.f32.mrf.mxu0  ;;  %v2107_v0 = vadd.f32 %v12950_v24, %v12872_v2 }
 0x157   : > { %2526 = vst.msk [vmem:[#allocation3 + $0x38] sm:$0xff] %vm1655_vm4, %v2494_v16  ;;  %v2492_v34 = vadd.f32 %v2379_v25, %v2054_v32  ;;  %v12116_v25 = vld [vmem:[#allocation2 + $0x158] sm:$0xff]  }
 0x158   : > { %v13031_v26 = vpop.f32.mrf.mxu1  ;;  %11614 = vmatmul.mubr.msk.bf16.gmra.mxu1 %vm1655_vm4, %v12115_v62 }
 0x159   : > { %2524 = vst.msk [vmem:[#allocation3 + $0x28] sm:$0xff] %vm1655_vm4, %v2492_v34 }
 0x15a   : > { %v13035_v1 = vpop.f32.mrf.mxu1  ;;  %11620 = vmatmul.mubr.msk.bf16.vlgmr.msra.gmra.mxu0 %vm1655_vm4, %v12108_v40  ;;  %v2083_v40 = vadd.f32 %v12925_v7, %v12858_v56 }
 0x15b   : > { %11623 = vmatprep.mubr.msk.bf16.mxu0 %vm1655_vm4, %v12110_v37  ;;  %v12117_v37 = vld [vmem:[#allocation2 + $0x160] sm:$0xff]  }
 0x15c   : > { %v13037_v23 = vpop.f32.mrf.mxu1 }
 0x15e   : > { %v13041_v59 = vpop.f32.mrf.mxu1 }
 0x15f   : > { %v11425_v5 = vpop.f32.mrf.mxu0 }
 0x160   : > { %v2497_v31 = vadd.f32 %v11425_v5, %v2075_v47  ;;  %v13047_v58 = vpop.f32.mrf.mxu1 }
 0x161   : > { %v2392_v8 = vpop.f32.mrf.mxu0 }
 0x162   : > { %2529 = vst.msk [vmem:[#allocation3 + $0x50] sm:$0xff] %vm1655_vm4, %v2497_v31  ;;  %v2495_v42 = vadd.f32 %v2392_v8, %v2067_v13  ;;  %v13052_v38 = vpop.f32.mrf.mxu1  ;;  %11624 = vmatmul.mubr.msk.bf16.gmra.mxu0 %vm1655_vm4, %v12112_v6  ;;  %v2094_v31 = vadd.f32 %v12936_v52, %v12862_v60  ;;  %v12118_v6 = vld [vmem:[#allocation2 + $0x168] sm:$0xff]  }
 0x163   : > { %v11426_v27 = vpop.f32.mrf.mxu0  ;;  %11627 = vmatprep.mubr.msk.bf16.mxu0 %vm1655_vm4, %v12114_v44 }
 0x164   : > { %2527 = vst.msk [vmem:[#allocation3 + $0x40] sm:$0xff] %vm1655_vm4, %v2495_v42  ;;  %v2498_v49 = vadd.f32 %v11426_v27, %v2078_v28  ;;  %v13057_v32 = vpop.f32.mrf.mxu1  ;;  %v12119_v27 = vld [vmem:[#allocation2 + $0x170] sm:$0xff]  }
 0x165   : > { %v2395_v16 = vpop.f32.mrf.mxu0 }
 0x166   : > { %2530 = vst.msk [vmem:[#allocation3 + $0x58] sm:$0xff] %vm1655_vm4, %v2498_v49  ;;  %v2496_v48 = vadd.f32 %v2395_v16, %v2070_v19  ;;  %v13060_v63 = vpop.f32.mrf.mxu1  ;;  %v2099_v49 = vadd.f32 %v12956_v61, %v12878_v11  ;;  %v2102_v11 = vadd.f32 %v12968_v39, %v12886_v35  ;;  %v12120_v61 = vld [vmem:[#allocation2 + $0x178] sm:$0xff]  }
 0x168   : > { %2528 = vst.msk [vmem:[#allocation3 + $0x48] sm:$0xff] %vm1655_vm4, %v2496_v48  ;;  %v13065_v62 = vpop.f32.mrf.mxu1 }
 0x16a   : > { %v13069_v14 = vpop.f32.mrf.mxu1  ;;  %v11429_v34 = vpop.f32.mrf.mxu0  ;;  %11628 = vmatmul.mubr.msk.bf16.gmra.mxu0 %vm1655_vm4, %v12116_v25  ;;  %v2110_v25 = vadd.f32 %v12962_v21, %v12882_v20 }
 0x16b   : > { %v2501_v47 = vadd.f32 %v11429_v34, %v2091_v51  ;;  %11631 = vmatprep.mubr.msk.bf16.mxu0 %vm1655_vm4, %v12117_v37 }
 0x16c   : > { %v13073_v5 = vpop.f32.mrf.mxu1  ;;  %v2408_v13 = vpop.f32.mrf.mxu0 }
 0x16d   : > { %2533 = vst.msk [vmem:[#allocation3 + $0x70] sm:$0xff] %vm1655_vm4, %v2501_v47  ;;  %v2499_v8 = vadd.f32 %v2408_v13, %v2083_v40  ;;  %v12121_v47 = vld [vmem:[#allocation2 + $0x180] sm:$0xff]  }
 0x16e   : > { %v13078_v28 = vpop.f32.mrf.mxu1  ;;  %v11430_v54 = vpop.f32.mrf.mxu0 }
 0x16f   : > { %2531 = vst.msk [vmem:[#allocation3 + $0x60] sm:$0xff] %vm1655_vm4, %v2499_v8  ;;  %v2502_v56 = vadd.f32 %v11430_v54, %v2094_v31  ;;  %v2123_v31 = vadd.f32 %v12974_v57, %v12896_v43  ;;  %v2115_v8 = vadd.f32 %v12980_v36, %v12903_v46  ;;  %v12122_v43 = vld [vmem:[#allocation2 + $0x188] sm:$0xff]  }
 0x170   : > { %v13085_v7 = vpop.f32.mrf.mxu1  ;;  %v2411_v42 = vpop.f32.mrf.mxu0 }
 0x171   : > { %2534 = vst.msk [vmem:[#allocation3 + $0x78] sm:$0xff] %vm1655_vm4, %v2502_v56  ;;  %v2500_v60 = vadd.f32 %v2411_v42, %v2086_v45  ;;  %v2126_v42 = vadd.f32 %v12988_v50, %v12909_v9 }
 0x172   : > { %v13088_v52 = vpop.f32.mrf.mxu1  ;;  %11632 = vmatmul.mubr.msk.bf16.gmra.mxu0 %vm1655_vm4, %v12118_v6  ;;  %v12123_v6 = vld [vmem:[#allocation2 + $0x190] sm:$0xff]  }
 0x173   : > { %2532 = vst.msk [vmem:[#allocation3 + $0x68] sm:$0xff] %vm1655_vm4, %v2500_v60  ;;  %11635 = vmatprep.mubr.msk.bf16.mxu0 %vm1655_vm4, %v12119_v27 }
 0x174   : > { %v13091_v19 = vpop.f32.mrf.mxu1  ;;  %v11433_v30 = vpop.f32.mrf.mxu0 }
 0x175   : > { %v2505_v16 = vadd.f32 %v11433_v30, %v2107_v0  ;;  %v2118_v0 = vadd.f32 %v12998_v12, %v12919_v33  ;;  %v2139_v33 = vadd.f32 %v13004_v53, %v12929_v10  ;;  %v12124_v12 = vld [vmem:[#allocation2 + $0x198] sm:$0xff]  }
 0x176   : > { %v13095_v44 = vpop.f32.mrf.mxu1  ;;  %v2424_v48 = vpop.f32.mrf.mxu0 }
 0x177   : > { %2537 = vst.msk [vmem:[#allocation3 + $0x90] sm:$0xff] %vm1655_vm4, %v2505_v16  ;;  %v2503_v2 = vadd.f32 %v2424_v48, %v2099_v49  ;;  %v12125_v48 = vld [vmem:[#allocation2 + $0x1a0] sm:$0xff]  }
 0x178   : > { %v13101_v51 = vpop.f32.mrf.mxu1  ;;  %v11434_v24 = vpop.f32.mrf.mxu0 }
 0x179   : > { %2535 = vst.msk [vmem:[#allocation3 + $0x80] sm:$0xff] %vm1655_vm4, %v2503_v2  ;;  %v2506_v40 = vadd.f32 %v11434_v24, %v2110_v25  ;;  %v2131_v2 = vadd.f32 %v13008_v4, %v12940_v18  ;;  %v2134_v18 = vadd.f32 %v13023_v29, %v12954_v3  ;;  %v2147_v29 = vadd.f32 %v13035_v1, %v12966_v22 }
 0x17a   : > { %v13106_v34 = vpop.f32.mrf.mxu1  ;;  %v2427_v37 = vpop.f32.mrf.mxu0  ;;  %11636 = vmatmul.mubr.msk.bf16.gmra.mxu0 %vm1655_vm4, %v12120_v61 }
 0x17b   : > { %2538 = vst.msk [vmem:[#allocation3 + $0x98] sm:$0xff] %vm1655_vm4, %v2506_v40  ;;  %v2504_v20 = vadd.f32 %v2427_v37, %v2102_v11  ;;  %11639 = vmatprep.mubr.msk.bf16.mxu0 %vm1655_vm4, %v12121_v47  ;;  %v2142_v40 = vadd.f32 %v13014_v55, %v12944_v41  ;;  %v12126_v55 = vld [vmem:[#allocation2 + $0x1a8] sm:$0xff]  }
 0x17c   : > { %v13111_v13 = vpop.f32.mrf.mxu1 }
 0x17d   : > { %2536 = vst.msk [vmem:[#allocation3 + $0x88] sm:$0xff] %vm1655_vm4, %v2504_v20  ;;  %v11437_v35 = vpop.f32.mrf.mxu0 }
 0x17e   : > { %v13114_v21 = vpop.f32.mrf.mxu1  ;;  %v2509_v54 = vadd.f32 %v11437_v35, %v2123_v31  ;;  %v2155_v35 = vadd.f32 %v13031_v26, %v12958_v17  ;;  %v15466_v26 = vld [vmem:[#allocation10_spill] sm:$0xff] }
 0x17f   : > { %v2440_v45 = vpop.f32.mrf.mxu0 }
 0x180   : > { %v13121_v39 = vpop.f32.mrf.mxu1  ;;  %2541 = vst.msk [vmem:[#allocation3 + $0xb0] sm:$0xff] %vm1655_vm4, %v2509_v54  ;;  %v2507_v57 = vadd.f32 %v2440_v45, %v2115_v8 }
 0x181   : > { %v11438_v60 = vpop.f32.mrf.mxu0 }
 0x182   : > { %v13125_v56 = vpop.f32.mrf.mxu1  ;;  %2539 = vst.msk [vmem:[#allocation3 + $0xa0] sm:$0xff] %vm1655_vm4, %v2507_v57  ;;  %v2510_v36 = vadd.f32 %v11438_v60, %v2126_v42  ;;  %11640 = vmatmul.mubr.msk.bf16.gmra.mxu0 %vm1655_vm4, %v12122_v43  ;;  %v2158_v43 = vadd.f32 %v13037_v23, %v12970_v15 }
 0x183   : > { %v2443_v46 = vpop.f32.mrf.mxu0  ;;  %11643 = vmatprep.mubr.msk.bf16.mxu0 %vm1655_vm4, %v12123_v6  ;;  %v2150_v6 = vadd.f32 %v13041_v59, %v15466_v26  ;;  %v2557_v26 = vld [vmem:[#allocation3 + $0x30] sm:$0xff] }
 0x184   : > { %v13130_v27 = vpop.f32.mrf.mxu1  ;;  %2542 = vst.msk [vmem:[#allocation3 + $0xb8] sm:$0xff] %vm1655_vm4, %v2510_v36  ;;  %v2508_v50 = vadd.f32 %v2443_v46, %v2118_v0 }
 0x186   : > { %v13135_v30 = vpop.f32.mrf.mxu1  ;;  %2540 = vst.msk [vmem:[#allocation3 + $0xa8] sm:$0xff] %vm1655_vm4, %v2508_v50 }
 0x188   : > { %v13140_v9 = vpop.f32.mrf.mxu1  ;;  %v11441_v16 = vpop.f32.mrf.mxu0 }
 0x189   : > { %v2513_v24 = vadd.f32 %v11441_v16, %v2139_v33 }
 0x18a   : > { %v13143_v49 = vpop.f32.mrf.mxu1  ;;  %v2456_v11 = vpop.f32.mrf.mxu0  ;;  %11644 = vmatmul.mubr.msk.bf16.gmra.mxu0 %vm1655_vm4, %v12124_v12 }
 0x18b   : > { %2545 = vst.msk [vmem:[#allocation3 + $0xd0] sm:$0xff] %vm1655_vm4, %v2513_v24  ;;  %v2511_v10 = vadd.f32 %v2456_v11, %v2131_v2  ;;  %11647 = vmatprep.mubr.msk.bf16.mxu0 %vm1655_vm4, %v12125_v48  ;;  %v2553_v48 = vld [vmem:[#allocation3 + $0x10] sm:$0xff] }
 0x18c   : > { %v13147_v25 = vpop.f32.mrf.mxu1  ;;  %v11442_v53 = vpop.f32.mrf.mxu0 }
 0x18d   : > { %2543 = vst.msk [vmem:[#allocation3 + $0xc0] sm:$0xff] %vm1655_vm4, %v2511_v10  ;;  %v2514_v4 = vadd.f32 %v11442_v53, %v2142_v40  ;;  %v2551_v53 = vld [vmem:[#allocation3] sm:$0xff] }
 0x18e   : > { %v13151_v61 = vpop.f32.mrf.mxu1  ;;  %v2459_v47 = vpop.f32.mrf.mxu0 }
 0x18f   : > { %2546 = vst.msk [vmem:[#allocation3 + $0xd8] sm:$0xff] %vm1655_vm4, %v2514_v4  ;;  %v2512_v41 = vadd.f32 %v2459_v47, %v2134_v18 }
 0x190   : > { %v13158_v37 = vpop.f32.mrf.mxu1 }
 0x191   : > { %2544 = vst.msk [vmem:[#allocation3 + $0xc8] sm:$0xff] %vm1655_vm4, %v2512_v41 }
 0x192   : > { %v13163_v20 = vpop.f32.mrf.mxu1  ;;  %v11445_v3 = vpop.f32.mrf.mxu0  ;;  %11648 = vmatmul.mubr.msk.bf16.gmra.mxu0 %vm1655_vm4, %v12126_v55  ;;  %v2554_v55 = vld [vmem:[#allocation3 + $0x18] sm:$0xff] }
 0x193   : > { %v2517_v54 = vadd.f32 %v11445_v3, %v2155_v35 }
 0x194   : > { %v13166_v31 = vpop.f32.mrf.mxu1  ;;  %v2472_v42 = vpop.f32.mrf.mxu0 }
 0x195   : > { %2549 = vst.msk [vmem:[#allocation3 + $0xf0] sm:$0xff] %vm1655_vm4, %v2517_v54  ;;  %v2515_v57 = vadd.f32 %v2472_v42, %v2147_v29  ;;  %v2552_v54 = vld [vmem:[#allocation3 + $0x8] sm:$0xff] }
 0x196   : > { %v13171_v8 = vpop.f32.mrf.mxu1  ;;  %v11446_v17 = vpop.f32.mrf.mxu0 }
 0x197   : > { %2547 = vst.msk [vmem:[#allocation3 + $0xe0] sm:$0xff] %vm1655_vm4, %v2515_v57  ;;  %v2518_v0 = vadd.f32 %v11446_v17, %v2158_v43 }
 0x198   : > { %v13176_v45 = vpop.f32.mrf.mxu1  ;;  %v2475_v1 = vpop.f32.mrf.mxu0 }
 0x199   : > { %2550 = vst.msk [vmem:[#allocation3 + $0xf8] sm:$0xff] %vm1655_vm4, %v2518_v0  ;;  %v2516_v36 = vadd.f32 %v2475_v1, %v2150_v6 }
 0x19a   : > { %v13181_v60 = vpop.f32.mrf.mxu1  ;;  %v11485_v15 = vpop.f32.mrf.mxu0 }
 0x19b   : > { %2548 = vst.msk [vmem:[#allocation3 + $0xe8] sm:$0xff] %vm1655_vm4, %v2516_v36  ;;  %v3118_v23 = vadd.f32 %v11485_v15, %v13047_v58  ;;  %v2555_v15 = vld [vmem:[#allocation3 + $0x20] sm:$0xff] }
 0x19c   : > { %v13186_v22 = vpop.f32.mrf.mxu1  ;;  %v3109_v50 = vpop.f32.mrf.mxu0 }
 0x19d   : > { %v3110_v59 = vadd.f32 %v3109_v50, %v13052_v38 }
 0x19e   : > { %v13189_v46 = vpop.f32.mrf.mxu1  ;;  %v11486_v16 = vpop.f32.mrf.mxu0 }
 0x19f   : > { %v3121_v24 = vadd.f32 %v11486_v16, %v13057_v32 }
 0x1a0   : > { %v11519_v33 = vpop.f32.mrf.mxu1  ;;  %v3112_v10 = vpop.f32.mrf.mxu0 }
 0x1a1   : > { %v3565_v12 = vadd.f32 %v11519_v33, %v3118_v23  ;;  %v3113_v4 = vadd.f32 %v3112_v10, %v13060_v63 }
 0x1a2   : > { %v3436_v2 = vpop.f32.mrf.mxu1  ;;  %v11489_v41 = vpop.f32.mrf.mxu0 }
 0x1a3   : > { %v3597_v11 = vadd.f32 %v3565_v12, %v2553_v48  ;;  %v3563_v40 = vadd.f32 %v3436_v2, %v3110_v59  ;;  %v3134_v35 = vadd.f32 %v11489_v41, %v13065_v62  ;;  %v2558_v12 = vld [vmem:[#allocation3 + $0x38] sm:$0xff] }
 0x1a4   : > { %v11520_v18 = vpop.f32.mrf.mxu1  ;;  %v3125_v29 = vpop.f32.mrf.mxu0 }
 0x1a5   : > { %3629 = vst.msk [vmem:[#allocation3 + $0x10] sm:$0xff] %vm1655_vm4, %v3597_v11  ;;  %v3595_v58 = vadd.f32 %v3563_v40, %v2551_v53  ;;  %v3566_v47 = vadd.f32 %v11520_v18, %v3121_v24  ;;  %v3126_v43 = vadd.f32 %v3125_v29, %v13069_v14  ;;  %v2556_v11 = vld [vmem:[#allocation3 + $0x28] sm:$0xff] }
 0x1a6   : > { %v3439_v38 = vpop.f32.mrf.mxu1  ;;  %v11490_v17 = vpop.f32.mrf.mxu0 }
 0x1a7   : > { %3627 = vst.msk [vmem:[#allocation3] sm:$0xff] %vm1655_vm4, %v3595_v58  ;;  %v3598_v3 = vadd.f32 %v3566_v47, %v2554_v55  ;;  %v3564_v32 = vadd.f32 %v3439_v38, %v3113_v4  ;;  %v3137_v0 = vadd.f32 %v11490_v17, %v13073_v5  ;;  %v2561_v4 = vld [vmem:[#allocation3 + $0x50] sm:$0xff]  ;;  %v2559_v38 = vld [vmem:[#allocation3 + $0x40] sm:$0xff]  ;;  %v2560_v17 = vld [vmem:[#allocation3 + $0x48] sm:$0xff] }
 0x1a8   : > { %v11523_v42 = vpop.f32.mrf.mxu1  ;;  %v3128_v36 = vpop.f32.mrf.mxu0 }
 0x1a9   : > { %3630 = vst.msk [vmem:[#allocation3 + $0x18] sm:$0xff] %vm1655_vm4, %v3598_v3  ;;  %v3596_v63 = vadd.f32 %v3564_v32, %v2552_v54  ;;  %v3569_v57 = vadd.f32 %v11523_v42, %v3134_v35  ;;  %v3129_v50 = vadd.f32 %v3128_v36, %v13078_v28  ;;  %v2562_v54 = vld [vmem:[#allocation3 + $0x58] sm:$0xff] }
 0x1aa   : > { %v3452_v6 = vpop.f32.mrf.mxu1  ;;  %v11493_v59 = vpop.f32.mrf.mxu0 }
 0x1ab   : > { %3628 = vst.msk [vmem:[#allocation3 + $0x8] sm:$0xff] %vm1655_vm4, %v3596_v63  ;;  %v3601_v62 = vadd.f32 %v3569_v57, %v2557_v26  ;;  %v3567_v1 = vadd.f32 %v3452_v6, %v3126_v43  ;;  %v3150_v48 = vadd.f32 %v11493_v59, %v13085_v7 }
 0x1ac   : > { %v11524_v23 = vpop.f32.mrf.mxu1  ;;  %v3141_v24 = vpop.f32.mrf.mxu0 }
 0x1ad   : > { %3633 = vst.msk [vmem:[#allocation3 + $0x30] sm:$0xff] %vm1655_vm4, %v3601_v62  ;;  %v3599_v14 = vadd.f32 %v3567_v1, %v2555_v15  ;;  %v3570_v33 = vadd.f32 %v11524_v23, %v3137_v0  ;;  %v3142_v10 = vadd.f32 %v3141_v24, %v13088_v52  ;;  %v2565_v1 = vld [vmem:[#allocation3 + $0x70] sm:$0xff] }
 0x1ae   : > { %v3455_v16 = vpop.f32.mrf.mxu1  ;;  %v11494_v18 = vpop.f32.mrf.mxu0 }
 0x1af   : > { %3631 = vst.msk [vmem:[#allocation3 + $0x20] sm:$0xff] %vm1655_vm4, %v3599_v14  ;;  %v3602_v5 = vadd.f32 %v3570_v33, %v2558_v12  ;;  %v3568_v2 = vadd.f32 %v3455_v16, %v3129_v50  ;;  %v3153_v47 = vadd.f32 %v11494_v18, %v13091_v19  ;;  %v2563_v14 = vld [vmem:[#allocation3 + $0x60] sm:$0xff] }
 0x1b0   : > { %v11527_v40 = vpop.f32.mrf.mxu1  ;;  %v3144_v55 = vpop.f32.mrf.mxu0 }
 0x1b1   : > { %3634 = vst.msk [vmem:[#allocation3 + $0x38] sm:$0xff] %vm1655_vm4, %v3602_v5  ;;  %v3600_v28 = vadd.f32 %v3568_v2, %v2556_v11  ;;  %v3573_v53 = vadd.f32 %v11527_v40, %v3150_v48  ;;  %v3145_v3 = vadd.f32 %v3144_v55, %v13095_v44  ;;  %v2566_v48 = vld [vmem:[#allocation3 + $0x78] sm:$0xff]  ;;  %v2564_v40 = vld [vmem:[#allocation3 + $0x68] sm:$0xff]  ;;  %v2567_v55 = vld [vmem:[#allocation3 + $0x80] sm:$0xff] }
 0x1b2   : > { %v3468_v58 = vpop.f32.mrf.mxu1  ;;  %v11497_v29 = vpop.f32.mrf.mxu0 }
 0x1b3   : > { %3632 = vst.msk [vmem:[#allocation3 + $0x28] sm:$0xff] %vm1655_vm4, %v3600_v28  ;;  %v3605_v7 = vadd.f32 %v3573_v53, %v2561_v4  ;;  %v3571_v41 = vadd.f32 %v3468_v58, %v3142_v10  ;;  %v3166_v43 = vadd.f32 %v11497_v29, %v13101_v51  ;;  %v2569_v4 = vld [vmem:[#allocation3 + $0x90] sm:$0xff] }
 0x1b4   : > { %v11528_v35 = vpop.f32.mrf.mxu1  ;;  %v3157_v57 = vpop.f32.mrf.mxu0 }
 0x1b5   : > { %3637 = vst.msk [vmem:[#allocation3 + $0x50] sm:$0xff] %vm1655_vm4, %v3605_v7  ;;  %v3603_v52 = vadd.f32 %v3571_v41, %v2559_v38  ;;  %v3574_v32 = vadd.f32 %v11528_v35, %v3153_v47  ;;  %v3158_v6 = vadd.f32 %v3157_v57, %v13106_v34 }
 0x1b6   : > { %v3471_v42 = vpop.f32.mrf.mxu1  ;;  %v11498_v62 = vpop.f32.mrf.mxu0 }
 0x1b7   : > { %3635 = vst.msk [vmem:[#allocation3 + $0x40] sm:$0xff] %vm1655_vm4, %v3603_v52  ;;  %v3606_v19 = vadd.f32 %v3574_v32, %v2562_v54  ;;  %v3572_v63 = vadd.f32 %v3471_v42, %v3145_v3  ;;  %v3169_v15 = vadd.f32 %v11498_v62, %v13111_v13  ;;  %v2570_v32 = vld [vmem:[#allocation3 + $0x98] sm:$0xff] }
 0x1b8   : > { %v11531_v26 = vpop.f32.mrf.mxu1  ;;  %v3160_v50 = vpop.f32.mrf.mxu0 }
 0x1b9   : > { %3638 = vst.msk [vmem:[#allocation3 + $0x58] sm:$0xff] %vm1655_vm4, %v3606_v19  ;;  %v3604_v44 = vadd.f32 %v3572_v63, %v2560_v17  ;;  %v3577_v0 = vadd.f32 %v11531_v26, %v3166_v43  ;;  %v3161_v59 = vadd.f32 %v3160_v50, %v13114_v21  ;;  %v2568_v19 = vld [vmem:[#allocation3 + $0x88] sm:$0xff] }
 0x1ba   : > { %v3484_v36 = vpop.f32.mrf.mxu1  ;;  %v11501_v16 = vpop.f32.mrf.mxu0 }
 0x1bb   : > { %3636 = vst.msk [vmem:[#allocation3 + $0x48] sm:$0xff] %vm1655_vm4, %v3604_v44  ;;  %v3609_v51 = vadd.f32 %v3577_v0, %v2565_v1  ;;  %v3575_v23 = vadd.f32 %v3484_v36, %v3158_v6  ;;  %v3182_v2 = vadd.f32 %v11501_v16, %v13121_v39  ;;  %v2573_v6 = vld [vmem:[#allocation3 + $0xb0] sm:$0xff]  ;;  %v2571_v36 = vld [vmem:[#allocation3 + $0xa0] sm:$0xff]  ;;  %v2572_v16 = vld [vmem:[#allocation3 + $0xa8] sm:$0xff] }
 0x1bc   : > { %v11532_v33 = vpop.f32.mrf.mxu1  ;;  %v3173_v11 = vpop.f32.mrf.mxu0 }
 0x1bd   : > { %3641 = vst.msk [vmem:[#allocation3 + $0x70] sm:$0xff] %vm1655_vm4, %v3609_v51  ;;  %v3607_v34 = vadd.f32 %v3575_v23, %v2563_v14  ;;  %v3578_v12 = vadd.f32 %v11532_v33, %v3169_v15  ;;  %v3174_v28 = vadd.f32 %v3173_v11, %v13125_v56  ;;  %v2574_v14 = vld [vmem:[#allocation3 + $0xb8] sm:$0xff] }
 0x1be   : > { %v3487_v5 = vpop.f32.mrf.mxu1  ;;  %v11502_v18 = vpop.f32.mrf.mxu0 }
 0x1bf   : > { %3639 = vst.msk [vmem:[#allocation3 + $0x60] sm:$0xff] %vm1655_vm4, %v3607_v34  ;;  %v3610_v13 = vadd.f32 %v3578_v12, %v2566_v48  ;;  %v3576_v24 = vadd.f32 %v3487_v5, %v3161_v59  ;;  %v3185_v47 = vadd.f32 %v11502_v18, %v13130_v27 }
 0x1c0   : > { %v11535_v10 = vpop.f32.mrf.mxu1  ;;  %v3176_v41 = vpop.f32.mrf.mxu0 }
 0x1c1   : > { %3642 = vst.msk [vmem:[#allocation3 + $0x78] sm:$0xff] %vm1655_vm4, %v3610_v13  ;;  %v3608_v21 = vadd.f32 %v3576_v24, %v2564_v40  ;;  %v3581_v53 = vadd.f32 %v11535_v10, %v3182_v2  ;;  %v3177_v35 = vadd.f32 %v3176_v41, %v13135_v30  ;;  %v2577_v24 = vld [vmem:[#allocation3 + $0xd0] sm:$0xff] }
 0x1c2   : > { %v3500_v58 = vpop.f32.mrf.mxu1  ;;  %v11505_v52 = vpop.f32.mrf.mxu0 }
 0x1c3   : > { %3640 = vst.msk [vmem:[#allocation3 + $0x68] sm:$0xff] %vm1655_vm4, %v3608_v21  ;;  %v3613_v39 = vadd.f32 %v3581_v53, %v2569_v4  ;;  %v3579_v7 = vadd.f32 %v3500_v58, %v3174_v28  ;;  %v3198_v54 = vadd.f32 %v11505_v52, %v13140_v9  ;;  %v2575_v21 = vld [vmem:[#allocation3 + $0xc0] sm:$0xff] }
 0x1c4   : > { %v11536_v38 = vpop.f32.mrf.mxu1  ;;  %v3189_v43 = vpop.f32.mrf.mxu0 }
 0x1c5   : > { %3645 = vst.msk [vmem:[#allocation3 + $0x90] sm:$0xff] %vm1655_vm4, %v3613_v39  ;;  %v3611_v56 = vadd.f32 %v3579_v7, %v2567_v55  ;;  %v3582_v3 = vadd.f32 %v11536_v38, %v3185_v47  ;;  %v3190_v57 = vadd.f32 %v3189_v43, %v13143_v49  ;;  %v2578_v47 = vld [vmem:[#allocation3 + $0xd8] sm:$0xff]  ;;  %v2576_v38 = vld [vmem:[#allocation3 + $0xc8] sm:$0xff]  ;;  %v2579_v43 = vld [vmem:[#allocation3 + $0xe0] sm:$0xff] }
 0x1c6   : > { %v3503_v29 = vpop.f32.mrf.mxu1  ;;  %v11506_v26 = vpop.f32.mrf.mxu0 }
 0x1c7   : > { %3643 = vst.msk [vmem:[#allocation3 + $0x80] sm:$0xff] %vm1655_vm4, %v3611_v56  ;;  %v3614_v27 = vadd.f32 %v3582_v3, %v2570_v32  ;;  %v3580_v42 = vadd.f32 %v3503_v29, %v3177_v35  ;;  %v3201_v0 = vadd.f32 %v11506_v26, %v13147_v25  ;;  %v2581_v32 = vld [vmem:[#allocation3 + $0xf0] sm:$0xff] }
 0x1c8   : > { %v11539_v63 = vpop.f32.mrf.mxu1  ;;  %v3192_v1 = vpop.f32.mrf.mxu0 }
 0x1c9   : > { %3646 = vst.msk [vmem:[#allocation3 + $0x98] sm:$0xff] %vm1655_vm4, %v3614_v27  ;;  %v3612_v30 = vadd.f32 %v3580_v42, %v2568_v19  ;;  %v3585_v17 = vadd.f32 %v11539_v63, %v3198_v54  ;;  %v3193_v51 = vadd.f32 %v3192_v1, %v13151_v61 }
 0x1ca   : > { %v3516_v44 = vpop.f32.mrf.mxu1  ;;  %v11509_v50 = vpop.f32.mrf.mxu0 }
 0x1cb   : > { %3644 = vst.msk [vmem:[#allocation3 + $0x88] sm:$0xff] %vm1655_vm4, %v3612_v30  ;;  %v3617_v9 = vadd.f32 %v3585_v17, %v2573_v6  ;;  %v3583_v62 = vadd.f32 %v3516_v44, %v3190_v57  ;;  %v3214_v59 = vadd.f32 %v11509_v50, %v13158_v37  ;;  %v2582_v17 = vld [vmem:[#allocation3 + $0xf8] sm:$0xff] }
 0x1cc   : > { %v11540_v15 = vpop.f32.mrf.mxu1  ;;  %v3205_v12 = vpop.f32.mrf.mxu0 }
 0x1cd   : > { %3649 = vst.msk [vmem:[#allocation3 + $0xb0] sm:$0xff] %vm1655_vm4, %v3617_v9  ;;  %v3615_v49 = vadd.f32 %v3583_v62, %v2571_v36  ;;  %v3586_v23 = vadd.f32 %v11540_v15, %v3201_v0  ;;  %v3206_v5 = vadd.f32 %v3205_v12, %v13163_v20  ;;  %v2580_v0 = vld [vmem:[#allocation3 + $0xe8] sm:$0xff] }
 0x1ce   : > { %v3519_v33 = vpop.f32.mrf.mxu1  ;;  %v11510_v13 = vpop.f32.mrf.mxu0 }
 0x1cf   : > { %3647 = vst.msk [vmem:[#allocation3 + $0xa0] sm:$0xff] %vm1655_vm4, %v3615_v49  ;;  %v3618_v25 = vadd.f32 %v3586_v23, %v2574_v14  ;;  %v3584_v34 = vadd.f32 %v3519_v33, %v3193_v51  ;;  %v3217_v40 = vadd.f32 %v11510_v13, %v13166_v31 }
 0x1d0   : > { %v11543_v48 = vpop.f32.mrf.mxu1  ;;  %v3208_v28 = vpop.f32.mrf.mxu0 }
 0x1d1   : > { %3650 = vst.msk [vmem:[#allocation3 + $0xb8] sm:$0xff] %vm1655_vm4, %v3618_v25  ;;  %v3616_v61 = vadd.f32 %v3584_v34, %v2572_v16  ;;  %v3589_v2 = vadd.f32 %v11543_v48, %v3214_v59  ;;  %v3209_v18 = vadd.f32 %v3208_v28, %v13171_v8 }
 0x1d2   : > { %v3532_v11 = vpop.f32.mrf.mxu1  ;;  %v11513_v58 = vpop.f32.mrf.mxu0 }
 0x1d3   : > { %3648 = vst.msk [vmem:[#allocation3 + $0xa8] sm:$0xff] %vm1655_vm4, %v3616_v61  ;;  %v3621_v37 = vadd.f32 %v3589_v2, %v2577_v24  ;;  %v3587_v10 = vadd.f32 %v3532_v11, %v3206_v5  ;;  %v3230_v7 = vadd.f32 %v11513_v58, %v13176_v45 }
 0x1d4   : > { %v11544_v53 = vpop.f32.mrf.mxu1  ;;  %v3221_v55 = vpop.f32.mrf.mxu0 }
 0x1d5   : > { %3653 = vst.msk [vmem:[#allocation3 + $0xd0] sm:$0xff] %vm1655_vm4, %v3621_v37  ;;  %v3619_v20 = vadd.f32 %v3587_v10, %v2575_v21  ;;  %v3590_v4 = vadd.f32 %v11544_v53, %v3217_v40  ;;  %v3222_v56 = vadd.f32 %v3221_v55, %v13181_v60 }
 0x1d6   : > { %v3535_v39 = vpop.f32.mrf.mxu1  ;;  %v11514_v52 = vpop.f32.mrf.mxu0 }
 0x1d7   : > { %3651 = vst.msk [vmem:[#allocation3 + $0xc0] sm:$0xff] %vm1655_vm4, %v3619_v20  ;;  %v3622_v31 = vadd.f32 %v3590_v4, %v2578_v47  ;;  %v3588_v41 = vadd.f32 %v3535_v39, %v3209_v18  ;;  %v3233_v54 = vadd.f32 %v11514_v52, %v13186_v22 }
 0x1d8   : > { %v11547_v35 = vpop.f32.mrf.mxu1  ;;  %v3224_v42 = vpop.f32.mrf.mxu0 }
 0x1d9   : > { %3654 = vst.msk [vmem:[#allocation3 + $0xd8] sm:$0xff] %vm1655_vm4, %v3622_v31  ;;  %v3620_v8 = vadd.f32 %v3588_v41, %v2576_v38  ;;  %v3593_v3 = vadd.f32 %v11547_v35, %v3230_v7  ;;  %v3225_v63 = vadd.f32 %v3224_v42, %v13189_v46 }
 0x1da   : > { %v3548_v29 = vpop.f32.mrf.mxu1  ;;  %v11553_v30 = vpop.f32.mrf.mxu0 }
 0x1db   : > { %3652 = vst.msk [vmem:[#allocation3 + $0xc8] sm:$0xff] %vm1655_vm4, %v3620_v8  ;;  %v3625_v45 = vadd.f32 %v3593_v3, %v2581_v32  ;;  %v3591_v27 = vadd.f32 %v3548_v29, %v3222_v56 }
 0x1dc   : > { %v11548_v19 = vpop.f32.mrf.mxu1  ;;  %v3925_v44 = vpop.f32.mrf.mxu0 }
 0x1dd   : > { %3657 = vst.msk [vmem:[#allocation3 + $0xf0] sm:$0xff] %vm1655_vm4, %v3625_v45  ;;  %v3623_v60 = vadd.f32 %v3591_v27, %v2579_v43  ;;  %v3594_v57 = vadd.f32 %v11548_v19, %v3233_v54 }
 0x1de   : > { %v3551_v26 = vpop.f32.mrf.mxu1  ;;  %v11554_v1 = vpop.f32.mrf.mxu0 }
 0x1df   : > { %3655 = vst.msk [vmem:[#allocation3 + $0xe0] sm:$0xff] %vm1655_vm4, %v3623_v60  ;;  %v3626_v6 = vadd.f32 %v3594_v57, %v2582_v17  ;;  %v3592_v22 = vadd.f32 %v3551_v26, %v3225_v63  ;;  %v3659_v57 = vld [vmem:[#allocation3] sm:$0xff] }
 0x1e0   : > { %v11587_v9 = vpop.f32.mrf.mxu1  ;;  %v3928_v46 = vpop.f32.mrf.mxu0 }
 0x1e1   : > { %3658 = vst.msk [vmem:[#allocation3 + $0xf8] sm:$0xff] %vm1655_vm4, %v3626_v6  ;;  %v3624_v62 = vadd.f32 %v3592_v22, %v2580_v0  ;;  %v4226_v27 = vadd.f32 %v11587_v9, %v11553_v30 }
 0x1e2   : > { %v4217_v36 = vpop.f32.mrf.mxu1  ;;  %v11557_v51 = vpop.f32.mrf.mxu0 }
 0x1e3   : > { %3656 = vst.msk [vmem:[#allocation3 + $0xe8] sm:$0xff] %vm1655_vm4, %v3624_v62  ;;  %v4218_v45 = vadd.f32 %v4217_v36, %v3925_v44  ;;  %v3662_v44 = vld [vmem:[#allocation3 + $0x18] sm:$0xff] }
 0x1e4   : > { %v11588_v15 = vpop.f32.mrf.mxu1  ;;  %v3941_v49 = vpop.f32.mrf.mxu0 }
 0x1e5   : > { %v4229_v63 = vadd.f32 %v11588_v15, %v11554_v1  ;;  %v3660_v15 = vld [vmem:[#allocation3 + $0x8] sm:$0xff] }
 0x1e6   : > { %v4220_v23 = vpop.f32.mrf.mxu1  ;;  %v13256_v50 = vpop.f32.mrf.mxu0 }
 0x1e7   : > { %v4221_v6 = vadd.f32 %v4220_v23, %v3928_v46  ;;  %v10564_v46 = vld [vmem:[%s15429_s2 + $0x2] sm:$0x3]  ;;  %v6450_v23 = vld [vmem:[%s15429_s2] sm:$0x3] }
 0x1e8   : > { %v13258_v14 = vpop.f32.mrf.mxu0  ;;  %v11591_v33 = vpop.f32.mrf.mxu1  ;;  %11966 = vmatprep.subr.msk.bf16.mxu1 %vm1704_vm0, %v10564_v46  ;;  %11967 = vmatprep.subr.msk.bf16.mxu0 %vm1704_vm0, %v6450_v23 }
 0x1e9   : > { %v4242_v36 = vadd.f32 %v11591_v33, %v11557_v51  ;;  %v6906_v33 = vsel %vm1704_vm0, %v6450_v23, 0 }
 0x1ea   : > { %v13260_v59 = vpop.f32.mrf.mxu0  ;;  %v4233_v34 = vpop.f32.mrf.mxu1  ;;  %11686 = vmatpush3.bf16.msra.mxu0 %v6906_v33 }
 0x1ec   : > { %v13262_v25 = vpop.f32.mrf.mxu0  ;;  %v13268_v48 = vpop.f32.mrf.mxu1 }
 0x1ee   : > { %v13264_v12 = vpop.f32.mrf.mxu0  ;;  %v13274_v2 = vpop.f32.mrf.mxu1 }
 0x1f0   : > { %v13266_v16 = vpop.f32.mrf.mxu0  ;;  %v13280_v11 = vpop.f32.mrf.mxu1 }
 0x1f2   : > { %v13270_v5 = vpop.f32.mrf.mxu0  ;;  %v13286_v10 = vpop.f32.mrf.mxu1 }
 0x1f4   : > { %v13272_v61 = vpop.f32.mrf.mxu0  ;;  %v13292_v53 = vpop.f32.mrf.mxu1 }
 0x1f6   : > { %v13276_v13 = vpop.f32.mrf.mxu0  ;;  %v13298_v4 = vpop.f32.mrf.mxu1 }
 0x1f8   : > { %v13278_v24 = vpop.f32.mrf.mxu0  ;;  %v13304_v39 = vpop.f32.mrf.mxu1 }
 0x1fa   : > { %v13282_v40 = vpop.f32.mrf.mxu0  ;;  %v13310_v41 = vpop.f32.mrf.mxu1 }
 0x1fc   : > { %v13284_v37 = vpop.f32.mrf.mxu0  ;;  %v13314_v38 = vpop.f32.mrf.mxu1 }
 0x1fe   : > { %v13288_v28 = vpop.f32.mrf.mxu0  ;;  %v13320_v8 = vpop.f32.mrf.mxu1 }
 0x200   : > { %v13290_v21 = vpop.f32.mrf.mxu0  ;;  %v13326_v32 = vpop.f32.mrf.mxu1 }
 0x202   : > { %v13294_v18 = vpop.f32.mrf.mxu0  ;;  %v13330_v42 = vpop.f32.mrf.mxu1 }
 0x204   : > { %v13296_v20 = vpop.f32.mrf.mxu0  ;;  %v13334_v22 = vpop.f32.mrf.mxu1 }
 0x206   : > { %v13300_v58 = vpop.f32.mrf.mxu0 }
 0x208   : > { %v13302_v47 = vpop.f32.mrf.mxu0 }
 0x20a   : > { %v13306_v7 = vpop.f32.mrf.mxu0 }
 0x20c   : > { %v13308_v31 = vpop.f32.mrf.mxu0 }
 0x20e   : > { %v13312_v55 = vpop.f32.mrf.mxu0 }
 0x210   : > { %v13316_v35 = vpop.f32.mrf.mxu0 }
 0x212   : > { %v13318_v56 = vpop.f32.mrf.mxu0 }
 0x214   : > { %v13322_v3 = vpop.f32.mrf.mxu0 }
 0x215   : > { %15467 = vst [vmem:[#allocation10_spill] sm:$0xff] %v13322_v3  ;;  %v4234_v3 = vadd.f32 %v4233_v34, %v3941_v49  ;;  %v6614_v49 = vsel %vm1704_vm0, %v10564_v46, 0  ;;  %v4245_v34 = vadd.f32 %v13268_v48, %v13256_v50  ;;  %v4237_v50 = vadd.f32 %v13274_v2, %v13258_v14 }
 0x216   : > { %v13324_v52 = vpop.f32.mrf.mxu0  ;;  %11652 = vmatpush3.bf16.msra.mxu1 %v6614_v49  ;;  %v4258_v14 = vadd.f32 %v13280_v11, %v13260_v59  ;;  %v4261_v59 = vadd.f32 %v13292_v53, %v13264_v12 }
 0x217   : > { %15468 = vst [vmem:[#allocation11_spill] sm:$0xff] %v13324_v52  ;;  %v3661_v52 = vld [vmem:[#allocation3 + $0x10] sm:$0xff] }
 0x218   : > { %v13328_v29 = vpop.f32.mrf.mxu0 }
 0x219   : > { %15469 = vst [vmem:[#allocation12_spill] sm:$0xff] %v13328_v29 }
 0x21a   : > { %v11621_v54 = vpop.f32.mrf.mxu0 }
 0x21b   : > { %v4673_v60 = vadd.f32 %v11621_v54, %v4226_v27  ;;  %v13346_v54 = vpop.f32.mrf.mxu1 }
 0x21c   : > { %v4544_v43 = vpop.f32.mrf.mxu0 }
 0x21d   : > { %v4671_v19 = vadd.f32 %v4544_v43, %v4218_v45  ;;  %v13336_v29 = vadd.f32 %v4673_v60, %v3661_v52 }
 0x21e   : > { %v11622_v17 = vpop.f32.mrf.mxu0 }
 0x21f   : > { %v13332_v26 = vadd.f32 %v4671_v19, %v3659_v57  ;;  %v4674_v0 = vadd.f32 %v11622_v17, %v4229_v63  ;;  %v4807_v19 = vmul.f32 %v13336_v29, %v13336_v29  ;;  %v3663_v17 = vld [vmem:[#allocation3 + $0x20] sm:$0xff]  ;;  %v4738_v48 = vsel %vm1655_vm4, %v13336_v29, 0.0 }
 0x220   : > { %v4547_v62 = vpop.f32.mrf.mxu0 }
 0x221   : > { %v4672_v30 = vadd.f32 %v4547_v62, %v4221_v6  ;;  %v4805_v1 = vmul.f32 %v13332_v26, %v13332_v26  ;;  %v13348_v52 = vadd.f32 %v4674_v0, %v3662_v44  ;;  %v4735_v63 = vsel %vm1655_vm4, %v13332_v26, 0.0  ;;  %v13372_v62 = vpop.f32.mrf.mxu1 }
 0x222   : > { %v11625_v9 = vpop.f32.mrf.mxu0  ;;  %v4840_v49 = vsel %vm1655_vm4, %v4807_v19, 0.0 }
 0x223   : > { %v13350_v45 = vadd.f32 %v4672_v30, %v3660_v15  ;;  %v4677_v27 = vadd.f32 %v11625_v9, %v4242_v36  ;;  %v4837_v44 = vsel %vm1655_vm4, %v4805_v1, 0.0  ;;  %v4808_v30 = vmul.f32 %v13348_v52, %v13348_v52  ;;  %v3665_v36 = vld [vmem:[#allocation3 + $0x30] sm:$0xff] }
 0x224   : > { %v4560_v51 = vpop.f32.mrf.mxu0  ;;  %v4740_v1 = vsel %vm1655_vm4, %v13348_v52, 0.0 }
 0x225   : > { %v4675_v43 = vadd.f32 %v4560_v51, %v4234_v3  ;;  %v4736_v60 = vsel %vm1655_vm4, %v13350_v45, 0.0  ;;  %v4806_v57 = vmul.f32 %v13350_v45, %v13350_v45  ;;  %v13380_v51 = vadd.f32 %v4677_v27, %v3665_v36  ;;  %v3666_v27 = vld [vmem:[#allocation3 + $0x38] sm:$0xff] }
 0x226   : > { %v11626_v6 = vpop.f32.mrf.mxu0  ;;  %v4737_v3 = vadd.f32 %v4736_v60, %v4735_v63  ;;  %v4842_v19 = vsel %vm1655_vm4, %v4808_v30, 0.0 }
 0x227   : > { %v13370_v0 = vadd.f32 %v4675_v43, %v3663_v17  ;;  %v4838_v9 = vsel %vm1655_vm4, %v4806_v57, 0.0  ;;  %v4678_v15 = vadd.f32 %v11626_v6, %v4245_v34  ;;  %v4250_v34 = vadd.f32 %v13286_v10, %v13262_v25  ;;  %v3664_v57 = vld [vmem:[#allocation3 + $0x28] sm:$0xff]  ;;  %v13391_v17 = vpop.f32.mrf.mxu1 }
 0x228   : > { %v4563_v46 = vpop.f32.mrf.mxu0  ;;  %v4739_v2 = vadd.f32 %v4738_v48, %v4737_v3  ;;  %v4839_v23 = vadd.f32 %v4838_v9, %v4837_v44  ;;  %v4811_v25 = vmul.f32 %v13380_v51, %v13380_v51  ;;  %v13405_v44 = vld [vmem:[%s15429_s2 + $0x4] sm:$0x3] }
 0x229   : > { %v4809_v33 = vmul.f32 %v13370_v0, %v13370_v0  ;;  %v4676_v43 = vadd.f32 %v4563_v46, %v4237_v50  ;;  %v4742_v6 = vsel %vm1655_vm4, %v13370_v0, 0.0  ;;  %v13396_v48 = vadd.f32 %v4678_v15, %v3666_v27  ;;  %11968 = vmatprep.subr.msk.bf16.mxu1 %vm1704_vm0, %v13405_v44 }
 0x22a   : > { %v11629_v63 = vpop.f32.mrf.mxu0  ;;  %v4841_v11 = vadd.f32 %v4840_v49, %v4839_v23  ;;  %v4741_v60 = vadd.f32 %v4740_v1, %v4739_v2  ;;  %v4253_v2 = vadd.f32 %v13298_v4, %v13266_v16  ;;  %v4746_v23 = vsel %vm1655_vm4, %v13380_v51, 0.0 }
 0x22b   : > { %v13398_v50 = vadd.f32 %v4676_v43, %v3664_v57  ;;  %v4844_v30 = vsel %vm1655_vm4, %v4809_v33, 0.0  ;;  %v4681_v15 = vadd.f32 %v11629_v63, %v4258_v14  ;;  %v3667_v33 = vld [vmem:[#allocation3 + $0x40] sm:$0xff]  ;;  %v13418_v43 = vpop.f32.mrf.mxu1  ;;  %v4274_v16 = vadd.f32 %v13304_v39, %v13270_v5  ;;  %v3669_v57 = vld [vmem:[#allocation3 + $0x50] sm:$0xff] }
 0x22c   : > { %v4576_v3 = vpop.f32.mrf.mxu0  ;;  %v4743_v12 = vadd.f32 %v4742_v6, %v4741_v60  ;;  %v4843_v10 = vadd.f32 %v4842_v19, %v4841_v11  ;;  %v4848_v6 = vsel %vm1655_vm4, %v4811_v25, 0.0  ;;  %v4277_v25 = vadd.f32 %v13314_v38, %v13276_v13 }
 0x22d   : > { %v4679_v53 = vadd.f32 %v4576_v3, %v4250_v34  ;;  %v4744_v9 = vsel %vm1655_vm4, %v13398_v50, 0.0  ;;  %v4810_v36 = vmul.f32 %v13398_v50, %v13398_v50  ;;  %v4812_v34 = vmul.f32 %v13396_v48, %v13396_v48 }
 0x22e   : > { %v11630_v46 = vpop.f32.mrf.mxu0  ;;  %v4845_v49 = vadd.f32 %v4844_v30, %v4843_v10  ;;  %v4745_v1 = vadd.f32 %v4744_v9, %v4743_v12  ;;  %v4748_v3 = vsel %vm1655_vm4, %v13396_v48, 0.0  ;;  %v13430_v12 = vadd.f32 %v4681_v15, %v3669_v57  ;;  %v3670_v9 = vld [vmem:[#allocation3 + $0x58] sm:$0xff] }
 0x22f   : > { %v4846_v14 = vsel %vm1655_vm4, %v4810_v36, 0.0  ;;  %v13423_v63 = vadd.f32 %v4679_v53, %v3667_v33  ;;  %v4682_v11 = vadd.f32 %v11630_v46, %v4261_v59  ;;  %v3668_v53 = vld [vmem:[#allocation3 + $0x48] sm:$0xff]  ;;  %v4266_v30 = vadd.f32 %v13310_v41, %v13272_v61  ;;  %v13440_v46 = vpop.f32.mrf.mxu1 }
 0x230   : > { %v4579_v60 = vpop.f32.mrf.mxu0  ;;  %v4747_v4 = vadd.f32 %v4746_v23, %v4745_v1  ;;  %v4847_v27 = vadd.f32 %v4846_v14, %v4845_v49  ;;  %v4850_v15 = vsel %vm1655_vm4, %v4812_v34, 0.0  ;;  %v4815_v13 = vmul.f32 %v13430_v12, %v13430_v12 }
 0x231   : > { %v4680_v19 = vadd.f32 %v4579_v60, %v4253_v2  ;;  %v4813_v10 = vmul.f32 %v13423_v63, %v13423_v63  ;;  %v4750_v2 = vsel %vm1655_vm4, %v13423_v63, 0.0  ;;  %v13445_v23 = vadd.f32 %v4682_v11, %v3670_v9 }
 0x232   : > { %v11633_v59 = vpop.f32.mrf.mxu0  ;;  %v4849_v5 = vadd.f32 %v4848_v6, %v4847_v27  ;;  %v4749_v39 = vadd.f32 %v4748_v3, %v4747_v4  ;;  %v4269_v11 = vadd.f32 %v13320_v8, %v13278_v24  ;;  %v13457_v6 = vpop.f32.mrf.mxu1  ;;  %v4754_v3 = vsel %vm1655_vm4, %v13430_v12, 0.0 }
 0x233   : > { %v13436_v36 = vadd.f32 %v4680_v19, %v3668_v53  ;;  %v4852_v38 = vsel %vm1655_vm4, %v4813_v10, 0.0  ;;  %v4685_v34 = vadd.f32 %v11633_v59, %v4274_v16  ;;  %v3671_v19 = vld [vmem:[#allocation3 + $0x60] sm:$0xff]  ;;  %v4816_v53 = vmul.f32 %v13445_v23, %v13445_v23 }
 0x234   : > { %v4592_v49 = vpop.f32.mrf.mxu0  ;;  %v4751_v1 = vadd.f32 %v4750_v2, %v4749_v39  ;;  %v4851_v61 = vadd.f32 %v4850_v15, %v4849_v5  ;;  %v4290_v24 = vadd.f32 %v13326_v32, %v13282_v40  ;;  %v3673_v5 = vld [vmem:[#allocation3 + $0x70] sm:$0xff]  ;;  %v4856_v9 = vsel %vm1655_vm4, %v4815_v13, 0.0  ;;  %v13478_v13 = vpop.f32.mrf.mxu1 }
 0x235   : > { %v4752_v41 = vsel %vm1655_vm4, %v13436_v36, 0.0  ;;  %v4814_v33 = vmul.f32 %v13436_v36, %v13436_v36  ;;  %v4683_v14 = vadd.f32 %v4592_v49, %v4266_v30  ;;  %v4756_v15 = vsel %vm1655_vm4, %v13445_v23, 0.0 }
 0x236   : > { %v11634_v60 = vpop.f32.mrf.mxu0  ;;  %v4853_v4 = vadd.f32 %v4852_v38, %v4851_v61  ;;  %v4753_v27 = vadd.f32 %v4752_v41, %v4751_v1  ;;  %v13470_v2 = vadd.f32 %v4685_v34, %v3673_v5  ;;  %v4293_v40 = vadd.f32 %v13334_v22, %v13288_v28  ;;  %v3674_v41 = vld [vmem:[#allocation3 + $0x78] sm:$0xff] }
 0x237   : > { %v4854_v57 = vsel %vm1655_vm4, %v4814_v33, 0.0  ;;  %v13463_v10 = vadd.f32 %v4683_v14, %v3671_v19  ;;  %v4686_v16 = vadd.f32 %v11634_v60, %v4277_v25  ;;  %v4282_v25 = vadd.f32 %v13330_v42, %v13284_v37  ;;  %v3672_v33 = vld [vmem:[#allocation3 + $0x68] sm:$0xff] }
 0x238   : > { %v4595_v59 = vpop.f32.mrf.mxu0  ;;  %v4755_v8 = vadd.f32 %v4754_v3, %v4753_v27  ;;  %v4855_v30 = vadd.f32 %v4854_v57, %v4853_v4  ;;  %v4858_v38 = vsel %vm1655_vm4, %v4816_v53, 0.0  ;;  %v4819_v22 = vmul.f32 %v13470_v2, %v13470_v2  ;;  %v3675_v3 = vld [vmem:[#allocation3 + $0x80] sm:$0xff] }
 0x239   : > { %v4684_v39 = vadd.f32 %v4595_v59, %v4269_v11  ;;  %v4817_v49 = vmul.f32 %v13463_v10, %v13463_v10  ;;  %v4758_v34 = vsel %vm1655_vm4, %v13463_v10, 0.0  ;;  %v13483_v14 = vadd.f32 %v4686_v16, %v3674_v41 }
 0x23a   : > { %v11637_v1 = vpop.f32.mrf.mxu0  ;;  %v4857_v32 = vadd.f32 %v4856_v9, %v4855_v30  ;;  %v4757_v61 = vadd.f32 %v4756_v15, %v4755_v8  ;;  %v4285_v16 = vadd.f32 %v13346_v54, %v13290_v21  ;;  %v13498_v30 = vpop.f32.mrf.mxu1  ;;  %v4762_v5 = vsel %vm1655_vm4, %v13470_v2, 0.0  ;;  %v3677_v15 = vld [vmem:[#allocation3 + $0x90] sm:$0xff] }
 0x23b   : > { %v13485_v60 = vadd.f32 %v4684_v39, %v3672_v33  ;;  %v4689_v4 = vadd.f32 %v11637_v1, %v4290_v24  ;;  %v4860_v27 = vsel %vm1655_vm4, %v4817_v49, 0.0  ;;  %v4820_v39 = vmul.f32 %v13483_v14, %v13483_v14 }
 0x23c   : > { %v4608_v11 = vpop.f32.mrf.mxu0  ;;  %v4759_v37 = vadd.f32 %v4758_v34, %v4757_v61  ;;  %v4859_v42 = vadd.f32 %v4858_v38, %v4857_v32  ;;  %v4306_v21 = vadd.f32 %v13372_v62, %v13294_v18  ;;  %v4864_v61 = vsel %vm1655_vm4, %v4819_v22, 0.0 }
 0x23d   : > { %v4687_v28 = vadd.f32 %v4608_v11, %v4282_v25  ;;  %v4760_v57 = vsel %vm1655_vm4, %v13485_v60, 0.0  ;;  %v4818_v19 = vmul.f32 %v13485_v60, %v13485_v60  ;;  %v13507_v32 = vadd.f32 %v4689_v4, %v3677_v15  ;;  %v4316_v4 = vpop.f32.mrf.mxu1 }
 0x23e   : > { %v11638_v53 = vpop.f32.mrf.mxu0  ;;  %v4861_v59 = vadd.f32 %v4860_v27, %v4859_v42  ;;  %v4761_v8 = vadd.f32 %v4760_v57, %v4759_v37  ;;  %v4764_v41 = vsel %vm1655_vm4, %v13483_v14, 0.0  ;;  %v4309_v18 = vadd.f32 %v13418_v43, %v13300_v58  ;;  %v3678_v37 = vld [vmem:[#allocation3 + $0x98] sm:$0xff]  ;;  %v3676_v42 = vld [vmem:[#allocation3 + $0x88] sm:$0xff] }
 0x23f   : > { %v13496_v24 = vadd.f32 %v4687_v28, %v3675_v3  ;;  %v4862_v9 = vsel %vm1655_vm4, %v4818_v19, 0.0  ;;  %v4690_v49 = vadd.f32 %v11638_v53, %v4293_v40  ;;  %v4298_v40 = vadd.f32 %v13391_v17, %v13296_v20 }
 0x240   : > { %v4611_v1 = vpop.f32.mrf.mxu0  ;;  %v4763_v54 = vadd.f32 %v4762_v5, %v4761_v8  ;;  %v4863_v25 = vadd.f32 %v4862_v9, %v4861_v59  ;;  %v4866_v28 = vsel %vm1655_vm4, %v4820_v39, 0.0  ;;  %v4823_v20 = vmul.f32 %v13507_v32, %v13507_v32 }
 0x241   : > { %v4821_v33 = vmul.f32 %v13496_v24, %v13496_v24  ;;  %v4688_v38 = vadd.f32 %v4611_v1, %v4285_v16  ;;  %v4766_v22 = vsel %vm1655_vm4, %v13496_v24, 0.0  ;;  %v13521_v27 = vadd.f32 %v4690_v49, %v3678_v37  ;;  %v3679_v49 = vld [vmem:[#allocation3 + $0xa0] sm:$0xff]  ;;  %v11615_v1 = vpop.f32.mrf.mxu1 }
 0x242   : > { %v11641_v34 = vpop.f32.mrf.mxu0  ;;  %v4865_v62 = vadd.f32 %v4864_v61, %v4863_v25  ;;  %v4765_v11 = vadd.f32 %v4764_v41, %v4763_v54  ;;  %v4301_v5 = vadd.f32 %v13440_v46, %v13302_v47  ;;  %v4770_v39 = vsel %vm1655_vm4, %v13507_v32, 0.0 }
 0x243   : > { %v13523_v57 = vadd.f32 %v4688_v38, %v3676_v42  ;;  %v4868_v3 = vsel %vm1655_vm4, %v4821_v33, 0.0  ;;  %v4693_v59 = vadd.f32 %v11641_v34, %v4306_v21  ;;  %v4824_v54 = vmul.f32 %v13521_v27, %v13521_v27  ;;  %v3681_v38 = vld [vmem:[#allocation3 + $0xb0] sm:$0xff]  ;;  %v3680_v42 = vld [vmem:[#allocation3 + $0xa8] sm:$0xff] }
 0x244   : > { %v4624_v19 = vpop.f32.mrf.mxu0  ;;  %v4767_v17 = vadd.f32 %v4766_v22, %v4765_v11  ;;  %v4867_v58 = vadd.f32 %v4866_v28, %v4865_v62  ;;  %v4322_v33 = vadd.f32 %v13457_v6, %v13306_v7  ;;  %v4772_v62 = vsel %vm1655_vm4, %v13521_v27, 0.0  ;;  %v3682_v22 = vld [vmem:[#allocation3 + $0xb8] sm:$0xff] }
 0x245   : > { %v4691_v43 = vadd.f32 %v4624_v19, %v4298_v40  ;;  %v4768_v53 = vsel %vm1655_vm4, %v13523_v57, 0.0  ;;  %v4822_v16 = vmul.f32 %v13523_v57, %v13523_v57  ;;  %v4872_v40 = vsel %vm1655_vm4, %v4823_v20, 0.0 }
 0x246   : > { %v11642_v8 = vpop.f32.mrf.mxu0  ;;  %v4869_v9 = vadd.f32 %v4868_v3, %v4867_v58  ;;  %v4769_v15 = vadd.f32 %v4768_v53, %v4767_v17  ;;  %v13546_v11 = vadd.f32 %v4693_v59, %v3681_v38  ;;  %v4314_v28 = vadd.f32 %v13478_v13, %v13308_v31  ;;  %v4329_v17 = vpop.f32.mrf.mxu1 }
 0x247   : > { %v4870_v25 = vsel %vm1655_vm4, %v4822_v16, 0.0  ;;  %v13539_v61 = vadd.f32 %v4691_v43, %v3679_v49  ;;  %v4694_v41 = vadd.f32 %v11642_v8, %v4309_v18  ;;  %v4874_v20 = vsel %vm1655_vm4, %v4824_v54, 0.0 }
 0x248   : > { %v4627_v21 = vpop.f32.mrf.mxu0  ;;  %v4771_v47 = vadd.f32 %v4770_v39, %v4769_v15  ;;  %v4871_v46 = vadd.f32 %v4870_v25, %v4869_v9  ;;  %v4325_v8 = vadd.f32 %v13498_v30, %v13312_v55  ;;  %v4317_v49 = vadd.f32 %v4316_v4, %v13316_v35  ;;  %v3685_v30 = vld [vmem:[#allocation3 + $0xd0] sm:$0xff] }
 0x249   : > { %v4692_v34 = vadd.f32 %v4627_v21, %v4301_v5  ;;  %v4825_v37 = vmul.f32 %v13539_v61, %v13539_v61  ;;  %v4774_v58 = vsel %vm1655_vm4, %v13539_v61, 0.0  ;;  %v13557_v43 = vadd.f32 %v4694_v41, %v3682_v22  ;;  %v3683_v21 = vld [vmem:[#allocation3 + $0xc0] sm:$0xff] }
 0x24a   : > { %v11645_v18 = vpop.f32.mrf.mxu0  ;;  %v4873_v7 = vadd.f32 %v4872_v40, %v4871_v46  ;;  %v4773_v6 = vadd.f32 %v4772_v62, %v4771_v47  ;;  %v4827_v5 = vmul.f32 %v13546_v11, %v13546_v11  ;;  %v4778_v47 = vsel %vm1655_vm4, %v13546_v11, 0.0 }
 0x24b   : > { %v13552_v19 = vadd.f32 %v4692_v34, %v3680_v42  ;;  %v4697_v3 = vadd.f32 %v11645_v18, %v4322_v33  ;;  %v4876_v39 = vsel %vm1655_vm4, %v4825_v37, 0.0  ;;  %v11616_v33 = vpop.f32.mrf.mxu1  ;;  %v4828_v55 = vmul.f32 %v13557_v43, %v13557_v43 }
 0x24c   : > { %v4640_v53 = vpop.f32.mrf.mxu0  ;;  %v4775_v16 = vadd.f32 %v4774_v58, %v4773_v6  ;;  %v4875_v59 = vadd.f32 %v4874_v20, %v4873_v7  ;;  %v4338_v37 = vadd.f32 %v11615_v1, %v13318_v56  ;;  %v4880_v42 = vsel %vm1655_vm4, %v4827_v5, 0.0  ;;  %v15470_v6 = vld [vmem:[#allocation10_spill] sm:$0xff]  ;;  %v15471_v20 = vld [vmem:[#allocation11_spill] sm:$0xff] }
 0x24d   : > { %v4776_v31 = vsel %vm1655_vm4, %v13552_v19, 0.0  ;;  %v4826_v13 = vmul.f32 %v13552_v19, %v13552_v19  ;;  %v4695_v9 = vadd.f32 %v4640_v53, %v4314_v28  ;;  %v13576_v35 = vadd.f32 %v4697_v3, %v3685_v30  ;;  %v3686_v3 = vld [vmem:[#allocation3 + $0xd8] sm:$0xff] }
 0x24e   : > { %v11646_v15 = vpop.f32.mrf.mxu0  ;;  %v4877_v54 = vadd.f32 %v4876_v39, %v4875_v59  ;;  %v4777_v25 = vadd.f32 %v4776_v31, %v4775_v16  ;;  %v4780_v18 = vsel %vm1655_vm4, %v13557_v43, 0.0  ;;  %v4330_v22 = vadd.f32 %v4329_v17, %v15470_v6  ;;  %v3684_v59 = vld [vmem:[#allocation3 + $0xc8] sm:$0xff]  ;;  %v4332_v31 = vpop.f32.mrf.mxu1  ;;  %v3689_v6 = vld [vmem:[#allocation3 + $0xf0] sm:$0xff] }
 0x24f   : > { %v4878_v41 = vsel %vm1655_vm4, %v4826_v13, 0.0  ;;  %v13574_v46 = vadd.f32 %v4695_v9, %v3683_v21  ;;  %v4698_v38 = vadd.f32 %v11646_v15, %v4325_v8  ;;  %v4341_v58 = vadd.f32 %v11616_v33, %v15471_v20  ;;  %v3687_v21 = vld [vmem:[#allocation3 + $0xe0] sm:$0xff] }
 0x250   : > { %v4643_v34 = vpop.f32.mrf.mxu0  ;;  %v4779_v40 = vadd.f32 %v4778_v47, %v4777_v25  ;;  %v4879_v62 = vadd.f32 %v4878_v41, %v4877_v54  ;;  %v4882_v56 = vsel %vm1655_vm4, %v4828_v55, 0.0  ;;  %v4831_v17 = vmul.f32 %v13576_v35, %v13576_v35  ;;  %v15472_v47 = vld [vmem:[#allocation12_spill] sm:$0xff] }
 0x251   : > { %v4696_v4 = vadd.f32 %v4643_v34, %v4317_v49  ;;  %v4829_v28 = vmul.f32 %v13574_v46, %v13574_v46  ;;  %v4782_v1 = vsel %vm1655_vm4, %v13574_v46, 0.0  ;;  %v13589_v13 = vadd.f32 %v4698_v38, %v3686_v3 }
 0x252   : > { %v11649_v7 = vpop.f32.mrf.mxu0  ;;  %v4881_v53 = vadd.f32 %v4880_v42, %v4879_v62  ;;  %v4781_v16 = vadd.f32 %v4780_v18, %v4779_v40  ;;  %v4333_v55 = vadd.f32 %v4332_v31, %v15472_v47  ;;  %v4786_v40 = vsel %vm1655_vm4, %v13576_v35, 0.0  ;;  %v3690_v31 = vld [vmem:[#allocation3 + $0xf8] sm:$0xff] }
 0x253   : > { %v13591_v8 = vadd.f32 %v4696_v4, %v3684_v59  ;;  %v4884_v49 = vsel %vm1655_vm4, %v4829_v28, 0.0  ;;  %v4701_v41 = vadd.f32 %v11649_v7, %v4338_v37  ;;  %v4832_v62 = vmul.f32 %v13589_v13, %v13589_v13 }
 0x254   : > { %v4656_v5 = vpop.f32.mrf.mxu0  ;;  %v4783_v39 = vadd.f32 %v4782_v1, %v4781_v16  ;;  %v4883_v9 = vadd.f32 %v4882_v56, %v4881_v53  ;;  %v4888_v37 = vsel %vm1655_vm4, %v4831_v17, 0.0  ;;  %v3688_v56 = vld [vmem:[#allocation3 + $0xe8] sm:$0xff] }
 0x255   : > { %v4699_v15 = vadd.f32 %v4656_v5, %v4330_v22  ;;  %v4784_v54 = vsel %vm1655_vm4, %v13591_v8, 0.0  ;;  %v4830_v25 = vmul.f32 %v13591_v8, %v13591_v8  ;;  %v4788_v22 = vsel %vm1655_vm4, %v13589_v13, 0.0 }
 0x256   : > { %v11650_v33 = vpop.f32.mrf.mxu0  ;;  %v4885_v30 = vadd.f32 %v4884_v49, %v4883_v9  ;;  %v4785_v38 = vadd.f32 %v4784_v54, %v4783_v39  ;;  %v13611_v20 = vadd.f32 %v4701_v41, %v3689_v6 }
 0x257   : > { %v13601_v34 = vadd.f32 %v4699_v15, %v3687_v21  ;;  %v4886_v4 = vsel %vm1655_vm4, %v4830_v25, 0.0  ;;  %v4702_v42 = vadd.f32 %v11650_v33, %v4341_v58  ;;  %v4890_v58 = vsel %vm1655_vm4, %v4832_v62, 0.0 }
 0x258   : > { %v4659_v18 = vpop.f32.mrf.mxu0  ;;  %v4787_v28 = vadd.f32 %v4786_v40, %v4785_v38  ;;  %v4887_v7 = vadd.f32 %v4886_v4, %v4885_v30  ;;  %v4835_v15 = vmul.f32 %v13611_v20, %v13611_v20  ;;  %v4794_v33 = vsel %vm1655_vm4, %v13611_v20, 0.0 }
 0x259   : > { %v4833_v53 = vmul.f32 %v13601_v34, %v13601_v34  ;;  %v4700_v16 = vadd.f32 %v4659_v18, %v4333_v55  ;;  %v4790_v1 = vsel %vm1655_vm4, %v13601_v34, 0.0  ;;  %v13618_v5 = vadd.f32 %v4702_v42, %v3690_v31 }
 0x25a   : > { %v4889_v3 = vadd.f32 %v4888_v37, %v4887_v7  ;;  %v4789_v59 = vadd.f32 %v4788_v22, %v4787_v28  ;;  %v4896_v40 = vsel %vm1655_vm4, %v4835_v15, 0.0 }
 0x25b   : > { %v13620_v17 = vadd.f32 %v4700_v16, %v3688_v56  ;;  %v4892_v49 = vsel %vm1655_vm4, %v4833_v53, 0.0  ;;  %v4836_v47 = vmul.f32 %v13618_v5, %v13618_v5  ;;  %v4796_v62 = vsel %vm1655_vm4, %v13618_v5, 0.0 }
 0x25c   : > { %v4791_v39 = vadd.f32 %v4790_v1, %v4789_v59  ;;  %v4891_v9 = vadd.f32 %v4890_v58, %v4889_v3 }
 0x25d   : > { %v4792_v54 = vsel %vm1655_vm4, %v13620_v17, 0.0  ;;  %v4834_v25 = vmul.f32 %v13620_v17, %v13620_v17  ;;  %v4898_v18 = vsel %vm1655_vm4, %v4836_v47, 0.0 }
 0x25e   : > { %v4893_v41 = vadd.f32 %v4892_v49, %v4891_v9  ;;  %v4793_v21 = vadd.f32 %v4792_v54, %v4791_v39  ;;  %v13643_v9 = vld [vmem:[%s15429_s2 + $0x8] sm:$0x3] }
 0x25f   : > { %v4894_v55 = vsel %vm1655_vm4, %v4834_v25, 0.0  ;;  %11969 = vmatprep.subr.msk.bf16.mxu0 %vm1704_vm0, %v13643_v9 }
 0x260   : > { %v4795_v30 = vadd.f32 %v4794_v33, %v4793_v21  ;;  %v4895_v38 = vadd.f32 %v4894_v55, %v4893_v41 }
 0x262   : > { %v4797_v4 = vadd.f32 %v4796_v62, %v4795_v30  ;;  %v4897_v42 = vadd.f32 %v4896_v40, %v4895_v38 }
 0x264   : > { %v4798_v37 = vrot.slane %v4797_v4, 4  ;;  %v4899_v28 = vadd.f32 %v4898_v18, %v4897_v42 }
 0x266   : > { %v4799_v7 = vadd.f32 %v4798_v37, %v4797_v4  ;;  %v4900_v6 = vrot.slane %v4899_v28, 4 }
 0x268   : > { %v4800_v22 = vrot.slane %v4799_v7, 2  ;;  %v4901_v53 = vadd.f32 %v4900_v6, %v4899_v28 }
 0x26a   : > { %v4801_v16 = vadd.f32 %v4800_v22, %v4799_v7  ;;  %v4902_v3 = vrot.slane %v4901_v53, 2 }
 0x26c   : > { %v4802_v59 = vrot.slane %v4801_v16, 1  ;;  %v4903_v31 = vadd.f32 %v4902_v3, %v4901_v53 }
 0x26e   : > { %v4803_v56 = vadd.f32 %v4802_v59, %v4801_v16  ;;  %v4904_v58 = vrot.slane %v4903_v31, 1 }
 0x270   : > { %v13638_v1 = vmul.f32 0.00390625, %v4803_v56  ;;  %v4905_v39 = vadd.f32 %v4904_v58, %v4903_v31 }
 0x272   : > { %v4906_v15 = vmul.f32 0.00390625, %v4905_v39  ;;  %v4907_v49 = vmul.f32 %v13638_v1, %v13638_v1  ;;  %v4922_v41 = vsub.f32 %v13463_v10, %v13638_v1  ;;  %v4923_v21 = vsub.f32 %v13485_v60, %v13638_v1 }
 0x273   : > { %v4924_v33 = vsub.f32 %v13470_v2, %v13638_v1  ;;  %v4925_v47 = vsub.f32 %v13483_v14, %v13638_v1  ;;  %v4926_v55 = vsub.f32 %v13496_v24, %v13638_v1  ;;  %v4927_v30 = vsub.f32 %v13523_v57, %v13638_v1 }
 0x274   : > { %v4908_v54 = vsub.f32 %v4906_v15, %v4907_v49  ;;  %v4928_v38 = vsub.f32 %v13507_v32, %v13638_v1  ;;  %v4929_v10 = vsub.f32 %v13521_v27, %v13638_v1  ;;  %v4930_v60 = vsub.f32 %v13539_v61, %v13638_v1 }
 0x275   : > { %v4931_v2 = vsub.f32 %v13552_v19, %v13638_v1  ;;  %v4932_v14 = vsub.f32 %v13546_v11, %v13638_v1  ;;  %v4933_v24 = vsub.f32 %v13557_v43, %v13638_v1  ;;  %v4934_v57 = vsub.f32 %v13574_v46, %v13638_v1 }
 0x276   : > { %v4909_v25 = vmax.f32 %v4908_v54, 0.0  ;;  %v4935_v32 = vsub.f32 %v13591_v8, %v13638_v1  ;;  %v4936_v27 = vsub.f32 %v13576_v35, %v13638_v1  ;;  %v4937_v61 = vsub.f32 %v13589_v13, %v13638_v1 }
 0x277   : > { %v4938_v19 = vsub.f32 %v13601_v34, %v13638_v1  ;;  %v4940_v11 = vsub.f32 %v13611_v20, %v13638_v1  ;;  %v4941_v43 = vsub.f32 %v13618_v5, %v13638_v1  ;;  %v4939_v46 = vsub.f32 %v13620_v17, %v13638_v1 }
 0x278   : > { %v4942_v40 = vadd.f32 1e-05, %v4909_v25  ;;  %v4910_v8 = vsub.f32 %v13332_v26, %v13638_v1  ;;  %v4911_v35 = vsub.f32 %v13350_v45, %v13638_v1  ;;  %v4912_v13 = vsub.f32 %v13336_v29, %v13638_v1 }
 0x279   : > { %v4913_v34 = vsub.f32 %v13348_v52, %v13638_v1  ;;  %v4914_v20 = vsub.f32 %v13370_v0, %v13638_v1  ;;  %v4915_v5 = vsub.f32 %v13398_v50, %v13638_v1  ;;  %v4916_v17 = vsub.f32 %v13380_v51, %v13638_v1 }
 0x27a   : > { %12271 = vrsqrt.f32 %v4942_v40  ;;  %v4917_v26 = vsub.f32 %v13396_v48, %v13638_v1  ;;  %v4918_v45 = vsub.f32 %v13423_v63, %v13638_v1  ;;  %v4919_v29 = vsub.f32 %v13436_v36, %v13638_v1 }
 0x27b   : > { %v4920_v52 = vsub.f32 %v13430_v12, %v13638_v1  ;;  %v4921_v0 = vsub.f32 %v13445_v23, %v13638_v1 }
 0x287   : > { %v12272_v62 = vpop.eup %12271 }
 0x288   : > { %v4973_v50 = vmul.f32 %v12272_v62, %v4939_v46  ;;  %v13713_v4 = vmul.f32 %v12272_v62, %v4910_v8  ;;  %v13715_v51 = vmul.f32 %v12272_v62, %v4911_v35  ;;  %v13717_v42 = vmul.f32 %v12272_v62, %v4912_v13 }
 0x289   : > { %v13719_v48 = vmul.f32 %v12272_v62, %v4913_v34  ;;  %v13721_v18 = vmul.f32 %v12272_v62, %v4914_v20  ;;  %v13723_v63 = vmul.f32 %v12272_v62, %v4915_v5  ;;  %v13725_v36 = vmul.f32 %v12272_v62, %v4916_v17 }
 0x28a   : > { %v5005_v37 = vmax.f32 %v4973_v50, 0.0  ;;  %v13727_v12 = vmul.f32 %v12272_v62, %v4917_v26  ;;  %v13729_v28 = vmul.f32 %v12272_v62, %v4918_v45  ;;  %v13731_v23 = vmul.f32 %v12272_v62, %v4919_v29 }
 0x28b   : > { %v13733_v7 = vmul.f32 %v12272_v62, %v4920_v52  ;;  %v13735_v6 = vmul.f32 %v12272_v62, %v4921_v0  ;;  %v13737_v22 = vmul.f32 %v12272_v62, %v4922_v41  ;;  %v13739_v53 = vmul.f32 %v12272_v62, %v4923_v21 }
 0x28c   : > { %v10925_v16 = vpack.c.bf16 %v5005_v37, %v5005_v37  ;;  %v13741_v3 = vmul.f32 %v12272_v62, %v4924_v33  ;;  %v13743_v59 = vmul.f32 %v12272_v62, %v4925_v47  ;;  %v13745_v31 = vmul.f32 %v12272_v62, %v4926_v55 }
 0x28d   : > { %v13747_v56 = vmul.f32 %v12272_v62, %v4927_v30  ;;  %v13749_v58 = vmul.f32 %v12272_v62, %v4928_v38  ;;  %v13751_v1 = vmul.f32 %v12272_v62, %v4929_v10  ;;  %v13753_v39 = vmul.f32 %v12272_v62, %v4930_v60 }
 0x28e   : > { %5165 = vst.msk [vmem:[#allocation2 + $0x10c] sm:$0xf] %vm205_vm1, %v10925_v16  ;;  %v13756_v15 = vmul.f32 %v12272_v62, %v4931_v2  ;;  %v13758_v49 = vmul.f32 %v12272_v62, %v4932_v14  ;;  %v13760_v54 = vmul.f32 %v12272_v62, %v4933_v24  ;;  %v13762_v25 = vmul.f32 %v12272_v62, %v4934_v57 }
 0x28f   : > { %v13764_v41 = vmul.f32 %v12272_v62, %v4935_v32  ;;  %v13766_v21 = vmul.f32 %v12272_v62, %v4936_v27  ;;  %v13768_v33 = vmul.f32 %v12272_v62, %v4937_v61  ;;  %v13770_v47 = vmul.f32 %v12272_v62, %v4938_v19 }
 0x290   : > { %v13772_v55 = vmul.f32 %v12272_v62, %v4940_v11  ;;  %v13774_v30 = vmul.f32 %v12272_v62, %v4941_v43  ;;  %v4976_v38 = vmax.f32 %v13713_v4, 0.0  ;;  %v4977_v40 = vmax.f32 %v13715_v51, 0.0 }
 0x291   : > { %v4978_v10 = vmax.f32 %v13717_v42, 0.0  ;;  %v4979_v60 = vmax.f32 %v13719_v48, 0.0  ;;  %v4980_v2 = vmax.f32 %v13721_v18, 0.0  ;;  %v4981_v14 = vmax.f32 %v13723_v63, 0.0 }
 0x292   : > { %v4982_v24 = vmax.f32 %v13725_v36, 0.0  ;;  %v4983_v57 = vmax.f32 %v13727_v12, 0.0  ;;  %v4984_v32 = vmax.f32 %v13729_v28, 0.0  ;;  %v4985_v27 = vmax.f32 %v13731_v23, 0.0 }
 0x293   : > { %v4986_v61 = vmax.f32 %v13733_v7, 0.0  ;;  %v4987_v19 = vmax.f32 %v13735_v6, 0.0  ;;  %v4988_v11 = vmax.f32 %v13737_v22, 0.0  ;;  %v4989_v43 = vmax.f32 %v13739_v53, 0.0 }
 0x294   : > { %v4990_v46 = vmax.f32 %v13741_v3, 0.0  ;;  %v4991_v8 = vmax.f32 %v13743_v59, 0.0  ;;  %v4992_v35 = vmax.f32 %v13745_v31, 0.0  ;;  %v4993_v13 = vmax.f32 %v13747_v56, 0.0 }
 0x295   : > { %v4994_v34 = vmax.f32 %v13749_v58, 0.0  ;;  %v4995_v20 = vmax.f32 %v13751_v1, 0.0  ;;  %v4996_v5 = vmax.f32 %v13753_v39, 0.0  ;;  %v4997_v17 = vmax.f32 %v13756_v15, 0.0 }
 0x296   : > { %v4998_v26 = vmax.f32 %v13758_v49, 0.0  ;;  %v4999_v62 = vmax.f32 %v13760_v54, 0.0  ;;  %v5000_v45 = vmax.f32 %v13762_v25, 0.0  ;;  %v5001_v29 = vmax.f32 %v13764_v41, 0.0 }
 0x297   : > { %v5002_v52 = vmax.f32 %v13766_v21, 0.0  ;;  %v5003_v0 = vmax.f32 %v13768_v33, 0.0  ;;  %v5004_v50 = vmax.f32 %v13770_v47, 0.0  ;;  %v5006_v4 = vmax.f32 %v13772_v55, 0.0 }
 0x298   : > { %v5007_v51 = vmax.f32 %v13774_v30, 0.0  ;;  %v10896_v42 = vpack.c.bf16 %v4976_v38, %v4976_v38  ;;  %v10897_v48 = vpack.c.bf16 %v4977_v40, %v4977_v40  ;;  %v10898_v18 = vpack.c.bf16 %v4978_v10, %v4978_v10 }
 0x299   : > { %v10899_v63 = vpack.c.bf16 %v4979_v60, %v4979_v60  ;;  %v10900_v36 = vpack.c.bf16 %v4980_v2, %v4980_v2  ;;  %v10901_v37 = vpack.c.bf16 %v4981_v14, %v4981_v14  ;;  %v10902_v12 = vpack.c.bf16 %v4982_v24, %v4982_v24  ;;  %v13843_v24 = vld [vmem:[%s15429_s2 + $0x6] sm:$0x3] }
 0x29a   : > { %v10903_v28 = vpack.c.bf16 %v4983_v57, %v4983_v57  ;;  %v10904_v23 = vpack.c.bf16 %v4984_v32, %v4984_v32  ;;  %v10905_v7 = vpack.c.bf16 %v4985_v27, %v4985_v27  ;;  %v10906_v6 = vpack.c.bf16 %v4986_v61, %v4986_v61  ;;  %5136 = vst.msk [vmem:[#allocation2 + $0x98] sm:$0xf] %vm205_vm1, %v10896_v42 }
 0x29b   : > { %5137 = vst.msk [vmem:[#allocation2 + $0x9c] sm:$0xf] %vm205_vm1, %v10897_v48  ;;  %5138 = vst.msk [vmem:[#allocation2 + $0xa0] sm:$0xf] %vm205_vm1, %v10898_v18  ;;  %v10907_v22 = vpack.c.bf16 %v4987_v19, %v4987_v19  ;;  %v10908_v53 = vpack.c.bf16 %v4988_v11, %v4988_v11  ;;  %v10909_v16 = vpack.c.bf16 %v4989_v43, %v4989_v43  ;;  %v7232_v32 = vsel %vm1704_vm0, %v13405_v44, 0 }
 0x29c   : > { %v10910_v3 = vpack.c.bf16 %v4990_v46, %v4990_v46  ;;  %5139 = vst.msk [vmem:[#allocation2 + $0xa4] sm:$0xf] %vm205_vm1, %v10899_v63  ;;  %5140 = vst.msk [vmem:[#allocation2 + $0xa8] sm:$0xf] %vm205_vm1, %v10900_v36  ;;  %v10911_v59 = vpack.c.bf16 %v4991_v8, %v4991_v8  ;;  %v10912_v31 = vpack.c.bf16 %v4992_v35, %v4992_v35  ;;  %v5536_v19 = vld [vmem:[#allocation2] sm:$0xf] }
 0x29d   : > { %5141 = vst.msk [vmem:[#allocation2 + $0xac] sm:$0xf] %vm205_vm1, %v10901_v37  ;;  %5142 = vst.msk [vmem:[#allocation2 + $0xb0] sm:$0xf] %vm205_vm1, %v10902_v12  ;;  %v10913_v56 = vpack.c.bf16 %v4993_v13, %v4993_v13  ;;  %v10914_v58 = vpack.c.bf16 %v4994_v34, %v4994_v34  ;;  %v10915_v1 = vpack.c.bf16 %v4995_v20, %v4995_v20  ;;  %v13858_v63 = vsel %vm1704_vm0, %v13643_v9, 0 }
 0x29e   : > { %5143 = vst.msk [vmem:[#allocation2 + $0xb4] sm:$0xf] %vm205_vm1, %v10903_v28  ;;  %5144 = vst.msk [vmem:[#allocation2 + $0xb8] sm:$0xf] %vm205_vm1, %v10904_v23  ;;  %v10916_v39 = vpack.c.bf16 %v4996_v5, %v4996_v5  ;;  %v10917_v15 = vpack.c.bf16 %v4997_v17, %v4997_v17  ;;  %v10918_v49 = vpack.c.bf16 %v4998_v26, %v4998_v26 }
 0x29f   : > { %5145 = vst.msk [vmem:[#allocation2 + $0xbc] sm:$0xf] %vm205_vm1, %v10905_v7  ;;  %5146 = vst.msk [vmem:[#allocation2 + $0xc0] sm:$0xf] %vm205_vm1, %v10906_v6  ;;  %v10919_v54 = vpack.c.bf16 %v4999_v62, %v4999_v62  ;;  %v10920_v25 = vpack.c.bf16 %v5000_v45, %v5000_v45  ;;  %v10921_v41 = vpack.c.bf16 %v5001_v29, %v5001_v29  ;;  %v5540_v62 = vld [vmem:[#allocation2 + $0x8] sm:$0xf] }
 0x2a0   : > { %5147 = vst.msk [vmem:[#allocation2 + $0xc4] sm:$0xf] %vm205_vm1, %v10907_v22  ;;  %5148 = vst.msk [vmem:[#allocation2 + $0xc8] sm:$0xf] %vm205_vm1, %v10908_v53  ;;  %v10922_v21 = vpack.c.bf16 %v5002_v52, %v5002_v52  ;;  %v10923_v33 = vpack.c.bf16 %v5003_v0, %v5003_v0  ;;  %v10924_v47 = vpack.c.bf16 %v5004_v50, %v5004_v50  ;;  %v5544_v6 = vld [vmem:[#allocation2 + $0x10] sm:$0xf] }
 0x2a1   : > { %5149 = vst.msk [vmem:[#allocation2 + $0xcc] sm:$0xf] %vm205_vm1, %v10909_v16  ;;  %5150 = vst.msk [vmem:[#allocation2 + $0xd0] sm:$0xf] %vm205_vm1, %v10910_v3  ;;  %v10926_v55 = vpack.c.bf16 %v5006_v4, %v5006_v4  ;;  %v10927_v30 = vpack.c.bf16 %v5007_v51, %v5007_v51  ;;  %v5178_v46 = vld [vmem:[#allocation2 + $0x98] sm:$0xf] }
 0x2a2   : > { %5151 = vst.msk [vmem:[#allocation2 + $0xd4] sm:$0xf] %vm205_vm1, %v10911_v59  ;;  %5152 = vst.msk [vmem:[#allocation2 + $0xd8] sm:$0xf] %vm205_vm1, %v10912_v31  ;;  %v5168_v38 = vld [vmem:[#allocation2 + $0xa0] sm:$0xf] }
 0x2a3   : > { %5153 = vst.msk [vmem:[#allocation2 + $0xdc] sm:$0xf] %vm205_vm1, %v10913_v56  ;;  %5154 = vst.msk [vmem:[#allocation2 + $0xe0] sm:$0xf] %vm205_vm1, %v10914_v58  ;;  %v5169_v40 = vld [vmem:[#allocation2 + $0xa4] sm:$0xf] }
 0x2a4   : > { %5155 = vst.msk [vmem:[#allocation2 + $0xe4] sm:$0xf] %vm205_vm1, %v10915_v1  ;;  %5156 = vst.msk [vmem:[#allocation2 + $0xe8] sm:$0xf] %vm205_vm1, %v10916_v39  ;;  %v12128_v57 = vld [vmem:[#allocation2 + $0x98] sm:$0xff]   ;;  %v12129_v27 = vld [vmem:[#allocation2 + $0xa0] sm:$0xff]  }
 0x2a5   : > { %5157 = vst.msk [vmem:[#allocation2 + $0xec] sm:$0xf] %vm205_vm1, %v10917_v15  ;;  %5158 = vst.msk [vmem:[#allocation2 + $0xf0] sm:$0xf] %vm205_vm1, %v10918_v49  ;;  %v5179_v8 = vld [vmem:[#allocation2 + $0x9c] sm:$0xf] }
 0x2a6   : > { %5159 = vst.msk [vmem:[#allocation2 + $0xf4] sm:$0xf] %vm205_vm1, %v10919_v54  ;;  %5160 = vst.msk [vmem:[#allocation2 + $0xf8] sm:$0xf] %vm205_vm1, %v10920_v25  ;;  %v5229_v34 = vshrl.u32 %v5178_v46, 16  ;;  %v5237_v20 = vshrl.u32 %v5179_v8, 16 }
 0x2a7   : > { %5161 = vst.msk [vmem:[#allocation2 + $0xfc] sm:$0xf] %vm205_vm1, %v10921_v41  ;;  %5162 = vst.msk [vmem:[#allocation2 + $0x100] sm:$0xf] %vm205_vm1, %v10922_v21  ;;  %v5232_v17 = vshll.u32 %v5178_v46, 16  ;;  %v5240_v26 = vshll.u32 %v5179_v8, 16 }
 0x2a8   : > { %5166 = vst.msk [vmem:[#allocation2 + $0x110] sm:$0xf] %vm205_vm1, %v10926_v55  ;;  %5167 = vst.msk [vmem:[#allocation2 + $0x114] sm:$0xf] %vm205_vm1, %v10927_v30  ;;  %v5231_v29 = vrot.slane %v5229_v34, 7  ;;  %v5239_v52 = vrot.slane %v5237_v20, 7 }
 0x2a9   : > { %5163 = vst.msk [vmem:[#allocation2 + $0x104] sm:$0xf] %vm205_vm1, %v10923_v33  ;;  %5164 = vst.msk [vmem:[#allocation2 + $0x108] sm:$0xf] %vm205_vm1, %v10924_v47  ;;  %v5180_v0 = vld [vmem:[#allocation2 + $0xa0] sm:$0xf] }
 0x2aa   : > { %5170 = vst.msk [vmem:[#allocation2 + $0x90] sm:$0xf] %vm205_vm1, %v5168_v38  ;;  %5171 = vst.msk [vmem:[#allocation2 + $0x94] sm:$0xf] %vm205_vm1, %v5169_v40  ;;  %v5181_v50 = vld [vmem:[#allocation2 + $0xa4] sm:$0xf]  ;;  %v5234_v28 = vor.u32 %v5232_v17, %v5231_v29  ;;  %v5242_v7 = vor.u32 %v5240_v26, %v5239_v52 }
 0x2ab   : > { %v13852_v4 = vld [vmem:[#allocation2 + $0x98] sm:$0x1]  ;;  %v5245_v48 = vshrl.u32 %v5180_v0, 16  ;;  %v5253_v18 = vshrl.u32 %v5181_v50, 16  ;;  %v12130_v36 = vld [vmem:[#allocation2 + $0xa8] sm:$0xff]   ;;  %v5235_v23 = vrot.slane %v5231_v29, 4 }
 0x2ac   : > { %v5248_v53 = vshll.u32 %v5180_v0, 16  ;;  %v5256_v3 = vshll.u32 %v5181_v50, 16  ;;  %v5182_v59 = vld [vmem:[#allocation2 + $0xa8] sm:$0xf]  ;;  %v12131_v31 = vld [vmem:[#allocation2 + $0xb0] sm:$0xff]   ;;  %v5541_v58 = vsel %vm12393_vm6, %v5234_v28, %v5540_v62  ;;  %v5632_v41 = vshrl.u32 %v13852_v4, 16 }
 0x2ad   : > { %v5247_v22 = vrot.slane %v5245_v48, 7  ;;  %v5255_v16 = vrot.slane %v5253_v18, 7  ;;  %v5243_v9 = vsel %vm12399_vm7, %v5235_v23, %v5242_v7  ;;  %v5183_v1 = vld [vmem:[#allocation2 + $0xac] sm:$0xf]  ;;  %v5261_v39 = vshrl.u32 %v5182_v59, 16  ;;  %v12133_v17 = vld [vmem:[#allocation2 + $0xc0] sm:$0xff]  }
 0x2ae   : > { %5542 = vst [vmem:[#allocation2 + $0x8] sm:$0xf] %v5541_v58  ;;  %5543 = vst.msk [vmem:[#allocation2 + $0xc] sm:$0xf] %vm205_vm1, %v5243_v9  ;;  %v5269_v25 = vshrl.u32 %v5183_v1, 16  ;;  %v5264_v33 = vshll.u32 %v5182_v59, 16 }
 0x2af   : > { %v5250_v15 = vor.u32 %v5248_v53, %v5247_v22  ;;  %v5251_v49 = vrot.slane %v5247_v22, 4  ;;  %v5258_v54 = vor.u32 %v5256_v3, %v5255_v16  ;;  %v5263_v21 = vrot.slane %v5261_v39, 7  ;;  %v5184_v55 = vld [vmem:[#allocation2 + $0xb0] sm:$0xf]  ;;  %v5611_v62 = vld [vmem:[#allocation2 + $0xa8] sm:$0x1] }
 0x2b0   : > { %v5272_v47 = vshll.u32 %v5183_v1, 16  ;;  %v5271_v40 = vrot.slane %v5269_v25, 7  ;;  %v5280_v8 = vshll.u32 %v5184_v55, 16  ;;  %v5186_v52 = vld [vmem:[#allocation2 + $0xb8] sm:$0xf]  ;;  %v5642_v9 = vshrl.u32 %v5611_v62, 16 }
 0x2b1   : > { %v5176_v10 = vld [vmem:[#allocation2 + $0x90] sm:$0xf]  ;;  %v5177_v2 = vld [vmem:[#allocation2 + $0x94] sm:$0xf]  ;;  %v5259_v30 = vsel %vm12399_vm7, %v5251_v49, %v5258_v54  ;;  %v5545_v38 = vsel %vm12393_vm6, %v5250_v15, %v5544_v6  ;;  %v5187_v0 = vld [vmem:[#allocation2 + $0xbc] sm:$0xf] }
 0x2b2   : > { %v12127_v60 = vld [vmem:[#allocation2 + $0x90] sm:$0xff]   ;;  %v5213_v14 = vshrl.u32 %v5176_v10, 16  ;;  %v5221_v61 = vshrl.u32 %v5177_v2, 16  ;;  %v5216_v43 = vshll.u32 %v5176_v10, 16  ;;  %v5224_v13 = vshll.u32 %v5177_v2, 16 }
 0x2b3   : > { %11653 = vmatprep.mubr.msk.bf16.mxu1 %vm1655_vm4, %v12127_v60  ;;  %v5608_v56 = vld [vmem:[#allocation2 + $0x90] sm:$0x1]  ;;  %v5548_v10 = vld [vmem:[#allocation2 + $0x18] sm:$0xf]  ;;  %v5185_v60 = vld [vmem:[#allocation2 + $0xb4] sm:$0xf] }
 0x2b4   : > { %v5215_v11 = vrot.slane %v5213_v14, 7  ;;  %11654 = vmatmul.mubr.msk.bf16.vlgmr.msra.gmra.mxu1 %vm1655_vm4, %v12128_v57  ;;  %v5223_v35 = vrot.slane %v5221_v61, 7  ;;  %v5277_v2 = vshrl.u32 %v5184_v55, 16  ;;  %v5627_v14 = vshrl.u32 %v5608_v56, 16  ;;  %5546 = vst [vmem:[#allocation2 + $0x10] sm:$0xf] %v5545_v38 }
 0x2b5   : > { %11720 = vmatpush3.bf16.msra.mxu1 %v7232_v32  ;;  %11657 = vmatprep.mubr.msk.bf16.mxu1 %vm1655_vm4, %v12129_v27  ;;  %5547 = vst.msk [vmem:[#allocation2 + $0x14] sm:$0xf] %vm205_vm1, %v5259_v30  ;;  %v5266_v57 = vor.u32 %v5264_v33, %v5263_v21  ;;  %v5267_v32 = vrot.slane %v5263_v21, 4  ;;  %v5285_v27 = vshrl.u32 %v5185_v60, 16  ;;  %v5552_v61 = vld [vmem:[#allocation2 + $0x20] sm:$0xf] }
 0x2b6   : > { %v5218_v5 = vor.u32 %v5216_v43, %v5215_v11  ;;  %v5219_v44 = vrot.slane %v5215_v11, 4  ;;  %v5226_v45 = vor.u32 %v5224_v13, %v5223_v35  ;;  %11970 = vmatprep.subr.msk.bf16.mxu1 %vm1704_vm0, %v13843_v24  ;;  %v5610_v11 = vld [vmem:[#allocation2 + $0xa0] sm:$0x1]  ;;  %v5274_v43 = vor.u32 %v5272_v47, %v5271_v40  ;;  %v12132_v35 = vld [vmem:[#allocation2 + $0xb8] sm:$0xff]   ;;  %v5737_v50 = vld [vmem:[#allocation2 + $0x8] sm:$0x1] }
 0x2b7   : > { %v5279_v46 = vrot.slane %v5277_v2, 7  ;;  %v5549_v20 = vsel %vm12393_vm6, %v5266_v57, %v5548_v10  ;;  %v5637_v4 = vshrl.u32 %v5610_v11, 16  ;;  %v5293_v48 = vshrl.u32 %v5186_v52, 16  ;;  %v5556_v7 = vld [vmem:[#allocation2 + $0x28] sm:$0xf]  ;;  %v12137_v40 = vld [vmem:[#allocation2 + $0xd0] sm:$0xff]  }
 0x2b8   : > { %v5537_v42 = vsel %vm12393_vm6, %v5218_v5, %v5536_v19  ;;  %v5227_v12 = vsel %vm12399_vm7, %v5219_v44, %v5226_v45  ;;  %v5287_v5 = vrot.slane %v5285_v27, 7  ;;  %v5288_v44 = vshll.u32 %v5185_v60, 16  ;;  %5550 = vst [vmem:[#allocation2 + $0x18] sm:$0xf] %v5549_v20  ;;  %v5188_v16 = vld [vmem:[#allocation2 + $0xc0] sm:$0xf] }
 0x2b9   : > { %5538 = vst [vmem:[#allocation2] sm:$0xf] %v5537_v42  ;;  %5539 = vst.msk [vmem:[#allocation2 + $0x4] sm:$0xf] %vm205_vm1, %v5227_v12  ;;  %v5275_v26 = vsel %vm12399_vm7, %v5267_v32, %v5274_v43  ;;  %v5282_v45 = vor.u32 %v5280_v8, %v5279_v46  ;;  %v5283_v29 = vrot.slane %v5279_v46, 4  ;;  %v5738_v18 = vsel %vm12420_vm9, %v5632_v41, %v5737_v50  ;;  %v12135_v33 = vld [vmem:[#allocation2 + $0xc8] sm:$0xff]  }
 0x2ba   : > { %5551 = vst.msk [vmem:[#allocation2 + $0x1c] sm:$0xf] %vm205_vm1, %v5275_v26  ;;  %v5290_v42 = vor.u32 %v5288_v44, %v5287_v5  ;;  %v5612_v12 = vld [vmem:[#allocation2 + $0xb0] sm:$0x1]  ;;  %v5296_v28 = vshll.u32 %v5186_v52, 16  ;;  %v5301_v23 = vshrl.u32 %v5187_v0, 16 }
 0x2bb   : > { %5739 = vst [vmem:[#allocation2 + $0x8] sm:$0x1] %v5738_v18  ;;  %v5295_v22 = vrot.slane %v5293_v48, 7  ;;  %v5304_v53 = vshll.u32 %v5187_v0, 16  ;;  %v5740_v3 = vld [vmem:[#allocation2 + $0x10] sm:$0x1] }
 0x2bc   : > { %11658 = vmatmul.mubr.msk.bf16.gmra.mxu1 %vm1655_vm4, %v12130_v36  ;;  %v5553_v36 = vsel %vm12393_vm6, %v5282_v45, %v5552_v61  ;;  %v5291_v6 = vsel %vm12399_vm7, %v5283_v29, %v5290_v42  ;;  %v5303_v59 = vrot.slane %v5301_v23, 7  ;;  %v5741_v56 = vsel %vm12420_vm9, %v5637_v4, %v5740_v3  ;;  %v5189_v39 = vld [vmem:[#allocation2 + $0xc4] sm:$0xf]  ;;  %v5560_v15 = vld [vmem:[#allocation2 + $0x30] sm:$0xf] }
 0x2bd   : > { %11661 = vmatprep.mubr.msk.bf16.mxu1 %vm1655_vm4, %v12131_v31  ;;  %5554 = vst [vmem:[#allocation2 + $0x20] sm:$0xf] %v5553_v36  ;;  %5555 = vst.msk [vmem:[#allocation2 + $0x24] sm:$0xf] %vm205_vm1, %v5291_v6  ;;  %v5309_v31 = vshrl.u32 %v5188_v16, 16  ;;  %v5298_v58 = vor.u32 %v5296_v28, %v5295_v22  ;;  %v5299_v1 = vrot.slane %v5295_v22, 4 }
 0x2be   : > { %5742 = vst [vmem:[#allocation2 + $0x10] sm:$0x1] %v5741_v56  ;;  %v5306_v49 = vor.u32 %v5304_v53, %v5303_v59  ;;  %v5312_v25 = vshll.u32 %v5188_v16, 16  ;;  %v5317_v41 = vshrl.u32 %v5189_v39, 16  ;;  %v5647_v55 = vshrl.u32 %v5612_v12, 16  ;;  %v12139_v36 = vld [vmem:[#allocation2 + $0xd8] sm:$0xff]  }
 0x2bf   : > { %v5311_v54 = vrot.slane %v5309_v31, 7  ;;  %v5743_v47 = vld [vmem:[#allocation2 + $0x18] sm:$0x1]  ;;  %v5557_v30 = vsel %vm12393_vm6, %v5298_v58, %v5556_v7  ;;  %v13896_v38 = vld [vmem:[#allocation2 + $0x10c] sm:$0xf]  ;;  %v12141_v22 = vld [vmem:[#allocation2 + $0xe0] sm:$0xff]  }
 0x2c0   : > { %v5734_v19 = vld [vmem:[#allocation2] sm:$0x1]  ;;  %v5744_v10 = vsel %vm12420_vm9, %v5642_v9, %v5743_v47  ;;  %v5307_v60 = vsel %vm12399_vm7, %v5299_v1, %v5306_v49  ;;  %5558 = vst [vmem:[#allocation2 + $0x28] sm:$0xf] %v5557_v30  ;;  %v5613_v57 = vld [vmem:[#allocation2 + $0xb8] sm:$0x1] }
 0x2c1   : > { %v5735_v34 = vsel %vm12420_vm9, %v5627_v14, %v5734_v19  ;;  %v5314_v2 = vor.u32 %v5312_v25, %v5311_v54  ;;  %v5320_v14 = vshll.u32 %v5189_v39, 16  ;;  %5745 = vst [vmem:[#allocation2 + $0x18] sm:$0x1] %v5744_v10  ;;  %5559 = vst.msk [vmem:[#allocation2 + $0x2c] sm:$0xf] %vm205_vm1, %v5307_v60  ;;  %v5315_v32 = vrot.slane %v5311_v54, 4 }
 0x2c2   : > { %5736 = vst [vmem:[#allocation2] sm:$0x1] %v5735_v34  ;;  %v5319_v27 = vrot.slane %v5317_v41, 7  ;;  %v5190_v61 = vld [vmem:[#allocation2 + $0xc8] sm:$0xf]  ;;  %v5461_v29 = vshrl.u32 %v13896_v38, 16 }
 0x2c3   : > { %v5191_v19 = vld [vmem:[#allocation2 + $0xcc] sm:$0xf]  ;;  %v5561_v46 = vsel %vm12393_vm6, %v5314_v2, %v5560_v15  ;;  %v5325_v8 = vshrl.u32 %v5190_v61, 16  ;;  %v5614_v20 = vld [vmem:[#allocation2 + $0xc0] sm:$0x1]  ;;  %v5328_v62 = vshll.u32 %v5190_v61, 16 }
 0x2c4   : > { %11662 = vmatmul.mubr.msk.bf16.gmra.mxu1 %vm1655_vm4, %v12132_v35  ;;  %v12136_v11 = vld [vmem:[#allocation2 + $0x8] sm:$0xff]   ;;  %v5746_v43 = vld [vmem:[#allocation2 + $0x20] sm:$0x1]  ;;  %v5322_v34 = vor.u32 %v5320_v14, %v5319_v27  ;;  %5562 = vst [vmem:[#allocation2 + $0x30] sm:$0xf] %v5561_v46  ;;  %v5333_v5 = vshrl.u32 %v5191_v19, 16 }
 0x2c5   : > { %11665 = vmatprep.mubr.msk.bf16.mxu1 %vm1655_vm4, %v12133_v17  ;;  %v5747_v35 = vsel %vm12420_vm9, %v5647_v55, %v5746_v43  ;;  %v5564_v44 = vld [vmem:[#allocation2 + $0x38] sm:$0xf]  ;;  %v13911_v17 = vsel %vm1704_vm0, %v13843_v24, 0  ;;  %v5327_v26 = vrot.slane %v5325_v8, 7  ;;  %v5336_v45 = vshll.u32 %v5191_v19, 16  ;;  %v12138_v52 = vld [vmem:[#allocation2 + $0x10] sm:$0xff]  }
 0x2c6   : > { %5748 = vst [vmem:[#allocation2 + $0x20] sm:$0x1] %v5747_v35  ;;  %v5323_v0 = vsel %vm12399_vm7, %v5315_v32, %v5322_v34  ;;  %v5335_v50 = vrot.slane %v5333_v5, 7  ;;  %v5652_v4 = vshrl.u32 %v5613_v57, 16  ;;  %v5192_v48 = vld [vmem:[#allocation2 + $0xd0] sm:$0xf] }
 0x2c7   : > { %5563 = vst.msk [vmem:[#allocation2 + $0x34] sm:$0xf] %vm205_vm1, %v5323_v0  ;;  %v5330_v24 = vor.u32 %v5328_v62, %v5327_v26  ;;  %v5331_v42 = vrot.slane %v5327_v26, 4  ;;  %v5193_v18 = vld [vmem:[#allocation2 + $0xd4] sm:$0xf]  ;;  %v5341_v7 = vshrl.u32 %v5192_v48, 16 }
 0x2c8   : > { %v5749_v12 = vld [vmem:[#allocation2 + $0x28] sm:$0x1]  ;;  %v5338_v28 = vor.u32 %v5336_v45, %v5335_v50  ;;  %v5349_v6 = vshrl.u32 %v5193_v18, 16  ;;  %v5344_v3 = vshll.u32 %v5192_v48, 16  ;;  %v5568_v59 = vld [vmem:[#allocation2 + $0x40] sm:$0xf] }
 0x2c9   : > { %v12134_v21 = vld [vmem:[#allocation2] sm:$0xff]   ;;  %v5615_v23 = vld [vmem:[#allocation2 + $0xc8] sm:$0x1]  ;;  %v5750_v53 = vsel %vm12420_vm9, %v5652_v4, %v5749_v12  ;;  %v5565_v16 = vsel %vm12393_vm6, %v5330_v24, %v5564_v44  ;;  %v12140_v31 = vld [vmem:[#allocation2 + $0x18] sm:$0xff]   ;;  %v5343_v9 = vrot.slane %v5341_v7, 7  ;;  %v5352_v1 = vshll.u32 %v5193_v18, 16 }
 0x2ca   : > { %11687 = vmatprep.mubr.msk.bf16.mxu0 %vm1655_vm4, %v12134_v21  ;;  %5751 = vst [vmem:[#allocation2 + $0x28] sm:$0x1] %v5750_v53  ;;  %v5339_v56 = vsel %vm12399_vm7, %v5331_v42, %v5338_v28  ;;  %5566 = vst [vmem:[#allocation2 + $0x38] sm:$0xf] %v5565_v16  ;;  %v5351_v58 = vrot.slane %v5349_v6, 7  ;;  %v5662_v55 = vshrl.u32 %v5615_v23, 16 }
 0x2cb   : > { %11688 = vmatmul.mubr.msk.bf16.vlgmr.msra.gmra.mxu0 %vm1655_vm4, %v12136_v11  ;;  %v5752_v39 = vld [vmem:[#allocation2 + $0x30] sm:$0x1]  ;;  %5567 = vst.msk [vmem:[#allocation2 + $0x3c] sm:$0xf] %vm205_vm1, %v5339_v56  ;;  %v5194_v49 = vld [vmem:[#allocation2 + $0xd8] sm:$0xf]  ;;  %v5346_v41 = vor.u32 %v5344_v3, %v5343_v9 }
 0x2cc   : > { %11666 = vmatmul.mubr.msk.bf16.gmra.mxu1 %vm1655_vm4, %v12135_v33  ;;  %11754 = vmatpush3.bf16.msra.mxu0 %v13858_v63  ;;  %v5657_v63 = vshrl.u32 %v5614_v20, 16  ;;  %v13928_v15 = vld [vmem:[#allocation2 + $0xd0] sm:$0x1]  ;;  %v5347_v21 = vrot.slane %v5343_v9, 4  ;;  %v5354_v33 = vor.u32 %v5352_v1, %v5351_v58  ;;  %v5195_v47 = vld [vmem:[#allocation2 + $0xdc] sm:$0xf] }
 0x2cd   : > { %11669 = vmatprep.mubr.msk.bf16.mxu1 %vm1655_vm4, %v12137_v40  ;;  %11691 = vmatprep.mubr.msk.bf16.mxu0 %vm1655_vm4, %v12138_v52  ;;  %v12142_v54 = vld [vmem:[#allocation2 + $0x20] sm:$0xff]   ;;  %v5357_v30 = vshrl.u32 %v5194_v49, 16  ;;  %v5365_v40 = vshrl.u32 %v5195_v47, 16  ;;  %v5464_v10 = vshll.u32 %v13896_v38, 16  ;;  %v5569_v2 = vsel %vm12393_vm6, %v5346_v41, %v5568_v59  ;;  %v5572_v32 = vld [vmem:[#allocation2 + $0x48] sm:$0xf] }
 0x2ce   : > { %v5753_v25 = vsel %vm12420_vm9, %v5657_v63, %v5752_v39  ;;  %v5355_v60 = vsel %vm12399_vm7, %v5347_v21, %v5354_v33  ;;  %v5667_v14 = vshrl.u32 %v13928_v15, 16  ;;  %v5360_v57 = vshll.u32 %v5194_v49, 16  ;;  %v5196_v27 = vld [vmem:[#allocation2 + $0xe0] sm:$0xf]  ;;  %5570 = vst [vmem:[#allocation2 + $0x40] sm:$0xf] %v5569_v2 }
 0x2cf   : > { %5754 = vst [vmem:[#allocation2 + $0x30] sm:$0x1] %v5753_v25  ;;  %5571 = vst.msk [vmem:[#allocation2 + $0x44] sm:$0xf] %vm205_vm1, %v5355_v60  ;;  %v5359_v61 = vrot.slane %v5357_v30, 7  ;;  %v5367_v19 = vrot.slane %v5365_v40, 7 }
 0x2d0   : > { %v5368_v11 = vshll.u32 %v5195_v47, 16  ;;  %v5197_v43 = vld [vmem:[#allocation2 + $0xe4] sm:$0xf]  ;;  %v5373_v46 = vshrl.u32 %v5196_v27, 16  ;;  %v12143_v8 = vld [vmem:[#allocation2 + $0xe8] sm:$0xff]   ;;  %v5376_v34 = vshll.u32 %v5196_v27, 16 }
 0x2d1   : > { %v13943_v35 = vld [vmem:[#allocation2 + $0xd8] sm:$0x1]  ;;  %v5381_v20 = vshrl.u32 %v5197_v43, 16  ;;  %v5788_v5 = vld [vmem:[#allocation2 + $0x90] sm:$0xf]  ;;  %v5362_v26 = vor.u32 %v5360_v57, %v5359_v61  ;;  %v5363_v62 = vrot.slane %v5359_v61, 4 }
 0x2d2   : > { %v5755_v44 = vld [vmem:[#allocation2 + $0x38] sm:$0x1]  ;;  %v5370_v45 = vor.u32 %v5368_v11, %v5367_v19  ;;  %v5384_v52 = vshll.u32 %v5197_v43, 16  ;;  %v5576_v0 = vld [vmem:[#allocation2 + $0x50] sm:$0xf]  ;;  %v5375_v4 = vrot.slane %v5373_v46, 7 }
 0x2d3   : > { %11692 = vmatmul.mubr.msk.bf16.gmra.mxu0 %vm1655_vm4, %v12140_v31  ;;  %v5756_v50 = vsel %vm12420_vm9, %v5662_v55, %v5755_v44  ;;  %v5383_v24 = vrot.slane %v5381_v20, 7  ;;  %v13947_v42 = vld [vmem:[#allocation2 + $0xe0] sm:$0x1]  ;;  %v12144_v48 = vld [vmem:[#allocation2 + $0x28] sm:$0xff]   ;;  %v12145_v18 = vld [vmem:[#allocation2 + $0xf0] sm:$0xff]   ;;  %v5573_v12 = vsel %vm12393_vm6, %v5362_v26, %v5572_v32  ;;  %v5825_v23 = vshrl.u32 %v5788_v5, 16 }
 0x2d4   : > { %11670 = vmatmul.mubr.msk.bf16.gmra.mxu1 %vm1655_vm4, %v12139_v36  ;;  %11695 = vmatprep.mubr.msk.bf16.mxu0 %vm1655_vm4, %v12142_v54  ;;  %5757 = vst [vmem:[#allocation2 + $0x38] sm:$0x1] %v5756_v50  ;;  %v5371_v36 = vsel %vm12399_vm7, %v5363_v62, %v5370_v45  ;;  %v5789_v28 = vld [vmem:[#allocation2 + $0x94] sm:$0xf]  ;;  %v5828_v7 = vshll.u32 %v5788_v5, 16  ;;  %v5379_v53 = vrot.slane %v5375_v4, 4 }
 0x2d5   : > { %11673 = vmatprep.mubr.msk.bf16.mxu1 %vm1655_vm4, %v12141_v22  ;;  %5574 = vst [vmem:[#allocation2 + $0x48] sm:$0xf] %v5573_v12  ;;  %5575 = vst.msk [vmem:[#allocation2 + $0x4c] sm:$0xf] %vm205_vm1, %v5371_v36  ;;  %v5378_v22 = vor.u32 %v5376_v34, %v5375_v4  ;;  %v5386_v63 = vor.u32 %v5384_v52, %v5383_v24  ;;  %v5834_v16 = vshll.u32 %v5789_v28, 16  ;;  %v5672_v3 = vshrl.u32 %v13943_v35, 16 }
 0x2d6   : > { %v12146_v6 = vld [vmem:[#allocation2 + $0x30] sm:$0xff]   ;;  %v5827_v59 = vrot.slane %v5825_v23, 4  ;;  %v5830_v31 = vrot.slane %v5828_v7, 5  ;;  %v5838_v56 = vshrl.u32 %v5789_v28, 16  ;;  %v5198_v9 = vld [vmem:[#allocation2 + $0xe8] sm:$0xf] }
 0x2d7   : > { %v5758_v58 = vld [vmem:[#allocation2 + $0x40] sm:$0x1]  ;;  %v5387_v1 = vsel %vm12399_vm7, %v5379_v53, %v5386_v63  ;;  %v5577_v39 = vsel %vm12393_vm6, %v5378_v22, %v5576_v0  ;;  %v5836_v15 = vrot.slane %v5834_v16, 5  ;;  %v5389_v49 = vshrl.u32 %v5198_v9, 16  ;;  %v5199_v33 = vld [vmem:[#allocation2 + $0xec] sm:$0xf] }
 0x2d8   : > { %v5759_v54 = vsel %vm12420_vm9, %v5667_v14, %v5758_v58  ;;  %5578 = vst [vmem:[#allocation2 + $0x50] sm:$0xf] %v5577_v39  ;;  %5579 = vst.msk [vmem:[#allocation2 + $0x54] sm:$0xf] %vm205_vm1, %v5387_v1  ;;  %v5677_v25 = vshrl.u32 %v13947_v42, 16  ;;  %v5831_v41 = vor.u32 %v5830_v31, %v5827_v59  ;;  %v5840_v21 = vrot.slane %v5838_v56, 4 }
 0x2d9   : > { %v5580_v47 = vld [vmem:[#allocation2 + $0x58] sm:$0xf]  ;;  %5760 = vst [vmem:[#allocation2 + $0x40] sm:$0x1] %v5759_v54  ;;  %v6203_v30 = vld [vmem:[#allocation2 + $0x124] sm:$0xf] }
 0x2da   : > { %v12147_v55 = vld [vmem:[#allocation2 + $0xf8] sm:$0xff]   ;;  %v5391_v40 = vrot.slane %v5389_v49, 7  ;;  %v5392_v60 = vshll.u32 %v5198_v9, 16  ;;  %v5397_v2 = vshrl.u32 %v5199_v33, 16  ;;  %v5400_v57 = vshll.u32 %v5199_v33, 16  ;;  %v12149_v27 = vld [vmem:[#allocation2 + $0x100] sm:$0xff]  }
 0x2db   : > { %11696 = vmatmul.mubr.msk.bf16.gmra.mxu0 %vm1655_vm4, %v12144_v48  ;;  %v5790_v32 = vld [vmem:[#allocation2 + $0x98] sm:$0xf]  ;;  %v5832_v61 = vrot.slane %v5831_v41, 4  ;;  %v5841_v14 = vor.u32 %v5840_v21, %v5836_v15  ;;  %v13967_v19 = vld [vmem:[#allocation2 + $0x94] sm:$0x8]  ;;  %v12151_v33 = vld [vmem:[#allocation2 + $0x108] sm:$0xff]  }
 0x2dc   : > { %11674 = vmatmul.mubr.msk.bf16.gmra.mxu1 %vm1655_vm4, %v12143_v8  ;;  %11699 = vmatprep.mubr.msk.bf16.mxu0 %vm1655_vm4, %v12146_v6  ;;  %v5791_v11 = vld [vmem:[#allocation2 + $0x9c] sm:$0xf]  ;;  %v5844_v43 = vshrl.u32 %v5790_v32, 16  ;;  %v5847_v46 = vshll.u32 %v5790_v32, 16  ;;  %v5394_v35 = vor.u32 %v5392_v60, %v5391_v40  ;;  %v5395_v34 = vrot.slane %v5391_v40, 4  ;;  %v12234_v26 = vld [vmem:[#allocation2 + $0x20] sm:$0xff]  }
 0x2dd   : > { %11677 = vmatprep.mubr.msk.bf16.mxu1 %vm1655_vm4, %v12145_v18  ;;  %v12148_v8 = vld [vmem:[#allocation2 + $0x38] sm:$0xff]   ;;  %v5399_v20 = vrot.slane %v5397_v2, 7  ;;  %v5853_v5 = vshll.u32 %v5791_v11, 16  ;;  %v5761_v44 = vld [vmem:[#allocation2 + $0x48] sm:$0x1]  ;;  %v5837_v62 = vsel %vm12540_vm14, %v5832_v61, %v5836_v15  ;;  %v5842_v45 = vrot.slane %v5841_v14, 4 }
 0x2de   : > { %v5846_v52 = vrot.slane %v5844_v43, 4  ;;  %v5762_v0 = vsel %vm12420_vm9, %v5672_v3, %v5761_v44  ;;  %6202 = vst.msk [vmem:[#allocation2 + $0x120] sm:$0xf] %vm205_vm1, %v5837_v62  ;;  %v5581_v4 = vsel %vm12393_vm6, %v5394_v35, %v5580_v47  ;;  %v5849_v24 = vrot.slane %v5847_v46, 5  ;;  %v5200_v42 = vld [vmem:[#allocation2 + $0xf0] sm:$0xf] }
 0x2df   : > { %v5402_v50 = vor.u32 %v5400_v57, %v5399_v20  ;;  %v5201_v48 = vld [vmem:[#allocation2 + $0xf4] sm:$0xf]  ;;  %5763 = vst [vmem:[#allocation2 + $0x48] sm:$0x1] %v5762_v0  ;;  %v6204_v36 = vsel %vm12546_vm15, %v5842_v45, %v6203_v30  ;;  %5582 = vst [vmem:[#allocation2 + $0x58] sm:$0xf] %v5581_v4 }
 0x2e0   : > { %v5619_v12 = vld [vmem:[#allocation2 + $0xe8] sm:$0x1]  ;;  %v5855_v28 = vrot.slane %v5853_v5, 5  ;;  %v5857_v23 = vshrl.u32 %v5791_v11, 16  ;;  %v5405_v7 = vshrl.u32 %v5200_v42, 16  ;;  %v6293_v22 = vshll.u32 %v13967_v19, 16 }
 0x2e1   : > { %v5764_v6 = vld [vmem:[#allocation2 + $0x50] sm:$0x1]  ;;  %6205 = vst [vmem:[#allocation2 + $0x124] sm:$0xf] %v6204_v36  ;;  %v5403_v53 = vsel %vm12399_vm7, %v5395_v34, %v5402_v50  ;;  %v5850_v63 = vor.u32 %v5849_v24, %v5846_v52  ;;  %v5413_v16 = vshrl.u32 %v5201_v48, 16  ;;  %v12150_v59 = vld [vmem:[#allocation2 + $0x40] sm:$0xff]  }
 0x2e2   : > { %v5584_v3 = vld [vmem:[#allocation2 + $0x60] sm:$0xf]  ;;  %v5765_v31 = vsel %vm12420_vm9, %v5677_v25, %v5764_v6  ;;  %5583 = vst.msk [vmem:[#allocation2 + $0x5c] sm:$0xf] %vm205_vm1, %v5403_v53  ;;  %v5859_v56 = vrot.slane %v5857_v23, 4  ;;  %v5407_v9 = vrot.slane %v5405_v7, 7 }
 0x2e3   : > { %11700 = vmatmul.mubr.msk.bf16.gmra.mxu0 %vm1655_vm4, %v12148_v8  ;;  %v5408_v58 = vshll.u32 %v5200_v42, 16  ;;  %5766 = vst [vmem:[#allocation2 + $0x50] sm:$0x1] %v5765_v31  ;;  %v5682_v1 = vshrl.u32 %v5619_v12, 16  ;;  %v5851_v39 = vrot.slane %v5850_v63, 4  ;;  %v5415_v49 = vrot.slane %v5413_v16, 7 }
 0x2e4   : > { %11678 = vmatmul.mubr.msk.bf16.gmra.mxu1 %vm1655_vm4, %v12147_v55  ;;  %v6207_v15 = vld [vmem:[#allocation2 + $0x12c] sm:$0xf]  ;;  %v5416_v54 = vshll.u32 %v5201_v48, 16  ;;  %v5792_v41 = vld [vmem:[#allocation2 + $0xa0] sm:$0xf]  ;;  %11703 = vmatprep.mubr.msk.bf16.mxu0 %vm1655_vm4, %v12150_v59  ;;  %v5860_v47 = vor.u32 %v5859_v56, %v5855_v28  ;;  %v5411_v25 = vrot.slane %v5407_v9, 4 }
 0x2e5   : > { %11681 = vmatprep.mubr.msk.bf16.mxu1 %vm1655_vm4, %v12149_v27  ;;  %v13987_v21 = vld [vmem:[#allocation2 + $0x9c] sm:$0x8]  ;;  %v5410_v55 = vor.u32 %v5408_v58, %v5407_v9  ;;  %v5793_v30 = vld [vmem:[#allocation2 + $0xa4] sm:$0xf]  ;;  %v5863_v40 = vshrl.u32 %v5792_v41, 16  ;;  %v5856_v60 = vsel %vm12540_vm14, %v5851_v39, %v5855_v28  ;;  %v5866_v32 = vshll.u32 %v5792_v41, 16 }
 0x2e6   : > { %v5418_v2 = vor.u32 %v5416_v54, %v5415_v49  ;;  %v13992_v57 = vld [vmem:[#allocation2 + $0xf0] sm:$0x1]  ;;  %v5872_v27 = vshll.u32 %v5793_v30, 16  ;;  %v5202_v61 = vld [vmem:[#allocation2 + $0xf8] sm:$0xf]  ;;  %v5861_v19 = vrot.slane %v5860_v47, 4 }
 0x2e7   : > { %v5203_v14 = vld [vmem:[#allocation2 + $0xfc] sm:$0xf]  ;;  %6206 = vst.msk [vmem:[#allocation2 + $0x128] sm:$0xf] %vm205_vm1, %v5856_v60  ;;  %v5585_v11 = vsel %vm12393_vm6, %v5410_v55, %v5584_v3  ;;  %v5865_v43 = vrot.slane %v5863_v40, 4  ;;  %v5876_v46 = vshrl.u32 %v5793_v30, 16 }
 0x2e8   : > { %v12152_v8 = vld [vmem:[#allocation2 + $0x48] sm:$0xff]   ;;  %v5767_v35 = vld [vmem:[#allocation2 + $0x58] sm:$0x1]  ;;  %v5419_v34 = vsel %vm12399_vm7, %v5411_v25, %v5418_v2  ;;  %5586 = vst [vmem:[#allocation2 + $0x60] sm:$0xf] %v5585_v11  ;;  %v5868_v20 = vrot.slane %v5866_v32, 5  ;;  %v6208_v62 = vsel %vm12546_vm15, %v5861_v19, %v6207_v15 }
 0x2e9   : > { %v6364_v5 = vld [vmem:[#allocation2 + $0x124] sm:$0x8]  ;;  %v5768_v44 = vsel %vm12420_vm9, %v5682_v1, %v5767_v35  ;;  %5587 = vst.msk [vmem:[#allocation2 + $0x64] sm:$0xf] %vm205_vm1, %v5419_v34  ;;  %v5874_v45 = vrot.slane %v5872_v27, 5  ;;  %v5878_v52 = vrot.slane %v5876_v46, 4 }
 0x2ea   : > { %v6296_v0 = vshll.u32 %v13987_v21, 16  ;;  %v6365_v4 = vsel %vm12568_vm2, %v6293_v22, %v6364_v5  ;;  %5769 = vst [vmem:[#allocation2 + $0x58] sm:$0x1] %v5768_v44  ;;  %6209 = vst [vmem:[#allocation2 + $0x12c] sm:$0xf] %v6208_v62  ;;  %v5869_v24 = vor.u32 %v5868_v20, %v5865_v43  ;;  %v5421_v48 = vshrl.u32 %v5202_v61, 16 }
 0x2eb   : > { %11704 = vmatmul.mubr.msk.bf16.gmra.mxu0 %vm1655_vm4, %v12152_v8  ;;  %v6211_v42 = vld [vmem:[#allocation2 + $0x134] sm:$0xf]  ;;  %v5794_v36 = vld [vmem:[#allocation2 + $0xa8] sm:$0xf]  ;;  %6366 = vst [vmem:[#allocation2 + $0x124] sm:$0x8] %v6365_v4  ;;  %v5879_v23 = vor.u32 %v5878_v52, %v5874_v45 }
 0x2ec   : > { %11682 = vmatmul.mubr.msk.bf16.gmra.mxu1 %vm1655_vm4, %v12151_v33  ;;  %v12153_v12 = vld [vmem:[#allocation2 + $0x50] sm:$0xff]   ;;  %v5687_v28 = vshrl.u32 %v13992_v57, 16  ;;  %v5424_v7 = vshll.u32 %v5202_v61, 16  ;;  %v5429_v6 = vshrl.u32 %v5203_v14, 16  ;;  %v5588_v53 = vld [vmem:[#allocation2 + $0x68] sm:$0xf] }
 0x2ed   : > { %v5870_v63 = vrot.slane %v5869_v24, 4  ;;  %v5423_v16 = vrot.slane %v5421_v48, 7  ;;  %v5432_v3 = vshll.u32 %v5203_v14, 16  ;;  %v5795_v59 = vld [vmem:[#allocation2 + $0xac] sm:$0xf]  ;;  %v5882_v31 = vshrl.u32 %v5794_v36, 16  ;;  %11707 = vmatprep.mubr.msk.bf16.mxu0 %vm1655_vm4, %v12153_v12 }
 0x2ee   : > { %v5880_v22 = vrot.slane %v5879_v23, 4  ;;  %v14011_v56 = vld [vmem:[#allocation2 + $0xa4] sm:$0x8]  ;;  %v5431_v9 = vrot.slane %v5429_v6, 7  ;;  %v5885_v58 = vshll.u32 %v5794_v36, 16  ;;  %v5891_v1 = vshll.u32 %v5795_v59, 16 }
 0x2ef   : > { %v5875_v39 = vsel %vm12540_vm14, %v5870_v63, %v5874_v45  ;;  %v5426_v15 = vor.u32 %v5424_v7, %v5423_v16  ;;  %v5427_v49 = vrot.slane %v5423_v16, 4  ;;  %v5884_v54 = vrot.slane %v5882_v31, 4  ;;  %v5204_v41 = vld [vmem:[#allocation2 + $0x100] sm:$0xf]  ;;  %v5205_v25 = vld [vmem:[#allocation2 + $0x104] sm:$0xf] }
 0x2f0   : > { %v5770_v21 = vld [vmem:[#allocation2 + $0x60] sm:$0x1]  ;;  %6210 = vst.msk [vmem:[#allocation2 + $0x130] sm:$0xf] %vm205_vm1, %v5875_v39  ;;  %v6212_v33 = vsel %vm12546_vm15, %v5880_v22, %v6211_v42  ;;  %v5434_v47 = vor.u32 %v5432_v3, %v5431_v9  ;;  %v5887_v55 = vrot.slane %v5885_v58, 5  ;;  %v14020_v30 = vrot.slane %v5461_v29, 7 }
 0x2f1   : > { %v5771_v40 = vsel %vm12420_vm9, %v5687_v28, %v5770_v21  ;;  %6213 = vst [vmem:[#allocation2 + $0x134] sm:$0xf] %v6212_v33  ;;  %v5589_v60 = vsel %vm12393_vm6, %v5426_v15, %v5588_v53  ;;  %v5893_v2 = vrot.slane %v5891_v1, 5  ;;  %v5895_v57 = vshrl.u32 %v5795_v59, 16  ;;  %v12155_v32 = vld [vmem:[#allocation2 + $0x58] sm:$0xff]  }
 0x2f2   : > { %v6367_v27 = vld [vmem:[#allocation2 + $0x12c] sm:$0x8]  ;;  %5772 = vst [vmem:[#allocation2 + $0x60] sm:$0x1] %v5771_v40  ;;  %v5435_v61 = vsel %vm12399_vm7, %v5427_v49, %v5434_v47  ;;  %5590 = vst [vmem:[#allocation2 + $0x68] sm:$0xf] %v5589_v60  ;;  %v5888_v14 = vor.u32 %v5887_v55, %v5884_v54 }
 0x2f3   : > { %v5437_v19 = vshrl.u32 %v5204_v41, 16  ;;  %v12154_v29 = vld [vmem:[#allocation2 + $0x120] sm:$0xff]   ;;  %v6368_v11 = vsel %vm12568_vm2, %v6296_v0, %v6367_v27  ;;  %v6299_v43 = vshll.u32 %v14011_v56, 16  ;;  %5591 = vst.msk [vmem:[#allocation2 + $0x6c] sm:$0xf] %vm205_vm1, %v5435_v61  ;;  %v5897_v8 = vrot.slane %v5895_v57, 4  ;;  %11708 = vmatmul.mubr.msk.bf16.gmra.mxu0 %vm1655_vm4, %v12155_v32 }
 0x2f4   : > { %v5621_v46 = vld [vmem:[#allocation2 + $0xf8] sm:$0x1]  ;;  %v5445_v35 = vshrl.u32 %v5205_v25, 16  ;;  %v5592_v34 = vld [vmem:[#allocation2 + $0x70] sm:$0xf]  ;;  %v5889_v20 = vrot.slane %v5888_v14, 4  ;;  %11721 = vmatprep.mubr.msk.bf16.mxu1 %vm1655_vm4, %v12154_v29  ;;  %v5466_v27 = vor.u32 %v5464_v10, %v14020_v30 }
 0x2f5   : > { %6369 = vst [vmem:[#allocation2 + $0x12c] sm:$0x8] %v6368_v11  ;;  %v6215_v5 = vld [vmem:[#allocation2 + $0x13c] sm:$0xf]  ;;  %v5439_v44 = vrot.slane %v5437_v19, 7  ;;  %v5440_v62 = vshll.u32 %v5204_v41, 16  ;;  %v5898_v0 = vor.u32 %v5897_v8, %v5893_v2 }
 0x2f6   : > { %v5448_v45 = vshll.u32 %v5205_v25, 16  ;;  %v5796_v52 = vld [vmem:[#allocation2 + $0xb0] sm:$0xf]  ;;  %v5447_v4 = vrot.slane %v5445_v35, 7  ;;  %v5797_v24 = vld [vmem:[#allocation2 + $0xb4] sm:$0xf]  ;;  %v5894_v36 = vsel %vm12540_vm14, %v5889_v20, %v5893_v2 }
 0x2f7   : > { %v5901_v42 = vshrl.u32 %v5796_v52, 16  ;;  %v5904_v48 = vshll.u32 %v5796_v52, 16  ;;  %v14036_v12 = vld [vmem:[#allocation2 + $0xac] sm:$0x8]  ;;  %v5442_v28 = vor.u32 %v5440_v62, %v5439_v44  ;;  %v5443_v23 = vrot.slane %v5439_v44, 4 }
 0x2f8   : > { %v5910_v7 = vshll.u32 %v5797_v24, 16  ;;  %v5206_v6 = vld [vmem:[#allocation2 + $0x108] sm:$0xf]  ;;  %v5899_v53 = vrot.slane %v5898_v0, 4  ;;  %6214 = vst.msk [vmem:[#allocation2 + $0x138] sm:$0xf] %vm205_vm1, %v5894_v36  ;;  %v5450_v63 = vor.u32 %v5448_v45, %v5447_v4 }
 0x2f9   : > { %v5903_v16 = vrot.slane %v5901_v42, 4  ;;  %v5906_v3 = vrot.slane %v5904_v48, 5  ;;  %v6370_v59 = vld [vmem:[#allocation2 + $0x134] sm:$0x8]  ;;  %v5692_v31 = vshrl.u32 %v5621_v46, 16  ;;  %v5593_v22 = vsel %vm12393_vm6, %v5442_v28, %v5592_v34  ;;  %v12157_v58 = vld [vmem:[#allocation2 + $0x60] sm:$0xff]  }
 0x2fa   : > { %v5912_v56 = vrot.slane %v5910_v7, 5  ;;  %v5914_v9 = vshrl.u32 %v5797_v24, 16  ;;  %v6371_v1 = vsel %vm12568_vm2, %v6299_v43, %v6370_v59  ;;  %v5773_v39 = vld [vmem:[#allocation2 + $0x68] sm:$0x1]  ;;  %v6216_v15 = vsel %vm12546_vm15, %v5899_v53, %v6215_v5  ;;  %5594 = vst [vmem:[#allocation2 + $0x70] sm:$0xf] %v5593_v22  ;;  %11711 = vmatprep.mubr.msk.bf16.mxu0 %vm1655_vm4, %v12157_v58 }
 0x2fb   : > { %v5451_v49 = vsel %vm12399_vm7, %v5443_v23, %v5450_v63  ;;  %v5907_v54 = vor.u32 %v5906_v3, %v5903_v16  ;;  %6372 = vst [vmem:[#allocation2 + $0x134] sm:$0x8] %v6371_v1  ;;  %v5774_v41 = vsel %vm12420_vm9, %v5692_v31, %v5773_v39  ;;  %6217 = vst [vmem:[#allocation2 + $0x13c] sm:$0xf] %v6216_v15  ;;  %v6302_v21 = vshll.u32 %v14036_v12, 16 }
 0x2fc   : > { %5595 = vst.msk [vmem:[#allocation2 + $0x74] sm:$0xf] %vm205_vm1, %v5451_v49  ;;  %v5916_v33 = vrot.slane %v5914_v9, 4  ;;  %v5453_v47 = vshrl.u32 %v5206_v6, 16  ;;  %v12156_v55 = vld [vmem:[#allocation2 + $0x128] sm:$0xff]   ;;  %v5456_v32 = vshll.u32 %v5206_v6, 16 }
 0x2fd   : > { %5775 = vst [vmem:[#allocation2 + $0x68] sm:$0x1] %v5774_v41  ;;  %v5622_v25 = vld [vmem:[#allocation2 + $0x100] sm:$0x1]  ;;  %v5908_v40 = vrot.slane %v5907_v54, 4  ;;  %11722 = vmatmul.mubr.msk.bf16.vlgmr.msra.gmra.mxu1 %vm1655_vm4, %v12156_v55 }
 0x2fe   : > { %v6219_v60 = vld [vmem:[#allocation2 + $0x144] sm:$0xf]  ;;  %v5917_v2 = vor.u32 %v5916_v33, %v5912_v56  ;;  %v5455_v57 = vrot.slane %v5453_v47, 7  ;;  %v5798_v61 = vld [vmem:[#allocation2 + $0xb8] sm:$0xf]  ;;  %11788 = vmatpush3.bf16.msra.mxu1 %v13911_v17  ;;  %v5697_v10 = vshrl.u32 %v5622_v25, 16 }
 0x2ff   : > { %v5799_v14 = vld [vmem:[#allocation2 + $0xbc] sm:$0xf]  ;;  %v5913_v19 = vsel %vm12540_vm14, %v5908_v40, %v5912_v56  ;;  %v5596_v29 = vld [vmem:[#allocation2 + $0x78] sm:$0xf]  ;;  %v5920_v11 = vshrl.u32 %v5798_v61, 16  ;;  %v5923_v43 = vshll.u32 %v5798_v61, 16 }
 0x300   : > { %v5929_v46 = vshll.u32 %v5799_v14, 16  ;;  %v5918_v8 = vrot.slane %v5917_v2, 4  ;;  %6218 = vst.msk [vmem:[#allocation2 + $0x140] sm:$0xf] %vm205_vm1, %v5913_v19  ;;  %v5458_v35 = vor.u32 %v5456_v32, %v5455_v57  ;;  %v5459_v34 = vrot.slane %v5455_v57, 4 }
 0x301   : > { %v5933_v38 = vshrl.u32 %v5799_v14, 16  ;;  %v5922_v30 = vrot.slane %v5920_v11, 4  ;;  %v5925_v20 = vrot.slane %v5923_v43, 5  ;;  %v5800_v44 = vld [vmem:[#allocation2 + $0xc0] sm:$0xf] }
 0x302   : > { %v5931_v5 = vrot.slane %v5929_v46, 5  ;;  %v5776_v62 = vld [vmem:[#allocation2 + $0x70] sm:$0x1]  ;;  %v6220_v45 = vsel %vm12546_vm15, %v5918_v8, %v6219_v60  ;;  %v5467_v52 = vsel %vm12399_vm7, %v5459_v34, %v5466_v27  ;;  %v5597_v17 = vsel %vm12393_vm6, %v5458_v35, %v5596_v29  ;;  %v5801_v4 = vld [vmem:[#allocation2 + $0xc4] sm:$0xf] }
 0x303   : > { %v5935_v0 = vrot.slane %v5933_v38, 4  ;;  %v12158_v24 = vld [vmem:[#allocation2 + $0x130] sm:$0xff]   ;;  %v6373_v42 = vld [vmem:[#allocation2 + $0x13c] sm:$0x8]  ;;  %v5777_v48 = vsel %vm12420_vm9, %v5697_v10, %v5776_v62  ;;  %6221 = vst [vmem:[#allocation2 + $0x144] sm:$0xf] %v6220_v45  ;;  %v5926_v12 = vor.u32 %v5925_v20, %v5922_v30 }
 0x304   : > { %v6278_v36 = vld [vmem:[#allocation2 + $0xb4] sm:$0x8]  ;;  %5598 = vst [vmem:[#allocation2 + $0x78] sm:$0xf] %v5597_v17  ;;  %5599 = vst.msk [vmem:[#allocation2 + $0x7c] sm:$0xf] %vm205_vm1, %v5467_v52  ;;  %v6374_v6 = vsel %vm12568_vm2, %v6302_v21, %v6373_v42  ;;  %11725 = vmatprep.mubr.msk.bf16.mxu1 %vm1655_vm4, %v12158_v24 }
 0x305   : > { %v6223_v28 = vld [vmem:[#allocation2 + $0x14c] sm:$0xf]  ;;  %v5939_v23 = vshrl.u32 %v5800_v44, 16  ;;  %5778 = vst [vmem:[#allocation2 + $0x70] sm:$0x1] %v5777_v48  ;;  %v5936_v53 = vor.u32 %v5935_v0, %v5931_v5  ;;  %v5942_v63 = vshll.u32 %v5800_v44, 16 }
 0x306   : > { %v12159_v7 = vld [vmem:[#allocation2 + $0x68] sm:$0xff]   ;;  %6375 = vst [vmem:[#allocation2 + $0x13c] sm:$0x8] %v6374_v6  ;;  %v5927_v3 = vrot.slane %v5926_v12, 4  ;;  %v5948_v31 = vshll.u32 %v5801_v4, 16  ;;  %v5952_v22 = vshrl.u32 %v5801_v4, 16 }
 0x307   : > { %v5623_v16 = vld [vmem:[#allocation2 + $0x108] sm:$0x1]  ;;  %v5941_v59 = vrot.slane %v5939_v23, 4  ;;  %11712 = vmatmul.mubr.msk.bf16.gmra.mxu0 %vm1655_vm4, %v12159_v7  ;;  %v5937_v56 = vrot.slane %v5936_v53, 4  ;;  %v5944_v9 = vrot.slane %v5942_v63, 5  ;;  %v6305_v15 = vshll.u32 %v6278_v36, 16 }
 0x308   : > { %v5932_v58 = vsel %vm12540_vm14, %v5927_v3, %v5931_v5  ;;  %v5950_v1 = vrot.slane %v5948_v31, 5  ;;  %v5954_v39 = vrot.slane %v5952_v22, 4  ;;  %v5702_v49 = vshrl.u32 %v5623_v16, 16  ;;  %v6227_v21 = vld [vmem:[#allocation2 + $0x154] sm:$0xf] }
 0x309   : > { %6222 = vst.msk [vmem:[#allocation2 + $0x148] sm:$0xf] %vm205_vm1, %v5932_v58  ;;  %v6224_v54 = vsel %vm12546_vm15, %v5937_v56, %v6223_v28  ;;  %v5945_v41 = vor.u32 %v5944_v9, %v5941_v59  ;;  %v5802_v33 = vld [vmem:[#allocation2 + $0xc8] sm:$0xf]  ;;  %v5803_v47 = vld [vmem:[#allocation2 + $0xcc] sm:$0xf] }
 0x30a   : > { %6225 = vst [vmem:[#allocation2 + $0x14c] sm:$0xf] %v6224_v54  ;;  %v5955_v55 = vor.u32 %v5954_v39, %v5950_v1  ;;  %v5958_v25 = vshrl.u32 %v5802_v33, 16  ;;  %v5961_v40 = vshll.u32 %v5802_v33, 16  ;;  %v5967_v60 = vshll.u32 %v5803_v47, 16  ;;  %v12166_v58 = vld [vmem:[#allocation2 + $0x98] sm:$0xff]  }
 0x30b   : > { %v6376_v2 = vld [vmem:[#allocation2 + $0x144] sm:$0x8]  ;;  %v5779_v57 = vld [vmem:[#allocation2 + $0x78] sm:$0x1]  ;;  %v6279_v32 = vld [vmem:[#allocation2 + $0xbc] sm:$0x8] }
 0x30c   : > { %v12161_v27 = vld [vmem:[#allocation2 + $0x70] sm:$0xff]   ;;  %v6377_v61 = vsel %vm12568_vm2, %v6305_v15, %v6376_v2  ;;  %v5780_v14 = vsel %vm12420_vm9, %v5702_v49, %v5779_v57  ;;  %v5946_v19 = vrot.slane %v5945_v41, 4  ;;  %v5956_v29 = vrot.slane %v5955_v55, 4  ;;  %v6280_v30 = vld [vmem:[#allocation2 + $0xc4] sm:$0x8] }
 0x30d   : > { %v12160_v11 = vld [vmem:[#allocation2 + $0x138] sm:$0xff]   ;;  %6378 = vst [vmem:[#allocation2 + $0x144] sm:$0x8] %v6377_v61  ;;  %5781 = vst [vmem:[#allocation2 + $0x78] sm:$0x1] %v5780_v14  ;;  %v5960_v43 = vrot.slane %v5958_v25, 4  ;;  %11715 = vmatprep.mubr.msk.bf16.mxu0 %vm1655_vm4, %v12161_v27 }
 0x30e   : > { %v5963_v46 = vrot.slane %v5961_v40, 5  ;;  %v5951_v8 = vsel %vm12540_vm14, %v5946_v19, %v5950_v1  ;;  %v6228_v35 = vsel %vm12546_vm15, %v5956_v29, %v6227_v21  ;;  %v5969_v34 = vrot.slane %v5967_v60, 5  ;;  %v5804_v10 = vld [vmem:[#allocation2 + $0xd0] sm:$0xf]  ;;  %11726 = vmatmul.mubr.msk.bf16.gmra.mxu1 %vm1655_vm4, %v12160_v11  ;;  %v5805_v5 = vld [vmem:[#allocation2 + $0xd4] sm:$0xf] }
 0x30f   : > { %v5971_v38 = vshrl.u32 %v5803_v47, 16  ;;  %6226 = vst.msk [vmem:[#allocation2 + $0x150] sm:$0xf] %vm205_vm1, %v5951_v8  ;;  %6229 = vst [vmem:[#allocation2 + $0x154] sm:$0xf] %v6228_v35  ;;  %v5977_v44 = vshrl.u32 %v5804_v10, 16 }
 0x310   : > { %v5964_v20 = vor.u32 %v5963_v46, %v5960_v43  ;;  %v5980_v62 = vshll.u32 %v5804_v10, 16  ;;  %v6308_v45 = vshll.u32 %v6279_v32, 16  ;;  %v5986_v17 = vshll.u32 %v5805_v5, 16  ;;  %v6231_v42 = vld [vmem:[#allocation2 + $0x15c] sm:$0xf]  ;;  %v12168_v10 = vld [vmem:[#allocation2 + $0xa0] sm:$0xff]  }
 0x311   : > { %v5973_v52 = vrot.slane %v5971_v38, 4  ;;  %v5990_v0 = vshrl.u32 %v5805_v5, 16  ;;  %v6379_v4 = vld [vmem:[#allocation2 + $0x14c] sm:$0x8]  ;;  %v5979_v48 = vrot.slane %v5977_v44, 4  ;;  %v6311_v6 = vshll.u32 %v6280_v30, 16 }
 0x312   : > { %v5965_v24 = vrot.slane %v5964_v20, 4  ;;  %v5982_v36 = vrot.slane %v5980_v62, 5  ;;  %v6380_v12 = vsel %vm12568_vm2, %v6308_v45, %v6379_v4  ;;  %v5988_v23 = vrot.slane %v5986_v17, 5  ;;  %v6235_v16 = vld [vmem:[#allocation2 + $0x164] sm:$0xf] }
 0x313   : > { %v5974_v28 = vor.u32 %v5973_v52, %v5969_v34  ;;  %v5992_v7 = vrot.slane %v5990_v0, 4  ;;  %6381 = vst [vmem:[#allocation2 + $0x14c] sm:$0x8] %v6380_v12  ;;  %v5806_v3 = vld [vmem:[#allocation2 + $0xd8] sm:$0xf] }
 0x314   : > { %v5970_v53 = vsel %vm12540_vm14, %v5965_v24, %v5969_v34  ;;  %v5983_v63 = vor.u32 %v5982_v36, %v5979_v48  ;;  %v5807_v59 = vld [vmem:[#allocation2 + $0xdc] sm:$0xf]  ;;  %v12162_v31 = vld [vmem:[#allocation2 + $0x140] sm:$0xff]   ;;  %v5996_v39 = vshrl.u32 %v5806_v3, 16  ;;  %v5999_v15 = vshll.u32 %v5806_v3, 16  ;;  %v12170_v36 = vld [vmem:[#allocation2 + $0xa8] sm:$0xff]  }
 0x315   : > { %v5975_v22 = vrot.slane %v5974_v28, 4  ;;  %6230 = vst.msk [vmem:[#allocation2 + $0x158] sm:$0xf] %vm205_vm1, %v5970_v53  ;;  %v5993_v56 = vor.u32 %v5992_v7, %v5988_v23  ;;  %v12163_v9 = vld [vmem:[#allocation2 + $0x78] sm:$0xff]   ;;  %v6005_v49 = vshll.u32 %v5807_v59, 16  ;;  %11729 = vmatprep.mubr.msk.bf16.mxu1 %vm1655_vm4, %v12162_v31  ;;  %v6009_v33 = vshrl.u32 %v5807_v59, 16 }
 0x316   : > { %v5984_v1 = vrot.slane %v5983_v63, 4  ;;  %v6382_v54 = vld [vmem:[#allocation2 + $0x154] sm:$0x8]  ;;  %11716 = vmatmul.mubr.msk.bf16.gmra.mxu0 %vm1655_vm4, %v12163_v9  ;;  %v5998_v25 = vrot.slane %v5996_v39, 4  ;;  %v6001_v40 = vrot.slane %v5999_v15, 5 }
 0x317   : > { %v6232_v41 = vsel %vm12546_vm15, %v5975_v22, %v6231_v42  ;;  %v5994_v21 = vrot.slane %v5993_v56, 4  ;;  %v6383_v47 = vsel %vm12568_vm2, %v6311_v6, %v6382_v54  ;;  %11755 = vmatprep.mubr.msk.bf16.mxu0 %vm1655_vm4, %v12166_v58  ;;  %v6281_v60 = vld [vmem:[#allocation2 + $0xcc] sm:$0x8]  ;;  %v6007_v57 = vrot.slane %v6005_v49, 5  ;;  %v5808_v27 = vld [vmem:[#allocation2 + $0xe0] sm:$0xf] }
 0x318   : > { %6233 = vst [vmem:[#allocation2 + $0x15c] sm:$0xf] %v6232_v41  ;;  %v5989_v55 = vsel %vm12540_vm14, %v5984_v1, %v5988_v23  ;;  %6384 = vst [vmem:[#allocation2 + $0x154] sm:$0x8] %v6383_v47  ;;  %v6011_v32 = vrot.slane %v6009_v33, 4  ;;  %v6002_v14 = vor.u32 %v6001_v40, %v5998_v25  ;;  %v6015_v11 = vshrl.u32 %v5808_v27, 16 }
 0x319   : > { %6234 = vst.msk [vmem:[#allocation2 + $0x160] sm:$0xf] %vm205_vm1, %v5989_v55  ;;  %v6236_v2 = vsel %vm12546_vm15, %v5994_v21, %v6235_v16  ;;  %v6282_v61 = vld [vmem:[#allocation2 + $0xd4] sm:$0x8]  ;;  %v6239_v19 = vld [vmem:[#allocation2 + $0x16c] sm:$0xf] }
 0x31a   : > { %6237 = vst [vmem:[#allocation2 + $0x164] sm:$0xf] %v6236_v2  ;;  %v5809_v29 = vld [vmem:[#allocation2 + $0xe4] sm:$0xf]  ;;  %v6018_v43 = vshll.u32 %v5808_v27, 16  ;;  %v12164_v46 = vld [vmem:[#allocation2 + $0x148] sm:$0xff]   ;;  %v6012_v8 = vor.u32 %v6011_v32, %v6007_v57 }
 0x31b   : > { %v6024_v35 = vshll.u32 %v5809_v29, 16  ;;  %v6028_v34 = vshrl.u32 %v5809_v29, 16  ;;  %v6314_v38 = vshll.u32 %v6281_v60, 16  ;;  %v6003_v30 = vrot.slane %v6002_v14, 4  ;;  %11730 = vmatmul.mubr.msk.bf16.gmra.mxu1 %vm1655_vm4, %v12164_v46  ;;  %v6243_v4 = vld [vmem:[#allocation2 + $0x174] sm:$0xf] }
 0x31c   : > { %v6017_v20 = vrot.slane %v6015_v11, 4  ;;  %v6020_v5 = vrot.slane %v6018_v43, 5  ;;  %v6317_v44 = vshll.u32 %v6282_v61, 16  ;;  %v6013_v62 = vrot.slane %v6012_v8, 4  ;;  %v5810_v24 = vld [vmem:[#allocation2 + $0xe8] sm:$0xf] }
 0x31d   : > { %v6026_v45 = vrot.slane %v6024_v35, 5  ;;  %v6030_v52 = vrot.slane %v6028_v34, 4  ;;  %v6008_v17 = vsel %vm12540_vm14, %v6003_v30, %v6007_v57  ;;  %v5811_v42 = vld [vmem:[#allocation2 + $0xec] sm:$0xf]  ;;  %v6034_v23 = vshrl.u32 %v5810_v24, 16  ;;  %v12172_v40 = vld [vmem:[#allocation2 + $0xb0] sm:$0xff]  }
 0x31e   : > { %v6021_v0 = vor.u32 %v6020_v5, %v6017_v20  ;;  %6238 = vst.msk [vmem:[#allocation2 + $0x168] sm:$0xf] %vm205_vm1, %v6008_v17  ;;  %v6240_v12 = vsel %vm12546_vm15, %v6013_v62, %v6239_v19  ;;  %v6037_v7 = vshll.u32 %v5810_v24, 16  ;;  %11756 = vmatmul.mubr.msk.bf16.vlgmr.msra.gmra.mxu0 %vm1655_vm4, %v12168_v10  ;;  %v6283_v63 = vld [vmem:[#allocation2 + $0xdc] sm:$0x8]  ;;  %v6043_v56 = vshll.u32 %v5811_v42, 16 }
 0x31f   : > { %v6385_v48 = vld [vmem:[#allocation2 + $0x15c] sm:$0x8]  ;;  %v6031_v28 = vor.u32 %v6030_v52, %v6026_v45  ;;  %v12165_v6 = vld [vmem:[#allocation2 + $0x150] sm:$0xff]   ;;  %6241 = vst [vmem:[#allocation2 + $0x16c] sm:$0xf] %v6240_v12  ;;  %11759 = vmatprep.mubr.msk.bf16.mxu0 %vm1655_vm4, %v12170_v36  ;;  %v6036_v31 = vrot.slane %v6034_v23, 4 }
 0x320   : > { %v6386_v53 = vsel %vm12568_vm2, %v6314_v38, %v6385_v48  ;;  %v6022_v16 = vrot.slane %v6021_v0, 4  ;;  %v6039_v22 = vrot.slane %v6037_v7, 5  ;;  %11733 = vmatprep.mubr.msk.bf16.mxu1 %vm1655_vm4, %v12165_v6  ;;  %v6284_v1 = vld [vmem:[#allocation2 + $0xe4] sm:$0x8]  ;;  %v6047_v39 = vshrl.u32 %v5811_v42, 16  ;;  %v12174_v27 = vld [vmem:[#allocation2 + $0xb8] sm:$0xff]  }
 0x321   : > { %6387 = vst [vmem:[#allocation2 + $0x15c] sm:$0x8] %v6386_v53  ;;  %v6388_v3 = vld [vmem:[#allocation2 + $0x164] sm:$0x8]  ;;  %v6032_v59 = vrot.slane %v6031_v28, 4  ;;  %v6045_v54 = vrot.slane %v6043_v56, 5 }
 0x322   : > { %v6389_v9 = vsel %vm12568_vm2, %v6317_v44, %v6388_v3  ;;  %v6027_v58 = vsel %vm12540_vm14, %v6022_v16, %v6026_v45  ;;  %v6040_v49 = vor.u32 %v6039_v22, %v6036_v31  ;;  %v5812_v41 = vld [vmem:[#allocation2 + $0xf0] sm:$0xf]  ;;  %v6049_v21 = vrot.slane %v6047_v39, 4  ;;  %v5813_v33 = vld [vmem:[#allocation2 + $0xf4] sm:$0xf]  ;;  %v12176_v23 = vld [vmem:[#allocation2 + $0xc0] sm:$0xff]  }
 0x323   : > { %6390 = vst [vmem:[#allocation2 + $0x164] sm:$0x8] %v6389_v9  ;;  %6242 = vst.msk [vmem:[#allocation2 + $0x170] sm:$0xf] %vm205_vm1, %v6027_v58  ;;  %v6244_v15 = vsel %vm12546_vm15, %v6032_v59, %v6243_v4  ;;  %v6053_v47 = vshrl.u32 %v5812_v41, 16  ;;  %v6056_v55 = vshll.u32 %v5812_v41, 16 }
 0x324   : > { %6245 = vst [vmem:[#allocation2 + $0x174] sm:$0xf] %v6244_v15  ;;  %v6320_v25 = vshll.u32 %v6283_v63, 16  ;;  %v6041_v60 = vrot.slane %v6040_v49, 4  ;;  %v6062_v2 = vshll.u32 %v5813_v33, 16  ;;  %v6066_v57 = vshrl.u32 %v5813_v33, 16 }
 0x325   : > { %v6323_v32 = vshll.u32 %v6284_v1, 16  ;;  %v6050_v61 = vor.u32 %v6049_v21, %v6045_v54  ;;  %v6055_v14 = vrot.slane %v6053_v47, 4  ;;  %v6058_v19 = vrot.slane %v6056_v55, 5  ;;  %v6247_v43 = vld [vmem:[#allocation2 + $0x17c] sm:$0xf]  ;;  %v12178_v16 = vld [vmem:[#allocation2 + $0xc8] sm:$0xff]  }
 0x326   : > { %v6391_v29 = vld [vmem:[#allocation2 + $0x16c] sm:$0x8]  ;;  %v6046_v11 = vsel %vm12540_vm14, %v6041_v60, %v6045_v54  ;;  %v6064_v46 = vrot.slane %v6062_v2, 5  ;;  %v6068_v8 = vrot.slane %v6066_v57, 4  ;;  %11760 = vmatmul.mubr.msk.bf16.gmra.mxu0 %vm1655_vm4, %v12172_v40  ;;  %v6251_v30 = vld [vmem:[#allocation2 + $0x184] sm:$0xf] }
 0x327   : > { %v6392_v34 = vsel %vm12568_vm2, %v6320_v25, %v6391_v29  ;;  %v6051_v38 = vrot.slane %v6050_v61, 4  ;;  %6246 = vst.msk [vmem:[#allocation2 + $0x178] sm:$0xf] %vm205_vm1, %v6046_v11  ;;  %v6059_v10 = vor.u32 %v6058_v19, %v6055_v14  ;;  %11763 = vmatprep.mubr.msk.bf16.mxu0 %vm1655_vm4, %v12174_v27  ;;  %v5814_v5 = vld [vmem:[#allocation2 + $0xf8] sm:$0xf] }
 0x328   : > { %v12167_v35 = vld [vmem:[#allocation2 + $0x158] sm:$0xff]   ;;  %6393 = vst [vmem:[#allocation2 + $0x16c] sm:$0x8] %v6392_v34  ;;  %v6069_v20 = vor.u32 %v6068_v8, %v6064_v46  ;;  %v6072_v4 = vshrl.u32 %v5814_v5, 16  ;;  %v6075_v24 = vshll.u32 %v5814_v5, 16 }
 0x329   : > { %v5815_v44 = vld [vmem:[#allocation2 + $0xfc] sm:$0xf]  ;;  %11734 = vmatmul.mubr.msk.bf16.gmra.mxu1 %vm1655_vm4, %v12167_v35  ;;  %v6248_v45 = vsel %vm12546_vm15, %v6051_v38, %v6247_v43  ;;  %v6060_v52 = vrot.slane %v6059_v10, 4  ;;  %v6285_v36 = vld [vmem:[#allocation2 + $0xec] sm:$0x8]  ;;  %v12180_v35 = vld [vmem:[#allocation2 + $0xd0] sm:$0xff]  }
 0x32a   : > { %v12169_v62 = vld [vmem:[#allocation2 + $0x160] sm:$0xff]   ;;  %6249 = vst [vmem:[#allocation2 + $0x17c] sm:$0xf] %v6248_v45  ;;  %v6070_v0 = vrot.slane %v6069_v20, 4  ;;  %v6081_v42 = vshll.u32 %v5815_v44, 16  ;;  %v6085_v28 = vshrl.u32 %v5815_v44, 16 }
 0x32b   : > { %v6394_v17 = vld [vmem:[#allocation2 + $0x174] sm:$0x8]  ;;  %11737 = vmatprep.mubr.msk.bf16.mxu1 %vm1655_vm4, %v12169_v62  ;;  %v6065_v12 = vsel %vm12540_vm14, %v6060_v52, %v6064_v46  ;;  %v6074_v6 = vrot.slane %v6072_v4, 4  ;;  %v6077_v53 = vrot.slane %v6075_v24, 5  ;;  %v5816_v59 = vld [vmem:[#allocation2 + $0x100] sm:$0xf] }
 0x32c   : > { %v6395_v48 = vsel %vm12568_vm2, %v6323_v32, %v6394_v17  ;;  %6250 = vst.msk [vmem:[#allocation2 + $0x180] sm:$0xf] %vm205_vm1, %v6065_v12  ;;  %v6252_v7 = vsel %vm12546_vm15, %v6070_v0, %v6251_v30  ;;  %v6083_v63 = vrot.slane %v6081_v42, 5  ;;  %v6087_v3 = vrot.slane %v6085_v28, 4  ;;  %v6286_v31 = vld [vmem:[#allocation2 + $0xf4] sm:$0x8] }
 0x32d   : > { %6396 = vst [vmem:[#allocation2 + $0x174] sm:$0x8] %v6395_v48  ;;  %6253 = vst [vmem:[#allocation2 + $0x184] sm:$0xf] %v6252_v7  ;;  %v6078_v22 = vor.u32 %v6077_v53, %v6074_v6  ;;  %v5817_v56 = vld [vmem:[#allocation2 + $0x104] sm:$0xf] }
 0x32e   : > { %v6091_v9 = vshrl.u32 %v5816_v59, 16  ;;  %v6094_v58 = vshll.u32 %v5816_v59, 16  ;;  %11764 = vmatmul.mubr.msk.bf16.gmra.mxu0 %vm1655_vm4, %v12176_v23  ;;  %v6088_v39 = vor.u32 %v6087_v3, %v6083_v63  ;;  %v6100_v15 = vshll.u32 %v5817_v56, 16  ;;  %v6255_v21 = vld [vmem:[#allocation2 + $0x18c] sm:$0xf]  ;;  %v12182_v5 = vld [vmem:[#allocation2 + $0xd8] sm:$0xff]  }
 0x32f   : > { %v12171_v1 = vld [vmem:[#allocation2 + $0x168] sm:$0xff]   ;;  %v6104_v49 = vshrl.u32 %v5817_v56, 16  ;;  %v6326_v54 = vshll.u32 %v6285_v36, 16  ;;  %11767 = vmatprep.mubr.msk.bf16.mxu0 %vm1655_vm4, %v12178_v16  ;;  %v6079_v41 = vrot.slane %v6078_v22, 4  ;;  %v6259_v27 = vld [vmem:[#allocation2 + $0x194] sm:$0xf] }
 0x330   : > { %v6093_v33 = vrot.slane %v6091_v9, 4  ;;  %v6096_v47 = vrot.slane %v6094_v58, 5  ;;  %v6089_v25 = vrot.slane %v6088_v39, 4  ;;  %v6102_v40 = vrot.slane %v6100_v15, 5  ;;  %v5818_v46 = vld [vmem:[#allocation2 + $0x108] sm:$0xf] }
 0x331   : > { %11738 = vmatmul.mubr.msk.bf16.gmra.mxu1 %vm1655_vm4, %v12171_v1  ;;  %v6397_v55 = vld [vmem:[#allocation2 + $0x17c] sm:$0x8]  ;;  %v6106_v60 = vrot.slane %v6104_v49, 4  ;;  %v6084_v57 = vsel %vm12540_vm14, %v6079_v41, %v6083_v63  ;;  %v6329_v14 = vshll.u32 %v6286_v31, 16  ;;  %v5819_v38 = vld [vmem:[#allocation2 + $0x10c] sm:$0xf] }
 0x332   : > { %v6398_v2 = vsel %vm12568_vm2, %v6326_v54, %v6397_v55  ;;  %v6097_v32 = vor.u32 %v6096_v47, %v6093_v33  ;;  %6254 = vst.msk [vmem:[#allocation2 + $0x188] sm:$0xf] %vm205_vm1, %v6084_v57  ;;  %v6256_v19 = vsel %vm12546_vm15, %v6089_v25, %v6255_v21  ;;  %v6110_v10 = vshrl.u32 %v5818_v46, 16  ;;  %v6287_v45 = vld [vmem:[#allocation2 + $0xfc] sm:$0x8]  ;;  %v12184_v53 = vld [vmem:[#allocation2 + $0xe0] sm:$0xff]  }
 0x333   : > { %6399 = vst [vmem:[#allocation2 + $0x17c] sm:$0x8] %v6398_v2  ;;  %v6107_v29 = vor.u32 %v6106_v60, %v6102_v40  ;;  %6257 = vst [vmem:[#allocation2 + $0x18c] sm:$0xf] %v6256_v19  ;;  %v6113_v30 = vshll.u32 %v5818_v46, 16  ;;  %v6119_v44 = vshll.u32 %v5819_v38, 16 }
 0x334   : > { %v12173_v61 = vld [vmem:[#allocation2 + $0x170] sm:$0xff]   ;;  %v6400_v11 = vld [vmem:[#allocation2 + $0x184] sm:$0x8]  ;;  %v6098_v43 = vrot.slane %v6097_v32, 4  ;;  %v6123_v62 = vshrl.u32 %v5819_v38, 16  ;;  %v6112_v17 = vrot.slane %v6110_v10, 4 }
 0x335   : > { %11741 = vmatprep.mubr.msk.bf16.mxu1 %vm1655_vm4, %v12173_v61  ;;  %v6401_v8 = vsel %vm12568_vm2, %v6329_v14, %v6400_v11  ;;  %v6108_v34 = vrot.slane %v6107_v29, 4  ;;  %v6115_v0 = vrot.slane %v6113_v30, 5  ;;  %v6288_v4 = vld [vmem:[#allocation2 + $0x104] sm:$0x8]  ;;  %v6121_v24 = vrot.slane %v6119_v44, 5  ;;  %v12185_v59 = vld [vmem:[#allocation2 + $0xe8] sm:$0xff]  }
 0x336   : > { %6402 = vst [vmem:[#allocation2 + $0x184] sm:$0x8] %v6401_v8  ;;  %v6103_v20 = vsel %vm12540_vm14, %v6098_v43, %v6102_v40  ;;  %11768 = vmatmul.mubr.msk.bf16.gmra.mxu0 %vm1655_vm4, %v12180_v35  ;;  %v6125_v42 = vrot.slane %v6123_v62, 4  ;;  %v6263_v36 = vld [vmem:[#allocation2 + $0x19c] sm:$0xf]  ;;  %v6332_v28 = vshll.u32 %v6287_v45, 16 }
 0x337   : > { %6258 = vst.msk [vmem:[#allocation2 + $0x190] sm:$0xf] %vm205_vm1, %v6103_v20  ;;  %v6260_v52 = vsel %vm12546_vm15, %v6108_v34, %v6259_v27  ;;  %11771 = vmatprep.mubr.msk.bf16.mxu0 %vm1655_vm4, %v12182_v5  ;;  %v6116_v48 = vor.u32 %v6115_v0, %v6112_v17  ;;  %v10728_v63 = vld [vmem:[%s15429_s2 + $0xa] sm:$0x3]  ;;  %v10762_v22 = vld [vmem:[%s15429_s2 + $0xe] sm:$0x3] }
 0x338   : > { %6261 = vst [vmem:[#allocation2 + $0x194] sm:$0xf] %v6260_v52  ;;  %v6126_v23 = vor.u32 %v6125_v42, %v6121_v24  ;;  %11971 = vmatprep.subr.msk.bf16.mxu0 %vm1704_vm0, %v10728_v63  ;;  %v8306_v31 = vsel %vm1704_vm0, %v10728_v63, 0  ;;  %v6335_v9 = vshll.u32 %v6288_v4, 16  ;;  %11972 = vmatprep.subr.msk.bf16.mxu1 %vm1704_vm0, %v10762_v22  ;;  %v6289_v15 = vld [vmem:[#allocation2 + $0x10c] sm:$0x8] }
 0x339   : > { %v6117_v6 = vrot.slane %v6116_v48, 4  ;;  %11822 = vmatpush3.bf16.msra.mxu0 %v8306_v31  ;;  %v12187_v54 = vld [vmem:[#allocation2 + $0xf0] sm:$0xff]   ;;  %v6338_v21 = vshll.u32 %v6289_v15, 16  ;;  %v12189_v33 = vld [vmem:[#allocation2 + $0xf8] sm:$0xff]   ;;  %v12191_v40 = vld [vmem:[#allocation2 + $0x100] sm:$0xff]   ;;  %v8794_v61 = vsel %vm1704_vm0, %v10762_v22, 0 }
 0x33a   : > { %v12175_v12 = vld [vmem:[#allocation2 + $0x178] sm:$0xff]   ;;  %v6403_v7 = vld [vmem:[#allocation2 + $0x18c] sm:$0x8]  ;;  %v6127_v3 = vrot.slane %v6126_v23, 4  ;;  %v5208_v32 = vld [vmem:[#allocation2 + $0x110] sm:$0xf] }
 0x33b   : > { %11742 = vmatmul.mubr.msk.bf16.gmra.mxu1 %vm1655_vm4, %v12175_v12  ;;  %v6404_v16 = vsel %vm12568_vm2, %v6332_v28, %v6403_v7  ;;  %v6122_v58 = vsel %vm12540_vm14, %v6117_v6, %v6121_v24  ;;  %v12193_v60 = vld [vmem:[#allocation2 + $0x108] sm:$0xff]   ;;  %v5209_v27 = vld [vmem:[#allocation2 + $0x114] sm:$0xf]  ;;  %v5469_v29 = vshrl.u32 %v5208_v32, 16  ;;  %v5472_v46 = vshll.u32 %v5208_v32, 16  ;;  %v12190_v30 = vld [vmem:[#allocation2 + $0x18] sm:$0xff]  }
 0x33c   : > { %6405 = vst [vmem:[#allocation2 + $0x18c] sm:$0x8] %v6404_v16  ;;  %6262 = vst.msk [vmem:[#allocation2 + $0x198] sm:$0xf] %vm205_vm1, %v6122_v58  ;;  %v6264_v1 = vsel %vm12546_vm15, %v6127_v3, %v6263_v36  ;;  %v12186_v2 = vld [vmem:[#allocation2 + $0x8] sm:$0xff]   ;;  %v12195_v14 = vld [vmem:[#allocation2 + $0x110] sm:$0xff]  }
 0x33d   : > { %v12177_v56 = vld [vmem:[#allocation2 + $0x180] sm:$0xff]   ;;  %6265 = vst [vmem:[#allocation2 + $0x19c] sm:$0xf] %v6264_v1  ;;  %v12198_v19 = vld [vmem:[#allocation2 + $0x128] sm:$0xff]   ;;  %v5477_v11 = vshrl.u32 %v5209_v27, 16  ;;  %v12188_v43 = vld [vmem:[#allocation2 + $0x10] sm:$0xff]  }
 0x33e   : > { %11745 = vmatprep.mubr.msk.bf16.mxu1 %vm1655_vm4, %v12177_v56  ;;  %11772 = vmatmul.mubr.msk.bf16.gmra.mxu0 %vm1655_vm4, %v12184_v53  ;;  %v5480_v8 = vshll.u32 %v5209_v27, 16  ;;  %v5600_v35 = vld [vmem:[#allocation2 + $0x80] sm:$0xf]  ;;  %v5471_v34 = vrot.slane %v5469_v29, 7  ;;  %v10761_v10 = vld [vmem:[%s15429_s2 + $0xc] sm:$0x3] }
 0x33f   : > { %v6406_v39 = vld [vmem:[#allocation2 + $0x194] sm:$0x8]  ;;  %11775 = vmatprep.mubr.msk.bf16.mxu0 %vm1655_vm4, %v12185_v59  ;;  %v5479_v38 = vrot.slane %v5477_v11, 7  ;;  %11973 = vmatprep.subr.msk.bf16.mxu0 %vm1704_vm0, %v10761_v10  ;;  %v14204_v62 = vld [vmem:[%s15429_s2 + $0x10] sm:$0x3]  ;;  %v9086_v4 = vsel %vm1704_vm0, %v10761_v10, 0 }
 0x340   : > { %v6407_v49 = vsel %vm12568_vm2, %v6335_v9, %v6406_v39  ;;  %v5474_v20 = vor.u32 %v5472_v46, %v5471_v34  ;;  %v5475_v5 = vrot.slane %v5471_v34, 4  ;;  %v5624_v17 = vld [vmem:[#allocation2 + $0x110] sm:$0x1]  ;;  %v12202_v24 = vld [vmem:[#allocation2 + $0x138] sm:$0xff]   ;;  %v12192_v42 = vld [vmem:[#allocation2 + $0x20] sm:$0xff]  }
 0x341   : > { %6408 = vst [vmem:[#allocation2 + $0x194] sm:$0x8] %v6407_v49  ;;  %v5482_v44 = vor.u32 %v5480_v8, %v5479_v38  ;;  %v12200_v0 = vld [vmem:[#allocation2 + $0x130] sm:$0xff]   ;;  %v12194_v48 = vld [vmem:[#allocation2 + $0x28] sm:$0xff]   ;;  %v5707_v36 = vshrl.u32 %v5624_v17, 16  ;;  %v12204_v16 = vld [vmem:[#allocation2 + $0x140] sm:$0xff]  }
 0x342   : > { %v5601_v52 = vsel %vm12393_vm6, %v5474_v20, %v5600_v35  ;;  %v5820_v12 = vld [vmem:[#allocation2 + $0x110] sm:$0xf]  ;;  %v5821_v28 = vld [vmem:[#allocation2 + $0x114] sm:$0xf]  ;;  %v12206_v56 = vld [vmem:[#allocation2 + $0x148] sm:$0xff]  }
 0x343   : > { %v12179_v41 = vld [vmem:[#allocation2 + $0x188] sm:$0xff]   ;;  %v5483_v45 = vsel %vm12399_vm7, %v5475_v5, %v5482_v44  ;;  %5602 = vst [vmem:[#allocation2 + $0x80] sm:$0xf] %v5601_v52  ;;  %v6129_v23 = vshrl.u32 %v5820_v12, 16  ;;  %v6132_v7 = vshll.u32 %v5820_v12, 16  ;;  %v6138_v6 = vshll.u32 %v5821_v28, 16 }
 0x344   : > { %11746 = vmatmul.mubr.msk.bf16.gmra.mxu1 %vm1655_vm4, %v12179_v41  ;;  %v6409_v47 = vld [vmem:[#allocation2 + $0x19c] sm:$0x8]  ;;  %5603 = vst.msk [vmem:[#allocation2 + $0x84] sm:$0xf] %vm205_vm1, %v5483_v45  ;;  %v6142_v53 = vshrl.u32 %v5821_v28, 16  ;;  %v12196_v15 = vld [vmem:[#allocation2 + $0x30] sm:$0xff]  }
 0x345   : > { %v6410_v55 = vsel %vm12568_vm2, %v6338_v21, %v6409_v47  ;;  %v6131_v59 = vrot.slane %v6129_v23, 4  ;;  %v6134_v31 = vrot.slane %v6132_v7, 5  ;;  %v6140_v22 = vrot.slane %v6138_v6, 5  ;;  %v6267_v39 = vld [vmem:[#allocation2 + $0x1a4] sm:$0xf]  ;;  %v12208_v47 = vld [vmem:[#allocation2 + $0x150] sm:$0xff]  }
 0x346   : > { %11776 = vmatmul.mubr.msk.bf16.gmra.mxu0 %vm1655_vm4, %v12187_v54  ;;  %6411 = vst [vmem:[#allocation2 + $0x19c] sm:$0x8] %v6410_v55  ;;  %v6144_v9 = vrot.slane %v6142_v53, 4  ;;  %v12197_v54 = vld [vmem:[#allocation2 + $0x38] sm:$0xff]   ;;  %v5172_v11 = vld [vmem:[#allocation2 + $0x108] sm:$0xf] }
 0x347   : > { %11779 = vmatprep.mubr.msk.bf16.mxu0 %vm1655_vm4, %v12189_v33  ;;  %v6135_v58 = vor.u32 %v6134_v31, %v6131_v59  ;;  %v12210_v55 = vld [vmem:[#allocation2 + $0x158] sm:$0xff]   ;;  %5174 = vst.msk [vmem:[#allocation2 + $0x118] sm:$0xf] %vm205_vm1, %v5172_v11  ;;  %v12216_v38 = vld [vmem:[#allocation2 + $0x170] sm:$0xff]   ;;  %v12207_v20 = vld [vmem:[#allocation2 + $0x60] sm:$0xff]  }
 0x348   : > { %v12181_v25 = vld [vmem:[#allocation2 + $0x190] sm:$0xff]   ;;  %v6145_v1 = vor.u32 %v6144_v9, %v6140_v22  ;;  %v12205_v46 = vld [vmem:[#allocation2 + $0x58] sm:$0xff]   ;;  %v12209_v5 = vld [vmem:[#allocation2 + $0x68] sm:$0xff]  }
 0x349   : > { %11749 = vmatprep.mubr.msk.bf16.mxu1 %vm1655_vm4, %v12181_v25  ;;  %v6136_v49 = vrot.slane %v6135_v58, 4  ;;  %v6290_v25 = vld [vmem:[#allocation2 + $0x114] sm:$0x8]  ;;  %v12217_v10 = vld [vmem:[#allocation2 + $0x178] sm:$0xff]   ;;  %v12221_v12 = vld [vmem:[#allocation2 + $0x188] sm:$0xff]  }
 0x34a   : > { %v5782_v63 = vld [vmem:[#allocation2 + $0x80] sm:$0x1]  ;;  %v6146_v41 = vrot.slane %v6145_v1, 4  ;;  %v12223_v58 = vld [vmem:[#allocation2 + $0x190] sm:$0xff]  }
 0x34b   : > { %v5783_v3 = vsel %vm12420_vm9, %v5707_v36, %v5782_v63  ;;  %v6141_v21 = vsel %vm12540_vm14, %v6136_v49, %v6140_v22  ;;  %v12213_v36 = vld [vmem:[#allocation2 + $0x78] sm:$0xff]  }
 0x34c   : > { %5784 = vst [vmem:[#allocation2 + $0x80] sm:$0x1] %v5783_v3  ;;  %6266 = vst.msk [vmem:[#allocation2 + $0x1a0] sm:$0xf] %vm205_vm1, %v6141_v21  ;;  %v6268_v33 = vsel %vm12546_vm15, %v6146_v41, %v6267_v39  ;;  %v12218_v21 = vld [vmem:[#allocation2 + $0xa0] sm:$0xff]  }
 0x34d   : > { %v12183_v57 = vld [vmem:[#allocation2 + $0x198] sm:$0xff]   ;;  %6269 = vst [vmem:[#allocation2 + $0x1a4] sm:$0xf] %v6268_v33 }
 0x34e   : > { %11780 = vmatmul.mubr.msk.bf16.gmra.mxu0 %vm1655_vm4, %v12191_v40  ;;  %11750 = vmatmul.mubr.msk.bf16.gmra.mxu1 %vm1655_vm4, %v12183_v57  ;;  %v12199_v40 = vld [vmem:[#allocation2 + $0x40] sm:$0xff]   ;;  %v5210_v17 = vld [vmem:[#allocation2 + $0x118] sm:$0xf] }
 0x34f   : > { %11783 = vmatprep.mubr.msk.bf16.mxu0 %vm1655_vm4, %v12193_v60  ;;  %11789 = vmatprep.mubr.msk.bf16.mxu1 %vm1655_vm4, %v12186_v2  ;;  %v12201_v60 = vld [vmem:[#allocation2 + $0x48] sm:$0xff]   ;;  %v6341_v2 = vshll.u32 %v6290_v25, 16  ;;  %v5488_v7 = vshll.u32 %v5210_v17, 16  ;;  %v12225_v39 = vld [vmem:[#allocation2 + $0x198] sm:$0xff]  }
 0x350   : > { %v5625_v37 = vld [vmem:[#allocation2 + $0x118] sm:$0x1] }
 0x351   : > { %v5822_v33 = vld [vmem:[#allocation2 + $0x118] sm:$0xf] }
 0x352   : > { %v6148_v25 = vshrl.u32 %v5822_v33, 16 }
 0x353   : > { %v12215_v49 = vld [vmem:[#allocation2 + $0x80] sm:$0xff]  }
 0x354   : > { %v6412_v57 = vld [vmem:[#allocation2 + $0x1a4] sm:$0x8] }
 0x355   : > { %v6413_v32 = vsel %vm12568_vm2, %v6341_v2, %v6412_v57  ;;  %v5712_v2 = vshrl.u32 %v5625_v37, 16 }
 0x356   : > { %11784 = vmatmul.mubr.msk.bf16.gmra.mxu0 %vm1655_vm4, %v12195_v14  ;;  %11790 = vmatmul.mubr.msk.bf16.vlgmr.msra.gmra.mxu1 %vm1655_vm4, %v12188_v43  ;;  %6414 = vst [vmem:[#allocation2 + $0x1a4] sm:$0x8] %v6413_v32  ;;  %v12212_v14 = vld [vmem:[#allocation2 + $0x160] sm:$0xff]   ;;  %v5173_v43 = vld [vmem:[#allocation2 + $0x10c] sm:$0xf] }
 0x357   : > { %11823 = vmatprep.mubr.msk.bf16.mxu0 %vm1655_vm4, %v12198_v19  ;;  %11856 = vmatpush3.bf16.msra.mxu1 %v8794_v61  ;;  %v12203_v61 = vld [vmem:[#allocation2 + $0x50] sm:$0xff]   ;;  %v12214_v19 = vld [vmem:[#allocation2 + $0x168] sm:$0xff]   ;;  %5175 = vst.msk [vmem:[#allocation2 + $0x11c] sm:$0xf] %vm205_vm1, %v5173_v43 }
 0x358   : > { %11793 = vmatprep.mubr.msk.bf16.mxu1 %vm1655_vm4, %v12190_v30  ;;  %11974 = vmatprep.subr.msk.bf16.mxu1 %vm1704_vm0, %v14204_v62 }
 0x35e   : > { %11824 = vmatmul.mubr.msk.bf16.vlgmr.msra.gmra.mxu0 %vm1655_vm4, %v12200_v0  ;;  %11794 = vmatmul.mubr.msk.bf16.gmra.mxu1 %vm1655_vm4, %v12192_v42  ;;  %v5211_v0 = vld [vmem:[#allocation2 + $0x11c] sm:$0xf]  ;;  %v5485_v42 = vshrl.u32 %v5210_v17, 16 }
 0x35f   : > { %11827 = vmatprep.mubr.msk.bf16.mxu0 %vm1655_vm4, %v12202_v24  ;;  %11890 = vmatpush3.bf16.msra.mxu0 %v9086_v4  ;;  %v12211_v4 = vld [vmem:[#allocation2 + $0x70] sm:$0xff]   ;;  %v12219_v24 = vld [vmem:[#allocation2 + $0x180] sm:$0xff]   ;;  %v5496_v53 = vshll.u32 %v5211_v0, 16 }
 0x360   : > { %11797 = vmatprep.mubr.msk.bf16.mxu1 %vm1655_vm4, %v12194_v48  ;;  %v5493_v48 = vshrl.u32 %v5211_v0, 16  ;;  %v5487_v23 = vrot.slane %v5485_v42, 7  ;;  %v12230_v0 = vld [vmem:[#allocation2 + $0x10] sm:$0xff]   ;;  %v12220_v42 = vld [vmem:[#allocation2 + $0xa8] sm:$0xff]  }
 0x362   : > { %v5495_v6 = vrot.slane %v5493_v48, 7  ;;  %v5490_v3 = vor.u32 %v5488_v7, %v5487_v23  ;;  %v5491_v59 = vrot.slane %v5487_v23, 4  ;;  %v9412_v48 = vsel %vm1704_vm0, %v14204_v62, 0  ;;  %v12222_v23 = vld [vmem:[#allocation2 + $0xb0] sm:$0xff]  }
 0x364   : > { %v5498_v31 = vor.u32 %v5496_v53, %v5495_v6 }
 0x366   : > { %11828 = vmatmul.mubr.msk.bf16.gmra.mxu0 %vm1655_vm4, %v12204_v16  ;;  %11798 = vmatmul.mubr.msk.bf16.gmra.mxu1 %vm1655_vm4, %v12196_v15  ;;  %v5604_v16 = vld [vmem:[#allocation2 + $0x88] sm:$0xf] }
 0x367   : > { %11831 = vmatprep.mubr.msk.bf16.mxu0 %vm1655_vm4, %v12206_v56  ;;  %11801 = vmatprep.mubr.msk.bf16.mxu1 %vm1655_vm4, %v12197_v54  ;;  %v5499_v56 = vsel %vm12399_vm7, %v5491_v59, %v5498_v31  ;;  %v5605_v9 = vsel %vm12393_vm6, %v5490_v3, %v5604_v16 }
 0x368   : > { %5606 = vst [vmem:[#allocation2 + $0x88] sm:$0xf] %v5605_v9  ;;  %5607 = vst.msk [vmem:[#allocation2 + $0x8c] sm:$0xf] %vm205_vm1, %v5499_v56  ;;  %v12232_v56 = vld [vmem:[#allocation2 + $0x18] sm:$0xff]  }
 0x36e   : > { %11832 = vmatmul.mubr.msk.bf16.gmra.mxu0 %vm1655_vm4, %v12208_v47  ;;  %11802 = vmatmul.mubr.msk.bf16.gmra.mxu1 %vm1655_vm4, %v12199_v40  ;;  %v6151_v40 = vshll.u32 %v5822_v33, 16 }
 0x36f   : > { %11835 = vmatprep.mubr.msk.bf16.mxu0 %vm1655_vm4, %v12210_v55  ;;  %11805 = vmatprep.mubr.msk.bf16.mxu1 %vm1655_vm4, %v12201_v60  ;;  %v5823_v55 = vld [vmem:[#allocation2 + $0x11c] sm:$0xf] }
 0x370   : > { %v6157_v57 = vshll.u32 %v5823_v55, 16  ;;  %v6161_v32 = vshrl.u32 %v5823_v55, 16  ;;  %v6153_v11 = vrot.slane %v6151_v40, 5 }
 0x374   : > { %v14237_v27 = vpop.f32.mrf.mxu1 }
 0x376   : > { %v14239_v29 = vpop.f32.mrf.mxu1  ;;  %11836 = vmatmul.mubr.msk.bf16.gmra.mxu0 %vm1655_vm4, %v12212_v14  ;;  %11806 = vmatmul.mubr.msk.bf16.gmra.mxu1 %vm1655_vm4, %v12203_v61  ;;  %v5785_v14 = vld [vmem:[#allocation2 + $0x88] sm:$0x1] }
 0x377   : > { %11839 = vmatprep.mubr.msk.bf16.mxu0 %vm1655_vm4, %v12214_v19  ;;  %11809 = vmatprep.mubr.msk.bf16.mxu1 %vm1655_vm4, %v12205_v46  ;;  %v6150_v19 = vrot.slane %v6148_v25, 4  ;;  %v5786_v46 = vsel %vm12420_vm9, %v5712_v2, %v5785_v14  ;;  %v12236_v14 = vld [vmem:[#allocation2 + $0x28] sm:$0xff]  }
 0x378   : > { %v14243_v8 = vpop.f32.mrf.mxu1  ;;  %5787 = vst [vmem:[#allocation2 + $0x88] sm:$0x1] %v5786_v46 }
 0x379   : > { %v6154_v17 = vor.u32 %v6153_v11, %v6150_v19  ;;  %v12238_v11 = vld [vmem:[#allocation2 + $0x30] sm:$0xff]  }
 0x37a   : > { %v14249_v35 = vpop.f32.mrf.mxu1 }
 0x37b   : > { %v6155_v13 = vrot.slane %v6154_v17, 4 }
 0x37c   : > { %v14251_v34 = vpop.f32.mrf.mxu1 }
 0x37e   : > { %v14253_v30 = vpop.f32.mrf.mxu1  ;;  %11840 = vmatmul.mubr.msk.bf16.gmra.mxu0 %vm1655_vm4, %v12216_v38  ;;  %11810 = vmatmul.mubr.msk.bf16.gmra.mxu1 %vm1655_vm4, %v12207_v20  ;;  %v6159_v38 = vrot.slane %v6157_v57, 5  ;;  %v12227_v20 = vld [vmem:[#allocation2 + $0x1a0] sm:$0xff]  }
 0x37f   : > { %11843 = vmatprep.mubr.msk.bf16.mxu0 %vm1655_vm4, %v12217_v10  ;;  %11813 = vmatprep.mubr.msk.bf16.mxu1 %vm1655_vm4, %v12209_v5  ;;  %v6163_v10 = vrot.slane %v6161_v32, 4 }
 0x380   : > { %v14257_v44 = vpop.f32.mrf.mxu1  ;;  %v6160_v16 = vsel %vm12540_vm14, %v6155_v13, %v6159_v38 }
 0x381   : > { %6270 = vst.msk [vmem:[#allocation2 + $0x1a8] sm:$0xf] %vm205_vm1, %v6160_v16 }
 0x382   : > { %v14261_v45 = vpop.f32.mrf.mxu1 }
 0x384   : > { %v14263_v52 = vpop.f32.mrf.mxu1 }
 0x386   : > { %v14265_v28 = vpop.f32.mrf.mxu1  ;;  %11844 = vmatmul.mubr.msk.bf16.gmra.mxu0 %vm1655_vm4, %v12219_v24  ;;  %11814 = vmatmul.mubr.msk.bf16.gmra.mxu1 %vm1655_vm4, %v12211_v4  ;;  %v6164_v24 = vor.u32 %v6163_v10, %v6159_v38  ;;  %v12228_v38 = vld [vmem:[#allocation2 + $0xc8] sm:$0xff]  }
 0x387   : > { %11847 = vmatprep.mubr.msk.bf16.mxu0 %vm1655_vm4, %v12221_v12  ;;  %11817 = vmatprep.mubr.msk.bf16.mxu1 %vm1655_vm4, %v12213_v36  ;;  %v6271_v12 = vld [vmem:[#allocation2 + $0x1ac] sm:$0xf] }
 0x388   : > { %v14269_v63 = vpop.f32.mrf.mxu1  ;;  %v6165_v6 = vrot.slane %v6164_v24, 4 }
 0x38a   : > { %v14273_v22 = vpop.f32.mrf.mxu1  ;;  %v6272_v3 = vsel %vm12546_vm15, %v6165_v6, %v6271_v12  ;;  %v12231_v12 = vld [vmem:[#allocation2 + $0xd8] sm:$0xff]  }
 0x38b   : > { %v14282_v15 = vpop.f32.mrf.mxu0  ;;  %6273 = vst [vmem:[#allocation2 + $0x1ac] sm:$0xf] %v6272_v3 }
 0x38c   : > { %v14279_v1 = vpop.f32.mrf.mxu1 }
 0x38d   : > { %v14287_v41 = vpop.f32.mrf.mxu0 }
 0x38e   : > { %v14284_v54 = vpop.f32.mrf.mxu1  ;;  %11848 = vmatmul.mubr.msk.bf16.gmra.mxu0 %vm1655_vm4, %v12223_v58  ;;  %11818 = vmatmul.mubr.msk.bf16.gmra.mxu1 %vm1655_vm4, %v12215_v49  ;;  %v12224_v49 = vld [vmem:[#allocation2 + $0xb8] sm:$0xff]  }
 0x38f   : > { %11851 = vmatprep.mubr.msk.bf16.mxu0 %vm1655_vm4, %v12225_v39  ;;  %v14293_v47 = vpop.f32.mrf.mxu0  ;;  %11857 = vmatprep.mubr.msk.bf16.mxu1 %vm1655_vm4, %v12218_v21  ;;  %v6291_v39 = vld [vmem:[#allocation2 + $0x11c] sm:$0x8]  ;;  %v12226_v21 = vld [vmem:[#allocation2 + $0xc0] sm:$0xff]  }
 0x390   : > { %v14290_v51 = vpop.f32.mrf.mxu1  ;;  %v6344_v55 = vshll.u32 %v6291_v39, 16  ;;  %v12244_v39 = vld [vmem:[#allocation2 + $0x48] sm:$0xff]  }
 0x391   : > { %v14298_v61 = vpop.f32.mrf.mxu0 }
 0x392   : > { %v14296_v60 = vpop.f32.mrf.mxu1  ;;  %v6415_v40 = vld [vmem:[#allocation2 + $0x1ac] sm:$0x8] }
 0x393   : > { %v14304_v5 = vpop.f32.mrf.mxu0  ;;  %v6416_v57 = vsel %vm12568_vm2, %v6344_v55, %v6415_v40  ;;  %v12237_v40 = vld [vmem:[#allocation2 + $0xf0] sm:$0xff]  }
 0x394   : > { %v14300_v43 = vpop.f32.mrf.mxu1  ;;  %6417 = vst [vmem:[#allocation2 + $0x1ac] sm:$0x8] %v6416_v57 }
 0x395   : > { %v14311_v36 = vpop.f32.mrf.mxu0 }
 0x396   : > { %v14306_v4 = vpop.f32.mrf.mxu1  ;;  %11852 = vmatmul.mubr.msk.bf16.gmra.mxu0 %vm1655_vm4, %v12227_v20  ;;  %11858 = vmatmul.mubr.msk.bf16.vlgmr.msra.gmra.mxu1 %vm1655_vm4, %v12220_v42  ;;  %v12229_v20 = vld [vmem:[#allocation2 + $0xd0] sm:$0xff]   ;;  %v12240_v42 = vld [vmem:[#allocation2 + $0x38] sm:$0xff]  }
 0x397   : > { %11891 = vmatprep.mubr.msk.bf16.mxu0 %vm1655_vm4, %v12230_v0  ;;  %v14317_v53 = vpop.f32.mrf.mxu0  ;;  %11924 = vmatpush3.bf16.msra.mxu1 %v9412_v48  ;;  %v12242_v48 = vld [vmem:[#allocation2 + $0x40] sm:$0xff]  }
 0x398   : > { %v14314_v7 = vpop.f32.mrf.mxu1  ;;  %11861 = vmatprep.mubr.msk.bf16.mxu1 %vm1655_vm4, %v12222_v23  ;;  %v12233_v23 = vld [vmem:[#allocation2 + $0xe0] sm:$0xff]  }
 0x399   : > { %v14327_v59 = vpop.f32.mrf.mxu0 }
 0x39a   : > { %v14322_v62 = vpop.f32.mrf.mxu1 }
 0x39b   : > { %v14331_v9 = vpop.f32.mrf.mxu0 }
 0x39c   : > { %v14329_v31 = vpop.f32.mrf.mxu1 }
 0x39d   : > { %v14336_v37 = vpop.f32.mrf.mxu0 }
 0x39e   : > { %v14333_v58 = vpop.f32.mrf.mxu1  ;;  %11892 = vmatmul.mubr.msk.bf16.vlgmr.msra.gmra.mxu0 %vm1655_vm4, %v12232_v56  ;;  %11862 = vmatmul.mubr.msk.bf16.gmra.mxu1 %vm1655_vm4, %v12224_v49  ;;  %v12246_v49 = vld [vmem:[#allocation2 + $0x50] sm:$0xff]  }
 0x39f   : > { %11895 = vmatprep.mubr.msk.bf16.mxu0 %vm1655_vm4, %v12234_v26  ;;  %v14342_v33 = vpop.f32.mrf.mxu0  ;;  %11865 = vmatprep.mubr.msk.bf16.mxu1 %vm1655_vm4, %v12226_v21  ;;  %v12235_v21 = vld [vmem:[#allocation2 + $0xe8] sm:$0xff]  }
 0x3a0   : > { %v14339_v18 = vpop.f32.mrf.mxu1 }
 0x3a1   : > { %v14347_v2 = vpop.f32.mrf.mxu0 }
 0x3a2   : > { %v14345_v25 = vpop.f32.mrf.mxu1 }
 0x3a3   : > { %v14353_v19 = vpop.f32.mrf.mxu0 }
 0x3a4   : > { %v14351_v32 = vpop.f32.mrf.mxu1 }
 0x3a5   : > { %v14358_v10 = vpop.f32.mrf.mxu0 }
 0x3a6   : > { %v14355_v46 = vpop.f32.mrf.mxu1  ;;  %11896 = vmatmul.mubr.msk.bf16.gmra.mxu0 %vm1655_vm4, %v12236_v14  ;;  %11866 = vmatmul.mubr.msk.bf16.gmra.mxu1 %vm1655_vm4, %v12228_v38  ;;  %v12248_v38 = vld [vmem:[#allocation2 + $0x58] sm:$0xff]  }
 0x3a7   : > { %11899 = vmatprep.mubr.msk.bf16.mxu0 %vm1655_vm4, %v12238_v11  ;;  %v14364_v50 = vpop.f32.mrf.mxu0  ;;  %11869 = vmatprep.mubr.msk.bf16.mxu1 %vm1655_vm4, %v12229_v20  ;;  %v12249_v20 = vld [vmem:[#allocation2 + $0x60] sm:$0xff]  }
 0x3a8   : > { %v14361_v17 = vpop.f32.mrf.mxu1 }
 0x3a9   : > { %v14367_v0 = vpop.f32.mrf.mxu0 }
 0x3aa   : > { %v14369_v24 = vpop.f32.mrf.mxu1 }
 0x3ab   : > { %v14371_v13 = vpop.f32.mrf.mxu0 }
 0x3ac   : > { %v14375_v6 = vpop.f32.mrf.mxu1 }
 0x3ad   : > { %v14377_v16 = vpop.f32.mrf.mxu0 }
 0x3ae   : > { %11900 = vmatmul.mubr.msk.bf16.gmra.mxu0 %vm1655_vm4, %v12240_v42  ;;  %11870 = vmatmul.mubr.msk.bf16.gmra.mxu1 %vm1655_vm4, %v12231_v12  ;;  %v14383_v56 = vpop.f32.mrf.mxu1  ;;  %v6951_v42 = vadd.f32 %v14282_v15, %v14237_v27  ;;  %v6954_v27 = vadd.f32 %v14293_v47, %v14243_v8 }
 0x3af   : > { %11903 = vmatprep.mubr.msk.bf16.mxu0 %vm1655_vm4, %v12242_v48  ;;  %11873 = vmatprep.mubr.msk.bf16.mxu1 %vm1655_vm4, %v12233_v23  ;;  %v14381_v3 = vpop.f32.mrf.mxu0  ;;  %v12239_v48 = vld [vmem:[#allocation2 + $0xf8] sm:$0xff]   ;;  %v12241_v23 = vld [vmem:[#allocation2 + $0x100] sm:$0xff]  }
 0x3b0   : > { %v14391_v57 = vpop.f32.mrf.mxu1 }
 0x3b1   : > { %v14385_v26 = vpop.f32.mrf.mxu0  ;;  %15479 = vst [vmem:[#allocation10_spill] sm:$0xff] %v14391_v57  ;;  %v12251_v57 = vld [vmem:[#allocation2 + $0x68] sm:$0xff]  }
 0x3b2   : > { %v14397_v11 = vpop.f32.mrf.mxu1 }
 0x3b3   : > { %v14388_v55 = vpop.f32.mrf.mxu0  ;;  %15480 = vst [vmem:[#allocation11_spill] sm:$0xff] %v14397_v11 }
 0x3b5   : > { %v14395_v14 = vpop.f32.mrf.mxu0 }
 0x3b6   : > { %11904 = vmatmul.mubr.msk.bf16.gmra.mxu0 %vm1655_vm4, %v12244_v39  ;;  %11874 = vmatmul.mubr.msk.bf16.gmra.mxu1 %vm1655_vm4, %v12235_v21 }
 0x3b7   : > { %11907 = vmatprep.mubr.msk.bf16.mxu0 %vm1655_vm4, %v12246_v49  ;;  %11877 = vmatprep.mubr.msk.bf16.mxu1 %vm1655_vm4, %v12237_v40  ;;  %v14402_v12 = vpop.f32.mrf.mxu0  ;;  %v6943_v49 = vadd.f32 %v14287_v41, %v14239_v29  ;;  %v12253_v41 = vld [vmem:[#allocation2 + $0x70] sm:$0xff]  }
 0x3bd   : > { %v11723_v39 = vpop.f32.mrf.mxu1 }
 0x3be   : > { %11908 = vmatmul.mubr.msk.bf16.gmra.mxu0 %vm1655_vm4, %v12248_v38  ;;  %11878 = vmatmul.mubr.msk.bf16.gmra.mxu1 %vm1655_vm4, %v12239_v48  ;;  %v7397_v21 = vadd.f32 %v11723_v39, %v6951_v42  ;;  %v14412_v38 = vpop.f32.mrf.mxu0  ;;  %v12243_v48 = vld [vmem:[#allocation2 + $0x108] sm:$0xff]   ;;  %v12247_v39 = vld [vmem:[#allocation2 + $0x118] sm:$0xff]  }
 0x3bf   : > { %11911 = vmatprep.mubr.msk.bf16.mxu0 %vm1655_vm4, %v12249_v20  ;;  %11881 = vmatprep.mubr.msk.bf16.mxu1 %vm1655_vm4, %v12241_v23  ;;  %v7268_v40 = vpop.f32.mrf.mxu1  ;;  %v6946_v20 = vadd.f32 %v14298_v61, %v14249_v35  ;;  %v12245_v23 = vld [vmem:[#allocation2 + $0x110] sm:$0xff]   ;;  %v12255_v61 = vld [vmem:[#allocation2 + $0x78] sm:$0xff]  }
 0x3c0   : > { %7429 = vst.msk [vmem:[#allocation3 + $0x10] sm:$0xff] %vm1655_vm4, %v7397_v21  ;;  %v7395_v15 = vadd.f32 %v7268_v40, %v6943_v49  ;;  %v6959_v40 = vadd.f32 %v14311_v36, %v14253_v30  ;;  %v6962_v30 = vadd.f32 %v14327_v59, %v14261_v45  ;;  %v6983_v45 = vadd.f32 %v14331_v9, %v14263_v52  ;;  %v12258_v52 = vld [vmem:[#allocation2 + $0x150] sm:$0xff]  }
 0x3c1   : > { %v11724_v11 = vpop.f32.mrf.mxu1 }
 0x3c2   : > { %7427 = vst.msk [vmem:[#allocation3] sm:$0xff] %vm1655_vm4, %v7395_v15  ;;  %v7398_v29 = vadd.f32 %v11724_v11, %v6954_v27  ;;  %v12257_v11 = vld [vmem:[#allocation2 + $0x80] sm:$0xff]   ;;  %v12250_v27 = vld [vmem:[#allocation2 + $0x130] sm:$0xff]  }
 0x3c3   : > { %v7271_v42 = vpop.f32.mrf.mxu1 }
 0x3c4   : > { %7430 = vst.msk [vmem:[#allocation3 + $0x18] sm:$0xff] %vm1655_vm4, %v7398_v29  ;;  %v7396_v8 = vadd.f32 %v7271_v42, %v6946_v20 }
 0x3c6   : > { %11912 = vmatmul.mubr.msk.bf16.gmra.mxu0 %vm1655_vm4, %v12251_v57  ;;  %11882 = vmatmul.mubr.msk.bf16.gmra.mxu1 %vm1655_vm4, %v12243_v48  ;;  %7428 = vst.msk [vmem:[#allocation3 + $0x8] sm:$0xff] %vm1655_vm4, %v7396_v8  ;;  %v6967_v57 = vadd.f32 %v14304_v5, %v14251_v34  ;;  %v6970_v34 = vadd.f32 %v14317_v53, %v14257_v44  ;;  %v12259_v48 = vld [vmem:[#allocation2 + $0x88] sm:$0xff]   ;;  %v12252_v44 = vld [vmem:[#allocation2 + $0x138] sm:$0xff]  }
 0x3c7   : > { %v14419_v47 = vpop.f32.mrf.mxu0  ;;  %11915 = vmatprep.mubr.msk.bf16.mxu0 %vm1655_vm4, %v12253_v41  ;;  %11885 = vmatprep.mubr.msk.bf16.mxu1 %vm1655_vm4, %v12245_v23  ;;  %v12254_v23 = vld [vmem:[#allocation2 + $0x140] sm:$0xff]  }
 0x3c9   : > { %v14425_v35 = vpop.f32.mrf.mxu0 }
 0x3cb   : > { %v14430_v21 = vpop.f32.mrf.mxu0 }
 0x3cd   : > { %v14440_v41 = vpop.f32.mrf.mxu0 }
 0x3ce   : > { %v11727_v49 = vpop.f32.mrf.mxu1  ;;  %11916 = vmatmul.mubr.msk.bf16.gmra.mxu0 %vm1655_vm4, %v12255_v61  ;;  %11886 = vmatmul.mubr.msk.bf16.gmra.mxu1 %vm1655_vm4, %v12247_v39 }
 0x3cf   : > { %v7401_v15 = vadd.f32 %v11727_v49, %v6967_v57  ;;  %11919 = vmatprep.mubr.msk.bf16.mxu0 %vm1655_vm4, %v12257_v11  ;;  %11925 = vmatprep.mubr.msk.bf16.mxu1 %vm1655_vm4, %v12250_v27  ;;  %v6975_v11 = vadd.f32 %v14336_v37, %v14265_v28  ;;  %v6986_v27 = vadd.f32 %v14342_v33, %v14269_v63 }
 0x3d0   : > { %v7284_v20 = vpop.f32.mrf.mxu1 }
 0x3d1   : > { %7433 = vst.msk [vmem:[#allocation3 + $0x30] sm:$0xff] %vm1655_vm4, %v7401_v15  ;;  %v7399_v5 = vadd.f32 %v7284_v20, %v6959_v40  ;;  %v12256_v15 = vld [vmem:[#allocation2 + $0x148] sm:$0xff]  }
 0x3d2   : > { %v11728_v29 = vpop.f32.mrf.mxu1 }
 0x3d3   : > { %7431 = vst.msk [vmem:[#allocation3 + $0x20] sm:$0xff] %vm1655_vm4, %v7399_v5  ;;  %v7402_v36 = vadd.f32 %v11728_v29, %v6970_v34  ;;  %v6978_v5 = vadd.f32 %v14347_v2, %v14273_v22  ;;  %v12260_v22 = vld [vmem:[#allocation2 + $0x158] sm:$0xff]  }
 0x3d4   : > { %v7287_v42 = vpop.f32.mrf.mxu1 }
 0x3d5   : > { %7434 = vst.msk [vmem:[#allocation3 + $0x38] sm:$0xff] %vm1655_vm4, %v7402_v36  ;;  %v7400_v8 = vadd.f32 %v7287_v42, %v6962_v30  ;;  %v6999_v36 = vadd.f32 %v14353_v19, %v14279_v1  ;;  %v12261_v42 = vld [vmem:[#allocation2 + $0x160] sm:$0xff]  }
 0x3d6   : > { %v14446_v53 = vpop.f32.mrf.mxu0  ;;  %11920 = vmatmul.mubr.msk.bf16.gmra.mxu0 %vm1655_vm4, %v12259_v48  ;;  %11926 = vmatmul.mubr.msk.bf16.vlgmr.msra.gmra.mxu1 %vm1655_vm4, %v12252_v44  ;;  %v6991_v44 = vadd.f32 %v14358_v10, %v14284_v54  ;;  %v12262_v10 = vld [vmem:[#allocation2 + $0x168] sm:$0xff]  }
 0x3d7   : > { %7432 = vst.msk [vmem:[#allocation3 + $0x28] sm:$0xff] %vm1655_vm4, %v7400_v8  ;;  %11929 = vmatprep.mubr.msk.bf16.mxu1 %vm1655_vm4, %v12254_v23 }
 0x3d8   : > { %v14451_v61 = vpop.f32.mrf.mxu0 }
 0x3da   : > { %v14456_v59 = vpop.f32.mrf.mxu0 }
 0x3db   : > { %v11731_v57 = vpop.f32.mrf.mxu1 }
 0x3dc   : > { %v7405_v39 = vadd.f32 %v11731_v57, %v6983_v45  ;;  %v14460_v49 = vpop.f32.mrf.mxu0 }
 0x3dd   : > { %v7300_v40 = vpop.f32.mrf.mxu1 }
 0x3de   : > { %7437 = vst.msk [vmem:[#allocation3 + $0x50] sm:$0xff] %vm1655_vm4, %v7405_v39  ;;  %v7403_v20 = vadd.f32 %v7300_v40, %v6975_v11  ;;  %v14465_v34 = vpop.f32.mrf.mxu0  ;;  %11930 = vmatmul.mubr.msk.bf16.gmra.mxu1 %vm1655_vm4, %v12256_v15  ;;  %v7002_v11 = vadd.f32 %v14364_v50, %v14290_v51  ;;  %v6994_v40 = vadd.f32 %v14367_v0, %v14296_v60  ;;  %v12263_v51 = vld [vmem:[#allocation2 + $0x170] sm:$0xff]  }
 0x3df   : > { %v11732_v9 = vpop.f32.mrf.mxu1  ;;  %11933 = vmatprep.mubr.msk.bf16.mxu1 %vm1655_vm4, %v12258_v52  ;;  %v7007_v60 = vadd.f32 %v14377_v16, %v14306_v4  ;;  %v7010_v4 = vadd.f32 %v14385_v26, %v14322_v62  ;;  %v7031_v62 = vadd.f32 %v14388_v55, %v14329_v31  ;;  %v12267_v31 = vld [vmem:[#allocation2 + $0x190] sm:$0xff]  }
 0x3e0   : > { %7435 = vst.msk [vmem:[#allocation3 + $0x40] sm:$0xff] %vm1655_vm4, %v7403_v20  ;;  %v7406_v28 = vadd.f32 %v11732_v9, %v6986_v27  ;;  %v14471_v37 = vpop.f32.mrf.mxu0  ;;  %v7015_v20 = vadd.f32 %v14371_v13, %v14300_v43  ;;  %v7018_v43 = vadd.f32 %v14381_v3, %v14314_v7 }
 0x3e1   : > { %v7303_v63 = vpop.f32.mrf.mxu1 }
 0x3e2   : > { %7438 = vst.msk [vmem:[#allocation3 + $0x58] sm:$0xff] %vm1655_vm4, %v7406_v28  ;;  %v7404_v33 = vadd.f32 %v7303_v63, %v6978_v5  ;;  %v14475_v29 = vpop.f32.mrf.mxu0 }
 0x3e4   : > { %7436 = vst.msk [vmem:[#allocation3 + $0x48] sm:$0xff] %vm1655_vm4, %v7404_v33  ;;  %v14478_v30 = vpop.f32.mrf.mxu0 }
 0x3e6   : > { %v14480_v2 = vpop.f32.mrf.mxu0  ;;  %11934 = vmatmul.mubr.msk.bf16.gmra.mxu1 %vm1655_vm4, %v12260_v22  ;;  %v12264_v22 = vld [vmem:[#allocation2 + $0x178] sm:$0xff]  }
 0x3e7   : > { %11937 = vmatprep.mubr.msk.bf16.mxu1 %vm1655_vm4, %v12261_v42 }
 0x3e8   : > { %v14485_v8 = vpop.f32.mrf.mxu0 }
 0x3e9   : > { %v11735_v48 = vpop.f32.mrf.mxu1 }
 0x3ea   : > { %v7409_v23 = vadd.f32 %v11735_v48, %v6999_v36  ;;  %v14490_v57 = vpop.f32.mrf.mxu0  ;;  %v12265_v48 = vld [vmem:[#allocation2 + $0x180] sm:$0xff]  }
 0x3eb   : > { %v7316_v45 = vpop.f32.mrf.mxu1 }
 0x3ec   : > { %7441 = vst.msk [vmem:[#allocation3 + $0x70] sm:$0xff] %vm1655_vm4, %v7409_v23  ;;  %v7407_v1 = vadd.f32 %v7316_v45, %v6991_v44  ;;  %v14495_v39 = vpop.f32.mrf.mxu0  ;;  %v7023_v23 = vadd.f32 %v14395_v14, %v14333_v58 }
 0x3ed   : > { %v11736_v19 = vpop.f32.mrf.mxu1 }
 0x3ee   : > { %7439 = vst.msk [vmem:[#allocation3 + $0x60] sm:$0xff] %vm1655_vm4, %v7407_v1  ;;  %v7410_v54 = vadd.f32 %v11736_v19, %v7002_v11  ;;  %v14500_v15 = vpop.f32.mrf.mxu0  ;;  %11938 = vmatmul.mubr.msk.bf16.gmra.mxu1 %vm1655_vm4, %v12262_v10  ;;  %v7034_v19 = vadd.f32 %v14402_v12, %v14339_v18 }
 0x3ef   : > { %v7319_v27 = vpop.f32.mrf.mxu1  ;;  %11941 = vmatprep.mubr.msk.bf16.mxu1 %vm1655_vm4, %v12263_v51  ;;  %v7047_v51 = vadd.f32 %v14419_v47, %v14351_v32 }
 0x3f0   : > { %7442 = vst.msk [vmem:[#allocation3 + $0x78] sm:$0xff] %vm1655_vm4, %v7410_v54  ;;  %v7408_v50 = vadd.f32 %v7319_v27, %v6994_v40  ;;  %v14506_v9 = vpop.f32.mrf.mxu0  ;;  %v12266_v40 = vld [vmem:[#allocation2 + $0x188] sm:$0xff]   ;;  %v7026_v27 = vadd.f32 %v14412_v38, %v14345_v25 }
 0x3f1   : > { %v11739_v52 = vpop.f32.mrf.mxu1 }
 0x3f2   : > { %7440 = vst.msk [vmem:[#allocation3 + $0x68] sm:$0xff] %vm1655_vm4, %v7408_v50  ;;  %v7413_v0 = vadd.f32 %v11739_v52, %v7015_v20  ;;  %v14512_v28 = vpop.f32.mrf.mxu0  ;;  %v7039_v50 = vadd.f32 %v14425_v35, %v14355_v46  ;;  %v7042_v46 = vadd.f32 %v14440_v41, %v14369_v24 }
 0x3f3   : > { %v7332_v5 = vpop.f32.mrf.mxu1 }
 0x3f4   : > { %7445 = vst.msk [vmem:[#allocation3 + $0x90] sm:$0xff] %vm1655_vm4, %v7413_v0  ;;  %v7411_v13 = vadd.f32 %v7332_v5, %v7007_v60  ;;  %v14517_v33 = vpop.f32.mrf.mxu0  ;;  %v12268_v60 = vld [vmem:[#allocation2 + $0x198] sm:$0xff]   ;;  %v12269_v5 = vld [vmem:[#allocation2 + $0x1a0] sm:$0xff]  }
 0x3f5   : > { %v11740_v63 = vpop.f32.mrf.mxu1 }
 0x3f6   : > { %7443 = vst.msk [vmem:[#allocation3 + $0x80] sm:$0xff] %vm1655_vm4, %v7411_v13  ;;  %v7414_v16 = vadd.f32 %v11740_v63, %v7018_v43  ;;  %v14522_v42 = vpop.f32.mrf.mxu0  ;;  %11942 = vmatmul.mubr.msk.bf16.gmra.mxu1 %vm1655_vm4, %v12264_v22  ;;  %v7050_v13 = vadd.f32 %v14430_v21, %v14361_v17  ;;  %v12270_v22 = vld [vmem:[#allocation2 + $0x1a8] sm:$0xff]  }
 0x3f7   : > { %v7335_v36 = vpop.f32.mrf.mxu1  ;;  %11945 = vmatprep.mubr.msk.bf16.mxu1 %vm1655_vm4, %v12265_v48  ;;  %v7063_v48 = vadd.f32 %v14446_v53, %v14375_v6  ;;  %v15482_v53 = vld [vmem:[#allocation11_spill] sm:$0xff] }
 0x3f8   : > { %7446 = vst.msk [vmem:[#allocation3 + $0x98] sm:$0xff] %vm1655_vm4, %v7414_v16  ;;  %v7412_v7 = vadd.f32 %v7335_v36, %v7010_v4  ;;  %v14526_v3 = vpop.f32.mrf.mxu0 }
 0x3fa   : > { %7444 = vst.msk [vmem:[#allocation3 + $0x88] sm:$0xff] %vm1655_vm4, %v7412_v7  ;;  %v14532_v26 = vpop.f32.mrf.mxu0  ;;  %v7055_v7 = vadd.f32 %v14451_v61, %v14383_v56 }
 0x3fb   : > { %v11743_v44 = vpop.f32.mrf.mxu1 }
 0x3fc   : > { %v7417_v45 = vadd.f32 %v11743_v44, %v7031_v62  ;;  %v14536_v11 = vpop.f32.mrf.mxu0 }
 0x3fd   : > { %v7348_v1 = vpop.f32.mrf.mxu1 }
 0x3fe   : > { %7449 = vst.msk [vmem:[#allocation3 + $0xb0] sm:$0xff] %vm1655_vm4, %v7417_v45  ;;  %v7415_v54 = vadd.f32 %v7348_v1, %v7023_v23  ;;  %v14541_v10 = vpop.f32.mrf.mxu0  ;;  %11946 = vmatmul.mubr.msk.bf16.gmra.mxu1 %vm1655_vm4, %v12266_v40  ;;  %v15481_v45 = vld [vmem:[#allocation10_spill] sm:$0xff] }
 0x3ff   : > { %v11744_v55 = vpop.f32.mrf.mxu1  ;;  %11949 = vmatprep.mubr.msk.bf16.mxu1 %vm1655_vm4, %v12267_v31  ;;  %v7066_v1 = vadd.f32 %v14456_v59, %v15481_v45 }
 0x400   : > { %7447 = vst.msk [vmem:[#allocation3 + $0xa0] sm:$0xff] %vm1655_vm4, %v7415_v54  ;;  %v7418_v58 = vadd.f32 %v11744_v55, %v7034_v19  ;;  %v14547_v14 = vpop.f32.mrf.mxu0  ;;  %v7058_v54 = vadd.f32 %v14460_v49, %v15482_v53 }
 0x401   : > { %v7351_v18 = vpop.f32.mrf.mxu1 }
 0x402   : > { %7450 = vst.msk [vmem:[#allocation3 + $0xb8] sm:$0xff] %vm1655_vm4, %v7418_v58  ;;  %v7416_v12 = vadd.f32 %v7351_v18, %v7026_v27  ;;  %v14551_v20 = vpop.f32.mrf.mxu0 }
 0x404   : > { %7448 = vst.msk [vmem:[#allocation3 + $0xa8] sm:$0xff] %vm1655_vm4, %v7416_v12  ;;  %v14556_v25 = vpop.f32.mrf.mxu0  ;;  %v11747_v38 = vpop.f32.mrf.mxu1 }
 0x405   : > { %v7421_v52 = vadd.f32 %v11747_v38, %v7047_v51 }
 0x406   : > { %v14560_v0 = vpop.f32.mrf.mxu0  ;;  %v7364_v43 = vpop.f32.mrf.mxu1  ;;  %11950 = vmatmul.mubr.msk.bf16.gmra.mxu1 %vm1655_vm4, %v12268_v60 }
 0x407   : > { %7453 = vst.msk [vmem:[#allocation3 + $0xd0] sm:$0xff] %vm1655_vm4, %v7421_v52  ;;  %v7419_v32 = vadd.f32 %v7364_v43, %v7039_v50  ;;  %11953 = vmatprep.mubr.msk.bf16.mxu1 %vm1655_vm4, %v12269_v5  ;;  %v7461_v43 = vld [vmem:[#allocation3 + $0x10] sm:$0xff] }
 0x408   : > { %v14566_v47 = vpop.f32.mrf.mxu0  ;;  %v11748_v63 = vpop.f32.mrf.mxu1 }
 0x409   : > { %7451 = vst.msk [vmem:[#allocation3 + $0xc0] sm:$0xff] %vm1655_vm4, %v7419_v32  ;;  %v7422_v35 = vadd.f32 %v11748_v63, %v7050_v13 }
 0x40a   : > { %v14572_v4 = vpop.f32.mrf.mxu0  ;;  %v7367_v16 = vpop.f32.mrf.mxu1 }
 0x40b   : > { %7454 = vst.msk [vmem:[#allocation3 + $0xd8] sm:$0xff] %vm1655_vm4, %v7422_v35  ;;  %v7420_v17 = vadd.f32 %v7367_v16, %v7042_v46  ;;  %v7459_v16 = vld [vmem:[#allocation3] sm:$0xff] }
 0x40c   : > { %v14575_v21 = vpop.f32.mrf.mxu0 }
 0x40d   : > { %7452 = vst.msk [vmem:[#allocation3 + $0xc8] sm:$0xff] %vm1655_vm4, %v7420_v17 }
 0x40e   : > { %v14578_v36 = vpop.f32.mrf.mxu0  ;;  %v11751_v24 = vpop.f32.mrf.mxu1  ;;  %11954 = vmatmul.mubr.msk.bf16.gmra.mxu1 %vm1655_vm4, %v12270_v22 }
 0x40f   : > { %v7425_v62 = vadd.f32 %v11751_v24, %v7063_v48 }
 0x410   : > { %v14583_v41 = vpop.f32.mrf.mxu0  ;;  %v7380_v44 = vpop.f32.mrf.mxu1 }
 0x411   : > { %7457 = vst.msk [vmem:[#allocation3 + $0xf0] sm:$0xff] %vm1655_vm4, %v7425_v62  ;;  %v7423_v19 = vadd.f32 %v7380_v44, %v7055_v7  ;;  %v7462_v7 = vld [vmem:[#allocation3 + $0x18] sm:$0xff] }
 0x412   : > { %v14587_v23 = vpop.f32.mrf.mxu0  ;;  %v11752_v40 = vpop.f32.mrf.mxu1 }
 0x413   : > { %7455 = vst.msk [vmem:[#allocation3 + $0xe0] sm:$0xff] %vm1655_vm4, %v7423_v19  ;;  %v7426_v31 = vadd.f32 %v11752_v40, %v7066_v1  ;;  %v7460_v1 = vld [vmem:[#allocation3 + $0x8] sm:$0xff] }
 0x414   : > { %v14592_v6 = vpop.f32.mrf.mxu0  ;;  %v7383_v56 = vpop.f32.mrf.mxu1 }
 0x415   : > { %7458 = vst.msk [vmem:[#allocation3 + $0xf8] sm:$0xff] %vm1655_vm4, %v7426_v31  ;;  %v7424_v55 = vadd.f32 %v7383_v56, %v7058_v54  ;;  %v7465_v31 = vld [vmem:[#allocation3 + $0x30] sm:$0xff] }
 0x416   : > { %v14597_v61 = vpop.f32.mrf.mxu0  ;;  %v11791_v27 = vpop.f32.mrf.mxu1 }
 0x417   : > { %7456 = vst.msk [vmem:[#allocation3 + $0xe8] sm:$0xff] %vm1655_vm4, %v7424_v55  ;;  %v8025_v49 = vadd.f32 %v11791_v27, %v14465_v34 }
 0x418   : > { %v14600_v59 = vpop.f32.mrf.mxu0  ;;  %v8016_v58 = vpop.f32.mrf.mxu1 }
 0x419   : > { %v8017_v52 = vadd.f32 %v8016_v58, %v14471_v37 }
 0x41a   : > { %v14603_v18 = vpop.f32.mrf.mxu0  ;;  %v11792_v12 = vpop.f32.mrf.mxu1 }
 0x41b   : > { %v8028_v32 = vadd.f32 %v11792_v12, %v14475_v29  ;;  %v7463_v12 = vld [vmem:[#allocation3 + $0x20] sm:$0xff] }
 0x41c   : > { %v14605_v51 = vpop.f32.mrf.mxu0  ;;  %v8019_v38 = vpop.f32.mrf.mxu1 }
 0x41d   : > { %v8020_v22 = vadd.f32 %v8019_v38, %v14478_v30 }
 0x41e   : > { %v11825_v50 = vpop.f32.mrf.mxu0  ;;  %v11795_v5 = vpop.f32.mrf.mxu1 }
 0x41f   : > { %v8471_v60 = vadd.f32 %v11825_v50, %v8025_v49  ;;  %v8041_v62 = vadd.f32 %v11795_v5, %v14480_v2 }
 0x420   : > { %v8342_v13 = vpop.f32.mrf.mxu0  ;;  %v8032_v35 = vpop.f32.mrf.mxu1 }
 0x421   : > { %v8503_v63 = vadd.f32 %v8471_v60, %v7461_v43  ;;  %v8469_v46 = vadd.f32 %v8342_v13, %v8017_v52  ;;  %v8033_v40 = vadd.f32 %v8032_v35, %v14485_v8  ;;  %v7466_v60 = vld [vmem:[#allocation3 + $0x38] sm:$0xff] }
 0x422   : > { %v11826_v17 = vpop.f32.mrf.mxu0  ;;  %v11796_v24 = vpop.f32.mrf.mxu1 }
 0x423   : > { %8535 = vst.msk [vmem:[#allocation3 + $0x10] sm:$0xff] %vm1655_vm4, %v8503_v63  ;;  %v8501_v34 = vadd.f32 %v8469_v46, %v7459_v16  ;;  %v8472_v48 = vadd.f32 %v11826_v17, %v8028_v32  ;;  %v8044_v55 = vadd.f32 %v11796_v24, %v14490_v57  ;;  %v7464_v63 = vld [vmem:[#allocation3 + $0x28] sm:$0xff] }
 0x424   : > { %v8345_v37 = vpop.f32.mrf.mxu0  ;;  %v8035_v45 = vpop.f32.mrf.mxu1 }
 0x425   : > { %8533 = vst.msk [vmem:[#allocation3] sm:$0xff] %vm1655_vm4, %v8501_v34  ;;  %v8504_v44 = vadd.f32 %v8472_v48, %v7462_v7  ;;  %v8470_v29 = vadd.f32 %v8345_v37, %v8020_v22  ;;  %v8036_v38 = vadd.f32 %v8035_v45, %v14495_v39  ;;  %v7469_v22 = vld [vmem:[#allocation3 + $0x50] sm:$0xff]  ;;  %v7467_v37 = vld [vmem:[#allocation3 + $0x40] sm:$0xff] }
 0x426   : > { %v11829_v19 = vpop.f32.mrf.mxu0  ;;  %v11799_v54 = vpop.f32.mrf.mxu1 }
 0x427   : > { %8536 = vst.msk [vmem:[#allocation3 + $0x18] sm:$0xff] %vm1655_vm4, %v8504_v44  ;;  %v8502_v30 = vadd.f32 %v8470_v29, %v7460_v1  ;;  %v8475_v53 = vadd.f32 %v11829_v19, %v8041_v62  ;;  %v8057_v43 = vadd.f32 %v11799_v54, %v14500_v15  ;;  %v7470_v1 = vld [vmem:[#allocation3 + $0x58] sm:$0xff]  ;;  %v7468_v54 = vld [vmem:[#allocation3 + $0x48] sm:$0xff] }
 0x428   : > { %v8358_v56 = vpop.f32.mrf.mxu0  ;;  %v8048_v58 = vpop.f32.mrf.mxu1 }
 0x429   : > { %8534 = vst.msk [vmem:[#allocation3 + $0x8] sm:$0xff] %vm1655_vm4, %v8502_v30  ;;  %v8507_v2 = vadd.f32 %v8475_v53, %v7465_v31  ;;  %v8473_v27 = vadd.f32 %v8358_v56, %v8033_v40  ;;  %v8049_v35 = vadd.f32 %v8048_v58, %v14506_v9 }
 0x42a   : > { %v11830_v49 = vpop.f32.mrf.mxu0  ;;  %v11800_v52 = vpop.f32.mrf.mxu1 }
 0x42b   : > { %8539 = vst.msk [vmem:[#allocation3 + $0x30] sm:$0xff] %vm1655_vm4, %v8507_v2  ;;  %v8505_v8 = vadd.f32 %v8473_v27, %v7463_v12  ;;  %v8476_v50 = vadd.f32 %v11830_v49, %v8044_v55  ;;  %v8060_v48 = vadd.f32 %v11800_v52, %v14512_v28  ;;  %v7473_v27 = vld [vmem:[#allocation3 + $0x70] sm:$0xff] }
 0x42c   : > { %v8361_v5 = vpop.f32.mrf.mxu0  ;;  %v8051_v32 = vpop.f32.mrf.mxu1 }
 0x42d   : > { %8537 = vst.msk [vmem:[#allocation3 + $0x20] sm:$0xff] %vm1655_vm4, %v8505_v8  ;;  %v8508_v57 = vadd.f32 %v8476_v50, %v7466_v60  ;;  %v8474_v13 = vadd.f32 %v8361_v5, %v8036_v38  ;;  %v8052_v44 = vadd.f32 %v8051_v32, %v14517_v33  ;;  %v7471_v8 = vld [vmem:[#allocation3 + $0x60] sm:$0xff] }
 0x42e   : > { %v11833_v46 = vpop.f32.mrf.mxu0  ;;  %v11803_v17 = vpop.f32.mrf.mxu1 }
 0x42f   : > { %8540 = vst.msk [vmem:[#allocation3 + $0x38] sm:$0xff] %vm1655_vm4, %v8508_v57  ;;  %v8506_v39 = vadd.f32 %v8474_v13, %v7464_v63  ;;  %v8479_v16 = vadd.f32 %v11833_v46, %v8057_v43  ;;  %v8073_v40 = vadd.f32 %v11803_v17, %v14522_v42  ;;  %v7474_v43 = vld [vmem:[#allocation3 + $0x78] sm:$0xff]  ;;  %v7472_v46 = vld [vmem:[#allocation3 + $0x68] sm:$0xff] }
 0x430   : > { %v8374_v34 = vpop.f32.mrf.mxu0  ;;  %v8064_v7 = vpop.f32.mrf.mxu1 }
 0x431   : > { %8538 = vst.msk [vmem:[#allocation3 + $0x28] sm:$0xff] %vm1655_vm4, %v8506_v39  ;;  %v8511_v15 = vadd.f32 %v8479_v16, %v7469_v22  ;;  %v8477_v24 = vadd.f32 %v8374_v34, %v8049_v35  ;;  %v8065_v56 = vadd.f32 %v8064_v7, %v14526_v3  ;;  %v7477_v22 = vld [vmem:[#allocation3 + $0x90] sm:$0xff]  ;;  %v7475_v7 = vld [vmem:[#allocation3 + $0x80] sm:$0xff] }
 0x432   : > { %v11834_v62 = vpop.f32.mrf.mxu0  ;;  %v11804_v45 = vpop.f32.mrf.mxu1 }
 0x433   : > { %8543 = vst.msk [vmem:[#allocation3 + $0x50] sm:$0xff] %vm1655_vm4, %v8511_v15  ;;  %v8509_v9 = vadd.f32 %v8477_v24, %v7467_v37  ;;  %v8480_v29 = vadd.f32 %v11834_v62, %v8060_v48  ;;  %v8076_v12 = vadd.f32 %v11804_v45, %v14532_v26 }
 0x434   : > { %v8377_v19 = vpop.f32.mrf.mxu0  ;;  %v8067_v53 = vpop.f32.mrf.mxu1 }
 0x435   : > { %8541 = vst.msk [vmem:[#allocation3 + $0x40] sm:$0xff] %vm1655_vm4, %v8509_v9  ;;  %v8512_v28 = vadd.f32 %v8480_v29, %v7470_v1  ;;  %v8478_v30 = vadd.f32 %v8377_v19, %v8052_v44  ;;  %v8068_v52 = vadd.f32 %v8067_v53, %v14536_v11  ;;  %v7478_v29 = vld [vmem:[#allocation3 + $0x98] sm:$0xff] }
 0x436   : > { %v11837_v31 = vpop.f32.mrf.mxu0  ;;  %v11807_v2 = vpop.f32.mrf.mxu1 }
 0x437   : > { %8544 = vst.msk [vmem:[#allocation3 + $0x58] sm:$0xff] %vm1655_vm4, %v8512_v28  ;;  %v8510_v33 = vadd.f32 %v8478_v30, %v7468_v54  ;;  %v8483_v55 = vadd.f32 %v11837_v31, %v8073_v40  ;;  %v8089_v13 = vadd.f32 %v11807_v2, %v14541_v10  ;;  %v7476_v28 = vld [vmem:[#allocation3 + $0x88] sm:$0xff] }
 0x438   : > { %v8390_v58 = vpop.f32.mrf.mxu0  ;;  %v8080_v38 = vpop.f32.mrf.mxu1 }
 0x439   : > { %8542 = vst.msk [vmem:[#allocation3 + $0x48] sm:$0xff] %vm1655_vm4, %v8510_v33  ;;  %v8515_v42 = vadd.f32 %v8483_v55, %v7473_v27  ;;  %v8481_v49 = vadd.f32 %v8390_v58, %v8065_v56  ;;  %v8081_v39 = vadd.f32 %v8080_v38, %v14547_v14  ;;  %v7481_v56 = vld [vmem:[#allocation3 + $0xb0] sm:$0xff]  ;;  %v7479_v58 = vld [vmem:[#allocation3 + $0xa0] sm:$0xff] }
 0x43a   : > { %v11838_v50 = vpop.f32.mrf.mxu0  ;;  %v11808_v5 = vpop.f32.mrf.mxu1 }
 0x43b   : > { %8547 = vst.msk [vmem:[#allocation3 + $0x70] sm:$0xff] %vm1655_vm4, %v8515_v42  ;;  %v8513_v3 = vadd.f32 %v8481_v49, %v7471_v8  ;;  %v8484_v60 = vadd.f32 %v11838_v50, %v8076_v12  ;;  %v8092_v48 = vadd.f32 %v11808_v5, %v14551_v20  ;;  %v7482_v8 = vld [vmem:[#allocation3 + $0xb8] sm:$0xff]  ;;  %v7480_v5 = vld [vmem:[#allocation3 + $0xa8] sm:$0xff] }
 0x43c   : > { %v8393_v57 = vpop.f32.mrf.mxu0  ;;  %v8083_v63 = vpop.f32.mrf.mxu1 }
 0x43d   : > { %8545 = vst.msk [vmem:[#allocation3 + $0x60] sm:$0xff] %vm1655_vm4, %v8513_v3  ;;  %v8516_v26 = vadd.f32 %v8484_v60, %v7474_v43  ;;  %v8482_v32 = vadd.f32 %v8393_v57, %v8068_v52  ;;  %v8084_v62 = vadd.f32 %v8083_v63, %v14556_v25 }
 0x43e   : > { %v11841_v35 = vpop.f32.mrf.mxu0  ;;  %v11811_v17 = vpop.f32.mrf.mxu1 }
 0x43f   : > { %8548 = vst.msk [vmem:[#allocation3 + $0x78] sm:$0xff] %vm1655_vm4, %v8516_v26  ;;  %v8514_v11 = vadd.f32 %v8482_v32, %v7472_v46  ;;  %v8487_v16 = vadd.f32 %v11841_v35, %v8089_v13  ;;  %v8105_v1 = vadd.f32 %v11811_v17, %v14560_v0  ;;  %v7485_v32 = vld [vmem:[#allocation3 + $0xd0] sm:$0xff] }
 0x440   : > { %v8406_v34 = vpop.f32.mrf.mxu0  ;;  %v8096_v24 = vpop.f32.mrf.mxu1 }
 0x441   : > { %8546 = vst.msk [vmem:[#allocation3 + $0x68] sm:$0xff] %vm1655_vm4, %v8514_v11  ;;  %v8519_v10 = vadd.f32 %v8487_v16, %v7477_v22  ;;  %v8485_v15 = vadd.f32 %v8406_v34, %v8081_v39  ;;  %v8097_v53 = vadd.f32 %v8096_v24, %v14566_v47  ;;  %v7483_v11 = vld [vmem:[#allocation3 + $0xc0] sm:$0xff] }
 0x442   : > { %v11842_v37 = vpop.f32.mrf.mxu0  ;;  %v11812_v9 = vpop.f32.mrf.mxu1 }
 0x443   : > { %8551 = vst.msk [vmem:[#allocation3 + $0x90] sm:$0xff] %vm1655_vm4, %v8519_v10  ;;  %v8517_v14 = vadd.f32 %v8485_v15, %v7475_v7  ;;  %v8488_v44 = vadd.f32 %v11842_v37, %v8092_v48  ;;  %v8108_v55 = vadd.f32 %v11812_v9, %v14572_v4  ;;  %v7486_v48 = vld [vmem:[#allocation3 + $0xd8] sm:$0xff]  ;;  %v7484_v37 = vld [vmem:[#allocation3 + $0xc8] sm:$0xff] }
 0x444   : > { %v8409_v45 = vpop.f32.mrf.mxu0  ;;  %v8099_v40 = vpop.f32.mrf.mxu1 }
 0x445   : > { %8549 = vst.msk [vmem:[#allocation3 + $0x80] sm:$0xff] %vm1655_vm4, %v8517_v14  ;;  %v8520_v20 = vadd.f32 %v8488_v44, %v7478_v29  ;;  %v8486_v19 = vadd.f32 %v8409_v45, %v8084_v62  ;;  %v8100_v42 = vadd.f32 %v8099_v40, %v14575_v21  ;;  %v7489_v29 = vld [vmem:[#allocation3 + $0xf0] sm:$0xff]  ;;  %v7487_v40 = vld [vmem:[#allocation3 + $0xe0] sm:$0xff] }
 0x446   : > { %v11845_v30 = vpop.f32.mrf.mxu0  ;;  %v11815_v31 = vpop.f32.mrf.mxu1 }
 0x447   : > { %8552 = vst.msk [vmem:[#allocation3 + $0x98] sm:$0xff] %vm1655_vm4, %v8520_v20  ;;  %v8518_v25 = vadd.f32 %v8486_v19, %v7476_v28  ;;  %v8491_v54 = vadd.f32 %v11845_v30, %v8105_v1  ;;  %v8121_v52 = vadd.f32 %v11815_v31, %v14578_v36 }
 0x448   : > { %v8422_v33 = vpop.f32.mrf.mxu0  ;;  %v8112_v27 = vpop.f32.mrf.mxu1 }
 0x449   : > { %8550 = vst.msk [vmem:[#allocation3 + $0x88] sm:$0xff] %vm1655_vm4, %v8518_v25  ;;  %v8523_v0 = vadd.f32 %v8491_v54, %v7481_v56  ;;  %v8489_v2 = vadd.f32 %v8422_v33, %v8097_v53  ;;  %v8113_v57 = vadd.f32 %v8112_v27, %v14583_v41  ;;  %v7490_v54 = vld [vmem:[#allocation3 + $0xf8] sm:$0xff] }
 0x44a   : > { %v11846_v12 = vpop.f32.mrf.mxu0  ;;  %v11816_v38 = vpop.f32.mrf.mxu1 }
 0x44b   : > { %8555 = vst.msk [vmem:[#allocation3 + $0xb0] sm:$0xff] %vm1655_vm4, %v8523_v0  ;;  %v8521_v47 = vadd.f32 %v8489_v2, %v7479_v58  ;;  %v8492_v49 = vadd.f32 %v11846_v12, %v8108_v55  ;;  %v8124_v46 = vadd.f32 %v11816_v38, %v14587_v23  ;;  %v7488_v55 = vld [vmem:[#allocation3 + $0xe8] sm:$0xff] }
 0x44c   : > { %v8425_v50 = vpop.f32.mrf.mxu0  ;;  %v8115_v60 = vpop.f32.mrf.mxu1 }
 0x44d   : > { %8553 = vst.msk [vmem:[#allocation3 + $0xa0] sm:$0xff] %vm1655_vm4, %v8521_v47  ;;  %v8524_v4 = vadd.f32 %v8492_v49, %v7482_v8  ;;  %v8490_v3 = vadd.f32 %v8425_v50, %v8100_v42  ;;  %v8116_v17 = vadd.f32 %v8115_v60, %v14592_v6 }
 0x44e   : > { %v11849_v43 = vpop.f32.mrf.mxu0  ;;  %v11819_v26 = vpop.f32.mrf.mxu1 }
 0x44f   : > { %8556 = vst.msk [vmem:[#allocation3 + $0xb8] sm:$0xff] %vm1655_vm4, %v8524_v4  ;;  %v8522_v21 = vadd.f32 %v8490_v3, %v7480_v5  ;;  %v8495_v13 = vadd.f32 %v11849_v43, %v8121_v52  ;;  %v8137_v15 = vadd.f32 %v11819_v26, %v14597_v61 }
 0x450   : > { %v8438_v63 = vpop.f32.mrf.mxu0  ;;  %v8128_v39 = vpop.f32.mrf.mxu1 }
 0x451   : > { %8554 = vst.msk [vmem:[#allocation3 + $0xa8] sm:$0xff] %vm1655_vm4, %v8522_v21  ;;  %v8527_v36 = vadd.f32 %v8495_v13, %v7485_v32  ;;  %v8493_v35 = vadd.f32 %v8438_v63, %v8113_v57  ;;  %v8129_v14 = vadd.f32 %v8128_v39, %v14600_v59 }
 0x452   : > { %v11850_v16 = vpop.f32.mrf.mxu0  ;;  %v11820_v34 = vpop.f32.mrf.mxu1 }
 0x453   : > { %8559 = vst.msk [vmem:[#allocation3 + $0xd0] sm:$0xff] %vm1655_vm4, %v8527_v36  ;;  %v8525_v41 = vadd.f32 %v8493_v35, %v7483_v11  ;;  %v8496_v22 = vadd.f32 %v11850_v16, %v8124_v46  ;;  %v8140_v1 = vadd.f32 %v11820_v34, %v14603_v18 }
 0x454   : > { %v8441_v10 = vpop.f32.mrf.mxu0  ;;  %v8131_v7 = vpop.f32.mrf.mxu1 }
 0x455   : > { %8557 = vst.msk [vmem:[#allocation3 + $0xc0] sm:$0xff] %vm1655_vm4, %v8525_v41  ;;  %v8528_v23 = vadd.f32 %v8496_v22, %v7486_v48  ;;  %v8494_v24 = vadd.f32 %v8441_v10, %v8116_v17  ;;  %v8132_v59 = vadd.f32 %v8131_v7, %v14605_v51 }
 0x456   : > { %v11853_v62 = vpop.f32.mrf.mxu0  ;;  %v14664_v9 = vpop.f32.mrf.mxu1 }
 0x457   : > { %8560 = vst.msk [vmem:[#allocation3 + $0xd8] sm:$0xff] %vm1655_vm4, %v8528_v23  ;;  %v8526_v6 = vadd.f32 %v8494_v24, %v7484_v37  ;;  %v8499_v44 = vadd.f32 %v11853_v62, %v8137_v15 }
 0x458   : > { %v8454_v45 = vpop.f32.mrf.mxu0  ;;  %v14668_v19 = vpop.f32.mrf.mxu1 }
 0x459   : > { %8558 = vst.msk [vmem:[#allocation3 + $0xc8] sm:$0xff] %vm1655_vm4, %v8526_v6  ;;  %v8531_v61 = vadd.f32 %v8499_v44, %v7489_v29  ;;  %v8497_v20 = vadd.f32 %v8454_v45, %v8129_v14 }
 0x45a   : > { %v11854_v28 = vpop.f32.mrf.mxu0  ;;  %v11860_v25 = vpop.f32.mrf.mxu1 }
 0x45b   : > { %8563 = vst.msk [vmem:[#allocation3 + $0xf0] sm:$0xff] %vm1655_vm4, %v8531_v61  ;;  %v8529_v30 = vadd.f32 %v8497_v20, %v7487_v40  ;;  %v8500_v53 = vadd.f32 %v11854_v28, %v8140_v1 }
 0x45c   : > { %v8457_v31 = vpop.f32.mrf.mxu0  ;;  %v8833_v33 = vpop.f32.mrf.mxu1 }
 0x45d   : > { %8561 = vst.msk [vmem:[#allocation3 + $0xe0] sm:$0xff] %vm1655_vm4, %v8529_v30  ;;  %v8532_v18 = vadd.f32 %v8500_v53, %v7490_v54  ;;  %v8498_v56 = vadd.f32 %v8457_v31, %v8132_v59  ;;  %v8565_v54 = vld [vmem:[#allocation3] sm:$0xff] }
 0x45e   : > { %v11893_v0 = vpop.f32.mrf.mxu0  ;;  %v14674_v27 = vpop.f32.mrf.mxu1 }
 0x45f   : > { %8564 = vst.msk [vmem:[#allocation3 + $0xf8] sm:$0xff] %vm1655_vm4, %v8532_v18  ;;  %v8530_v2 = vadd.f32 %v8498_v56, %v7488_v55  ;;  %v9131_v61 = vadd.f32 %v11893_v0, %v14664_v9 }
 0x460   : > { %v9122_v51 = vpop.f32.mrf.mxu0  ;;  %v8846_v58 = vpop.f32.mrf.mxu1 }
 0x461   : > { %8562 = vst.msk [vmem:[#allocation3 + $0xe8] sm:$0xff] %vm1655_vm4, %v8530_v2  ;;  %v9123_v1 = vadd.f32 %v9122_v51, %v14668_v19 }
 0x462   : > { %v11894_v12 = vpop.f32.mrf.mxu0  ;;  %v14677_v42 = vpop.f32.mrf.mxu1 }
 0x463   : > { %v9134_v59 = vadd.f32 %v11894_v12, %v11860_v25  ;;  %v8566_v25 = vld [vmem:[#allocation3 + $0x8] sm:$0xff] }
 0x464   : > { %v9125_v47 = vpop.f32.mrf.mxu0  ;;  %v14679_v49 = vpop.f32.mrf.mxu1 }
 0x465   : > { %v9126_v31 = vadd.f32 %v9125_v47, %v8833_v33 }
 0x466   : > { %v11897_v38 = vpop.f32.mrf.mxu0  ;;  %v14681_v8 = vpop.f32.mrf.mxu1 }
 0x467   : > { %v9147_v0 = vadd.f32 %v11897_v38, %v14674_v27 }
 0x468   : > { %v14683_v50 = vpop.f32.mrf.mxu1  ;;  %v9138_v52 = vpop.f32.mrf.mxu0 }
 0x469   : > { %v9139_v51 = vadd.f32 %v9138_v52, %v8846_v58 }
 0x46a   : > { %v14685_v4 = vpop.f32.mrf.mxu1  ;;  %v11898_v60 = vpop.f32.mrf.mxu0 }
 0x46c   : > { %v14687_v3 = vpop.f32.mrf.mxu1  ;;  %v14693_v57 = vpop.f32.mrf.mxu0 }
 0x46e   : > { %v14689_v5 = vpop.f32.mrf.mxu1  ;;  %v14699_v26 = vpop.f32.mrf.mxu0 }
 0x470   : > { %v14691_v43 = vpop.f32.mrf.mxu1  ;;  %v14705_v46 = vpop.f32.mrf.mxu0 }
 0x472   : > { %v14695_v21 = vpop.f32.mrf.mxu1  ;;  %v14711_v39 = vpop.f32.mrf.mxu0 }
 0x474   : > { %v14697_v13 = vpop.f32.mrf.mxu1  ;;  %v14717_v17 = vpop.f32.mrf.mxu0 }
 0x476   : > { %v14701_v32 = vpop.f32.mrf.mxu1  ;;  %v14723_v34 = vpop.f32.mrf.mxu0 }
 0x478   : > { %v14703_v63 = vpop.f32.mrf.mxu1  ;;  %v14729_v15 = vpop.f32.mrf.mxu0 }
 0x47a   : > { %v14707_v36 = vpop.f32.mrf.mxu1  ;;  %v14733_v24 = vpop.f32.mrf.mxu0 }
 0x47c   : > { %v14709_v35 = vpop.f32.mrf.mxu1  ;;  %v14739_v62 = vpop.f32.mrf.mxu0 }
 0x47e   : > { %v14713_v11 = vpop.f32.mrf.mxu1  ;;  %v14745_v44 = vpop.f32.mrf.mxu0 }
 0x480   : > { %v14715_v16 = vpop.f32.mrf.mxu1  ;;  %v14751_v20 = vpop.f32.mrf.mxu0 }
 0x482   : > { %v14719_v41 = vpop.f32.mrf.mxu1  ;;  %v14753_v18 = vpop.f32.mrf.mxu0 }
 0x484   : > { %v14721_v22 = vpop.f32.mrf.mxu1  ;;  %v14760_v12 = vpop.f32.mrf.mxu0 }
 0x486   : > { %v14725_v48 = vpop.f32.mrf.mxu1 }
 0x488   : > { %v14727_v10 = vpop.f32.mrf.mxu1 }
 0x48a   : > { %v14731_v23 = vpop.f32.mrf.mxu1 }
 0x48c   : > { %v14735_v7 = vpop.f32.mrf.mxu1 }
 0x48e   : > { %v14737_v37 = vpop.f32.mrf.mxu1 }
 0x490   : > { %v14741_v14 = vpop.f32.mrf.mxu1 }
 0x492   : > { %v14743_v6 = vpop.f32.mrf.mxu1 }
 0x493   : > { %15483 = vst [vmem:[#allocation12_spill] sm:$0xff] %v14743_v6 }
 0x494   : > { %v14747_v29 = vpop.f32.mrf.mxu1 }
 0x495   : > { %15484 = vst [vmem:[#allocation4_spill] sm:$0xff] %v14747_v29  ;;  %v8567_v29 = vld [vmem:[#allocation3 + $0x10] sm:$0xff] }
 0x496   : > { %v11927_v45 = vpop.f32.mrf.mxu1 }
 0x497   : > { %v9577_v30 = vadd.f32 %v11927_v45, %v9131_v61 }
 0x498   : > { %v9448_v40 = vpop.f32.mrf.mxu1 }
 0x499   : > { %v9575_v28 = vadd.f32 %v9448_v40, %v9123_v1  ;;  %v14757_v6 = vadd.f32 %v9577_v30, %v8567_v29  ;;  %v8568_v1 = vld [vmem:[#allocation3 + $0x18] sm:$0xff]  ;;  %v9150_v29 = vadd.f32 %v11898_v60, %v14677_v42 }
 0x49a   : > { %v11928_v53 = vpop.f32.mrf.mxu1 }
 0x49b   : > { %v14755_v56 = vadd.f32 %v9575_v28, %v8565_v54  ;;  %v9578_v55 = vadd.f32 %v11928_v53, %v9134_v59  ;;  %v9711_v27 = vmul.f32 %v14757_v6, %v14757_v6  ;;  %v8569_v59 = vld [vmem:[#allocation3 + $0x20] sm:$0xff]  ;;  %v9142_v53 = vadd.f32 %v14693_v57, %v14679_v49 }
 0x49c   : > { %v9451_v2 = vpop.f32.mrf.mxu1  ;;  %v9642_v42 = vsel %vm1655_vm4, %v14757_v6, 0.0  ;;  %v9163_v49 = vadd.f32 %v14699_v26, %v14681_v8  ;;  %v9166_v8 = vadd.f32 %v14711_v39, %v14685_v4 }
 0x49d   : > { %v9576_v19 = vadd.f32 %v9451_v2, %v9126_v31  ;;  %v9709_v33 = vmul.f32 %v14755_v56, %v14755_v56  ;;  %v14764_v47 = vadd.f32 %v9578_v55, %v8568_v1  ;;  %v9639_v58 = vsel %vm1655_vm4, %v14755_v56, 0.0  ;;  %v14783_v31 = vpop.f32.mrf.mxu0 }
 0x49e   : > { %v11931_v9 = vpop.f32.mrf.mxu1 }
 0x49f   : > { %v14766_v45 = vadd.f32 %v9576_v19, %v8566_v25  ;;  %v9581_v40 = vadd.f32 %v11931_v9, %v9147_v0  ;;  %v9741_v55 = vsel %vm1655_vm4, %v9709_v33, 0.0  ;;  %v9712_v2 = vmul.f32 %v14764_v47, %v14764_v47  ;;  %v8571_v9 = vld [vmem:[#allocation3 + $0x30] sm:$0xff] }
 0x4a0   : > { %v9464_v61 = vpop.f32.mrf.mxu1  ;;  %v9644_v33 = vsel %vm1655_vm4, %v14764_v47, 0.0 }
 0x4a1   : > { %v9579_v28 = vadd.f32 %v9464_v61, %v9139_v51  ;;  %v9640_v38 = vsel %vm1655_vm4, %v14766_v45, 0.0  ;;  %v9710_v52 = vmul.f32 %v14766_v45, %v14766_v45  ;;  %v14791_v25 = vadd.f32 %v9581_v40, %v8571_v9  ;;  %v8572_v40 = vld [vmem:[#allocation3 + $0x38] sm:$0xff] }
 0x4a2   : > { %v11932_v30 = vpop.f32.mrf.mxu1  ;;  %v9641_v60 = vadd.f32 %v9640_v38, %v9639_v58  ;;  %v9744_v61 = vsel %vm1655_vm4, %v9711_v27, 0.0  ;;  %v9746_v27 = vsel %vm1655_vm4, %v9712_v2, 0.0 }
 0x4a3   : > { %v14781_v54 = vadd.f32 %v9579_v28, %v8569_v59  ;;  %v9742_v19 = vsel %vm1655_vm4, %v9710_v52, 0.0  ;;  %v9582_v0 = vadd.f32 %v11932_v30, %v9150_v29  ;;  %v9155_v29 = vadd.f32 %v14705_v46, %v14683_v50  ;;  %v8570_v59 = vld [vmem:[#allocation3 + $0x28] sm:$0xff]  ;;  %v14802_v30 = vpop.f32.mrf.mxu0 }
 0x4a4   : > { %v9467_v51 = vpop.f32.mrf.mxu1  ;;  %v9643_v57 = vadd.f32 %v9642_v42, %v9641_v60  ;;  %v9743_v1 = vadd.f32 %v9742_v19, %v9741_v55  ;;  %v9715_v50 = vmul.f32 %v14791_v25, %v14791_v25 }
 0x4a5   : > { %v9713_v28 = vmul.f32 %v14781_v54, %v14781_v54  ;;  %v9580_v58 = vadd.f32 %v9467_v51, %v9142_v53  ;;  %v9646_v42 = vsel %vm1655_vm4, %v14781_v54, 0.0  ;;  %v14807_v60 = vadd.f32 %v9582_v0, %v8572_v40 }
 0x4a6   : > { %v11935_v38 = vpop.f32.mrf.mxu1  ;;  %v9745_v26 = vadd.f32 %v9744_v61, %v9743_v1  ;;  %v9645_v52 = vadd.f32 %v9644_v33, %v9643_v57  ;;  %v9158_v57 = vadd.f32 %v14717_v17, %v14687_v3  ;;  %v9650_v1 = vsel %vm1655_vm4, %v14791_v25, 0.0 }
 0x4a7   : > { %v14809_v53 = vadd.f32 %v9580_v58, %v8570_v59  ;;  %v9748_v19 = vsel %vm1655_vm4, %v9713_v28, 0.0  ;;  %v9585_v51 = vadd.f32 %v11935_v38, %v9163_v49  ;;  %v8573_v58 = vld [vmem:[#allocation3 + $0x40] sm:$0xff]  ;;  %v9716_v28 = vmul.f32 %v14807_v60, %v14807_v60  ;;  %v8575_v59 = vld [vmem:[#allocation3 + $0x50] sm:$0xff] }
 0x4a8   : > { %v9480_v55 = vpop.f32.mrf.mxu1  ;;  %v9647_v4 = vadd.f32 %v9646_v42, %v9645_v52  ;;  %v9747_v46 = vadd.f32 %v9746_v27, %v9745_v26  ;;  %v9179_v3 = vadd.f32 %v14723_v34, %v14689_v5  ;;  %v9752_v42 = vsel %vm1655_vm4, %v9715_v50, 0.0 }
 0x4a9   : > { %v9583_v39 = vadd.f32 %v9480_v55, %v9155_v29  ;;  %v9648_v9 = vsel %vm1655_vm4, %v14809_v53, 0.0  ;;  %v9714_v2 = vmul.f32 %v14809_v53, %v14809_v53  ;;  %v14822_v29 = vpop.f32.mrf.mxu0  ;;  %v9652_v55 = vsel %vm1655_vm4, %v14807_v60, 0.0 }
 0x4aa   : > { %v11936_v0 = vpop.f32.mrf.mxu1  ;;  %v9749_v61 = vadd.f32 %v9748_v19, %v9747_v46  ;;  %v9649_v33 = vadd.f32 %v9648_v9, %v9647_v4  ;;  %v14834_v4 = vadd.f32 %v9585_v51, %v8575_v59  ;;  %v9171_v19 = vadd.f32 %v14729_v15, %v14691_v43  ;;  %v8576_v9 = vld [vmem:[#allocation3 + $0x58] sm:$0xff] }
 0x4ab   : > { %v9750_v26 = vsel %vm1655_vm4, %v9714_v2, 0.0  ;;  %v14827_v52 = vadd.f32 %v9583_v39, %v8573_v58  ;;  %v9586_v49 = vadd.f32 %v11936_v0, %v9166_v8  ;;  %v8574_v39 = vld [vmem:[#allocation3 + $0x48] sm:$0xff]  ;;  %v9182_v50 = vadd.f32 %v14733_v24, %v14695_v21  ;;  %v14844_v0 = vpop.f32.mrf.mxu0 }
 0x4ac   : > { %v9483_v38 = vpop.f32.mrf.mxu1  ;;  %v9651_v17 = vadd.f32 %v9650_v1, %v9649_v33  ;;  %v9751_v40 = vadd.f32 %v9750_v26, %v9749_v61  ;;  %v9754_v51 = vsel %vm1655_vm4, %v9716_v28, 0.0  ;;  %v9719_v21 = vmul.f32 %v14834_v4, %v14834_v4 }
 0x4ad   : > { %v9584_v27 = vadd.f32 %v9483_v38, %v9158_v57  ;;  %v9717_v46 = vmul.f32 %v14827_v52, %v14827_v52  ;;  %v9654_v57 = vsel %vm1655_vm4, %v14827_v52, 0.0  ;;  %v14849_v1 = vadd.f32 %v9586_v49, %v8576_v9 }
 0x4ae   : > { %v11939_v8 = vpop.f32.mrf.mxu1  ;;  %v9753_v5 = vadd.f32 %v9752_v42, %v9751_v40  ;;  %v9653_v34 = vadd.f32 %v9652_v55, %v9651_v17  ;;  %v9174_v49 = vadd.f32 %v14739_v62, %v14697_v13  ;;  %v14861_v42 = vpop.f32.mrf.mxu0  ;;  %v9658_v55 = vsel %vm1655_vm4, %v14834_v4, 0.0 }
 0x4af   : > { %v14840_v2 = vadd.f32 %v9584_v27, %v8574_v39  ;;  %v9756_v24 = vsel %vm1655_vm4, %v9717_v46, 0.0  ;;  %v9589_v28 = vadd.f32 %v11939_v8, %v9179_v3  ;;  %v8577_v27 = vld [vmem:[#allocation3 + $0x60] sm:$0xff]  ;;  %v9720_v39 = vmul.f32 %v14849_v1, %v14849_v1 }
 0x4b0   : > { %v9496_v61 = vpop.f32.mrf.mxu1  ;;  %v9655_v33 = vadd.f32 %v9654_v57, %v9653_v34  ;;  %v9755_v43 = vadd.f32 %v9754_v51, %v9753_v5  ;;  %v9195_v13 = vadd.f32 %v14745_v44, %v14701_v32  ;;  %v8579_v5 = vld [vmem:[#allocation3 + $0x70] sm:$0xff]  ;;  %v9760_v9 = vsel %vm1655_vm4, %v9719_v21, 0.0  ;;  %v14882_v21 = vpop.f32.mrf.mxu0 }
 0x4b1   : > { %v9656_v15 = vsel %vm1655_vm4, %v14840_v2, 0.0  ;;  %v9718_v58 = vmul.f32 %v14840_v2, %v14840_v2  ;;  %v9587_v26 = vadd.f32 %v9496_v61, %v9171_v19  ;;  %v9660_v51 = vsel %vm1655_vm4, %v14849_v1, 0.0 }
 0x4b2   : > { %v11940_v38 = vpop.f32.mrf.mxu1  ;;  %v9757_v17 = vadd.f32 %v9756_v24, %v9755_v43  ;;  %v9657_v40 = vadd.f32 %v9656_v15, %v9655_v33  ;;  %v14874_v57 = vadd.f32 %v9589_v28, %v8579_v5  ;;  %v9198_v32 = vadd.f32 %v14753_v18, %v14707_v36  ;;  %v8580_v15 = vld [vmem:[#allocation3 + $0x78] sm:$0xff] }
 0x4b3   : > { %v9758_v59 = vsel %vm1655_vm4, %v9718_v58, 0.0  ;;  %v14867_v46 = vadd.f32 %v9587_v26, %v8577_v27  ;;  %v9590_v3 = vadd.f32 %v11940_v38, %v9182_v50  ;;  %v9187_v50 = vadd.f32 %v14751_v20, %v14703_v63  ;;  %v8578_v58 = vld [vmem:[#allocation3 + $0x68] sm:$0xff] }
 0x4b4   : > { %v9499_v8 = vpop.f32.mrf.mxu1  ;;  %v9659_v62 = vadd.f32 %v9658_v55, %v9657_v40  ;;  %v9759_v19 = vadd.f32 %v9758_v59, %v9757_v17  ;;  %v9762_v24 = vsel %vm1655_vm4, %v9720_v39, 0.0  ;;  %v9723_v18 = vmul.f32 %v14874_v57, %v14874_v57  ;;  %v8581_v55 = vld [vmem:[#allocation3 + $0x80] sm:$0xff] }
 0x4b5   : > { %v9588_v34 = vadd.f32 %v9499_v8, %v9174_v49  ;;  %v9721_v61 = vmul.f32 %v14867_v46, %v14867_v46  ;;  %v9662_v28 = vsel %vm1655_vm4, %v14867_v46, 0.0  ;;  %v14887_v26 = vadd.f32 %v9590_v3, %v8580_v15 }
 0x4b6   : > { %v11943_v33 = vpop.f32.mrf.mxu1  ;;  %v9761_v44 = vadd.f32 %v9760_v9, %v9759_v19  ;;  %v9661_v43 = vadd.f32 %v9660_v51, %v9659_v62  ;;  %v9190_v3 = vadd.f32 %v14760_v12, %v14709_v35  ;;  %v14902_v19 = vpop.f32.mrf.mxu0  ;;  %v9666_v5 = vsel %vm1655_vm4, %v14874_v57, 0.0  ;;  %v8583_v51 = vld [vmem:[#allocation3 + $0x90] sm:$0xff] }
 0x4b7   : > { %v14889_v38 = vadd.f32 %v9588_v34, %v8578_v58  ;;  %v9593_v17 = vadd.f32 %v11943_v33, %v9195_v13  ;;  %v9764_v40 = vsel %vm1655_vm4, %v9721_v61, 0.0  ;;  %v9724_v34 = vmul.f32 %v14887_v26, %v14887_v26 }
 0x4b8   : > { %v9512_v49 = vpop.f32.mrf.mxu1  ;;  %v9663_v63 = vadd.f32 %v9662_v28, %v9661_v43  ;;  %v9763_v20 = vadd.f32 %v9762_v24, %v9761_v44  ;;  %v9211_v35 = vadd.f32 %v14783_v31, %v14713_v11  ;;  %v9768_v43 = vsel %vm1655_vm4, %v9723_v18, 0.0 }
 0x4b9   : > { %v9591_v36 = vadd.f32 %v9512_v49, %v9187_v50  ;;  %v9664_v59 = vsel %vm1655_vm4, %v14889_v38, 0.0  ;;  %v9722_v27 = vmul.f32 %v14889_v38, %v14889_v38  ;;  %v14911_v44 = vadd.f32 %v9593_v17, %v8583_v51  ;;  %v9221_v17 = vpop.f32.mrf.mxu0 }
 0x4ba   : > { %v11944_v39 = vpop.f32.mrf.mxu1  ;;  %v9765_v8 = vadd.f32 %v9764_v40, %v9763_v20  ;;  %v9665_v62 = vadd.f32 %v9664_v59, %v9663_v63  ;;  %v9668_v15 = vsel %vm1655_vm4, %v14887_v26, 0.0  ;;  %v9214_v11 = vadd.f32 %v14822_v29, %v14719_v41  ;;  %v8584_v63 = vld [vmem:[#allocation3 + $0x98] sm:$0xff]  ;;  %v8582_v20 = vld [vmem:[#allocation3 + $0x88] sm:$0xff] }
 0x4bb   : > { %v14900_v13 = vadd.f32 %v9591_v36, %v8581_v55  ;;  %v9766_v9 = vsel %vm1655_vm4, %v9722_v27, 0.0  ;;  %v9594_v61 = vadd.f32 %v11944_v39, %v9198_v32  ;;  %v9203_v32 = vadd.f32 %v14802_v30, %v14715_v16 }
 0x4bc   : > { %v9515_v33 = vpop.f32.mrf.mxu1  ;;  %v9667_v12 = vadd.f32 %v9666_v5, %v9665_v62  ;;  %v9767_v50 = vadd.f32 %v9766_v9, %v9765_v8  ;;  %v9770_v36 = vsel %vm1655_vm4, %v9724_v34, 0.0  ;;  %v9727_v16 = vmul.f32 %v14911_v44, %v14911_v44 }
 0x4bd   : > { %v9725_v58 = vmul.f32 %v14900_v13, %v14900_v13  ;;  %v9592_v24 = vadd.f32 %v9515_v33, %v9190_v3  ;;  %v9670_v18 = vsel %vm1655_vm4, %v14900_v13, 0.0  ;;  %v14925_v40 = vadd.f32 %v9594_v61, %v8584_v63  ;;  %v8585_v61 = vld [vmem:[#allocation3 + $0xa0] sm:$0xff]  ;;  %v11921_v33 = vpop.f32.mrf.mxu0 }
 0x4be   : > { %v11947_v28 = vpop.f32.mrf.mxu1  ;;  %v9769_v31 = vadd.f32 %v9768_v43, %v9767_v50  ;;  %v9669_v49 = vadd.f32 %v9668_v15, %v9667_v12  ;;  %v9206_v5 = vadd.f32 %v14844_v0, %v14721_v22  ;;  %v9674_v34 = vsel %vm1655_vm4, %v14911_v44, 0.0 }
 0x4bf   : > { %v14927_v59 = vadd.f32 %v9592_v24, %v8582_v20  ;;  %v9772_v55 = vsel %vm1655_vm4, %v9725_v58, 0.0  ;;  %v9597_v8 = vadd.f32 %v11947_v28, %v9211_v35  ;;  %v9728_v12 = vmul.f32 %v14925_v40, %v14925_v40  ;;  %v8587_v24 = vld [vmem:[#allocation3 + $0xb0] sm:$0xff]  ;;  %v8586_v20 = vld [vmem:[#allocation3 + $0xa8] sm:$0xff] }
 0x4c0   : > { %v9528_v27 = vpop.f32.mrf.mxu1  ;;  %v9671_v30 = vadd.f32 %v9670_v18, %v9669_v49  ;;  %v9771_v41 = vadd.f32 %v9770_v36, %v9769_v31  ;;  %v9227_v58 = vadd.f32 %v14861_v42, %v14725_v48  ;;  %v9676_v31 = vsel %vm1655_vm4, %v14925_v40, 0.0  ;;  %v8588_v18 = vld [vmem:[#allocation3 + $0xb8] sm:$0xff] }
 0x4c1   : > { %v9595_v29 = vadd.f32 %v9528_v27, %v9203_v32  ;;  %v9672_v39 = vsel %vm1655_vm4, %v14927_v59, 0.0  ;;  %v9726_v3 = vmul.f32 %v14927_v59, %v14927_v59  ;;  %v9776_v32 = vsel %vm1655_vm4, %v9727_v16, 0.0 }
 0x4c2   : > { %v11948_v62 = vpop.f32.mrf.mxu1  ;;  %v9773_v9 = vadd.f32 %v9772_v55, %v9771_v41  ;;  %v9673_v51 = vadd.f32 %v9672_v39, %v9671_v30  ;;  %v14950_v49 = vadd.f32 %v9597_v8, %v8587_v24  ;;  %v9219_v36 = vadd.f32 %v14882_v21, %v14727_v10  ;;  %v9234_v30 = vpop.f32.mrf.mxu0 }
 0x4c3   : > { %v9774_v50 = vsel %vm1655_vm4, %v9726_v3, 0.0  ;;  %v14943_v43 = vadd.f32 %v9595_v29, %v8585_v61  ;;  %v9598_v15 = vadd.f32 %v11948_v62, %v9214_v11  ;;  %v9778_v16 = vsel %vm1655_vm4, %v9728_v12, 0.0 }
 0x4c4   : > { %v9531_v35 = vpop.f32.mrf.mxu1  ;;  %v9675_v22 = vadd.f32 %v9674_v34, %v9673_v51  ;;  %v9775_v0 = vadd.f32 %v9774_v50, %v9773_v9  ;;  %v9230_v62 = vadd.f32 %v14902_v19, %v14731_v23  ;;  %v9222_v61 = vadd.f32 %v9221_v17, %v14735_v7  ;;  %v8591_v19 = vld [vmem:[#allocation3 + $0xd0] sm:$0xff] }
 0x4c5   : > { %v9596_v28 = vadd.f32 %v9531_v35, %v9206_v5  ;;  %v9729_v63 = vmul.f32 %v14943_v43, %v14943_v43  ;;  %v9678_v41 = vsel %vm1655_vm4, %v14943_v43, 0.0  ;;  %v14961_v29 = vadd.f32 %v9598_v15, %v8588_v18  ;;  %v8589_v35 = vld [vmem:[#allocation3 + $0xc0] sm:$0xff] }
 0x4c6   : > { %v11951_v11 = vpop.f32.mrf.mxu1  ;;  %v9777_v48 = vadd.f32 %v9776_v32, %v9775_v0  ;;  %v9677_v42 = vadd.f32 %v9676_v31, %v9675_v22  ;;  %v9731_v5 = vmul.f32 %v14950_v49, %v14950_v49  ;;  %v9682_v22 = vsel %vm1655_vm4, %v14950_v49, 0.0  ;;  %v15485_v18 = vld [vmem:[#allocation12_spill] sm:$0xff] }
 0x4c7   : > { %v14956_v27 = vadd.f32 %v9596_v28, %v8586_v20  ;;  %v9601_v55 = vadd.f32 %v11951_v11, %v9227_v58  ;;  %v9780_v34 = vsel %vm1655_vm4, %v9729_v63, 0.0  ;;  %v11922_v58 = vpop.f32.mrf.mxu0  ;;  %v9732_v23 = vmul.f32 %v14961_v29, %v14961_v29 }
 0x4c8   : > { %v9544_v39 = vpop.f32.mrf.mxu1  ;;  %v9679_v3 = vadd.f32 %v9678_v41, %v9677_v42  ;;  %v9779_v8 = vadd.f32 %v9778_v16, %v9777_v48  ;;  %v9243_v63 = vadd.f32 %v11921_v33, %v14737_v37  ;;  %v9784_v20 = vsel %vm1655_vm4, %v9731_v5, 0.0 }
 0x4c9   : > { %v9680_v10 = vsel %vm1655_vm4, %v14956_v27, 0.0  ;;  %v9730_v21 = vmul.f32 %v14956_v27, %v14956_v27  ;;  %v9599_v9 = vadd.f32 %v9544_v39, %v9219_v36  ;;  %v14980_v7 = vadd.f32 %v9601_v55, %v8591_v19  ;;  %v8592_v55 = vld [vmem:[#allocation3 + $0xd8] sm:$0xff] }
 0x4ca   : > { %v11952_v51 = vpop.f32.mrf.mxu1  ;;  %v9781_v12 = vadd.f32 %v9780_v34, %v9779_v8  ;;  %v9681_v50 = vadd.f32 %v9680_v10, %v9679_v3  ;;  %v9684_v11 = vsel %vm1655_vm4, %v14961_v29, 0.0  ;;  %v9235_v42 = vadd.f32 %v9234_v30, %v14741_v14  ;;  %v8590_v3 = vld [vmem:[#allocation3 + $0xc8] sm:$0xff]  ;;  %v9237_v8 = vpop.f32.mrf.mxu0 }
 0x4cb   : > { %v9782_v15 = vsel %vm1655_vm4, %v9730_v21, 0.0  ;;  %v14978_v0 = vadd.f32 %v9599_v9, %v8589_v35  ;;  %v9602_v24 = vadd.f32 %v11952_v51, %v9230_v62  ;;  %v9246_v16 = vadd.f32 %v11922_v58, %v15485_v18  ;;  %v15486_v35 = vld [vmem:[#allocation4_spill] sm:$0xff] }
 0x4cc   : > { %v9547_v28 = vpop.f32.mrf.mxu1  ;;  %v9683_v32 = vadd.f32 %v9682_v22, %v9681_v50  ;;  %v9783_v31 = vadd.f32 %v9782_v15, %v9781_v12  ;;  %v9786_v37 = vsel %vm1655_vm4, %v9732_v23, 0.0  ;;  %v9735_v14 = vmul.f32 %v14980_v7, %v14980_v7  ;;  %v8593_v50 = vld [vmem:[#allocation3 + $0xe0] sm:$0xff] }
 0x4cd   : > { %v9600_v17 = vadd.f32 %v9547_v28, %v9222_v61  ;;  %v9733_v36 = vmul.f32 %v14978_v0, %v14978_v0  ;;  %v9686_v33 = vsel %vm1655_vm4, %v14978_v0, 0.0  ;;  %v14993_v10 = vadd.f32 %v9602_v24, %v8592_v55 }
 0x4ce   : > { %v11955_v48 = vpop.f32.mrf.mxu1  ;;  %v9785_v41 = vadd.f32 %v9784_v20, %v9783_v31  ;;  %v9685_v39 = vadd.f32 %v9684_v11, %v9683_v32  ;;  %v9238_v58 = vadd.f32 %v9237_v8, %v15486_v35  ;;  %v9690_v24 = vsel %vm1655_vm4, %v14980_v7, 0.0  ;;  %v8594_v8 = vld [vmem:[#allocation3 + $0xe8] sm:$0xff] }
 0x4cf   : > { %v14995_v21 = vadd.f32 %v9600_v17, %v8590_v3  ;;  %v9788_v9 = vsel %vm1655_vm4, %v9733_v36, 0.0  ;;  %v9605_v12 = vadd.f32 %v11955_v48, %v9243_v63  ;;  %v9736_v28 = vmul.f32 %v14993_v10, %v14993_v10  ;;  %v8595_v36 = vld [vmem:[#allocation3 + $0xf0] sm:$0xff]  ;;  %v8596_v3 = vld [vmem:[#allocation3 + $0xf8] sm:$0xff] }
 0x4d0   : > { %v9560_v62 = vpop.f32.mrf.mxu1  ;;  %v9687_v30 = vadd.f32 %v9686_v33, %v9685_v39  ;;  %v9787_v5 = vadd.f32 %v9786_v37, %v9785_v41  ;;  %v9792_v63 = vsel %vm1655_vm4, %v9735_v14, 0.0  ;;  %v9692_v48 = vsel %vm1655_vm4, %v14993_v10, 0.0 }
 0x4d1   : > { %v9603_v34 = vadd.f32 %v9560_v62, %v9235_v42  ;;  %v9688_v51 = vsel %vm1655_vm4, %v14995_v21, 0.0  ;;  %v9734_v61 = vmul.f32 %v14995_v21, %v14995_v21  ;;  %v15015_v42 = vadd.f32 %v9605_v12, %v8595_v36 }
 0x4d2   : > { %v11956_v15 = vpop.f32.mrf.mxu1  ;;  %v9789_v22 = vadd.f32 %v9788_v9, %v9787_v5  ;;  %v9689_v23 = vadd.f32 %v9688_v51, %v9687_v30 }
 0x4d3   : > { %v15005_v19 = vadd.f32 %v9603_v34, %v8593_v50  ;;  %v9790_v32 = vsel %vm1655_vm4, %v9734_v61, 0.0  ;;  %v9606_v31 = vadd.f32 %v11956_v15, %v9246_v16  ;;  %v9794_v16 = vsel %vm1655_vm4, %v9736_v28, 0.0 }
 0x4d4   : > { %v9563_v17 = vpop.f32.mrf.mxu1  ;;  %v9691_v20 = vadd.f32 %v9690_v24, %v9689_v23  ;;  %v9791_v11 = vadd.f32 %v9790_v32, %v9789_v22  ;;  %v9739_v5 = vmul.f32 %v15015_v42, %v15015_v42  ;;  %v9698_v50 = vsel %vm1655_vm4, %v15015_v42, 0.0 }
 0x4d5   : > { %v9737_v18 = vmul.f32 %v15005_v19, %v15005_v19  ;;  %v9604_v41 = vadd.f32 %v9563_v17, %v9238_v58  ;;  %v9694_v37 = vsel %vm1655_vm4, %v15005_v19, 0.0  ;;  %v15022_v33 = vadd.f32 %v9606_v31, %v8596_v3 }
 0x4d6   : > { %v9793_v39 = vadd.f32 %v9792_v63, %v9791_v11  ;;  %v9693_v55 = vadd.f32 %v9692_v48, %v9691_v20  ;;  %v9800_v23 = vsel %vm1655_vm4, %v9739_v5, 0.0 }
 0x4d7   : > { %v15024_v62 = vadd.f32 %v9604_v41, %v8594_v8  ;;  %v9796_v34 = vsel %vm1655_vm4, %v9737_v18, 0.0  ;;  %v9740_v15 = vmul.f32 %v15022_v33, %v15022_v33  ;;  %v9700_v24 = vsel %vm1655_vm4, %v15022_v33, 0.0 }
 0x4d8   : > { %v9695_v14 = vadd.f32 %v9694_v37, %v9693_v55  ;;  %v9795_v30 = vadd.f32 %v9794_v16, %v9793_v39 }
 0x4d9   : > { %v9696_v9 = vsel %vm1655_vm4, %v15024_v62, 0.0  ;;  %v9738_v51 = vmul.f32 %v15024_v62, %v15024_v62  ;;  %v9802_v31 = vsel %vm1655_vm4, %v9740_v15, 0.0 }
 0x4da   : > { %v9797_v61 = vadd.f32 %v9796_v34, %v9795_v30  ;;  %v9697_v12 = vadd.f32 %v9696_v9, %v9695_v14 }
 0x4db   : > { %v9798_v35 = vsel %vm1655_vm4, %v9738_v51, 0.0 }
 0x4dc   : > { %v9699_v58 = vadd.f32 %v9698_v50, %v9697_v12  ;;  %v9799_v22 = vadd.f32 %v9798_v35, %v9797_v61 }
 0x4de   : > { %v9701_v28 = vadd.f32 %v9700_v24, %v9699_v58  ;;  %v9801_v32 = vadd.f32 %v9800_v23, %v9799_v22  ;;  %v15142_v22 = vld [vmem:[%s12336_s23 + $0x70] sm:$0xff]  }
 0x4df   : > { %15487 = vst [vmem:[#allocation5_spill] sm:$0xff] %v15142_v22 }
 0x4e0   : > { %v9702_v17 = vrot.slane %v9701_v28, 4  ;;  %v9803_v63 = vadd.f32 %v9802_v31, %v9801_v32  ;;  %v15125_v31 = vld [vmem:[%s12336_s23 + $0x58] sm:$0xff]  }
 0x4e2   : > { %v9703_v20 = vadd.f32 %v9702_v17, %v9701_v28  ;;  %v9804_v11 = vrot.slane %v9803_v63, 4  ;;  %v15132_v28 = vld [vmem:[%s12336_s23 + $0x60] sm:$0xff]  }
 0x4e4   : > { %v9704_v36 = vrot.slane %v9703_v20, 2  ;;  %v9805_v48 = vadd.f32 %v9804_v11, %v9803_v63  ;;  %v15115_v63 = vld [vmem:[%s12336_s23 + $0x48] sm:$0xff]  }
 0x4e6   : > { %v9705_v18 = vadd.f32 %v9704_v36, %v9703_v20  ;;  %v9806_v41 = vrot.slane %v9805_v48, 2  ;;  %v15081_v36 = vld [vmem:[%s12336_s23] sm:$0xff]   ;;  %v15145_v20 = vld [vmem:[%s12336_s23 + $0x78] sm:$0xff]  }
 0x4e7   : > { %15488 = vst [vmem:[#allocation6_spill] sm:$0xff] %v15145_v20 }
 0x4e8   : > { %v9706_v39 = vrot.slane %v9705_v18, 1  ;;  %v9807_v55 = vadd.f32 %v9806_v41, %v9805_v48  ;;  %v15084_v48 = vld [vmem:[%s12336_s23 + $0x8] sm:$0xff]   ;;  %v15090_v41 = vld [vmem:[%s12336_s23 + $0x18] sm:$0xff]  }
 0x4ea   : > { %v9707_v3 = vadd.f32 %v9706_v39, %v9705_v18  ;;  %v9808_v8 = vrot.slane %v9807_v55, 1  ;;  %v15087_v18 = vld [vmem:[%s12336_s23 + $0x10] sm:$0xff]   ;;  %v15093_v39 = vld [vmem:[%s12336_s23 + $0x20] sm:$0xff]  }
 0x4ec   : > { %v15042_v16 = vmul.f32 0.00390625, %v9707_v3  ;;  %v9809_v37 = vadd.f32 %v9808_v8, %v9807_v55  ;;  %v15096_v55 = vld [vmem:[%s12336_s23 + $0x28] sm:$0xff]   ;;  %v15112_v3 = vld [vmem:[%s12336_s23 + $0x40] sm:$0xff]  }
 0x4ed   : > { %v15135_v8 = vld [vmem:[%s12336_s23 + $0x68] sm:$0xff]  }
 0x4ee   : > { %v9810_v14 = vmul.f32 0.00390625, %v9809_v37  ;;  %v9811_v30 = vmul.f32 %v15042_v16, %v15042_v16  ;;  %v9816_v17 = vsub.f32 %v14757_v6, %v15042_v16  ;;  %v9817_v35 = vsub.f32 %v14764_v47, %v15042_v16 }
 0x4ef   : > { %v9818_v15 = vsub.f32 %v14781_v54, %v15042_v16  ;;  %v9819_v37 = vsub.f32 %v14809_v53, %v15042_v16  ;;  %v9822_v6 = vsub.f32 %v14827_v52, %v15042_v16  ;;  %v9823_v24 = vsub.f32 %v14840_v2, %v15042_v16 }
 0x4f0   : > { %v9812_v5 = vsub.f32 %v9810_v14, %v9811_v30  ;;  %v15102_v14 = vld [vmem:[%s12336_s23 + $0x30] sm:$0xff]   ;;  %v15105_v30 = vld [vmem:[%s12336_s23 + $0x38] sm:$0xff]   ;;  %v9824_v47 = vsub.f32 %v14834_v4, %v15042_v16  ;;  %v9825_v54 = vsub.f32 %v14849_v1, %v15042_v16  ;;  %v9835_v53 = vsub.f32 %v14956_v27, %v15042_v16 }
 0x4f1   : > { %v15489_v27 = vsub.f32 %v14867_v46, %v15042_v16  ;;  %v15494_v46 = vsub.f32 %v14927_v59, %v15042_v16  ;;  %v15499_v59 = vsub.f32 %v14961_v29, %v15042_v16  ;;  %v15504_v29 = vsub.f32 %v15015_v42, %v15042_v16 }
 0x4f2   : > { %v9813_v9 = vmax.f32 %v9812_v5, 0.0  ;;  %v9815_v5 = vsub.f32 %v14766_v45, %v15042_v16  ;;  %v9821_v45 = vsub.f32 %v14807_v60, %v15042_v16  ;;  %v9843_v60 = vsub.f32 %v15024_v62, %v15042_v16 }
 0x4f4   : > { %v9846_v11 = vadd.f32 1e-05, %v9813_v9  ;;  %v15122_v9 = vld [vmem:[%s12336_s23 + $0x50] sm:$0xff]  }
 0x4f6   : > { %12273 = vrsqrt.f32 %v9846_v11  ;;  %v9814_v11 = vsub.f32 %v14755_v56, %v15042_v16  ;;  %v9820_v56 = vsub.f32 %v14791_v25, %v15042_v16  ;;  %v9839_v25 = vsub.f32 %v14995_v21, %v15042_v16 }
 0x4f7   : > { %v15490_v21 = vsub.f32 %v14889_v38, %v15042_v16  ;;  %v15495_v38 = vsub.f32 %v14911_v44, %v15042_v16  ;;  %v15500_v44 = vsub.f32 %v14978_v0, %v15042_v16  ;;  %v15505_v0 = vsub.f32 %v15022_v33, %v15042_v16 }
 0x4f8   : > { %v15512_v33 = vunpack.c.l.bf16 %v15090_v41 }
 0x503   : > { %v12274_v32 = vpop.eup %12273 }
 0x504   : > { %v9848_v52 = vmul.f32 %v12274_v32, %v9814_v11  ;;  %v9849_v23 = vmul.f32 %v12274_v32, %v9815_v5  ;;  %v9850_v58 = vmul.f32 %v12274_v32, %v9816_v17  ;;  %v9851_v2 = vmul.f32 %v12274_v32, %v9817_v35 }
 0x505   : > { %v9852_v50 = vmul.f32 %v12274_v32, %v9818_v15  ;;  %v9853_v12 = vmul.f32 %v12274_v32, %v9819_v37  ;;  %v9854_v4 = vmul.f32 %v12274_v32, %v9820_v56  ;;  %v9855_v61 = vmul.f32 %v12274_v32, %v9821_v45 }
 0x506   : > { %v9856_v51 = vmul.f32 %v12274_v32, %v9822_v6  ;;  %v9857_v34 = vmul.f32 %v12274_v32, %v9823_v24  ;;  %v9858_v1 = vmul.f32 %v12274_v32, %v9824_v47  ;;  %v9859_v20 = vmul.f32 %v12274_v32, %v9825_v54 }
 0x507   : > { %v9860_v22 = vmul.f32 %v12274_v32, %v15489_v27  ;;  %v9861_v62 = vmul.f32 %v12274_v32, %v15490_v21  ;;  %v15491_v17 = vsub.f32 %v14874_v57, %v15042_v16  ;;  %v15492_v15 = vsub.f32 %v14887_v26, %v15042_v16 }
 0x508   : > { %v15493_v24 = vsub.f32 %v14900_v13, %v15042_v16  ;;  %v9865_v11 = vmul.f32 %v12274_v32, %v15494_v46  ;;  %v9866_v56 = vmul.f32 %v12274_v32, %v15495_v38  ;;  %v15496_v57 = vsub.f32 %v14925_v40, %v15042_v16 }
 0x509   : > { %v9862_v35 = vmul.f32 %v12274_v32, %v15491_v17  ;;  %v9863_v37 = vmul.f32 %v12274_v32, %v15492_v15  ;;  %v15497_v26 = vsub.f32 %v14943_v43, %v15042_v16  ;;  %v9869_v47 = vmul.f32 %v12274_v32, %v9835_v53 }
 0x50a   : > { %v9864_v5 = vmul.f32 %v12274_v32, %v15493_v24  ;;  %v9867_v45 = vmul.f32 %v12274_v32, %v15496_v57  ;;  %v15498_v13 = vsub.f32 %v14950_v49, %v15042_v16  ;;  %v9871_v27 = vmul.f32 %v12274_v32, %v15499_v59 }
 0x50b   : > { %v9868_v6 = vmul.f32 %v12274_v32, %v15497_v26  ;;  %v9872_v21 = vmul.f32 %v12274_v32, %v15500_v44  ;;  %v9873_v17 = vmul.f32 %v12274_v32, %v9839_v25  ;;  %v15501_v40 = vsub.f32 %v14980_v7, %v15042_v16 }
 0x50c   : > { %v9870_v54 = vmul.f32 %v12274_v32, %v15498_v13  ;;  %v15502_v43 = vsub.f32 %v14993_v10, %v15042_v16  ;;  %v15503_v49 = vsub.f32 %v15005_v19, %v15042_v16  ;;  %v9877_v46 = vmul.f32 %v12274_v32, %v9843_v60 }
 0x50d   : > { %v9874_v15 = vmul.f32 %v12274_v32, %v15501_v40  ;;  %v9878_v38 = vmul.f32 %v12274_v32, %v15504_v29  ;;  %v9879_v25 = vmul.f32 %v12274_v32, %v15505_v0  ;;  %v15506_v7 = vunpack.c.l.bf16 %v15081_v36 }
 0x50e   : > { %v9875_v53 = vmul.f32 %v12274_v32, %v15502_v43  ;;  %v9876_v24 = vmul.f32 %v12274_v32, %v15503_v49  ;;  %v15507_v26 = vunpack.c.h.bf16 %v15081_v36  ;;  %v15508_v13 = vunpack.c.l.bf16 %v15084_v48 }
 0x50f   : > { %v9944_v57 = vadd.f32 %v15506_v7, %v9848_v52  ;;  %v15509_v19 = vunpack.c.h.bf16 %v15084_v48  ;;  %v15510_v44 = vunpack.c.l.bf16 %v15087_v18  ;;  %v15511_v40 = vunpack.c.h.bf16 %v15087_v18 }
 0x510   : > { %v9945_v10 = vadd.f32 %v15507_v26, %v9849_v23  ;;  %v9946_v59 = vadd.f32 %v15508_v13, %v9850_v58  ;;  %v9950_v16 = vadd.f32 %v15512_v33, %v9854_v4  ;;  %v15513_v32 = vunpack.c.h.bf16 %v15090_v41 }
 0x511   : > { %v9947_v60 = vadd.f32 %v15509_v19, %v9851_v2  ;;  %v9948_v42 = vadd.f32 %v15510_v44, %v9852_v50  ;;  %v9949_v43 = vadd.f32 %v15511_v40, %v9853_v12  ;;  %v15514_v23 = vunpack.c.l.bf16 %v15093_v39 }
 0x512   : > { %v9951_v52 = vadd.f32 %v15513_v32, %v9855_v61  ;;  %v15515_v58 = vunpack.c.h.bf16 %v15093_v39  ;;  %v15516_v48 = vunpack.c.l.bf16 %v15096_v55  ;;  %v15517_v50 = vunpack.c.h.bf16 %v15096_v55 }
 0x513   : > { %v9952_v36 = vadd.f32 %v15514_v23, %v9856_v51  ;;  %v15518_v12 = vunpack.c.l.bf16 %v15102_v14  ;;  %v15519_v4 = vunpack.c.h.bf16 %v15102_v14  ;;  %v15520_v61 = vunpack.c.l.bf16 %v15105_v30 }
 0x514   : > { %v9953_v49 = vadd.f32 %v15515_v58, %v9857_v34  ;;  %v9954_v2 = vadd.f32 %v15516_v48, %v9858_v1  ;;  %v9955_v29 = vadd.f32 %v15517_v50, %v9859_v20  ;;  %v15521_v51 = vunpack.c.h.bf16 %v15105_v30 }
 0x515   : > { %v9956_v18 = vadd.f32 %v15518_v12, %v9860_v22  ;;  %v9957_v41 = vadd.f32 %v15519_v4, %v9861_v62  ;;  %v9958_v0 = vadd.f32 %v15520_v61, %v9862_v35  ;;  %v15522_v34 = vunpack.c.l.bf16 %v15112_v3 }
 0x516   : > { %v9959_v39 = vadd.f32 %v15521_v51, %v9863_v37  ;;  %v15523_v1 = vunpack.c.h.bf16 %v15112_v3  ;;  %v15524_v20 = vunpack.c.l.bf16 %v15115_v63  ;;  %v15525_v22 = vunpack.c.h.bf16 %v15115_v63 }
 0x517   : > { %v9960_v7 = vadd.f32 %v15522_v34, %v9864_v5  ;;  %v15526_v62 = vunpack.c.l.bf16 %v15122_v9  ;;  %v15527_v35 = vunpack.c.h.bf16 %v15122_v9  ;;  %v15528_v37 = vunpack.c.l.bf16 %v15125_v31 }
 0x518   : > { %v9961_v55 = vadd.f32 %v15523_v1, %v9865_v11  ;;  %v9962_v26 = vadd.f32 %v15524_v20, %v9866_v56  ;;  %v9963_v14 = vadd.f32 %v15525_v22, %v9867_v45  ;;  %v15529_v3 = vunpack.c.h.bf16 %v15125_v31  ;;  %v15534_v31 = vld [vmem:[#allocation5_spill] sm:$0xff] }
 0x519   : > { %v15283_v13 = vadd.f32 %v15526_v62, %v9868_v6  ;;  %v15287_v30 = vadd.f32 %v15527_v35, %v9869_v47  ;;  %v15291_v5 = vadd.f32 %v15528_v37, %v9870_v54  ;;  %v15530_v56 = vunpack.c.l.bf16 %v15132_v28 }
 0x51a   : > { %v15295_v11 = vadd.f32 %v15529_v3, %v9871_v27  ;;  %v15531_v45 = vunpack.c.h.bf16 %v15132_v28  ;;  %v15532_v9 = vunpack.c.l.bf16 %v15135_v8  ;;  %v15533_v19 = vunpack.c.h.bf16 %v15135_v8 }
 0x51b   : > { %v15299_v63 = vadd.f32 %v15530_v56, %v9872_v21  ;;  %v15535_v27 = vunpack.c.l.bf16 %v15534_v31  ;;  %v15536_v28 = vunpack.c.h.bf16 %v15534_v31  ;;  %v10928_v33 = vpack.c.bf16 %v9944_v57, %v9944_v57 }
 0x51c   : > { %v15303_v6 = vadd.f32 %v15531_v45, %v9873_v17  ;;  %v15307_v47 = vadd.f32 %v15532_v9, %v9874_v15  ;;  %v15311_v54 = vadd.f32 %v15533_v19, %v9875_v53  ;;  %v15537_v15 = vld [vmem:[#allocation6_spill] sm:$0xff]  ;;  %v10929_v32 = vpack.c.bf16 %v9945_v10, %v9945_v10 }
 0x51d   : > { %v15322_v21 = vadd.f32 %v15535_v27, %v9876_v24  ;;  %v15326_v17 = vadd.f32 %v15536_v28, %v9877_v46  ;;  %v15538_v44 = vunpack.c.l.bf16 %v15537_v15  ;;  %v15539_v53 = vunpack.c.h.bf16 %v15537_v15  ;;  %10104 = vst.msk [vmem:[%s15318_s5] sm:$0xf] %vm205_vm1, %v10928_v33 }
 0x51e   : > { %v10930_v24 = vpack.c.bf16 %v9946_v59, %v9946_v59  ;;  %v10931_v23 = vpack.c.bf16 %v9947_v60, %v9947_v60  ;;  %v10932_v58 = vpack.c.bf16 %v9948_v42, %v9948_v42  ;;  %v10933_v48 = vpack.c.bf16 %v9949_v43, %v9949_v43  ;;  %10105 = vst.msk [vmem:[%s15318_s5 + $0x4] sm:$0xf] %vm205_vm1, %v10929_v32 }
 0x51f   : > { %v15330_v8 = vadd.f32 %v15538_v44, %v9878_v38  ;;  %v15334_v40 = vadd.f32 %v15539_v53, %v9879_v25  ;;  %v10934_v46 = vpack.c.bf16 %v9950_v16, %v9950_v16  ;;  %v10935_v50 = vpack.c.bf16 %v9951_v52, %v9951_v52 }
 0x520   : > { %v10936_v38 = vpack.c.bf16 %v9952_v36, %v9952_v36  ;;  %v10937_v12 = vpack.c.bf16 %v9953_v49, %v9953_v49  ;;  %v10938_v4 = vpack.c.bf16 %v9954_v2, %v9954_v2  ;;  %v10939_v61 = vpack.c.bf16 %v9955_v29, %v9955_v29  ;;  %10106 = vst.msk [vmem:[%s15318_s5 + $0x8] sm:$0xf] %vm205_vm1, %v10930_v24 }
 0x521   : > { %10107 = vst.msk [vmem:[%s15318_s5 + $0xc] sm:$0xf] %vm205_vm1, %v10931_v23  ;;  %v10940_v25 = vpack.c.bf16 %v9956_v18, %v9956_v18  ;;  %v10941_v57 = vpack.c.bf16 %v9957_v41, %v9957_v41  ;;  %v10942_v10 = vpack.c.bf16 %v9958_v0, %v9958_v0  ;;  %v10943_v59 = vpack.c.bf16 %v9959_v39, %v9959_v39 }
 0x522   : > { %10108 = vst.msk [vmem:[%s15318_s5 + $0x10] sm:$0xf] %vm205_vm1, %v10932_v58  ;;  %10109 = vst.msk [vmem:[%s15318_s5 + $0x14] sm:$0xf] %vm205_vm1, %v10933_v48  ;;  %v10944_v60 = vpack.c.bf16 %v9960_v7, %v9960_v7  ;;  %v10945_v42 = vpack.c.bf16 %v9961_v55, %v9961_v55  ;;  %v10946_v43 = vpack.c.bf16 %v9962_v26, %v9962_v26 }
 0x523   : > { %10110 = vst.msk [vmem:[%s15318_s5 + $0x18] sm:$0xf] %vm205_vm1, %v10934_v46  ;;  %10111 = vst.msk [vmem:[%s15318_s5 + $0x1c] sm:$0xf] %vm205_vm1, %v10935_v50  ;;  %v10947_v16 = vpack.c.bf16 %v9963_v14, %v9963_v14  ;;  %v10948_v52 = vpack.c.bf16 %v15283_v13, %v15283_v13  ;;  %v10949_v36 = vpack.c.bf16 %v15287_v30, %v15287_v30 }
 0x524   : > { %10112 = vst.msk [vmem:[%s15318_s5 + $0x20] sm:$0xf] %vm205_vm1, %v10936_v38  ;;  %10113 = vst.msk [vmem:[%s15318_s5 + $0x24] sm:$0xf] %vm205_vm1, %v10937_v12  ;;  %v10950_v49 = vpack.c.bf16 %v15291_v5, %v15291_v5  ;;  %v10951_v2 = vpack.c.bf16 %v15295_v11, %v15295_v11  ;;  %v10952_v29 = vpack.c.bf16 %v15299_v63, %v15299_v63 }
 0x525   : > { %10114 = vst.msk [vmem:[%s15318_s5 + $0x28] sm:$0xf] %vm205_vm1, %v10938_v4  ;;  %10115 = vst.msk [vmem:[%s15318_s5 + $0x2c] sm:$0xf] %vm205_vm1, %v10939_v61  ;;  %v10953_v18 = vpack.c.bf16 %v15303_v6, %v15303_v6  ;;  %v10954_v41 = vpack.c.bf16 %v15307_v47, %v15307_v47  ;;  %v10955_v0 = vpack.c.bf16 %v15311_v54, %v15311_v54 }
 0x526   : > { %10116 = vst.msk [vmem:[%s15318_s5 + $0x30] sm:$0xf] %vm205_vm1, %v10940_v25  ;;  %10117 = vst.msk [vmem:[%s15318_s5 + $0x34] sm:$0xf] %vm205_vm1, %v10941_v57  ;;  %v10956_v51 = vpack.c.bf16 %v15322_v21, %v15322_v21  ;;  %v10957_v39 = vpack.c.bf16 %v15326_v17, %v15326_v17  ;;  %v10958_v34 = vpack.c.bf16 %v15330_v8, %v15330_v8 }
 0x527   : > { %10118 = vst.msk [vmem:[%s15318_s5 + $0x38] sm:$0xf] %vm205_vm1, %v10942_v10  ;;  %10119 = vst.msk [vmem:[%s15318_s5 + $0x3c] sm:$0xf] %vm205_vm1, %v10943_v59  ;;  %v10959_v7 = vpack.c.bf16 %v15334_v40, %v15334_v40 }
 0x528   : > { %10120 = vst.msk [vmem:[%s15318_s5 + $0x40] sm:$0xf] %vm205_vm1, %v10944_v60  ;;  %10121 = vst.msk [vmem:[%s15318_s5 + $0x44] sm:$0xf] %vm205_vm1, %v10945_v42 }
 0x529   : > { %10122 = vst.msk [vmem:[%s15318_s5 + $0x48] sm:$0xf] %vm205_vm1, %v10946_v43  ;;  %10123 = vst.msk [vmem:[%s15318_s5 + $0x4c] sm:$0xf] %vm205_vm1, %v10947_v16 }
 0x52a   : > { %10124 = vst.msk [vmem:[%s15318_s5 + $0x50] sm:$0xf] %vm205_vm1, %v10948_v52  ;;  %10125 = vst.msk [vmem:[%s15318_s5 + $0x54] sm:$0xf] %vm205_vm1, %v10949_v36 }
 0x52b   : > { %10126 = vst.msk [vmem:[%s15318_s5 + $0x58] sm:$0xf] %vm205_vm1, %v10950_v49  ;;  %10127 = vst.msk [vmem:[%s15318_s5 + $0x5c] sm:$0xf] %vm205_vm1, %v10951_v2 }
 0x52c   : > { %10128 = vst.msk [vmem:[%s15318_s5 + $0x60] sm:$0xf] %vm205_vm1, %v10952_v29  ;;  %10129 = vst.msk [vmem:[%s15318_s5 + $0x64] sm:$0xf] %vm205_vm1, %v10953_v18 }
 0x52d   : > { %10130 = vst.msk [vmem:[%s15318_s5 + $0x68] sm:$0xf] %vm205_vm1, %v10954_v41  ;;  %10131 = vst.msk [vmem:[%s15318_s5 + $0x6c] sm:$0xf] %vm205_vm1, %v10955_v0 }
 0x52e   : > { %10132 = vst.msk [vmem:[%s15318_s5 + $0x70] sm:$0xf] %vm205_vm1, %v10956_v51  ;;  %10133 = vst.msk [vmem:[%s15318_s5 + $0x74] sm:$0xf] %vm205_vm1, %v10957_v39 }
 0x52f   : > { %10134 = vst.msk [vmem:[%s15318_s5 + $0x78] sm:$0xf] %vm205_vm1, %v10958_v34  ;;  %10135 = vst.msk [vmem:[%s15318_s5 + $0x7c] sm:$0xf] %vm205_vm1, %v10959_v7 }
 0x530 PF: > { %s13_s12 = sadd.s32 1, %s12281_s12  }
 0x531   : > { %p10_p4 = scmp.ge.s32.totalorder %s13_s12, 4  }
 0x533   :  { %12 = sbr.rel (!%p10_p4) target bundleno = 1 (0x1), region = 88 }

</bundles_post_ra>
